<compile_context>
chip_gen: v7x
topology: tpu7x:2x2x1
jax: 0.10.0
libtpu: 0.0.40
codegen_flags: <defaults>
</compile_context>

<pallas_src>
import functools

import jax
import jax.numpy as jnp
from jax import lax
from jax.experimental import pallas as pl
from jax.experimental.pallas import tpu as pltpu

BN_EPS = 1e-5
# Explicit VMEM budget: 32 MiB is safe on v5e/v6e (128 MiB physical) and
# v7x (64 MiB physical), and far above what these kernels need.
VMEM_LIMIT_BYTES = 32 * 1024 * 1024


def _round_up(x, m):
    return ((x + m - 1) // m) * m


def _geometry(img_size):
    """Static per-block spatial geometry.

    Every conv block works on a zero-padded row-major "flat" layout: image rows
    of width `wk` (multiple of 8, >= w+2) packed along the sublane axis,
    channels along the lane axis.  A padded buffer has (h+3)*wk rows: 1 top
    padding row, h image rows, 2 bottom padding rows (the extra row keeps the
    dy=2/dx=2 conv-tap slices in bounds).
    """
    h1 = w1 = img_size
    wk1 = _round_up(w1 + 2, 8)
    h2, w2 = h1 // 2, w1 // 2
    wk2 = _round_up(w2 + 2, 8)
    h3, w3 = h2 // 2, w2 // 2
    wk3 = _round_up(w3 + 2, 8)
    return (h1, w1, wk1), (h2, w2, wk2), (h3, w3, wk3)


# ----------------------------------------------------------------------------
# Fused conv stack kernel helpers (traced inside the kernel)
# ----------------------------------------------------------------------------
def _col_select_mats(w_dst, wk_dst, wk_src, offset):
    """0/1 bf16 matrices (wk_dst, wk_src) selecting even / odd source columns of
    a row-pooled row into destination column x' = src//2 + offset.  Rows outside
    [offset, offset + w_dst) stay all-zero (left/right padding columns)."""
    xs = lax.broadcasted_iota(jnp.int32, (wk_dst, wk_src), 0)
    cs = lax.broadcasted_iota(jnp.int32, (wk_dst, wk_src), 1)
    valid = (xs >= offset) & (xs < offset + w_dst)
    pe = ((cs == 2 * (xs - offset)) & valid).astype(jnp.bfloat16)
    po = ((cs == 2 * (xs - offset) + 1) & valid).astype(jnp.bfloat16)
    return pe, po


def _maxpool_rows(src_ref, dst_ref, pe, po, h_dst, wk_src, wk_dst, dst_row0):
    """Fused 2x2 maxpool from the flat conv-output layout in `src_ref` into the
    flat (optionally zero-padded) layout in `dst_ref`.  Row pairing uses aligned
    sublane slices; column pairing + padding placement uses the tiny 0/1
    selection matmuls pe/po (exact copies -> pooling is exact)."""
    # TODO(synk): for very large img_size, switch this static unroll to
    # lax.fori_loop with dynamic pl.ds starts to bound generated code size.
    for y2 in range(h_dst):
        top = src_ref[pl.ds((2 * y2) * wk_src, wk_src), :]
        bot = src_ref[pl.ds((2 * y2 + 1) * wk_src, wk_src), :]
        rowmax = jnp.maximum(top, bot)
        col = jnp.maximum(
            jnp.dot(pe, rowmax, preferred_element_type=jnp.float32),
            jnp.dot(po, rowmax, preferred_element_type=jnp.float32))
        dst_ref[pl.ds(dst_row0 + y2 * wk_dst, wk_dst), :] = col.astype(dst_ref.dtype)


def _conv3x3(buf_ref, w_ref, b_ref, h, wk):
    """3x3 'same' conv read straight from the zero-padded flat layout, plus the
    folded-BN bias and ReLU.  9 taps (flat offsets dy*wk + dx), accumulated on
    the MXU in f32."""
    cout = w_ref.shape[-1]
    acc = jnp.zeros((h * wk, cout), jnp.float32)
    for t in range(9):
        dy, dx = divmod(t, 3)
        tap = buf_ref[pl.ds(dy * wk + dx, h * wk), :]
        acc = acc + jnp.dot(tap, w_ref[t], preferred_element_type=jnp.float32)
    return jnp.maximum(acc + b_ref[...], 0.0).astype(jnp.bfloat16)


# ----------------------------------------------------------------------------
# Fused conv stack kernel: (conv+BN+ReLU+maxpool) x3 for one image per grid step
# ----------------------------------------------------------------------------
def _conv_stack_kernel(geom, s8,
                       x1_ref, w1_ref, b1_ref, w2_ref, b2_ref, w3_ref, b3_ref,
                       o_ref, cb1, pb2, cb2, pb3, cb3):
    """x1_ref : (h1*wk1, 9*cin) bf16   9-tap packed im2col of one image
       wN_ref : conv weights with BN scale folded in (bf16)
       bN_ref : (1, coutN) f32         folded BN bias
       o_ref  : (out_rows, 128) bf16   pooled block-3 activations, NHWC row order
                (rows beyond s8*s8 are fc1 K-padding and are written as zeros)
       cb*/pb*: VMEM scratch for conv outputs / padded next-block inputs
       Dropout layers are identity (eval mode)."""
    (h1, w1, wk1), (h2, w2, wk2), (h3, w3, wk3) = geom

    # ---- block 1: single MXU matmul over the 9*cin packed taps + bias + ReLU
    a = jnp.dot(x1_ref[...], w1_ref[...], preferred_element_type=jnp.float32)
    cb1[...] = jnp.maximum(a + b1_ref[...], 0.0).astype(jnp.bfloat16)

    # ---- maxpool 2x2 into block-2's zero-padded flat layout
    pb2[...] = jnp.zeros_like(pb2)
    pe, po = _col_select_mats(w2, wk2, wk1, 1)
    _maxpool_rows(cb1, pb2, pe, po, h2, wk1, wk2, wk2)

    # ---- block 2: 9-tap conv (K=32) + bias + ReLU, then pool into block-3 layout
    cb2[...] = _conv3x3(pb2, w2_ref, b2_ref, h2, wk2)
    pb3[...] = jnp.zeros_like(pb3)
    pe, po = _col_select_mats(w3, wk3, wk2, 1)
    _maxpool_rows(cb2, pb3, pe, po, h3, wk2, wk3, wk3)

    # ---- block 3: 9-tap conv (K=64) + bias + ReLU, then pool into the output
    cb3[...] = _conv3x3(pb3, w3_ref, b3_ref, h3, wk3)
    o_ref[...] = jnp.zeros_like(o_ref)          # zero fc1 K-padding rows (if any)
    pe, po = _col_select_mats(s8, s8, wk3, 0)
    _maxpool_rows(cb3, o_ref, pe, po, s8, wk3, s8, 0)


def conv_stack(x_nhwc, prepped):
    """Whole conv stack (3x [conv3x3 'same' + BN(eval) + ReLU + 2x2 maxpool]) as
    one Pallas kernel gridded over batch."""
    n, h, w, cin = x_nhwc.shape
    assert h == w, "square images expected"
    geom = _geometry(h)
    (h1, w1, wk1), (h2, w2, wk2), (h3, w3, wk3) = geom
    s8 = h3 // 2
    out_rows = prepped["fc1"]["w"].shape[0] // 128

    # Block-1 input prep (cheap bf16 JAX glue): zero-pad into the flat layout and
    # pack the 9 (dy, dx) taps along channels so conv1 is a single MXU matmul.
    xb = x_nhwc.astype(jnp.bfloat16)
    xp = jnp.pad(xb, ((0, 0), (1, 2), (1, wk1 - w1 - 1), (0, 0)))
    xf = xp.reshape(n, (h1 + 3) * wk1, cin)
    taps = [xf[:, dy * wk1 + dx: dy * wk1 + dx + h1 * wk1, :]
            for dy in range(3) for dx in range(3)]
    x1 = jnp.concatenate(taps, axis=-1)              # (n, h1*wk1, 9*cin) bf16

    p = prepped
    return pl.pallas_call(
        functools.partial(_conv_stack_kernel, geom, s8),
        out_shape=jax.ShapeDtypeStruct((n, out_rows, 128), jnp.bfloat16),
        grid=(n,),
        in_specs=[
            pl.BlockSpec((None, h1 * wk1, 9 * cin), lambda i: (i, 0, 0)),
            pl.BlockSpec((9 * cin, 32), lambda i: (0, 0)),     # conv1 weight (resident)
            pl.BlockSpec((1, 32), lambda i: (0, 0)),
            pl.BlockSpec((9, 32, 64), lambda i: (0, 0, 0)),    # conv2 weight (resident)
            pl.BlockSpec((1, 64), lambda i: (0, 0)),
            pl.BlockSpec((9, 64, 128), lambda i: (0, 0, 0)),   # conv3 weight (resident)
            pl.BlockSpec((1, 128), lambda i: (0, 0)),
        ],
        out_specs=pl.BlockSpec((None, out_rows, 128), lambda i: (i, 0, 0)),
        scratch_shapes=[
            pltpu.VMEM((h1 * wk1, 32), jnp.bfloat16),          # conv1 output
            pltpu.VMEM(((h2 + 3) * wk2, 32), jnp.bfloat16),    # padded block-2 input
            pltpu.VMEM((h2 * wk2, 64), jnp.bfloat16),          # conv2 output
            pltpu.VMEM(((h3 + 3) * wk3, 64), jnp.bfloat16),    # padded block-3 input
            pltpu.VMEM((h3 * wk3, 128), jnp.bfloat16),         # conv3 output
        ],
        compiler_params=pltpu.CompilerParams(
            dimension_semantics=("parallel",),    # batch sharded across TCs on v7x
            vmem_limit_bytes=VMEM_LIMIT_BYTES),
    )(x1, p["conv1"]["w"], p["conv1"]["b"], p["conv2"]["w"], p["conv2"]["b"],
      p["conv3"]["w"], p["conv3"]["b"])


# ----------------------------------------------------------------------------
# Fused MLP head kernel: fc1 (K-streamed) -> ReLU -> fc2 -> fc3 -> fc4 -> softmax -> threshold
# ----------------------------------------------------------------------------
def _mlp_head_kernel(thr_ref, x_ref, w1_ref, w2_ref, w3_ref, w4_ref,
                     b1_ref, b2_ref, b3_ref, b4_ref, o_ref, acc_ref):
    """Grid = fc1's K tiles ("arbitrary"): fc1's weight (the only large operand)
    streams tile-by-tile and pipelines against the MXU, while fc2..fc4 weights
    and biases stay VMEM-resident.  Threshold comes from SMEM so changing it
    does not recompile.  Dropout layers are identity (eval mode)."""
    k = pl.program_id(0)

    @pl.when(k == 0)
    def _init():
        acc_ref[...] = jnp.zeros_like(acc_ref)

    acc_ref[...] += jnp.dot(x_ref[...], w1_ref[...],
                            preferred_element_type=jnp.float32)

    @pl.when(k == pl.num_programs(0) - 1)
    def _finalize():
        h1 = jnp.maximum(acc_ref[...] + b1_ref[...], 0.0).astype(jnp.bfloat16)
        h2 = jnp.maximum(
            jnp.dot(h1, w2_ref[...], preferred_element_type=jnp.float32)
            + b2_ref[...], 0.0).astype(jnp.bfloat16)
        h3 = jnp.maximum(
            jnp.dot(h2, w3_ref[...], preferred_element_type=jnp.float32)
            + b3_ref[...], 0.0).astype(jnp.bfloat16)
        logits = jnp.dot(h3, w4_ref[...],
                         preferred_element_type=jnp.float32) + b4_ref[...]
        m = jnp.max(logits, axis=-1, keepdims=True)
        e = jnp.exp(logits - m)
        probs = e / jnp.sum(e, axis=-1, keepdims=True)   # exact divide (review)
        o_ref[...] = (probs >= thr_ref[0, 0]).astype(jnp.float32)


def mlp_head(x_flat, pp, thr):
    n, flat_p = x_flat.shape
    d1 = pp["fc1"]["w"].shape[1]
    d2 = pp["fc2"]["w"].shape[1]
    d3 = pp["fc3"]["w"].shape[1]
    dout = pp["fc4"]["w"].shape[1]
    assert pp["fc1"]["w"].shape[0] == flat_p

    # flat_p is padded to a multiple of 512 in prepare_params, so a wide K tile
    # always divides it (no tk=flat fallback that could blow past VMEM on v7x).
    tk = 1024 if (flat_p % 1024 == 0 and flat_p > 1024) else min(512, flat_p)
    nsteps = flat_p // tk

    return pl.pallas_call(
        _mlp_head_kernel,
        out_shape=jax.ShapeDtypeStruct((n, dout), jnp.float32),
        grid=(nsteps,),
        in_specs=[
            pl.BlockSpec(memory_space=pltpu.MemorySpace.SMEM),  # threshold scalar
            pl.BlockSpec((n, tk), lambda k: (0, k)),            # flattened activations
            pl.BlockSpec((tk, d1), lambda k: (k, 0)),            # fc1 weight stream
            pl.BlockSpec((d1, d2), lambda k: (0, 0)),            # resident weights
            pl.BlockSpec((d2, d3), lambda k: (0, 0)),
            pl.BlockSpec((d3, dout), lambda k: (0, 0)),
            pl.BlockSpec((1, d1), lambda k: (0, 0)),              # biases
            pl.BlockSpec((1, d2), lambda k: (0, 0)),
            pl.BlockSpec((1, d3), lambda k: (0, 0)),
            pl.BlockSpec((1, dout), lambda k: (0, 0)),
        ],
        out_specs=pl.BlockSpec((n, dout), lambda k: (0, 0)),
        scratch_shapes=[pltpu.VMEM((n, d1), jnp.float32)],        # fc1 accumulator
        compiler_params=pltpu.CompilerParams(
            dimension_semantics=("arbitrary",),                   # K reduction axis
            vmem_limit_bytes=VMEM_LIMIT_BYTES),
    )(thr, x_flat, pp["fc1"]["w"], pp["fc2"]["w"], pp["fc3"]["w"], pp["fc4"]["w"],
      pp["fc1"]["b"], pp["fc2"]["b"], pp["fc3"]["b"], pp["fc4"]["b"])


# ----------------------------------------------------------------------------
# Parameters: synthetic torch-layout init + one-time prep for the kernels
# ----------------------------------------------------------------------------
def init_params(key, dim_in, dim_out, img_size):
    def conv_block_params(k, cin, cout):
        k = jax.random.split(k, 6)
        return {
            "w": 0.05 * jax.random.normal(k[0], (3, 3, cin, cout), jnp.float32),
            "b": 0.05 * jax.random.normal(k[1], (cout,), jnp.float32),
            "gamma": 1.0 + 0.1 * jax.random.normal(k[2], (cout,), jnp.float32),
            "beta": 0.1 * jax.random.normal(k[3], (cout,), jnp.float32),
            "mean": 0.1 * jax.random.normal(k[4], (cout,), jnp.float32),
            "var": jax.random.uniform(k[5], (cout,), jnp.float32, 0.5, 1.5),
        }

    def linear_params(k, din, dout):
        k1, k2 = jax.random.split(k)
        return {
            "w": 0.05 * jax.random.normal(k1, (din, dout), jnp.float32),
            "b": 0.05 * jax.random.normal(k2, (dout,), jnp.float32),
        }

    keys = jax.random.split(key, 7)
    flat = 128 * (img_size // 8) ** 2
    return {
        "conv1": conv_block_params(keys[0], dim_in, 32),
        "conv2": conv_block_params(keys[1], 32, 64),
        "conv3": conv_block_params(keys[2], 64, 128),
        "fc1": linear_params(keys[3], flat, 1024),
        "fc2": linear_params(keys[4], 1024, 512),
        "fc3": linear_params(keys[5], 512, 256),
        "fc4": linear_params(keys[6], 256, dim_out),
    }


def prepare_params(params, img_size):
    """One-time prep (outside the hot path):
      * fold BN running stats into the conv weights (scale) and biases,
      * reshape conv weights to the layouts the fused kernel expects,
      * permute fc1 rows from NCHW-flatten to NHWC-flatten order and zero-pad
        the K dimension to a multiple of 512 for the K-streamed fc1,
      * cast all matmul weights to bf16 (f32 accumulation stays in-kernel).
    """
    out = {}
    for name, pack_flat in (("conv1", True), ("conv2", False), ("conv3", False)):
        p = params[name]
        cin, cout = p["w"].shape[2], p["w"].shape[3]
        scale = p["gamma"] / jnp.sqrt(p["var"] + BN_EPS)
        bias = (p["b"] - p["mean"]) * scale + p["beta"]
        w = (p["w"] * scale).astype(jnp.bfloat16)       # fold BN scale into weight
        w = w.reshape(9 * cin, cout) if pack_flat else w.reshape(9, cin, cout)
        out[name] = {"w": w, "b": bias.reshape(1, cout).astype(jnp.float32)}

    s8 = img_size // 8
    flat = 128 * s8 * s8
    flat_p = max(512, _round_up(flat, 512))
    w1 = params["fc1"]["w"].reshape(128, s8, s8, -1)
    w1 = jnp.transpose(w1, (1, 2, 0, 3)).reshape(flat, -1)   # NCHW-rows -> NHWC-rows
    if flat_p > flat:
        w1 = jnp.pad(w1, ((0, flat_p - flat), (0, 0)))       # zero K-padding rows
    out["fc1"] = {"w": w1.astype(jnp.bfloat16),
                  "b": params["fc1"]["b"].reshape(1, -1).astype(jnp.float32)}
    for name in ("fc2", "fc3", "fc4"):
        out[name] = {"w": params[name]["w"].astype(jnp.bfloat16),
                     "b": params[name]["b"].reshape(1, -1).astype(jnp.float32)}
    return out


# ----------------------------------------------------------------------------
# Forward pass
# ----------------------------------------------------------------------------
@jax.jit
def classifier_forward(prepped, x_nchw, threshold=0.5):
    n = x_nchw.shape[0]
    x = jnp.transpose(x_nchw, (0, 2, 3, 1))           # NCHW -> NHWC

    y = conv_stack(x, prepped)                         # (n, flat_p/128, 128) bf16
    x_flat = y.reshape(n, -1)                          # NHWC flatten (+ zero K-pad)

    # threshold travels as a runtime (1,1) SMEM scalar -> no recompiles.
    # TODO(synk): the torch `if not training and threshold:` falsy-threshold
    # branch (return raw logits) is not implemented; eval path always thresholds.
    thr = jnp.reshape(jnp.asarray(threshold, jnp.float32), (1, 1))
    return mlp_head(x_flat, prepped, thr)


if __name__ == "__main__":
    batch, dim_in, img_size, dim_out = 2, 4, 16, 10
    key = jax.random.PRNGKey(0)
    k_param, k_x = jax.random.split(key)

    params = init_params(k_param, dim_in, dim_out, img_size)
    prepped = prepare_params(params, img_size)
    x = jax.random.normal(k_x, (batch, dim_in, img_size, img_size), jnp.float32)

    out = classifier_forward(prepped, x, threshold=0.5)
    out = jax.block_until_ready(out)

    assert out.shape == (batch, dim_out), out.shape
    assert out.dtype == jnp.float32
    assert bool(jnp.all((out == 0.0) | (out == 1.0)))
    print("KERNEL_OK")
</pallas_src>

<mosaic_0001>
module attributes {stable_mosaic.version = 11 : i64} {
  func.func @_conv_stack_kernel(%arg0: i32, %arg1: memref<1x384x36xbf16, #tpu.memory_space<vmem>>, %arg2: memref<36x32xbf16, #tpu.memory_space<vmem>>, %arg3: memref<1x32xf32, #tpu.memory_space<vmem>>, %arg4: memref<9x32x64xbf16, #tpu.memory_space<vmem>>, %arg5: memref<1x64xf32, #tpu.memory_space<vmem>>, %arg6: memref<9x64x128xbf16, #tpu.memory_space<vmem>>, %arg7: memref<1x128xf32, #tpu.memory_space<vmem>>, %arg8: memref<1x4x128xbf16, #tpu.memory_space<vmem>>, %arg9: memref<384x32xbf16, #tpu.memory_space<vmem>>, %arg10: memref<176x32xbf16, #tpu.memory_space<vmem>>, %arg11: memref<128x64xbf16, #tpu.memory_space<vmem>>, %arg12: memref<56x64xbf16, #tpu.memory_space<vmem>>, %arg13: memref<32x128xbf16, #tpu.memory_space<vmem>>) attributes {dimension_semantics = [#tpu.dimension_semantics<parallel>], iteration_bounds = array<i64: 2>, scalar_prefetch = 0 : i64, scratch_operands = 5 : i64, tpu.core_type = #tpu.core_type<tc>, window_params = [{transform_indices = @transform_0, window_bounds = array<i64: 1, 384, 36>}, {pipeline_mode = #tpu.pipeline_mode<synchronous>, transform_indices = @transform_1, window_bounds = array<i64: 36, 32>}, {pipeline_mode = #tpu.pipeline_mode<synchronous>, transform_indices = @transform_2, window_bounds = array<i64: 1, 32>}, {pipeline_mode = #tpu.pipeline_mode<synchronous>, transform_indices = @transform_3, window_bounds = array<i64: 9, 32, 64>}, {pipeline_mode = #tpu.pipeline_mode<synchronous>, transform_indices = @transform_4, window_bounds = array<i64: 1, 64>}, {pipeline_mode = #tpu.pipeline_mode<synchronous>, transform_indices = @transform_5, window_bounds = array<i64: 9, 64, 128>}, {pipeline_mode = #tpu.pipeline_mode<synchronous>, transform_indices = @transform_6, window_bounds = array<i64: 1, 128>}, {transform_indices = @transform_7, window_bounds = array<i64: 1, 4, 128>}]} {
    %c0 = arith.constant 0 : index
    %c0_0 = arith.constant 0 : index
    %c0_1 = arith.constant 0 : index
    %0 = vector.load %arg1[%c0, %c0_0, %c0_1] : memref<1x384x36xbf16, #tpu.memory_space<vmem>>, vector<1x384x36xbf16>
    %1 = vector.shape_cast %0 : vector<1x384x36xbf16> to vector<384x36xbf16>
    %c0_2 = arith.constant 0 : index
    %c0_3 = arith.constant 0 : index
    %2 = vector.load %arg2[%c0_2, %c0_3] : memref<36x32xbf16, #tpu.memory_space<vmem>>, vector<36x32xbf16>
    %cst = arith.constant dense<0.000000e+00> : vector<384x32xf32>
    %3 = tpu.matmul %1, %2, %cst {dimension_numbers = #tpu.dot_dimension_numbers<[1], [0], [0], [1], [0, 0, 1, 1], [], []>} : vector<384x36xbf16>, vector<36x32xbf16>, vector<384x32xf32> -> vector<384x32xf32>
    %c0_4 = arith.constant 0 : index
    %c0_5 = arith.constant 0 : index
    %4 = vector.load %arg3[%c0_4, %c0_5] : memref<1x32xf32, #tpu.memory_space<vmem>>, vector<1x32xf32>
    %5 = vector.broadcast %4 : vector<1x32xf32> to vector<384x32xf32>
    %6 = arith.addf %3, %5 : vector<384x32xf32>
    %cst_6 = arith.constant 0.000000e+00 : f32
    %7 = vector.broadcast %cst_6 : f32 to vector<384x32xf32>
    %8 = arith.maximumf %6, %7 : vector<384x32xf32>
    %9 = arith.truncf %8 : vector<384x32xf32> to vector<384x32xbf16>
    %c0_7 = arith.constant 0 : index
    %c0_8 = arith.constant 0 : index
    %10 = vector.load %arg9[%c0_7, %c0_8] : memref<384x32xbf16, #tpu.memory_space<vmem>>, vector<384x32xbf16>
    tpu.vector_store %arg9[%c0_7, %c0_8], %9 {strides = array<i32>} : memref<384x32xbf16, #tpu.memory_space<vmem>>, vector<384x32xbf16>,
    %cst_9 = arith.constant 0.000000e+00 : bf16
    %11 = vector.broadcast %cst_9 : bf16 to vector<176x32xbf16>
    %c0_10 = arith.constant 0 : index
    %c0_11 = arith.constant 0 : index
    %12 = vector.load %arg10[%c0_10, %c0_11] : memref<176x32xbf16, #tpu.memory_space<vmem>>, vector<176x32xbf16>
    tpu.vector_store %arg10[%c0_10, %c0_11], %11 {strides = array<i32>} : memref<176x32xbf16, #tpu.memory_space<vmem>>, vector<176x32xbf16>,
    %13 = tpu.iota {dimensions = array<i32: 0>} : vector<16x24xi32>
    %14 = tpu.iota {dimensions = array<i32: 1>} : vector<16x24xi32>
    %c1_i32 = arith.constant 1 : i32
    %15 = vector.broadcast %c1_i32 : i32 to vector<16x24xi32>
    %16 = arith.cmpi sge, %13, %15 : vector<16x24xi32>
    %c9_i32 = arith.constant 9 : i32
    %17 = vector.broadcast %c9_i32 : i32 to vector<16x24xi32>
    %18 = arith.cmpi slt, %13, %17 : vector<16x24xi32>
    %19 = arith.andi %16, %18 : vector<16x24xi1>
    %c1_i32_12 = arith.constant 1 : i32
    %20 = vector.broadcast %c1_i32_12 : i32 to vector<16x24xi32>
    %21 = arith.subi %13, %20 : vector<16x24xi32>
    %c2_i32 = arith.constant 2 : i32
    %22 = vector.broadcast %c2_i32 : i32 to vector<16x24xi32>
    %23 = arith.muli %22, %21 : vector<16x24xi32>
    %24 = arith.cmpi eq, %14, %23 : vector<16x24xi32>
    %25 = arith.andi %24, %19 : vector<16x24xi1>
    %26 = arith.extui %25 : vector<16x24xi1> to vector<16x24xi32>
    %27 = arith.sitofp %26 : vector<16x24xi32> to vector<16x24xf32>
    %28 = arith.truncf %27 : vector<16x24xf32> to vector<16x24xbf16>
    %c1_i32_13 = arith.constant 1 : i32
    %29 = vector.broadcast %c1_i32_13 : i32 to vector<16x24xi32>
    %30 = arith.subi %13, %29 : vector<16x24xi32>
    %c2_i32_14 = arith.constant 2 : i32
    %31 = vector.broadcast %c2_i32_14 : i32 to vector<16x24xi32>
    %32 = arith.muli %31, %30 : vector<16x24xi32>
    %c1_i32_15 = arith.constant 1 : i32
    %33 = vector.broadcast %c1_i32_15 : i32 to vector<16x24xi32>
    %34 = arith.addi %32, %33 : vector<16x24xi32>
    %35 = arith.cmpi eq, %14, %34 : vector<16x24xi32>
    %36 = arith.andi %35, %19 : vector<16x24xi1>
    %37 = arith.extui %36 : vector<16x24xi1> to vector<16x24xi32>
    %38 = arith.sitofp %37 : vector<16x24xi32> to vector<16x24xf32>
    %39 = arith.truncf %38 : vector<16x24xf32> to vector<16x24xbf16>
    %c0_16 = arith.constant 0 : index
    %c0_17 = arith.constant 0 : index
    %40 = vector.load %arg9[%c0_16, %c0_17] : memref<384x32xbf16, #tpu.memory_space<vmem>>, vector<24x32xbf16>
    %c24 = arith.constant 24 : index
    %c0_18 = arith.constant 0 : index
    %41 = vector.load %arg9[%c24, %c0_18] : memref<384x32xbf16, #tpu.memory_space<vmem>>, vector<24x32xbf16>
    %42 = arith.maximumf %40, %41 : vector<24x32xbf16>
    %cst_19 = arith.constant dense<0.000000e+00> : vector<16x32xf32>
    %43 = tpu.matmul %28, %42, %cst_19 {dimension_numbers = #tpu.dot_dimension_numbers<[1], [0], [0], [1], [0, 0, 1, 1], [], []>} : vector<16x24xbf16>, vector<24x32xbf16>, vector<16x32xf32> -> vector<16x32xf32>
    %cst_20 = arith.constant dense<0.000000e+00> : vector<16x32xf32>
    %44 = tpu.matmul %39, %42, %cst_20 {dimension_numbers = #tpu.dot_dimension_numbers<[1], [0], [0], [1], [0, 0, 1, 1], [], []>} : vector<16x24xbf16>, vector<24x32xbf16>, vector<16x32xf32> -> vector<16x32xf32>
    %45 = arith.maximumf %43, %44 : vector<16x32xf32>
    %46 = arith.truncf %45 : vector<16x32xf32> to vector<16x32xbf16>
    %c16 = arith.constant 16 : index
    %c0_21 = arith.constant 0 : index
    %47 = vector.load %arg10[%c16, %c0_21] : memref<176x32xbf16, #tpu.memory_space<vmem>>, vector<16x32xbf16>
    tpu.vector_store %arg10[%c16, %c0_21], %46 {strides = array<i32>} : memref<176x32xbf16, #tpu.memory_space<vmem>>, vector<16x32xbf16>,
    %c48 = arith.constant 48 : index
    %c0_22 = arith.constant 0 : index
    %48 = vector.load %arg9[%c48, %c0_22] : memref<384x32xbf16, #tpu.memory_space<vmem>>, vector<24x32xbf16>
    %c72 = arith.constant 72 : index
    %c0_23 = arith.constant 0 : index
    %49 = vector.load %arg9[%c72, %c0_23] : memref<384x32xbf16, #tpu.memory_space<vmem>>, vector<24x32xbf16>
    %50 = arith.maximumf %48, %49 : vector<24x32xbf16>
    %cst_24 = arith.constant dense<0.000000e+00> : vector<16x32xf32>
    %51 = tpu.matmul %28, %50, %cst_24 {dimension_numbers = #tpu.dot_dimension_numbers<[1], [0], [0], [1], [0, 0, 1, 1], [], []>} : vector<16x24xbf16>, vector<24x32xbf16>, vector<16x32xf32> -> vector<16x32xf32>
    %cst_25 = arith.constant dense<0.000000e+00> : vector<16x32xf32>
    %52 = tpu.matmul %39, %50, %cst_25 {dimension_numbers = #tpu.dot_dimension_numbers<[1], [0], [0], [1], [0, 0, 1, 1], [], []>} : vector<16x24xbf16>, vector<24x32xbf16>, vector<16x32xf32> -> vector<16x32xf32>
    %53 = arith.maximumf %51, %52 : vector<16x32xf32>
    %54 = arith.truncf %53 : vector<16x32xf32> to vector<16x32xbf16>
    %c32 = arith.constant 32 : index
    %c0_26 = arith.constant 0 : index
    %55 = vector.load %arg10[%c32, %c0_26] : memref<176x32xbf16, #tpu.memory_space<vmem>>, vector<16x32xbf16>
    tpu.vector_store %arg10[%c32, %c0_26], %54 {strides = array<i32>} : memref<176x32xbf16, #tpu.memory_space<vmem>>, vector<16x32xbf16>,
    %c96 = arith.constant 96 : index
    %c0_27 = arith.constant 0 : index
    %56 = vector.load %arg9[%c96, %c0_27] : memref<384x32xbf16, #tpu.memory_space<vmem>>, vector<24x32xbf16>
    %c120 = arith.constant 120 : index
    %c0_28 = arith.constant 0 : index
    %57 = vector.load %arg9[%c120, %c0_28] : memref<384x32xbf16, #tpu.memory_space<vmem>>, vector<24x32xbf16>
    %58 = arith.maximumf %56, %57 : vector<24x32xbf16>
    %cst_29 = arith.constant dense<0.000000e+00> : vector<16x32xf32>
    %59 = tpu.matmul %28, %58, %cst_29 {dimension_numbers = #tpu.dot_dimension_numbers<[1], [0], [0], [1], [0, 0, 1, 1], [], []>} : vector<16x24xbf16>, vector<24x32xbf16>, vector<16x32xf32> -> vector<16x32xf32>
    %cst_30 = arith.constant dense<0.000000e+00> : vector<16x32xf32>
    %60 = tpu.matmul %39, %58, %cst_30 {dimension_numbers = #tpu.dot_dimension_numbers<[1], [0], [0], [1], [0, 0, 1, 1], [], []>} : vector<16x24xbf16>, vector<24x32xbf16>, vector<16x32xf32> -> vector<16x32xf32>
    %61 = arith.maximumf %59, %60 : vector<16x32xf32>
    %62 = arith.truncf %61 : vector<16x32xf32> to vector<16x32xbf16>
    %c48_31 = arith.constant 48 : index
    %c0_32 = arith.constant 0 : index
    %63 = vector.load %arg10[%c48_31, %c0_32] : memref<176x32xbf16, #tpu.memory_space<vmem>>, vector<16x32xbf16>
    tpu.vector_store %arg10[%c48_31, %c0_32], %62 {strides = array<i32>} : memref<176x32xbf16, #tpu.memory_space<vmem>>, vector<16x32xbf16>,
    %c144 = arith.constant 144 : index
    %c0_33 = arith.constant 0 : index
    %64 = vector.load %arg9[%c144, %c0_33] : memref<384x32xbf16, #tpu.memory_space<vmem>>, vector<24x32xbf16>
    %c168 = arith.constant 168 : index
    %c0_34 = arith.constant 0 : index
    %65 = vector.load %arg9[%c168, %c0_34] : memref<384x32xbf16, #tpu.memory_space<vmem>>, vector<24x32xbf16>
    %66 = arith.maximumf %64, %65 : vector<24x32xbf16>
    %cst_35 = arith.constant dense<0.000000e+00> : vector<16x32xf32>
    %67 = tpu.matmul %28, %66, %cst_35 {dimension_numbers = #tpu.dot_dimension_numbers<[1], [0], [0], [1], [0, 0, 1, 1], [], []>} : vector<16x24xbf16>, vector<24x32xbf16>, vector<16x32xf32> -> vector<16x32xf32>
    %cst_36 = arith.constant dense<0.000000e+00> : vector<16x32xf32>
    %68 = tpu.matmul %39, %66, %cst_36 {dimension_numbers = #tpu.dot_dimension_numbers<[1], [0], [0], [1], [0, 0, 1, 1], [], []>} : vector<16x24xbf16>, vector<24x32xbf16>, vector<16x32xf32> -> vector<16x32xf32>
    %69 = arith.maximumf %67, %68 : vector<16x32xf32>
    %70 = arith.truncf %69 : vector<16x32xf32> to vector<16x32xbf16>
    %c64 = arith.constant 64 : index
    %c0_37 = arith.constant 0 : index
    %71 = vector.load %arg10[%c64, %c0_37] : memref<176x32xbf16, #tpu.memory_space<vmem>>, vector<16x32xbf16>
    tpu.vector_store %arg10[%c64, %c0_37], %70 {strides = array<i32>} : memref<176x32xbf16, #tpu.memory_space<vmem>>, vector<16x32xbf16>,
    %c192 = arith.constant 192 : index
    %c0_38 = arith.constant 0 : index
    %72 = vector.load %arg9[%c192, %c0_38] : memref<384x32xbf16, #tpu.memory_space<vmem>>, vector<24x32xbf16>
    %c216 = arith.constant 216 : index
    %c0_39 = arith.constant 0 : index
    %73 = vector.load %arg9[%c216, %c0_39] : memref<384x32xbf16, #tpu.memory_space<vmem>>, vector<24x32xbf16>
    %74 = arith.maximumf %72, %73 : vector<24x32xbf16>
    %cst_40 = arith.constant dense<0.000000e+00> : vector<16x32xf32>
    %75 = tpu.matmul %28, %74, %cst_40 {dimension_numbers = #tpu.dot_dimension_numbers<[1], [0], [0], [1], [0, 0, 1, 1], [], []>} : vector<16x24xbf16>, vector<24x32xbf16>, vector<16x32xf32> -> vector<16x32xf32>
    %cst_41 = arith.constant dense<0.000000e+00> : vector<16x32xf32>
    %76 = tpu.matmul %39, %74, %cst_41 {dimension_numbers = #tpu.dot_dimension_numbers<[1], [0], [0], [1], [0, 0, 1, 1], [], []>} : vector<16x24xbf16>, vector<24x32xbf16>, vector<16x32xf32> -> vector<16x32xf32>
    %77 = arith.maximumf %75, %76 : vector<16x32xf32>
    %78 = arith.truncf %77 : vector<16x32xf32> to vector<16x32xbf16>
    %c80 = arith.constant 80 : index
    %c0_42 = arith.constant 0 : index
    %79 = vector.load %arg10[%c80, %c0_42] : memref<176x32xbf16, #tpu.memory_space<vmem>>, vector<16x32xbf16>
    tpu.vector_store %arg10[%c80, %c0_42], %78 {strides = array<i32>} : memref<176x32xbf16, #tpu.memory_space<vmem>>, vector<16x32xbf16>,
    %c240 = arith.constant 240 : index
    %c0_43 = arith.constant 0 : index
    %80 = vector.load %arg9[%c240, %c0_43] : memref<384x32xbf16, #tpu.memory_space<vmem>>, vector<24x32xbf16>
    %c264 = arith.constant 264 : index
    %c0_44 = arith.constant 0 : index
    %81 = vector.load %arg9[%c264, %c0_44] : memref<384x32xbf16, #tpu.memory_space<vmem>>, vector<24x32xbf16>
    %82 = arith.maximumf %80, %81 : vector<24x32xbf16>
    %cst_45 = arith.constant dense<0.000000e+00> : vector<16x32xf32>
    %83 = tpu.matmul %28, %82, %cst_45 {dimension_numbers = #tpu.dot_dimension_numbers<[1], [0], [0], [1], [0, 0, 1, 1], [], []>} : vector<16x24xbf16>, vector<24x32xbf16>, vector<16x32xf32> -> vector<16x32xf32>
    %cst_46 = arith.constant dense<0.000000e+00> : vector<16x32xf32>
    %84 = tpu.matmul %39, %82, %cst_46 {dimension_numbers = #tpu.dot_dimension_numbers<[1], [0], [0], [1], [0, 0, 1, 1], [], []>} : vector<16x24xbf16>, vector<24x32xbf16>, vector<16x32xf32> -> vector<16x32xf32>
    %85 = arith.maximumf %83, %84 : vector<16x32xf32>
    %86 = arith.truncf %85 : vector<16x32xf32> to vector<16x32xbf16>
    %c96_47 = arith.constant 96 : index
    %c0_48 = arith.constant 0 : index
    %87 = vector.load %arg10[%c96_47, %c0_48] : memref<176x32xbf16, #tpu.memory_space<vmem>>, vector<16x32xbf16>
    tpu.vector_store %arg10[%c96_47, %c0_48], %86 {strides = array<i32>} : memref<176x32xbf16, #tpu.memory_space<vmem>>, vector<16x32xbf16>,
    %c288 = arith.constant 288 : index
    %c0_49 = arith.constant 0 : index
    %88 = vector.load %arg9[%c288, %c0_49] : memref<384x32xbf16, #tpu.memory_space<vmem>>, vector<24x32xbf16>
    %c312 = arith.constant 312 : index
    %c0_50 = arith.constant 0 : index
    %89 = vector.load %arg9[%c312, %c0_50] : memref<384x32xbf16, #tpu.memory_space<vmem>>, vector<24x32xbf16>
    %90 = arith.maximumf %88, %89 : vector<24x32xbf16>
    %cst_51 = arith.constant dense<0.000000e+00> : vector<16x32xf32>
    %91 = tpu.matmul %28, %90, %cst_51 {dimension_numbers = #tpu.dot_dimension_numbers<[1], [0], [0], [1], [0, 0, 1, 1], [], []>} : vector<16x24xbf16>, vector<24x32xbf16>, vector<16x32xf32> -> vector<16x32xf32>
    %cst_52 = arith.constant dense<0.000000e+00> : vector<16x32xf32>
    %92 = tpu.matmul %39, %90, %cst_52 {dimension_numbers = #tpu.dot_dimension_numbers<[1], [0], [0], [1], [0, 0, 1, 1], [], []>} : vector<16x24xbf16>, vector<24x32xbf16>, vector<16x32xf32> -> vector<16x32xf32>
    %93 = arith.maximumf %91, %92 : vector<16x32xf32>
    %94 = arith.truncf %93 : vector<16x32xf32> to vector<16x32xbf16>
    %c112 = arith.constant 112 : index
    %c0_53 = arith.constant 0 : index
    %95 = vector.load %arg10[%c112, %c0_53] : memref<176x32xbf16, #tpu.memory_space<vmem>>, vector<16x32xbf16>
    tpu.vector_store %arg10[%c112, %c0_53], %94 {strides = array<i32>} : memref<176x32xbf16, #tpu.memory_space<vmem>>, vector<16x32xbf16>,
    %c336 = arith.constant 336 : index
    %c0_54 = arith.constant 0 : index
    %96 = vector.load %arg9[%c336, %c0_54] : memref<384x32xbf16, #tpu.memory_space<vmem>>, vector<24x32xbf16>
    %c360 = arith.constant 360 : index
    %c0_55 = arith.constant 0 : index
    %97 = vector.load %arg9[%c360, %c0_55] : memref<384x32xbf16, #tpu.memory_space<vmem>>, vector<24x32xbf16>
    %98 = arith.maximumf %96, %97 : vector<24x32xbf16>
    %cst_56 = arith.constant dense<0.000000e+00> : vector<16x32xf32>
    %99 = tpu.matmul %28, %98, %cst_56 {dimension_numbers = #tpu.dot_dimension_numbers<[1], [0], [0], [1], [0, 0, 1, 1], [], []>} : vector<16x24xbf16>, vector<24x32xbf16>, vector<16x32xf32> -> vector<16x32xf32>
    %cst_57 = arith.constant dense<0.000000e+00> : vector<16x32xf32>
    %100 = tpu.matmul %39, %98, %cst_57 {dimension_numbers = #tpu.dot_dimension_numbers<[1], [0], [0], [1], [0, 0, 1, 1], [], []>} : vector<16x24xbf16>, vector<24x32xbf16>, vector<16x32xf32> -> vector<16x32xf32>
    %101 = arith.maximumf %99, %100 : vector<16x32xf32>
    %102 = arith.truncf %101 : vector<16x32xf32> to vector<16x32xbf16>
    %c128 = arith.constant 128 : index
    %c0_58 = arith.constant 0 : index
    %103 = vector.load %arg10[%c128, %c0_58] : memref<176x32xbf16, #tpu.memory_space<vmem>>, vector<16x32xbf16>
    tpu.vector_store %arg10[%c128, %c0_58], %102 {strides = array<i32>} : memref<176x32xbf16, #tpu.memory_space<vmem>>, vector<16x32xbf16>,
    %cst_59 = arith.constant 0.000000e+00 : f32
    %104 = vector.broadcast %cst_59 : f32 to vector<128x64xf32>
    %c0_60 = arith.constant 0 : index
    %c0_61 = arith.constant 0 : index
    %105 = vector.load %arg10[%c0_60, %c0_61] : memref<176x32xbf16, #tpu.memory_space<vmem>>, vector<128x32xbf16>
    %c0_62 = arith.constant 0 : index
    %c0_63 = arith.constant 0 : index
    %c0_64 = arith.constant 0 : index
    %106 = vector.load %arg4[%c0_62, %c0_63, %c0_64] : memref<9x32x64xbf16, #tpu.memory_space<vmem>>, vector<1x32x64xbf16>
    %107 = vector.shape_cast %106 : vector<1x32x64xbf16> to vector<32x64xbf16>
    %cst_65 = arith.constant dense<0.000000e+00> : vector<128x64xf32>
    %108 = tpu.matmul %105, %107, %cst_65 {dimension_numbers = #tpu.dot_dimension_numbers<[1], [0], [0], [1], [0, 0, 1, 1], [], []>} : vector<128x32xbf16>, vector<32x64xbf16>, vector<128x64xf32> -> vector<128x64xf32>
    %109 = arith.addf %104, %108 : vector<128x64xf32>
    %c1 = arith.constant 1 : index
    %c0_66 = arith.constant 0 : index
    %110 = vector.load %arg10[%c1, %c0_66] : memref<176x32xbf16, #tpu.memory_space<vmem>>, vector<128x32xbf16>
    %c1_67 = arith.constant 1 : index
    %c0_68 = arith.constant 0 : index
    %c0_69 = arith.constant 0 : index
    %111 = vector.load %arg4[%c1_67, %c0_68, %c0_69] : memref<9x32x64xbf16, #tpu.memory_space<vmem>>, vector<1x32x64xbf16>
    %112 = vector.shape_cast %111 : vector<1x32x64xbf16> to vector<32x64xbf16>
    %cst_70 = arith.constant dense<0.000000e+00> : vector<128x64xf32>
    %113 = tpu.matmul %110, %112, %cst_70 {dimension_numbers = #tpu.dot_dimension_numbers<[1], [0], [0], [1], [0, 0, 1, 1], [], []>} : vector<128x32xbf16>, vector<32x64xbf16>, vector<128x64xf32> -> vector<128x64xf32>
    %114 = arith.addf %109, %113 : vector<128x64xf32>
    %c2 = arith.constant 2 : index
    %c0_71 = arith.constant 0 : index
    %115 = vector.load %arg10[%c2, %c0_71] : memref<176x32xbf16, #tpu.memory_space<vmem>>, vector<128x32xbf16>
    %c2_72 = arith.constant 2 : index
    %c0_73 = arith.constant 0 : index
    %c0_74 = arith.constant 0 : index
    %116 = vector.load %arg4[%c2_72, %c0_73, %c0_74] : memref<9x32x64xbf16, #tpu.memory_space<vmem>>, vector<1x32x64xbf16>
    %117 = vector.shape_cast %116 : vector<1x32x64xbf16> to vector<32x64xbf16>
    %cst_75 = arith.constant dense<0.000000e+00> : vector<128x64xf32>
    %118 = tpu.matmul %115, %117, %cst_75 {dimension_numbers = #tpu.dot_dimension_numbers<[1], [0], [0], [1], [0, 0, 1, 1], [], []>} : vector<128x32xbf16>, vector<32x64xbf16>, vector<128x64xf32> -> vector<128x64xf32>
    %119 = arith.addf %114, %118 : vector<128x64xf32>
    %c16_76 = arith.constant 16 : index
    %c0_77 = arith.constant 0 : index
    %120 = vector.load %arg10[%c16_76, %c0_77] : memref<176x32xbf16, #tpu.memory_space<vmem>>, vector<128x32xbf16>
    %c3 = arith.constant 3 : index
    %c0_78 = arith.constant 0 : index
    %c0_79 = arith.constant 0 : index
    %121 = vector.load %arg4[%c3, %c0_78, %c0_79] : memref<9x32x64xbf16, #tpu.memory_space<vmem>>, vector<1x32x64xbf16>
    %122 = vector.shape_cast %121 : vector<1x32x64xbf16> to vector<32x64xbf16>
    %cst_80 = arith.constant dense<0.000000e+00> : vector<128x64xf32>
    %123 = tpu.matmul %120, %122, %cst_80 {dimension_numbers = #tpu.dot_dimension_numbers<[1], [0], [0], [1], [0, 0, 1, 1], [], []>} : vector<128x32xbf16>, vector<32x64xbf16>, vector<128x64xf32> -> vector<128x64xf32>
    %124 = arith.addf %119, %123 : vector<128x64xf32>
    %c17 = arith.constant 17 : index
    %c0_81 = arith.constant 0 : index
    %125 = vector.load %arg10[%c17, %c0_81] : memref<176x32xbf16, #tpu.memory_space<vmem>>, vector<128x32xbf16>
    %c4 = arith.constant 4 : index
    %c0_82 = arith.constant 0 : index
    %c0_83 = arith.constant 0 : index
    %126 = vector.load %arg4[%c4, %c0_82, %c0_83] : memref<9x32x64xbf16, #tpu.memory_space<vmem>>, vector<1x32x64xbf16>
    %127 = vector.shape_cast %126 : vector<1x32x64xbf16> to vector<32x64xbf16>
    %cst_84 = arith.constant dense<0.000000e+00> : vector<128x64xf32>
    %128 = tpu.matmul %125, %127, %cst_84 {dimension_numbers = #tpu.dot_dimension_numbers<[1], [0], [0], [1], [0, 0, 1, 1], [], []>} : vector<128x32xbf16>, vector<32x64xbf16>, vector<128x64xf32> -> vector<128x64xf32>
    %129 = arith.addf %124, %128 : vector<128x64xf32>
    %c18 = arith.constant 18 : index
    %c0_85 = arith.constant 0 : index
    %130 = vector.load %arg10[%c18, %c0_85] : memref<176x32xbf16, #tpu.memory_space<vmem>>, vector<128x32xbf16>
    %c5 = arith.constant 5 : index
    %c0_86 = arith.constant 0 : index
    %c0_87 = arith.constant 0 : index
    %131 = vector.load %arg4[%c5, %c0_86, %c0_87] : memref<9x32x64xbf16, #tpu.memory_space<vmem>>, vector<1x32x64xbf16>
    %132 = vector.shape_cast %131 : vector<1x32x64xbf16> to vector<32x64xbf16>
    %cst_88 = arith.constant dense<0.000000e+00> : vector<128x64xf32>
    %133 = tpu.matmul %130, %132, %cst_88 {dimension_numbers = #tpu.dot_dimension_numbers<[1], [0], [0], [1], [0, 0, 1, 1], [], []>} : vector<128x32xbf16>, vector<32x64xbf16>, vector<128x64xf32> -> vector<128x64xf32>
    %134 = arith.addf %129, %133 : vector<128x64xf32>
    %c32_89 = arith.constant 32 : index
    %c0_90 = arith.constant 0 : index
    %135 = vector.load %arg10[%c32_89, %c0_90] : memref<176x32xbf16, #tpu.memory_space<vmem>>, vector<128x32xbf16>
    %c6 = arith.constant 6 : index
    %c0_91 = arith.constant 0 : index
    %c0_92 = arith.constant 0 : index
    %136 = vector.load %arg4[%c6, %c0_91, %c0_92] : memref<9x32x64xbf16, #tpu.memory_space<vmem>>, vector<1x32x64xbf16>
    %137 = vector.shape_cast %136 : vector<1x32x64xbf16> to vector<32x64xbf16>
    %cst_93 = arith.constant dense<0.000000e+00> : vector<128x64xf32>
    %138 = tpu.matmul %135, %137, %cst_93 {dimension_numbers = #tpu.dot_dimension_numbers<[1], [0], [0], [1], [0, 0, 1, 1], [], []>} : vector<128x32xbf16>, vector<32x64xbf16>, vector<128x64xf32> -> vector<128x64xf32>
    %139 = arith.addf %134, %138 : vector<128x64xf32>
    %c33 = arith.constant 33 : index
    %c0_94 = arith.constant 0 : index
    %140 = vector.load %arg10[%c33, %c0_94] : memref<176x32xbf16, #tpu.memory_space<vmem>>, vector<128x32xbf16>
    %c7 = arith.constant 7 : index
    %c0_95 = arith.constant 0 : index
    %c0_96 = arith.constant 0 : index
    %141 = vector.load %arg4[%c7, %c0_95, %c0_96] : memref<9x32x64xbf16, #tpu.memory_space<vmem>>, vector<1x32x64xbf16>
    %142 = vector.shape_cast %141 : vector<1x32x64xbf16> to vector<32x64xbf16>
    %cst_97 = arith.constant dense<0.000000e+00> : vector<128x64xf32>
    %143 = tpu.matmul %140, %142, %cst_97 {dimension_numbers = #tpu.dot_dimension_numbers<[1], [0], [0], [1], [0, 0, 1, 1], [], []>} : vector<128x32xbf16>, vector<32x64xbf16>, vector<128x64xf32> -> vector<128x64xf32>
    %144 = arith.addf %139, %143 : vector<128x64xf32>
    %c34 = arith.constant 34 : index
    %c0_98 = arith.constant 0 : index
    %145 = vector.load %arg10[%c34, %c0_98] : memref<176x32xbf16, #tpu.memory_space<vmem>>, vector<128x32xbf16>
    %c8 = arith.constant 8 : index
    %c0_99 = arith.constant 0 : index
    %c0_100 = arith.constant 0 : index
    %146 = vector.load %arg4[%c8, %c0_99, %c0_100] : memref<9x32x64xbf16, #tpu.memory_space<vmem>>, vector<1x32x64xbf16>
    %147 = vector.shape_cast %146 : vector<1x32x64xbf16> to vector<32x64xbf16>
    %cst_101 = arith.constant dense<0.000000e+00> : vector<128x64xf32>
    %148 = tpu.matmul %145, %147, %cst_101 {dimension_numbers = #tpu.dot_dimension_numbers<[1], [0], [0], [1], [0, 0, 1, 1], [], []>} : vector<128x32xbf16>, vector<32x64xbf16>, vector<128x64xf32> -> vector<128x64xf32>
    %149 = arith.addf %144, %148 : vector<128x64xf32>
    %c0_102 = arith.constant 0 : index
    %c0_103 = arith.constant 0 : index
    %150 = vector.load %arg5[%c0_102, %c0_103] : memref<1x64xf32, #tpu.memory_space<vmem>>, vector<1x64xf32>
    %151 = vector.broadcast %150 : vector<1x64xf32> to vector<128x64xf32>
    %152 = arith.addf %149, %151 : vector<128x64xf32>
    %cst_104 = arith.constant 0.000000e+00 : f32
    %153 = vector.broadcast %cst_104 : f32 to vector<128x64xf32>
    %154 = arith.maximumf %152, %153 : vector<128x64xf32>
    %155 = arith.truncf %154 : vector<128x64xf32> to vector<128x64xbf16>
    %c0_105 = arith.constant 0 : index
    %c0_106 = arith.constant 0 : index
    %156 = vector.load %arg11[%c0_105, %c0_106] : memref<128x64xbf16, #tpu.memory_space<vmem>>, vector<128x64xbf16>
    tpu.vector_store %arg11[%c0_105, %c0_106], %155 {strides = array<i32>} : memref<128x64xbf16, #tpu.memory_space<vmem>>, vector<128x64xbf16>,
    %cst_107 = arith.constant 0.000000e+00 : bf16
    %157 = vector.broadcast %cst_107 : bf16 to vector<56x64xbf16>
    %c0_108 = arith.constant 0 : index
    %c0_109 = arith.constant 0 : index
    %158 = vector.load %arg12[%c0_108, %c0_109] : memref<56x64xbf16, #tpu.memory_space<vmem>>, vector<56x64xbf16>
    tpu.vector_store %arg12[%c0_108, %c0_109], %157 {strides = array<i32>} : memref<56x64xbf16, #tpu.memory_space<vmem>>, vector<56x64xbf16>,
    %159 = tpu.iota {dimensions = array<i32: 0>} : vector<8x16xi32>
    %160 = tpu.iota {dimensions = array<i32: 1>} : vector<8x16xi32>
    %c1_i32_110 = arith.constant 1 : i32
    %161 = vector.broadcast %c1_i32_110 : i32 to vector<8x16xi32>
    %162 = arith.cmpi sge, %159, %161 : vector<8x16xi32>
    %c5_i32 = arith.constant 5 : i32
    %163 = vector.broadcast %c5_i32 : i32 to vector<8x16xi32>
    %164 = arith.cmpi slt, %159, %163 : vector<8x16xi32>
    %165 = arith.andi %162, %164 : vector<8x16xi1>
    %c1_i32_111 = arith.constant 1 : i32
    %166 = vector.broadcast %c1_i32_111 : i32 to vector<8x16xi32>
    %167 = arith.subi %159, %166 : vector<8x16xi32>
    %c2_i32_112 = arith.constant 2 : i32
    %168 = vector.broadcast %c2_i32_112 : i32 to vector<8x16xi32>
    %169 = arith.muli %168, %167 : vector<8x16xi32>
    %170 = arith.cmpi eq, %160, %169 : vector<8x16xi32>
    %171 = arith.andi %170, %165 : vector<8x16xi1>
    %172 = arith.extui %171 : vector<8x16xi1> to vector<8x16xi32>
    %173 = arith.sitofp %172 : vector<8x16xi32> to vector<8x16xf32>
    %174 = arith.truncf %173 : vector<8x16xf32> to vector<8x16xbf16>
    %c1_i32_113 = arith.constant 1 : i32
    %175 = vector.broadcast %c1_i32_113 : i32 to vector<8x16xi32>
    %176 = arith.subi %159, %175 : vector<8x16xi32>
    %c2_i32_114 = arith.constant 2 : i32
    %177 = vector.broadcast %c2_i32_114 : i32 to vector<8x16xi32>
    %178 = arith.muli %177, %176 : vector<8x16xi32>
    %c1_i32_115 = arith.constant 1 : i32
    %179 = vector.broadcast %c1_i32_115 : i32 to vector<8x16xi32>
    %180 = arith.addi %178, %179 : vector<8x16xi32>
    %181 = arith.cmpi eq, %160, %180 : vector<8x16xi32>
    %182 = arith.andi %181, %165 : vector<8x16xi1>
    %183 = arith.extui %182 : vector<8x16xi1> to vector<8x16xi32>
    %184 = arith.sitofp %183 : vector<8x16xi32> to vector<8x16xf32>
    %185 = arith.truncf %184 : vector<8x16xf32> to vector<8x16xbf16>
    %c0_116 = arith.constant 0 : index
    %c0_117 = arith.constant 0 : index
    %186 = vector.load %arg11[%c0_116, %c0_117] : memref<128x64xbf16, #tpu.memory_space<vmem>>, vector<16x64xbf16>
    %c16_118 = arith.constant 16 : index
    %c0_119 = arith.constant 0 : index
    %187 = vector.load %arg11[%c16_118, %c0_119] : memref<128x64xbf16, #tpu.memory_space<vmem>>, vector<16x64xbf16>
    %188 = arith.maximumf %186, %187 : vector<16x64xbf16>
    %cst_120 = arith.constant dense<0.000000e+00> : vector<8x64xf32>
    %189 = tpu.matmul %174, %188, %cst_120 {dimension_numbers = #tpu.dot_dimension_numbers<[1], [0], [0], [1], [0, 0, 1, 1], [], []>} : vector<8x16xbf16>, vector<16x64xbf16>, vector<8x64xf32> -> vector<8x64xf32>
    %cst_121 = arith.constant dense<0.000000e+00> : vector<8x64xf32>
    %190 = tpu.matmul %185, %188, %cst_121 {dimension_numbers = #tpu.dot_dimension_numbers<[1], [0], [0], [1], [0, 0, 1, 1], [], []>} : vector<8x16xbf16>, vector<16x64xbf16>, vector<8x64xf32> -> vector<8x64xf32>
    %191 = arith.maximumf %189, %190 : vector<8x64xf32>
    %192 = arith.truncf %191 : vector<8x64xf32> to vector<8x64xbf16>
    %c8_122 = arith.constant 8 : index
    %c0_123 = arith.constant 0 : index
    %193 = vector.load %arg12[%c8_122, %c0_123] : memref<56x64xbf16, #tpu.memory_space<vmem>>, vector<8x64xbf16>
    tpu.vector_store %arg12[%c8_122, %c0_123], %192 {strides = array<i32>} : memref<56x64xbf16, #tpu.memory_space<vmem>>, vector<8x64xbf16>,
    %c32_124 = arith.constant 32 : index
    %c0_125 = arith.constant 0 : index
    %194 = vector.load %arg11[%c32_124, %c0_125] : memref<128x64xbf16, #tpu.memory_space<vmem>>, vector<16x64xbf16>
    %c48_126 = arith.constant 48 : index
    %c0_127 = arith.constant 0 : index
    %195 = vector.load %arg11[%c48_126, %c0_127] : memref<128x64xbf16, #tpu.memory_space<vmem>>, vector<16x64xbf16>
    %196 = arith.maximumf %194, %195 : vector<16x64xbf16>
    %cst_128 = arith.constant dense<0.000000e+00> : vector<8x64xf32>
    %197 = tpu.matmul %174, %196, %cst_128 {dimension_numbers = #tpu.dot_dimension_numbers<[1], [0], [0], [1], [0, 0, 1, 1], [], []>} : vector<8x16xbf16>, vector<16x64xbf16>, vector<8x64xf32> -> vector<8x64xf32>
    %cst_129 = arith.constant dense<0.000000e+00> : vector<8x64xf32>
    %198 = tpu.matmul %185, %196, %cst_129 {dimension_numbers = #tpu.dot_dimension_numbers<[1], [0], [0], [1], [0, 0, 1, 1], [], []>} : vector<8x16xbf16>, vector<16x64xbf16>, vector<8x64xf32> -> vector<8x64xf32>
    %199 = arith.maximumf %197, %198 : vector<8x64xf32>
    %200 = arith.truncf %199 : vector<8x64xf32> to vector<8x64xbf16>
    %c16_130 = arith.constant 16 : index
    %c0_131 = arith.constant 0 : index
    %201 = vector.load %arg12[%c16_130, %c0_131] : memref<56x64xbf16, #tpu.memory_space<vmem>>, vector<8x64xbf16>
    tpu.vector_store %arg12[%c16_130, %c0_131], %200 {strides = array<i32>} : memref<56x64xbf16, #tpu.memory_space<vmem>>, vector<8x64xbf16>,
    %c64_132 = arith.constant 64 : index
    %c0_133 = arith.constant 0 : index
    %202 = vector.load %arg11[%c64_132, %c0_133] : memref<128x64xbf16, #tpu.memory_space<vmem>>, vector<16x64xbf16>
    %c80_134 = arith.constant 80 : index
    %c0_135 = arith.constant 0 : index
    %203 = vector.load %arg11[%c80_134, %c0_135] : memref<128x64xbf16, #tpu.memory_space<vmem>>, vector<16x64xbf16>
    %204 = arith.maximumf %202, %203 : vector<16x64xbf16>
    %cst_136 = arith.constant dense<0.000000e+00> : vector<8x64xf32>
    %205 = tpu.matmul %174, %204, %cst_136 {dimension_numbers = #tpu.dot_dimension_numbers<[1], [0], [0], [1], [0, 0, 1, 1], [], []>} : vector<8x16xbf16>, vector<16x64xbf16>, vector<8x64xf32> -> vector<8x64xf32>
    %cst_137 = arith.constant dense<0.000000e+00> : vector<8x64xf32>
    %206 = tpu.matmul %185, %204, %cst_137 {dimension_numbers = #tpu.dot_dimension_numbers<[1], [0], [0], [1], [0, 0, 1, 1], [], []>} : vector<8x16xbf16>, vector<16x64xbf16>, vector<8x64xf32> -> vector<8x64xf32>
    %207 = arith.maximumf %205, %206 : vector<8x64xf32>
    %208 = arith.truncf %207 : vector<8x64xf32> to vector<8x64xbf16>
    %c24_138 = arith.constant 24 : index
    %c0_139 = arith.constant 0 : index
    %209 = vector.load %arg12[%c24_138, %c0_139] : memref<56x64xbf16, #tpu.memory_space<vmem>>, vector<8x64xbf16>
    tpu.vector_store %arg12[%c24_138, %c0_139], %208 {strides = array<i32>} : memref<56x64xbf16, #tpu.memory_space<vmem>>, vector<8x64xbf16>,
    %c96_140 = arith.constant 96 : index
    %c0_141 = arith.constant 0 : index
    %210 = vector.load %arg11[%c96_140, %c0_141] : memref<128x64xbf16, #tpu.memory_space<vmem>>, vector<16x64xbf16>
    %c112_142 = arith.constant 112 : index
    %c0_143 = arith.constant 0 : index
    %211 = vector.load %arg11[%c112_142, %c0_143] : memref<128x64xbf16, #tpu.memory_space<vmem>>, vector<16x64xbf16>
    %212 = arith.maximumf %210, %211 : vector<16x64xbf16>
    %cst_144 = arith.constant dense<0.000000e+00> : vector<8x64xf32>
    %213 = tpu.matmul %174, %212, %cst_144 {dimension_numbers = #tpu.dot_dimension_numbers<[1], [0], [0], [1], [0, 0, 1, 1], [], []>} : vector<8x16xbf16>, vector<16x64xbf16>, vector<8x64xf32> -> vector<8x64xf32>
    %cst_145 = arith.constant dense<0.000000e+00> : vector<8x64xf32>
    %214 = tpu.matmul %185, %212, %cst_145 {dimension_numbers = #tpu.dot_dimension_numbers<[1], [0], [0], [1], [0, 0, 1, 1], [], []>} : vector<8x16xbf16>, vector<16x64xbf16>, vector<8x64xf32> -> vector<8x64xf32>
    %215 = arith.maximumf %213, %214 : vector<8x64xf32>
    %216 = arith.truncf %215 : vector<8x64xf32> to vector<8x64xbf16>
    %c32_146 = arith.constant 32 : index
    %c0_147 = arith.constant 0 : index
    %217 = vector.load %arg12[%c32_146, %c0_147] : memref<56x64xbf16, #tpu.memory_space<vmem>>, vector<8x64xbf16>
    tpu.vector_store %arg12[%c32_146, %c0_147], %216 {strides = array<i32>} : memref<56x64xbf16, #tpu.memory_space<vmem>>, vector<8x64xbf16>,
    %cst_148 = arith.constant 0.000000e+00 : f32
    %218 = vector.broadcast %cst_148 : f32 to vector<32x128xf32>
    %c0_149 = arith.constant 0 : index
    %c0_150 = arith.constant 0 : index
    %219 = vector.load %arg12[%c0_149, %c0_150] : memref<56x64xbf16, #tpu.memory_space<vmem>>, vector<32x64xbf16>
    %c0_151 = arith.constant 0 : index
    %c0_152 = arith.constant 0 : index
    %c0_153 = arith.constant 0 : index
    %220 = vector.load %arg6[%c0_151, %c0_152, %c0_153] : memref<9x64x128xbf16, #tpu.memory_space<vmem>>, vector<1x64x128xbf16>
    %221 = vector.shape_cast %220 : vector<1x64x128xbf16> to vector<64x128xbf16>
    %cst_154 = arith.constant dense<0.000000e+00> : vector<32x128xf32>
    %222 = tpu.matmul %219, %221, %cst_154 {dimension_numbers = #tpu.dot_dimension_numbers<[1], [0], [0], [1], [0, 0, 1, 1], [], []>} : vector<32x64xbf16>, vector<64x128xbf16>, vector<32x128xf32> -> vector<32x128xf32>
    %223 = arith.addf %218, %222 : vector<32x128xf32>
    %c1_155 = arith.constant 1 : index
    %c0_156 = arith.constant 0 : index
    %224 = vector.load %arg12[%c1_155, %c0_156] : memref<56x64xbf16, #tpu.memory_space<vmem>>, vector<32x64xbf16>
    %c1_157 = arith.constant 1 : index
    %c0_158 = arith.constant 0 : index
    %c0_159 = arith.constant 0 : index
    %225 = vector.load %arg6[%c1_157, %c0_158, %c0_159] : memref<9x64x128xbf16, #tpu.memory_space<vmem>>, vector<1x64x128xbf16>
    %226 = vector.shape_cast %225 : vector<1x64x128xbf16> to vector<64x128xbf16>
    %cst_160 = arith.constant dense<0.000000e+00> : vector<32x128xf32>
    %227 = tpu.matmul %224, %226, %cst_160 {dimension_numbers = #tpu.dot_dimension_numbers<[1], [0], [0], [1], [0, 0, 1, 1], [], []>} : vector<32x64xbf16>, vector<64x128xbf16>, vector<32x128xf32> -> vector<32x128xf32>
    %228 = arith.addf %223, %227 : vector<32x128xf32>
    %c2_161 = arith.constant 2 : index
    %c0_162 = arith.constant 0 : index
    %229 = vector.load %arg12[%c2_161, %c0_162] : memref<56x64xbf16, #tpu.memory_space<vmem>>, vector<32x64xbf16>
    %c2_163 = arith.constant 2 : index
    %c0_164 = arith.constant 0 : index
    %c0_165 = arith.constant 0 : index
    %230 = vector.load %arg6[%c2_163, %c0_164, %c0_165] : memref<9x64x128xbf16, #tpu.memory_space<vmem>>, vector<1x64x128xbf16>
    %231 = vector.shape_cast %230 : vector<1x64x128xbf16> to vector<64x128xbf16>
    %cst_166 = arith.constant dense<0.000000e+00> : vector<32x128xf32>
    %232 = tpu.matmul %229, %231, %cst_166 {dimension_numbers = #tpu.dot_dimension_numbers<[1], [0], [0], [1], [0, 0, 1, 1], [], []>} : vector<32x64xbf16>, vector<64x128xbf16>, vector<32x128xf32> -> vector<32x128xf32>
    %233 = arith.addf %228, %232 : vector<32x128xf32>
    %c8_167 = arith.constant 8 : index
    %c0_168 = arith.constant 0 : index
    %234 = vector.load %arg12[%c8_167, %c0_168] : memref<56x64xbf16, #tpu.memory_space<vmem>>, vector<32x64xbf16>
    %c3_169 = arith.constant 3 : index
    %c0_170 = arith.constant 0 : index
    %c0_171 = arith.constant 0 : index
    %235 = vector.load %arg6[%c3_169, %c0_170, %c0_171] : memref<9x64x128xbf16, #tpu.memory_space<vmem>>, vector<1x64x128xbf16>
    %236 = vector.shape_cast %235 : vector<1x64x128xbf16> to vector<64x128xbf16>
    %cst_172 = arith.constant dense<0.000000e+00> : vector<32x128xf32>
    %237 = tpu.matmul %234, %236, %cst_172 {dimension_numbers = #tpu.dot_dimension_numbers<[1], [0], [0], [1], [0, 0, 1, 1], [], []>} : vector<32x64xbf16>, vector<64x128xbf16>, vector<32x128xf32> -> vector<32x128xf32>
    %238 = arith.addf %233, %237 : vector<32x128xf32>
    %c9 = arith.constant 9 : index
    %c0_173 = arith.constant 0 : index
    %239 = vector.load %arg12[%c9, %c0_173] : memref<56x64xbf16, #tpu.memory_space<vmem>>, vector<32x64xbf16>
    %c4_174 = arith.constant 4 : index
    %c0_175 = arith.constant 0 : index
    %c0_176 = arith.constant 0 : index
    %240 = vector.load %arg6[%c4_174, %c0_175, %c0_176] : memref<9x64x128xbf16, #tpu.memory_space<vmem>>, vector<1x64x128xbf16>
    %241 = vector.shape_cast %240 : vector<1x64x128xbf16> to vector<64x128xbf16>
    %cst_177 = arith.constant dense<0.000000e+00> : vector<32x128xf32>
    %242 = tpu.matmul %239, %241, %cst_177 {dimension_numbers = #tpu.dot_dimension_numbers<[1], [0], [0], [1], [0, 0, 1, 1], [], []>} : vector<32x64xbf16>, vector<64x128xbf16>, vector<32x128xf32> -> vector<32x128xf32>
    %243 = arith.addf %238, %242 : vector<32x128xf32>
    %c10 = arith.constant 10 : index
    %c0_178 = arith.constant 0 : index
    %244 = vector.load %arg12[%c10, %c0_178] : memref<56x64xbf16, #tpu.memory_space<vmem>>, vector<32x64xbf16>
    %c5_179 = arith.constant 5 : index
    %c0_180 = arith.constant 0 : index
    %c0_181 = arith.constant 0 : index
    %245 = vector.load %arg6[%c5_179, %c0_180, %c0_181] : memref<9x64x128xbf16, #tpu.memory_space<vmem>>, vector<1x64x128xbf16>
    %246 = vector.shape_cast %245 : vector<1x64x128xbf16> to vector<64x128xbf16>
    %cst_182 = arith.constant dense<0.000000e+00> : vector<32x128xf32>
    %247 = tpu.matmul %244, %246, %cst_182 {dimension_numbers = #tpu.dot_dimension_numbers<[1], [0], [0], [1], [0, 0, 1, 1], [], []>} : vector<32x64xbf16>, vector<64x128xbf16>, vector<32x128xf32> -> vector<32x128xf32>
    %248 = arith.addf %243, %247 : vector<32x128xf32>
    %c16_183 = arith.constant 16 : index
    %c0_184 = arith.constant 0 : index
    %249 = vector.load %arg12[%c16_183, %c0_184] : memref<56x64xbf16, #tpu.memory_space<vmem>>, vector<32x64xbf16>
    %c6_185 = arith.constant 6 : index
    %c0_186 = arith.constant 0 : index
    %c0_187 = arith.constant 0 : index
    %250 = vector.load %arg6[%c6_185, %c0_186, %c0_187] : memref<9x64x128xbf16, #tpu.memory_space<vmem>>, vector<1x64x128xbf16>
    %251 = vector.shape_cast %250 : vector<1x64x128xbf16> to vector<64x128xbf16>
    %cst_188 = arith.constant dense<0.000000e+00> : vector<32x128xf32>
    %252 = tpu.matmul %249, %251, %cst_188 {dimension_numbers = #tpu.dot_dimension_numbers<[1], [0], [0], [1], [0, 0, 1, 1], [], []>} : vector<32x64xbf16>, vector<64x128xbf16>, vector<32x128xf32> -> vector<32x128xf32>
    %253 = arith.addf %248, %252 : vector<32x128xf32>
    %c17_189 = arith.constant 17 : index
    %c0_190 = arith.constant 0 : index
    %254 = vector.load %arg12[%c17_189, %c0_190] : memref<56x64xbf16, #tpu.memory_space<vmem>>, vector<32x64xbf16>
    %c7_191 = arith.constant 7 : index
    %c0_192 = arith.constant 0 : index
    %c0_193 = arith.constant 0 : index
    %255 = vector.load %arg6[%c7_191, %c0_192, %c0_193] : memref<9x64x128xbf16, #tpu.memory_space<vmem>>, vector<1x64x128xbf16>
    %256 = vector.shape_cast %255 : vector<1x64x128xbf16> to vector<64x128xbf16>
    %cst_194 = arith.constant dense<0.000000e+00> : vector<32x128xf32>
    %257 = tpu.matmul %254, %256, %cst_194 {dimension_numbers = #tpu.dot_dimension_numbers<[1], [0], [0], [1], [0, 0, 1, 1], [], []>} : vector<32x64xbf16>, vector<64x128xbf16>, vector<32x128xf32> -> vector<32x128xf32>
    %258 = arith.addf %253, %257 : vector<32x128xf32>
    %c18_195 = arith.constant 18 : index
    %c0_196 = arith.constant 0 : index
    %259 = vector.load %arg12[%c18_195, %c0_196] : memref<56x64xbf16, #tpu.memory_space<vmem>>, vector<32x64xbf16>
    %c8_197 = arith.constant 8 : index
    %c0_198 = arith.constant 0 : index
    %c0_199 = arith.constant 0 : index
    %260 = vector.load %arg6[%c8_197, %c0_198, %c0_199] : memref<9x64x128xbf16, #tpu.memory_space<vmem>>, vector<1x64x128xbf16>
    %261 = vector.shape_cast %260 : vector<1x64x128xbf16> to vector<64x128xbf16>
    %cst_200 = arith.constant dense<0.000000e+00> : vector<32x128xf32>
    %262 = tpu.matmul %259, %261, %cst_200 {dimension_numbers = #tpu.dot_dimension_numbers<[1], [0], [0], [1], [0, 0, 1, 1], [], []>} : vector<32x64xbf16>, vector<64x128xbf16>, vector<32x128xf32> -> vector<32x128xf32>
    %263 = arith.addf %258, %262 : vector<32x128xf32>
    %c0_201 = arith.constant 0 : index
    %c0_202 = arith.constant 0 : index
    %264 = vector.load %arg7[%c0_201, %c0_202] : memref<1x128xf32, #tpu.memory_space<vmem>>, vector<1x128xf32>
    %265 = vector.broadcast %264 : vector<1x128xf32> to vector<32x128xf32>
    %266 = arith.addf %263, %265 : vector<32x128xf32>
    %cst_203 = arith.constant 0.000000e+00 : f32
    %267 = vector.broadcast %cst_203 : f32 to vector<32x128xf32>
    %268 = arith.maximumf %266, %267 : vector<32x128xf32>
    %269 = arith.truncf %268 : vector<32x128xf32> to vector<32x128xbf16>
    %c0_204 = arith.constant 0 : index
    %c0_205 = arith.constant 0 : index
    %270 = vector.load %arg13[%c0_204, %c0_205] : memref<32x128xbf16, #tpu.memory_space<vmem>>, vector<32x128xbf16>
    tpu.vector_store %arg13[%c0_204, %c0_205], %269 {strides = array<i32>} : memref<32x128xbf16, #tpu.memory_space<vmem>>, vector<32x128xbf16>,
    %cst_206 = arith.constant 0.000000e+00 : bf16
    %271 = vector.broadcast %cst_206 : bf16 to vector<4x128xbf16>
    %c0_207 = arith.constant 0 : index
    %c0_208 = arith.constant 0 : index
    %c0_209 = arith.constant 0 : index
    %272 = vector.load %arg8[%c0_207, %c0_208, %c0_209] : memref<1x4x128xbf16, #tpu.memory_space<vmem>>, vector<1x4x128xbf16>
    %273 = vector.shape_cast %272 : vector<1x4x128xbf16> to vector<4x128xbf16>
    %274 = vector.shape_cast %271 : vector<4x128xbf16> to vector<1x4x128xbf16>
    tpu.vector_store %arg8[%c0_207, %c0_208, %c0_209], %274 {strides = array<i32>} : memref<1x4x128xbf16, #tpu.memory_space<vmem>>, vector<1x4x128xbf16>,
    %275 = tpu.iota {dimensions = array<i32: 0>} : vector<2x8xi32>
    %276 = tpu.iota {dimensions = array<i32: 1>} : vector<2x8xi32>
    %c0_i32 = arith.constant 0 : i32
    %277 = vector.broadcast %c0_i32 : i32 to vector<2x8xi32>
    %278 = arith.cmpi sge, %275, %277 : vector<2x8xi32>
    %c2_i32_210 = arith.constant 2 : i32
    %279 = vector.broadcast %c2_i32_210 : i32 to vector<2x8xi32>
    %280 = arith.cmpi slt, %275, %279 : vector<2x8xi32>
    %281 = arith.andi %278, %280 : vector<2x8xi1>
    %c0_i32_211 = arith.constant 0 : i32
    %282 = vector.broadcast %c0_i32_211 : i32 to vector<2x8xi32>
    %283 = arith.subi %275, %282 : vector<2x8xi32>
    %c2_i32_212 = arith.constant 2 : i32
    %284 = vector.broadcast %c2_i32_212 : i32 to vector<2x8xi32>
    %285 = arith.muli %284, %283 : vector<2x8xi32>
    %286 = arith.cmpi eq, %276, %285 : vector<2x8xi32>
    %287 = arith.andi %286, %281 : vector<2x8xi1>
    %288 = arith.extui %287 : vector<2x8xi1> to vector<2x8xi32>
    %289 = arith.sitofp %288 : vector<2x8xi32> to vector<2x8xf32>
    %290 = arith.truncf %289 : vector<2x8xf32> to vector<2x8xbf16>
    %c0_i32_213 = arith.constant 0 : i32
    %291 = vector.broadcast %c0_i32_213 : i32 to vector<2x8xi32>
    %292 = arith.subi %275, %291 : vector<2x8xi32>
    %c2_i32_214 = arith.constant 2 : i32
    %293 = vector.broadcast %c2_i32_214 : i32 to vector<2x8xi32>
    %294 = arith.muli %293, %292 : vector<2x8xi32>
    %c1_i32_215 = arith.constant 1 : i32
    %295 = vector.broadcast %c1_i32_215 : i32 to vector<2x8xi32>
    %296 = arith.addi %294, %295 : vector<2x8xi32>
    %297 = arith.cmpi eq, %276, %296 : vector<2x8xi32>
    %298 = arith.andi %297, %281 : vector<2x8xi1>
    %299 = arith.extui %298 : vector<2x8xi1> to vector<2x8xi32>
    %300 = arith.sitofp %299 : vector<2x8xi32> to vector<2x8xf32>
    %301 = arith.truncf %300 : vector<2x8xf32> to vector<2x8xbf16>
    %c0_216 = arith.constant 0 : index
    %c0_217 = arith.constant 0 : index
    %302 = vector.load %arg13[%c0_216, %c0_217] : memref<32x128xbf16, #tpu.memory_space<vmem>>, vector<8x128xbf16>
    %c8_218 = arith.constant 8 : index
    %c0_219 = arith.constant 0 : index
    %303 = vector.load %arg13[%c8_218, %c0_219] : memref<32x128xbf16, #tpu.memory_space<vmem>>, vector<8x128xbf16>
    %304 = arith.maximumf %302, %303 : vector<8x128xbf16>
    %cst_220 = arith.constant dense<0.000000e+00> : vector<2x128xf32>
    %305 = tpu.matmul %290, %304, %cst_220 {dimension_numbers = #tpu.dot_dimension_numbers<[1], [0], [0], [1], [0, 0, 1, 1], [], []>} : vector<2x8xbf16>, vector<8x128xbf16>, vector<2x128xf32> -> vector<2x128xf32>
    %cst_221 = arith.constant dense<0.000000e+00> : vector<2x128xf32>
    %306 = tpu.matmul %301, %304, %cst_221 {dimension_numbers = #tpu.dot_dimension_numbers<[1], [0], [0], [1], [0, 0, 1, 1], [], []>} : vector<2x8xbf16>, vector<8x128xbf16>, vector<2x128xf32> -> vector<2x128xf32>
    %307 = arith.maximumf %305, %306 : vector<2x128xf32>
    %308 = arith.truncf %307 : vector<2x128xf32> to vector<2x128xbf16>
    %c0_222 = arith.constant 0 : index
    %c0_223 = arith.constant 0 : index
    %c0_224 = arith.constant 0 : index
    %309 = vector.load %arg8[%c0_222, %c0_223, %c0_224] : memref<1x4x128xbf16, #tpu.memory_space<vmem>>, vector<1x2x128xbf16>
    %310 = vector.shape_cast %309 : vector<1x2x128xbf16> to vector<2x128xbf16>
    %311 = vector.shape_cast %308 : vector<2x128xbf16> to vector<1x2x128xbf16>
    tpu.vector_store %arg8[%c0_222, %c0_223, %c0_224], %311 {strides = array<i32>} : memref<1x4x128xbf16, #tpu.memory_space<vmem>>, vector<1x2x128xbf16>,
    %c16_225 = arith.constant 16 : index
    %c0_226 = arith.constant 0 : index
    %312 = vector.load %arg13[%c16_225, %c0_226] : memref<32x128xbf16, #tpu.memory_space<vmem>>, vector<8x128xbf16>
    %c24_227 = arith.constant 24 : index
    %c0_228 = arith.constant 0 : index
    %313 = vector.load %arg13[%c24_227, %c0_228] : memref<32x128xbf16, #tpu.memory_space<vmem>>, vector<8x128xbf16>
    %314 = arith.maximumf %312, %313 : vector<8x128xbf16>
    %cst_229 = arith.constant dense<0.000000e+00> : vector<2x128xf32>
    %315 = tpu.matmul %290, %314, %cst_229 {dimension_numbers = #tpu.dot_dimension_numbers<[1], [0], [0], [1], [0, 0, 1, 1], [], []>} : vector<2x8xbf16>, vector<8x128xbf16>, vector<2x128xf32> -> vector<2x128xf32>
    %cst_230 = arith.constant dense<0.000000e+00> : vector<2x128xf32>
    %316 = tpu.matmul %301, %314, %cst_230 {dimension_numbers = #tpu.dot_dimension_numbers<[1], [0], [0], [1], [0, 0, 1, 1], [], []>} : vector<2x8xbf16>, vector<8x128xbf16>, vector<2x128xf32> -> vector<2x128xf32>
    %317 = arith.maximumf %315, %316 : vector<2x128xf32>
    %318 = arith.truncf %317 : vector<2x128xf32> to vector<2x128xbf16>
    %c0_231 = arith.constant 0 : index
    %c2_232 = arith.constant 2 : index
    %c0_233 = arith.constant 0 : index
    %319 = vector.load %arg8[%c0_231, %c2_232, %c0_233] : memref<1x4x128xbf16, #tpu.memory_space<vmem>>, vector<1x2x128xbf16>
    %320 = vector.shape_cast %319 : vector<1x2x128xbf16> to vector<2x128xbf16>
    %321 = vector.shape_cast %318 : vector<2x128xbf16> to vector<1x2x128xbf16>
    tpu.vector_store %arg8[%c0_231, %c2_232, %c0_233], %321 {strides = array<i32>} : memref<1x4x128xbf16, #tpu.memory_space<vmem>>, vector<1x2x128xbf16>,
    return
  }
  func.func @transform_0(%arg0: i32) -> (i32, i32, i32) {
    %c0_i32 = arith.constant 0 : i32
    %c0_i32_0 = arith.constant 0 : i32
    %c0_i32_1 = arith.constant 0 : i32
    return %arg0, %c0_i32, %c0_i32_0 : i32, i32, i32
  }
  func.func @transform_1(%arg0: i32) -> (i32, i32) {
    %c0_i32 = arith.constant 0 : i32
    %c0_i32_0 = arith.constant 0 : i32
    %c0_i32_1 = arith.constant 0 : i32
    return %c0_i32, %c0_i32_0 : i32, i32
  }
  func.func @transform_2(%arg0: i32) -> (i32, i32) {
    %c0_i32 = arith.constant 0 : i32
    %c0_i32_0 = arith.constant 0 : i32
    %c0_i32_1 = arith.constant 0 : i32
    return %c0_i32, %c0_i32_0 : i32, i32
  }
  func.func @transform_3(%arg0: i32) -> (i32, i32, i32) {
    %c0_i32 = arith.constant 0 : i32
    %c0_i32_0 = arith.constant 0 : i32
    %c0_i32_1 = arith.constant 0 : i32
    %c0_i32_2 = arith.constant 0 : i32
    return %c0_i32, %c0_i32_0, %c0_i32_1 : i32, i32, i32
  }
  func.func @transform_4(%arg0: i32) -> (i32, i32) {
    %c0_i32 = arith.constant 0 : i32
    %c0_i32_0 = arith.constant 0 : i32
    %c0_i32_1 = arith.constant 0 : i32
    return %c0_i32, %c0_i32_0 : i32, i32
  }
  func.func @transform_5(%arg0: i32) -> (i32, i32, i32) {
    %c0_i32 = arith.constant 0 : i32
    %c0_i32_0 = arith.constant 0 : i32
    %c0_i32_1 = arith.constant 0 : i32
    %c0_i32_2 = arith.constant 0 : i32
    return %c0_i32, %c0_i32_0, %c0_i32_1 : i32, i32, i32
  }
  func.func @transform_6(%arg0: i32) -> (i32, i32) {
    %c0_i32 = arith.constant 0 : i32
    %c0_i32_0 = arith.constant 0 : i32
    %c0_i32_1 = arith.constant 0 : i32
    return %c0_i32, %c0_i32_0 : i32, i32
  }
  func.func @transform_7(%arg0: i32) -> (i32, i32, i32) {
    %c0_i32 = arith.constant 0 : i32
    %c0_i32_0 = arith.constant 0 : i32
    %c0_i32_1 = arith.constant 0 : i32
    return %arg0, %c0_i32, %c0_i32_0 : i32, i32, i32
  }
}

module attributes {stable_mosaic.version = 11 : i64} {
  func.func @_mlp_head_kernel(%arg0: i32, %arg1: memref<1x1xf32, #tpu.memory_space<smem>>, %arg2: memref<2x512xbf16, #tpu.memory_space<vmem>>, %arg3: memref<512x1024xbf16, #tpu.memory_space<vmem>>, %arg4: memref<1024x512xbf16, #tpu.memory_space<vmem>>, %arg5: memref<512x256xbf16, #tpu.memory_space<vmem>>, %arg6: memref<256x10xbf16, #tpu.memory_space<vmem>>, %arg7: memref<1x1024xf32, #tpu.memory_space<vmem>>, %arg8: memref<1x512xf32, #tpu.memory_space<vmem>>, %arg9: memref<1x256xf32, #tpu.memory_space<vmem>>, %arg10: memref<1x10xf32, #tpu.memory_space<vmem>>, %arg11: memref<2x10xf32, #tpu.memory_space<vmem>>, %arg12: memref<2x1024xf32, #tpu.memory_space<vmem>>) attributes {dimension_semantics = [#tpu.dimension_semantics<arbitrary>], iteration_bounds = array<i64: 1>, scalar_prefetch = 0 : i64, scratch_operands = 1 : i64, tpu.core_type = #tpu.core_type<tc>, window_params = [{transform_indices = @transform_0, window_bounds = array<i64: 1, 1>}, {transform_indices = @transform_1, window_bounds = array<i64: 2, 512>}, {transform_indices = @transform_2, window_bounds = array<i64: 512, 1024>}, {pipeline_mode = #tpu.pipeline_mode<synchronous>, transform_indices = @transform_3, window_bounds = array<i64: 1024, 512>}, {pipeline_mode = #tpu.pipeline_mode<synchronous>, transform_indices = @transform_4, window_bounds = array<i64: 512, 256>}, {pipeline_mode = #tpu.pipeline_mode<synchronous>, transform_indices = @transform_5, window_bounds = array<i64: 256, 10>}, {pipeline_mode = #tpu.pipeline_mode<synchronous>, transform_indices = @transform_6, window_bounds = array<i64: 1, 1024>}, {pipeline_mode = #tpu.pipeline_mode<synchronous>, transform_indices = @transform_7, window_bounds = array<i64: 1, 512>}, {pipeline_mode = #tpu.pipeline_mode<synchronous>, transform_indices = @transform_8, window_bounds = array<i64: 1, 256>}, {pipeline_mode = #tpu.pipeline_mode<synchronous>, transform_indices = @transform_9, window_bounds = array<i64: 1, 10>}, {pipeline_mode = #tpu.pipeline_mode<synchronous>, transform_indices = @transform_10, window_bounds = array<i64: 2, 10>}]} {
    %c0_i32 = arith.constant 0 : i32
    %0 = arith.cmpi eq, %arg0, %c0_i32 : i32
    %1 = arith.extui %0 : i1 to i32
    %c0_i32_0 = arith.constant 0 : i32
    %2 = arith.cmpi ne, %1, %c0_i32_0 : i32
    scf.if %2 {
      %cst_10 = arith.constant 0.000000e+00 : f32
      %12 = vector.broadcast %cst_10 : f32 to vector<2x1024xf32>
      %c0_11 = arith.constant 0 : index
      %c0_12 = arith.constant 0 : index
      %13 = vector.load %arg12[%c0_11, %c0_12] : memref<2x1024xf32, #tpu.memory_space<vmem>>, vector<2x1024xf32>
      tpu.vector_store %arg12[%c0_11, %c0_12], %12 {strides = array<i32>} : memref<2x1024xf32, #tpu.memory_space<vmem>>, vector<2x1024xf32>,
    } else {
    }
    %c0 = arith.constant 0 : index
    %c0_1 = arith.constant 0 : index
    %3 = vector.load %arg12[%c0, %c0_1] : memref<2x1024xf32, #tpu.memory_space<vmem>>, vector<2x1024xf32>
    %c0_2 = arith.constant 0 : index
    %c0_3 = arith.constant 0 : index
    %4 = vector.load %arg2[%c0_2, %c0_3] : memref<2x512xbf16, #tpu.memory_space<vmem>>, vector<2x512xbf16>
    %c0_4 = arith.constant 0 : index
    %c0_5 = arith.constant 0 : index
    %5 = vector.load %arg3[%c0_4, %c0_5] : memref<512x1024xbf16, #tpu.memory_space<vmem>>, vector<512x1024xbf16>
    %cst = arith.constant dense<0.000000e+00> : vector<2x1024xf32>
    %6 = tpu.matmul %4, %5, %cst {dimension_numbers = #tpu.dot_dimension_numbers<[1], [0], [0], [1], [0, 0, 1, 1], [], []>} : vector<2x512xbf16>, vector<512x1024xbf16>, vector<2x1024xf32> -> vector<2x1024xf32>
    %7 = arith.addf %3, %6 : vector<2x1024xf32>
    %c0_6 = arith.constant 0 : index
    %c0_7 = arith.constant 0 : index
    %8 = vector.load %arg12[%c0_6, %c0_7] : memref<2x1024xf32, #tpu.memory_space<vmem>>, vector<2x1024xf32>
    tpu.vector_store %arg12[%c0_6, %c0_7], %7 {strides = array<i32>} : memref<2x1024xf32, #tpu.memory_space<vmem>>, vector<2x1024xf32>,
    %c0_i32_8 = arith.constant 0 : i32
    %9 = arith.cmpi eq, %arg0, %c0_i32_8 : i32
    %10 = arith.extui %9 : i1 to i32
    %c0_i32_9 = arith.constant 0 : i32
    %11 = arith.cmpi ne, %10, %c0_i32_9 : i32
    scf.if %11 {
      %c0_10 = arith.constant 0 : index
      %c0_11 = arith.constant 0 : index
      %12 = vector.load %arg12[%c0_10, %c0_11] : memref<2x1024xf32, #tpu.memory_space<vmem>>, vector<2x1024xf32>
      %c0_12 = arith.constant 0 : index
      %c0_13 = arith.constant 0 : index
      %13 = vector.load %arg7[%c0_12, %c0_13] : memref<1x1024xf32, #tpu.memory_space<vmem>>, vector<1x1024xf32>
      %14 = vector.broadcast %13 : vector<1x1024xf32> to vector<2x1024xf32>
      %15 = arith.addf %12, %14 : vector<2x1024xf32>
      %cst_14 = arith.constant 0.000000e+00 : f32
      %16 = vector.broadcast %cst_14 : f32 to vector<2x1024xf32>
      %17 = arith.maximumf %15, %16 : vector<2x1024xf32>
      %18 = arith.truncf %17 : vector<2x1024xf32> to vector<2x1024xbf16>
      %c0_15 = arith.constant 0 : index
      %c0_16 = arith.constant 0 : index
      %19 = vector.load %arg4[%c0_15, %c0_16] : memref<1024x512xbf16, #tpu.memory_space<vmem>>, vector<1024x512xbf16>
      %cst_17 = arith.constant dense<0.000000e+00> : vector<2x512xf32>
      %20 = tpu.matmul %18, %19, %cst_17 {dimension_numbers = #tpu.dot_dimension_numbers<[1], [0], [0], [1], [0, 0, 1, 1], [], []>} : vector<2x1024xbf16>, vector<1024x512xbf16>, vector<2x512xf32> -> vector<2x512xf32>
      %c0_18 = arith.constant 0 : index
      %c0_19 = arith.constant 0 : index
      %21 = vector.load %arg8[%c0_18, %c0_19] : memref<1x512xf32, #tpu.memory_space<vmem>>, vector<1x512xf32>
      %22 = vector.broadcast %21 : vector<1x512xf32> to vector<2x512xf32>
      %23 = arith.addf %20, %22 : vector<2x512xf32>
      %cst_20 = arith.constant 0.000000e+00 : f32
      %24 = vector.broadcast %cst_20 : f32 to vector<2x512xf32>
      %25 = arith.maximumf %23, %24 : vector<2x512xf32>
      %26 = arith.truncf %25 : vector<2x512xf32> to vector<2x512xbf16>
      %c0_21 = arith.constant 0 : index
      %c0_22 = arith.constant 0 : index
      %27 = vector.load %arg5[%c0_21, %c0_22] : memref<512x256xbf16, #tpu.memory_space<vmem>>, vector<512x256xbf16>
      %cst_23 = arith.constant dense<0.000000e+00> : vector<2x256xf32>
      %28 = tpu.matmul %26, %27, %cst_23 {dimension_numbers = #tpu.dot_dimension_numbers<[1], [0], [0], [1], [0, 0, 1, 1], [], []>} : vector<2x512xbf16>, vector<512x256xbf16>, vector<2x256xf32> -> vector<2x256xf32>
      %c0_24 = arith.constant 0 : index
      %c0_25 = arith.constant 0 : index
      %29 = vector.load %arg9[%c0_24, %c0_25] : memref<1x256xf32, #tpu.memory_space<vmem>>, vector<1x256xf32>
      %30 = vector.broadcast %29 : vector<1x256xf32> to vector<2x256xf32>
      %31 = arith.addf %28, %30 : vector<2x256xf32>
      %cst_26 = arith.constant 0.000000e+00 : f32
      %32 = vector.broadcast %cst_26 : f32 to vector<2x256xf32>
      %33 = arith.maximumf %31, %32 : vector<2x256xf32>
      %34 = arith.truncf %33 : vector<2x256xf32> to vector<2x256xbf16>
      %c0_27 = arith.constant 0 : index
      %c0_28 = arith.constant 0 : index
      %35 = vector.load %arg6[%c0_27, %c0_28] : memref<256x10xbf16, #tpu.memory_space<vmem>>, vector<256x10xbf16>
      %cst_29 = arith.constant dense<0.000000e+00> : vector<2x10xf32>
      %36 = tpu.matmul %34, %35, %cst_29 {dimension_numbers = #tpu.dot_dimension_numbers<[1], [0], [0], [1], [0, 0, 1, 1], [], []>} : vector<2x256xbf16>, vector<256x10xbf16>, vector<2x10xf32> -> vector<2x10xf32>
      %c0_30 = arith.constant 0 : index
      %c0_31 = arith.constant 0 : index
      %37 = vector.load %arg10[%c0_30, %c0_31] : memref<1x10xf32, #tpu.memory_space<vmem>>, vector<1x10xf32>
      %38 = vector.broadcast %37 : vector<1x10xf32> to vector<2x10xf32>
      %39 = arith.addf %36, %38 : vector<2x10xf32>
      %cst_32 = arith.constant dense<0xFF800000> : vector<2xf32>
      %40 = vector.multi_reduction <maximumf>, %39, %cst_32 [1] : vector<2x10xf32> to vector<2xf32>
      %41 = vector.shape_cast %40 : vector<2xf32> to vector<2x1xf32>
      %42 = vector.broadcast %41 : vector<2x1xf32> to vector<2x10xf32>
      %43 = arith.subf %39, %42 : vector<2x10xf32>
      %44 = math.exp %43 : vector<2x10xf32>
      %cst_33 = arith.constant dense<0.000000e+00> : vector<2xf32>
      %45 = vector.multi_reduction <add>, %44, %cst_33 [1] : vector<2x10xf32> to vector<2xf32>
      %46 = vector.shape_cast %45 : vector<2xf32> to vector<2x1xf32>
      %47 = vector.broadcast %46 : vector<2x1xf32> to vector<2x10xf32>
      %48 = arith.divf %44, %47 : vector<2x10xf32>
      %c0_34 = arith.constant 0 : index
      %c0_35 = arith.constant 0 : index
      %49 = memref.load %arg1[%c0_34, %c0_35] : memref<1x1xf32, #tpu.memory_space<smem>>
      %50 = vector.broadcast %49 : f32 to vector<2x10xf32>
      %51 = arith.cmpf oge, %48, %50 : vector<2x10xf32>
      %52 = arith.extui %51 : vector<2x10xi1> to vector<2x10xi32>
      %53 = arith.sitofp %52 : vector<2x10xi32> to vector<2x10xf32>
      %c0_36 = arith.constant 0 : index
      %c0_37 = arith.constant 0 : index
      %54 = vector.load %arg11[%c0_36, %c0_37] : memref<2x10xf32, #tpu.memory_space<vmem>>, vector<2x10xf32>
      tpu.vector_store %arg11[%c0_36, %c0_37], %53 {strides = array<i32>} : memref<2x10xf32, #tpu.memory_space<vmem>>, vector<2x10xf32>,
    } else {
    }
    return
  }
  func.func @transform_0(%arg0: i32) -> (i32, i32) {
    %c0_i32 = arith.constant 0 : i32
    %c0_i32_0 = arith.constant 0 : i32
    %c0_i32_1 = arith.constant 0 : i32
    return %c0_i32, %c0_i32_0 : i32, i32
  }
  func.func @transform_1(%arg0: i32) -> (i32, i32) {
    %c0_i32 = arith.constant 0 : i32
    %c0_i32_0 = arith.constant 0 : i32
    return %c0_i32, %arg0 : i32, i32
  }
  func.func @transform_2(%arg0: i32) -> (i32, i32) {
    %c0_i32 = arith.constant 0 : i32
    %c0_i32_0 = arith.constant 0 : i32
    return %arg0, %c0_i32 : i32, i32
  }
  func.func @transform_3(%arg0: i32) -> (i32, i32) {
    %c0_i32 = arith.constant 0 : i32
    %c0_i32_0 = arith.constant 0 : i32
    %c0_i32_1 = arith.constant 0 : i32
    return %c0_i32, %c0_i32_0 : i32, i32
  }
  func.func @transform_4(%arg0: i32) -> (i32, i32) {
    %c0_i32 = arith.constant 0 : i32
    %c0_i32_0 = arith.constant 0 : i32
    %c0_i32_1 = arith.constant 0 : i32
    return %c0_i32, %c0_i32_0 : i32, i32
  }
  func.func @transform_5(%arg0: i32) -> (i32, i32) {
    %c0_i32 = arith.constant 0 : i32
    %c0_i32_0 = arith.constant 0 : i32
    %c0_i32_1 = arith.constant 0 : i32
    return %c0_i32, %c0_i32_0 : i32, i32
  }
  func.func @transform_6(%arg0: i32) -> (i32, i32) {
    %c0_i32 = arith.constant 0 : i32
    %c0_i32_0 = arith.constant 0 : i32
    %c0_i32_1 = arith.constant 0 : i32
    return %c0_i32, %c0_i32_0 : i32, i32
  }
  func.func @transform_7(%arg0: i32) -> (i32, i32) {
    %c0_i32 = arith.constant 0 : i32
    %c0_i32_0 = arith.constant 0 : i32
    %c0_i32_1 = arith.constant 0 : i32
    return %c0_i32, %c0_i32_0 : i32, i32
  }
  func.func @transform_8(%arg0: i32) -> (i32, i32) {
    %c0_i32 = arith.constant 0 : i32
    %c0_i32_0 = arith.constant 0 : i32
    %c0_i32_1 = arith.constant 0 : i32
    return %c0_i32, %c0_i32_0 : i32, i32
  }
  func.func @transform_9(%arg0: i32) -> (i32, i32) {
    %c0_i32 = arith.constant 0 : i32
    %c0_i32_0 = arith.constant 0 : i32
    %c0_i32_1 = arith.constant 0 : i32
    return %c0_i32, %c0_i32_0 : i32, i32
  }
  func.func @transform_10(%arg0: i32) -> (i32, i32) {
    %c0_i32 = arith.constant 0 : i32
    %c0_i32_0 = arith.constant 0 : i32
    %c0_i32_1 = arith.constant 0 : i32
    return %c0_i32, %c0_i32_0 : i32, i32
  }
}

</mosaic_0001>

<bundles_post_ra>
// kernel: classifier_forward.2
= control target key start
LH: loop header
LB: loop body
LE: loop exit
PB: predicated region body
PF: predicated region fallthrough
CT: control target
= control target key end

     0   :  { %s6527_s24 = smov 0   ;;  %s7514_s0 = inlined_call_operand.vmem [shape: bf16[2,384,36], index: 0, kind: input, shape index: {}]   ;;  %s7515_s1 = inlined_call_operand.vmem [shape: bf16[36,32], index: 1, kind: input, shape index: {}]   ;;  %s7516_s2 = inlined_call_operand.vmem [shape: f32[1,32], index: 2, kind: input, shape index: {}]   ;;  %s7517_s3 = inlined_call_operand.vmem [shape: bf16[9,32,64], index: 3, kind: input, shape index: {}]   ;;  %s7518_s4 = inlined_call_operand.vmem [shape: f32[1,64], index: 4, kind: input, shape index: {}]   ;;  %s7519_s5 = inlined_call_operand.vmem [shape: bf16[9,64,128], index: 5, kind: input, shape index: {}]   ;;  %s7520_s6 = inlined_call_operand.vmem [shape: f32[1,128], index: 6, kind: input, shape index: {}]   ;;  %s7521_s7 = inlined_call_operand.vmem [shape: bf16[2,4,128], index: 7, kind: output, shape index: {}]  }
   0x1 LB: > { %s5058_s25 = sadd.s32 4294967295, %s6481_s24   ;;  %p5062_p0 = scmp.ge.s32.totalorder %s6481_s24, 1  ;;  %s6481_s24 = sphi %s6527_s24, %s17_s24  }
   0x2   : > { %p237_p1 = scmp.lt.s32.totalorder %s6481_s24, 3 }
   0x4   : > { %p238_p2 = pnand %p5062_p0, %p237_p1 }
   0x5   : > { %v6378_v0 = vld [vmem:[%s7515_s1] sm:$0xff] (!%p238_p2)   ;;  %v6379_v1 = vld [vmem:[%s7515_s1 + $0x8] sm:$0xff] (!%p238_p2)   ;;  %p268_p3 = scmp.lt.s32.totalorder (!%p238_p2), %s5058_s25, 1  ;;  %v6380_v2 = vld [vmem:[%s7515_s1 + $0x10] ss:$0 sps:$4 sm:$0x33] (!%p238_p2)   ;;  %v883_v40 = vlaneseq (!%p238_p2) }
   0x6   : > { %241 = sbr.rel (%p238_p2) target bundleno = 1966 (0x7ae), region = 48  ;;  %5658 = vmatprep.subr.bf16.mxu0 (!%p238_p2), %v6378_v0  ;;  %vm546_vm0 = vcmask (!%p238_p2), 1041408   ;;  %vm473_vm1 = vcmask (!%p238_p2), 293888   ;;  %v6483_v28 = vmov (!%p238_p2), 0.0   ;;  %vm6484_vm2 = vmmov (!%p238_p2), 0  }
   0x7   : > { %5659 = vmatpush3.bf16.msra.mxu0 (!%p238_p2), %v6378_v0  ;;  %v548_v3 = vsel (!%p238_p2), %vm546_vm0, %v6380_v2, 0  ;;  %5712 = vmatprep.subr.bf16.mxu1 (!%p238_p2), %v6483_v28  ;;  %v6609_v29 = vld [vmem:[%s7516_s2] ss:$0 sm:$0xff] (!%p238_p2)  ;;  %vm847_vm3 = vcmask (!%p238_p2), 261120   ;;  %v6617_v48 = vshrl.u32 (!%p238_p2), %v883_v40, 7  ;;  %vm924_vm6 = vcmask (!%p238_p2), 1043456  }
   0x8   : > { %5660 = vmatprep.subr.bf16.mxu0 (!%p238_p2), %v6379_v1  ;;  %5716 = vmatprep.mubr.msk.bf16.mxu1 (!%p238_p2), %vm6484_vm2, %v6483_v28  ;;  %vm932_vm13 = vcmask (!%p238_p2), 195584  }
   0x9   : > { %v6624_v56 = vadd.s32 (!%p238_p2), 8, %v6617_v48  ;;  %v5117_v62 = vadd.s32 (!%p238_p2), 4294967295, %v6617_v48  ;;  %vm888_vm4 = vcmp.ge.s32.totalorder (!%p238_p2), %v6617_v48, 1 }
   0xb   : > { %5661 = vmatpush3.bf16.msra.mxu0 (!%p238_p2), %v6379_v1  ;;  %v5118_v1 = vadd.s32 (!%p238_p2), 4294967295, %v6624_v56  ;;  %vm891_vm7 = vcmp.lt.s32.totalorder (!%p238_p2), %v6624_v56, 9 }
   0xc   : > { %6364 = vmatprep.subr.msk.bf16.mxu0 (!%p238_p2), %vm546_vm0, %v6380_v2  ;;  %vm1761_vm0 = vsmask.f32 (!%p238_p2), 7424 }
   0xd   : > { %s7527_s25 = smov (!%p268_p3, %s5058_s25), 1 }
   0xe   : > { %s6365_s9 = smul.u32 192, %s7527_s25  ;;  %s5064_s22 = sshll.u32 %s7527_s25, 1 }
   0xf   : > { %5663 = vmatpush3.bf16.msra.mxu0 %v548_v3  ;;  %s276_s27 = scalar_lea.vmem %s7521_s7, %s5064_s22 }
  0x10   : > { %s6550_s12 = scalar_lea.vmem %s7514_s0, %s6365_s9  ;;  %5816 = vmatprep.subr.bf16.mxu0 %v6483_v28 }
  0x11   : > { %v6381_v4 = vld [vmem:[%s6550_s12] sm:$0xff]   ;;  %v6382_v5 = vld [vmem:[%s6550_s12 + $0x8] sm:$0xff]   ;;  %v6383_v6 = vld [vmem:[%s6550_s12 + $0x10] sm:$0xff]  }
  0x12   : > { %5664 = vmatprep.mubr.msk.bf16.mxu0 %vm473_vm1, %v6381_v4  ;;  %v6384_v7 = vld [vmem:[%s6550_s12 + $0x18] sm:$0xff]   ;;  %v6385_v8 = vld [vmem:[%s6550_s12 + $0x20] sm:$0xff]   ;;  %v6386_v9 = vld [vmem:[%s6550_s12 + $0x28] sm:$0xff]  }
  0x13   : > { %5665 = vmatmul.mubr.msk.bf16.vlgmr.msra.gmra.mrb[0].mxu0 %vm473_vm1, %v6382_v5  ;;  %v6387_v10 = vld [vmem:[%s6550_s12 + $0x30] sm:$0xff]   ;;  %v6388_v11 = vld [vmem:[%s6550_s12 + $0x38] sm:$0xff]   ;;  %v6389_v12 = vld [vmem:[%s6550_s12 + $0x40] sm:$0xff]  }
  0x14   : > { %5668 = vmatprep.mubr.msk.bf16.mxu0 %vm473_vm1, %v6383_v6  ;;  %v6390_v13 = vld [vmem:[%s6550_s12 + $0x48] sm:$0xff]   ;;  %v6391_v14 = vld [vmem:[%s6550_s12 + $0x50] sm:$0xff]   ;;  %v6392_v15 = vld [vmem:[%s6550_s12 + $0x58] sm:$0xff]  }
  0x15   : > { %v6393_v16 = vld [vmem:[%s6550_s12 + $0x60] sm:$0xff]   ;;  %v6394_v17 = vld [vmem:[%s6550_s12 + $0x68] sm:$0xff]   ;;  %v6395_v18 = vld [vmem:[%s6550_s12 + $0x70] sm:$0xff]  }
  0x16   : > { %v6396_v19 = vld [vmem:[%s6550_s12 + $0x78] sm:$0xff]   ;;  %v6397_v20 = vld [vmem:[%s6550_s12 + $0x80] sm:$0xff]   ;;  %v6398_v21 = vld [vmem:[%s6550_s12 + $0x88] sm:$0xff]  }
  0x17   : > { %v6399_v22 = vld [vmem:[%s6550_s12 + $0x90] sm:$0xff]   ;;  %v6400_v23 = vld [vmem:[%s6550_s12 + $0x98] sm:$0xff]   ;;  %v6401_v24 = vld [vmem:[%s6550_s12 + $0xa0] sm:$0xff]  }
  0x18   : > { %v6402_v25 = vld [vmem:[%s6550_s12 + $0xa8] sm:$0xff]   ;;  %v6403_v26 = vld [vmem:[%s6550_s12 + $0xb0] sm:$0xff]   ;;  %v6404_v27 = vld [vmem:[%s6550_s12 + $0xb8] sm:$0xff]  }
  0x1b   : > { %5669 = vmatmul.mubr.msk.bf16.gmra.mrb[4].mxu0 %vm473_vm1, %v6384_v7 }
  0x1c   : > { %5672 = vmatprep.mubr.msk.bf16.mxu0 %vm473_vm1, %v6385_v8 }
  0x23   : > { %5673 = vmatmul.mubr.msk.bf16.gmra.mrb[8].mxu0 %vm473_vm1, %v6386_v9  ;;  %v6634_v9 = vand.u32 127, %v883_v40 }
  0x24   : > { %5676 = vmatprep.mubr.msk.bf16.mxu0 %vm473_vm1, %v6387_v10  ;;  %v896_v10 = vmul.u32 2, %v5117_v62 }
  0x26   : > { %vm6638_vm5 = vcmp.eq.s32.totalorder %v6634_v9, %v896_v10 }
  0x27   : > { %vm900_vm9 = vmand %vm6638_vm5, %vm888_vm4 }
  0x2b   : > { %5677 = vmatmul.mubr.msk.bf16.gmra.mrb[12].mxu0 %vm473_vm1, %v6388_v11 }
  0x2c   : > { %5680 = vmatprep.mubr.msk.bf16.mxu0 %vm473_vm1, %v6389_v12  ;;  %v897_v12 = vmul.u32 2, %v5118_v1 }
  0x2e   : > { %vm899_vm8 = vcmp.eq.s32.totalorder %v6634_v9, %v897_v12 }
  0x2f   : > { %vm901_vm10 = vmand %vm899_vm8, %vm891_vm7 }
  0x33   : > { %5681 = vmatmul.mubr.msk.bf16.gmra.mrb[16].mxu0 %vm473_vm1, %v6390_v13 }
  0x34   : > { %5684 = vmatprep.mubr.msk.bf16.mxu0 %vm473_vm1, %v6391_v14 }
  0x3b   : > { %5685 = vmatmul.mubr.msk.bf16.gmra.mrb[20].mxu0 %vm473_vm1, %v6392_v15 }
  0x3c   : > { %5688 = vmatprep.mubr.msk.bf16.mxu0 %vm473_vm1, %v6393_v16 }
  0x43   : > { %5689 = vmatmul.mubr.msk.bf16.gmra.mrb[24].mxu0 %vm473_vm1, %v6394_v17 }
  0x44   : > { %5692 = vmatprep.mubr.msk.bf16.mxu0 %vm473_vm1, %v6395_v18 }
  0x4b   : > { %5693 = vmatmul.mubr.msk.bf16.gmra.mrb[28].mxu0 %vm473_vm1, %v6396_v19 }
  0x4c   : > { %5696 = vmatprep.mubr.msk.bf16.mxu0 %vm473_vm1, %v6397_v20 }
  0x53   : > { %5697 = vmatmul.mubr.msk.bf16.gmra.mrb[32].mxu0 %vm473_vm1, %v6398_v21 }
  0x54   : > { %5700 = vmatprep.mubr.msk.bf16.mxu0 %vm473_vm1, %v6399_v22 }
  0x5b   : > { %5701 = vmatmul.mubr.msk.bf16.gmra.mrb[36].mxu0 %vm473_vm1, %v6400_v23 }
  0x5c   : > { %5704 = vmatprep.mubr.msk.bf16.mxu0 %vm473_vm1, %v6401_v24 }
  0x63   : > { %5705 = vmatmul.mubr.msk.bf16.gmra.mrb[40].mxu0 %vm473_vm1, %v6402_v25 }
  0x64   : > { %5708 = vmatprep.mubr.msk.bf16.mxu0 %vm473_vm1, %v6403_v26 }
  0x6b   : > { %5709 = vmatmul.mubr.msk.bf16.gmra.mrb[44].mxu0 %vm473_vm1, %v6404_v27  ;;  %vm2103_vm1 = vcmask 1046528  }
  0x6c   : > { %5820 = vmatprep.mubr.msk.bf16.mxu0 %vm6484_vm2, %v6483_v28 }
  0xe6   : > { %v5666_v30 = vpop.f32.mrb[0].mxu0 }
  0xe7   : > { %v593_v31 = vadd.f32 %v5666_v30, %v6609_v29  ;;  %v584_v32 = vpop.f32.mrb[1].mxu0 }
  0xe8   : > { %v585_v33 = vadd.f32 %v6609_v29, %v584_v32  ;;  %v5667_v34 = vpop.f32.mrb[2].mxu0 }
  0xe9   : > { %v596_v35 = vadd.f32 %v5667_v34, %v6609_v29  ;;  %v587_v36 = vpop.f32.mrb[3].mxu0  ;;  %v777_v38 = vmax.f32 %v593_v31, 0.0 }
  0xea   : > { %v588_v37 = vadd.f32 %v6609_v29, %v587_v36  ;;  %v775_v41 = vmax.f32 %v585_v33, 0.0 }
  0xeb   : > { %v778_v39 = vmax.f32 %v596_v35, 0.0  ;;  %v6657_v35 = vadd.s32 1, %v896_v10 }
  0xec   : > { %v776_v42 = vmax.f32 %v588_v37, 0.0 }
  0xed   : > { %v824_v43 = vpack.c.bf16 %v778_v39, %v777_v38  ;;  %v908_v39 = vadd.s32 1, %v897_v12  ;;  %vm909_vm11 = vcmp.eq.s32.totalorder %v6634_v9, %v6657_v35 }
  0xee   : > { %v823_v44 = vpack.c.bf16 %v776_v42, %v775_v41  ;;  %v5670_v45 = vpop.f32.mrb[4].mxu0  ;;  %vm911_vm14 = vmand %vm909_vm11, %vm888_vm4 }
  0xef   : > { %849 = vst.msk [vmem:[#allocation2 + $0x8] sm:$0xff] %vm847_vm3, %v824_v43  ;;  %v609_v46 = vadd.f32 %v5670_v45, %v6609_v29  ;;  %v600_v47 = vpop.f32.mrb[5].mxu0  ;;  %v5119_v43 = vsel %vm900_vm9, 1.0, %v6483_v28  ;;  %vm910_vm12 = vcmp.eq.s32.totalorder %v6634_v9, %v908_v39 }
  0xf0   : > { %848 = vst.msk [vmem:[#allocation2] sm:$0xff] %vm847_vm3, %v823_v44  ;;  %v601_v49 = vadd.f32 %v6609_v29, %v600_v47  ;;  %v5671_v50 = vpop.f32.mrb[6].mxu0  ;;  %v5120_v44 = vsel %vm901_vm10, 1.0, %v6483_v28  ;;  %vm912_vm15 = vmand %vm910_vm12, %vm891_vm7  ;;  %vm3440_vm7 = vcmp.lt.s32.totalorder %v6617_v48, 5  ;;  %vm3432_vm10 = vcmask 519168  }
  0xf1   : > { %v612_v51 = vadd.f32 %v5671_v50, %v6609_v29  ;;  %v603_v52 = vpop.f32.mrb[7].mxu0  ;;  %v781_v54 = vmax.f32 %v609_v46, 0.0  ;;  %vm7218_vm8 = vmand %vm888_vm4, %vm3440_vm7  ;;  %vm3453_vm4 = vcmask 130048  }
  0xf2   : > { %v604_v53 = vadd.f32 %v6609_v29, %v603_v52  ;;  %v779_v57 = vmax.f32 %v601_v49, 0.0  ;;  %vm3442_vm9 = vmand %vm6638_vm5, %vm7218_vm8 }
  0xf3   : > { %v782_v55 = vmax.f32 %v612_v51, 0.0  ;;  %vm3446_vm5 = vmand %vm909_vm11, %vm7218_vm8  ;;  %vm4790_vm11 = vcmp.lt.s32.totalorder %v6617_v48, 2 }
  0xf4   : > { %v780_v58 = vmax.f32 %v604_v53, 0.0  ;;  %v6670_v53 = vpack.c.bf16 %v5120_v44, %v5119_v43  ;;  %v5263_v35 = vsel %vm3446_vm5, 1.0, %v6483_v28 }
  0xf5   : > { %v826_v59 = vpack.c.bf16 %v782_v55, %v781_v54 }
  0xf6   : > { %v825_v60 = vpack.c.bf16 %v780_v58, %v779_v57  ;;  %v5674_v61 = vpop.f32.mrb[8].mxu0  ;;  %v920_v15 = vld [vmem:[#allocation2 + $0x8] sm:$0xf0]  ;;  %v919_v38 = vld [vmem:[#allocation2 + $0x8] sm:$0xf] }
  0xf7   : > { %851 = vst.msk [vmem:[#allocation2 + $0x18] sm:$0xff] %vm847_vm3, %v826_v59  ;;  %v625_v63 = vadd.f32 %v5674_v61, %v6609_v29  ;;  %v616_v0 = vpop.f32.mrb[9].mxu0  ;;  %v925_v24 = vrot.slane %v920_v15, 4  ;;  %v918_v33 = vld [vmem:[#allocation2] sm:$0xff] }
  0xf8   : > { %850 = vst.msk [vmem:[#allocation2 + $0x10] sm:$0xff] %vm847_vm3, %v825_v60  ;;  %v617_v2 = vadd.f32 %v6609_v29, %v616_v0  ;;  %v5675_v3 = vpop.f32.mrb[10].mxu0 }
  0xf9   : > { %v785_v4 = vmax.f32 %v625_v63, 0.0  ;;  %v628_v5 = vadd.f32 %v5675_v3, %v6609_v29  ;;  %v619_v6 = vpop.f32.mrb[11].mxu0  ;;  %v5121_v3 = vsel %vm911_vm14, 1.0, %v6483_v28 }
  0xfa   : > { %v783_v7 = vmax.f32 %v617_v2, 0.0  ;;  %v620_v8 = vadd.f32 %v6609_v29, %v619_v6 }
  0xfb   : > { %v786_v11 = vmax.f32 %v628_v5, 0.0 }
  0xfc   : > { %v784_v13 = vmax.f32 %v620_v8, 0.0 }
  0xfd   : > { %v828_v14 = vpack.c.bf16 %v786_v11, %v785_v4  ;;  %v5122_v4 = vsel %vm912_vm15, 1.0, %v6483_v28  ;;  %vm4810_vm15 = vcmask 64512  }
  0xfe   : > { %v827_v16 = vpack.c.bf16 %v784_v13, %v783_v7  ;;  %v5678_v17 = vpop.f32.mrb[12].mxu0  ;;  %v6695_v11 = vpack.c.bf16 %v5122_v4, %v5121_v3 }
  0xff   : > { %853 = vst.msk [vmem:[#allocation2 + $0x28] sm:$0xff] %vm847_vm3, %v828_v14  ;;  %v641_v19 = vadd.f32 %v5678_v17, %v6609_v29  ;;  %v632_v20 = vpop.f32.mrb[13].mxu0  ;;  %v921_v21 = vld [vmem:[#allocation2 + $0x10] sm:$0xff] }
 0x100   : > { %852 = vst.msk [vmem:[#allocation2 + $0x20] sm:$0xff] %vm847_vm3, %v827_v16  ;;  %v633_v22 = vadd.f32 %v6609_v29, %v632_v20  ;;  %v5679_v23 = vpop.f32.mrb[14].mxu0  ;;  %v926_v25 = vrot.slane %v921_v21, 4  ;;  %v1029_v20 = vld [vmem:[#allocation2 + $0x18] sm:$0xff] }
 0x101   : > { %v789_v26 = vmax.f32 %v641_v19, 0.0  ;;  %v644_v27 = vadd.f32 %v5679_v23, %v6609_v29  ;;  %v635_v30 = vpop.f32.mrb[15].mxu0 }
 0x102   : > { %v787_v31 = vmax.f32 %v633_v22, 0.0  ;;  %v636_v32 = vadd.f32 %v6609_v29, %v635_v30  ;;  %v927_v34 = vsel %vm924_vm6, %v925_v24, %v926_v25  ;;  %v931_v41 = vmax.bf16 %v926_v25, %v919_v38 }
 0x103   : > { %v790_v36 = vmax.f32 %v644_v27, 0.0  ;;  %v930_v37 = vmax.bf16 %v927_v34, %v918_v33 }
 0x104   : > { %v788_v40 = vmax.f32 %v636_v32, 0.0  ;;  %v938_v52 = vsel %vm924_vm6, %v931_v41, 0 }
 0x105   : > { %v830_v42 = vpack.c.bf16 %v790_v36, %v789_v26  ;;  %5713 = vmatpush3.bf16.msra.mxu1 %v930_v37 }
 0x106   : > { %v829_v45 = vpack.c.bf16 %v788_v40, %v787_v31  ;;  %v5682_v46 = vpop.f32.mrb[16].mxu0  ;;  %5714 = vmatprep.subr.bf16.mxu1 %v6483_v28  ;;  %v1032_v59 = vld [vmem:[#allocation2 + $0x28] sm:$0xff] }
 0x107   : > { %855 = vst.msk [vmem:[#allocation2 + $0x38] sm:$0xff] %vm847_vm3, %v830_v42  ;;  %v657_v47 = vadd.f32 %v5682_v46, %v6609_v29  ;;  %v648_v49 = vpop.f32.mrb[17].mxu0  ;;  %v1031_v58 = vld [vmem:[#allocation2 + $0x20] sm:$0xf0]  ;;  %v1036_v1 = vrot.slane %v1032_v59, 4 }
 0x108   : > { %854 = vst.msk [vmem:[#allocation2 + $0x30] sm:$0xff] %vm847_vm3, %v829_v45  ;;  %v649_v50 = vadd.f32 %v6609_v29, %v648_v49  ;;  %v5683_v51 = vpop.f32.mrb[18].mxu0  ;;  %v1035_v0 = vrot.slane %v1031_v58, 4  ;;  %v1030_v16 = vld [vmem:[#allocation2 + $0x20] sm:$0xf] }
 0x109   : > { %v793_v54 = vmax.f32 %v657_v47, 0.0  ;;  %v660_v55 = vadd.f32 %v5683_v51, %v6609_v29  ;;  %v651_v57 = vpop.f32.mrb[19].mxu0  ;;  %5715 = vmatpush3.bf16.msra.mxu1 %v938_v52  ;;  %v1041_v24 = vmax.bf16 %v1036_v1, %v1030_v16 }
 0x10a   : > { %v791_v60 = vmax.f32 %v649_v50, 0.0  ;;  %v652_v61 = vadd.f32 %v6609_v29, %v651_v57  ;;  %5720 = vmatprep.subr.bf16.mxu1 %v6483_v28  ;;  %v1037_v12 = vsel %vm924_vm6, %v1035_v0, %v1036_v1 }
 0x10b   : > { %v794_v62 = vmax.f32 %v660_v55, 0.0  ;;  %v1040_v22 = vmax.bf16 %v1037_v12, %v1029_v20  ;;  %v1043_v34 = vsel %vm924_vm6, %v1041_v24, 0 }
 0x10c   : > { %v792_v63 = vmax.f32 %v652_v61, 0.0  ;;  %5717 = vmatmul.mubr.msk.bf16.vlgmr.msra.gmra.mrb[0].mxu1 %vm932_vm13, %v6670_v53 }
 0x10d   : > { %v832_v2 = vpack.c.bf16 %v794_v62, %v793_v54  ;;  %5721 = vmatpush3.bf16.msra.mxu1 %v930_v37  ;;  %5724 = vmatprep.mubr.msk.bf16.mxu1 %vm6484_vm2, %v6483_v28 }
 0x10e   : > { %v831_v56 = vpack.c.bf16 %v792_v63, %v791_v60  ;;  %v5686_v5 = vpop.f32.mrb[20].mxu0  ;;  %5722 = vmatprep.subr.bf16.mxu1 %v6483_v28  ;;  %v1133_v43 = vld [vmem:[#allocation2 + $0x38] sm:$0xf0] }
 0x10f   : > { %857 = vst.msk [vmem:[#allocation2 + $0x48] sm:$0xff] %vm847_vm3, %v832_v2  ;;  %v673_v6 = vadd.f32 %v5686_v5, %v6609_v29  ;;  %v664_v7 = vpop.f32.mrb[21].mxu0  ;;  %v1137_v50 = vrot.slane %v1133_v43, 4  ;;  %v1131_v63 = vld [vmem:[#allocation2 + $0x30] sm:$0xff]  ;;  %v1132_v2 = vld [vmem:[#allocation2 + $0x38] sm:$0xf] }
 0x110   : > { %856 = vst.msk [vmem:[#allocation2 + $0x40] sm:$0xff] %vm847_vm3, %v831_v56  ;;  %v665_v8 = vadd.f32 %v6609_v29, %v664_v7  ;;  %v5687_v10 = vpop.f32.mrb[22].mxu0 }
 0x111   : > { %v797_v13 = vmax.f32 %v673_v6, 0.0  ;;  %v676_v14 = vadd.f32 %v5687_v10, %v6609_v29  ;;  %v667_v15 = vpop.f32.mrb[23].mxu0  ;;  %5723 = vmatpush3.bf16.msra.mxu1 %v938_v52 }
 0x112   : > { %v795_v17 = vmax.f32 %v665_v8, 0.0  ;;  %v668_v19 = vadd.f32 %v6609_v29, %v667_v15  ;;  %5728 = vmatprep.subr.bf16.mxu1 %v6483_v28 }
 0x113   : > { %v798_v21 = vmax.f32 %v676_v14, 0.0 }
 0x114   : > { %v796_v23 = vmax.f32 %v668_v19, 0.0  ;;  %5725 = vmatmul.mubr.msk.bf16.vlgmr.msra.gmra.mrb[4].mxu1 %vm932_vm13, %v6695_v11 }
 0x115   : > { %v834_v25 = vpack.c.bf16 %v798_v21, %v797_v13  ;;  %5729 = vmatpush3.bf16.msra.mxu1 %v1040_v22  ;;  %5732 = vmatprep.mubr.msk.bf16.mxu1 %vm6484_vm2, %v6483_v28 }
 0x116   : > { %v833_v26 = vpack.c.bf16 %v796_v23, %v795_v17  ;;  %v5690_v27 = vpop.f32.mrb[24].mxu0  ;;  %5730 = vmatprep.subr.bf16.mxu1 %v6483_v28  ;;  %v1233_v43 = vld [vmem:[#allocation2 + $0x48] sm:$0xff] }
 0x117   : > { %859 = vst.msk [vmem:[#allocation2 + $0x58] sm:$0xff] %vm847_vm3, %v834_v25  ;;  %v689_v30 = vadd.f32 %v5690_v27, %v6609_v29  ;;  %v680_v31 = vpop.f32.mrb[25].mxu0  ;;  %v1134_v39 = vld [vmem:[#allocation2 + $0x40] sm:$0xff] }
 0x118   : > { %858 = vst.msk [vmem:[#allocation2 + $0x50] sm:$0xff] %vm847_vm3, %v833_v26  ;;  %v681_v32 = vadd.f32 %v6609_v29, %v680_v31  ;;  %v5691_v33 = vpop.f32.mrb[26].mxu0  ;;  %v1138_v45 = vrot.slane %v1134_v39, 4 }
 0x119   : > { %v801_v36 = vmax.f32 %v689_v30, 0.0  ;;  %v692_v37 = vadd.f32 %v5691_v33, %v6609_v29  ;;  %v683_v38 = vpop.f32.mrb[27].mxu0  ;;  %5731 = vmatpush3.bf16.msra.mxu1 %v1043_v34 }
 0x11a   : > { %v799_v40 = vmax.f32 %v681_v32, 0.0  ;;  %v684_v41 = vadd.f32 %v6609_v29, %v683_v38  ;;  %5736 = vmatprep.subr.bf16.mxu1 %v6483_v28  ;;  %v1139_v57 = vsel %vm924_vm6, %v1137_v50, %v1138_v45  ;;  %v1143_v4 = vmax.bf16 %v1138_v45, %v1132_v2 }
 0x11b   : > { %v802_v42 = vmax.f32 %v692_v37, 0.0  ;;  %v1142_v1 = vmax.bf16 %v1139_v57, %v1131_v63 }
 0x11c   : > { %v800_v44 = vmax.f32 %v684_v41, 0.0  ;;  %5733 = vmatmul.mubr.msk.bf16.vlgmr.msra.gmra.mrb[8].mxu1 %vm932_vm13, %v6670_v53  ;;  %v1145_v13 = vsel %vm924_vm6, %v1143_v4, 0 }
 0x11d   : > { %v836_v46 = vpack.c.bf16 %v802_v42, %v801_v36  ;;  %5737 = vmatpush3.bf16.msra.mxu1 %v1040_v22  ;;  %5740 = vmatprep.mubr.msk.bf16.mxu1 %vm6484_vm2, %v6483_v28 }
 0x11e   : > { %v835_v47 = vpack.c.bf16 %v800_v44, %v799_v40  ;;  %v5694_v49 = vpop.f32.mrb[28].mxu0  ;;  %5738 = vmatprep.subr.bf16.mxu1 %v6483_v28  ;;  %v1236_v19 = vld [vmem:[#allocation2 + $0x58] sm:$0xff] }
 0x11f   : > { %861 = vst.msk [vmem:[#allocation2 + $0x68] sm:$0xff] %vm847_vm3, %v836_v46  ;;  %v705_v51 = vadd.f32 %v5694_v49, %v6609_v29  ;;  %v696_v52 = vpop.f32.mrb[29].mxu0  ;;  %v1235_v17 = vld [vmem:[#allocation2 + $0x50] sm:$0xf0]  ;;  %v1240_v25 = vrot.slane %v1236_v19, 4 }
 0x120   : > { %860 = vst.msk [vmem:[#allocation2 + $0x60] sm:$0xff] %vm847_vm3, %v835_v47  ;;  %v697_v54 = vadd.f32 %v6609_v29, %v696_v52  ;;  %v5695_v55 = vpop.f32.mrb[30].mxu0  ;;  %v1239_v24 = vrot.slane %v1235_v17, 4  ;;  %v1234_v40 = vld [vmem:[#allocation2 + $0x50] sm:$0xf] }
 0x121   : > { %v805_v58 = vmax.f32 %v705_v51, 0.0  ;;  %v708_v59 = vadd.f32 %v5695_v55, %v6609_v29  ;;  %v699_v60 = vpop.f32.mrb[31].mxu0  ;;  %5739 = vmatpush3.bf16.msra.mxu1 %v1043_v34  ;;  %v1245_v47 = vmax.bf16 %v1240_v25, %v1234_v40 }
 0x122   : > { %v803_v61 = vmax.f32 %v697_v54, 0.0  ;;  %v700_v62 = vadd.f32 %v6609_v29, %v699_v60  ;;  %5744 = vmatprep.subr.bf16.mxu1 %v6483_v28  ;;  %v1241_v36 = vsel %vm924_vm6, %v1239_v24, %v1240_v25 }
 0x123   : > { %v806_v0 = vmax.f32 %v708_v59, 0.0  ;;  %v1244_v45 = vmax.bf16 %v1241_v36, %v1233_v43 }
 0x124   : > { %v804_v3 = vmax.f32 %v700_v62, 0.0  ;;  %5741 = vmatmul.mubr.msk.bf16.vlgmr.msra.gmra.mrb[12].mxu1 %vm932_vm13, %v6695_v11 }
 0x125   : > { %v838_v56 = vpack.c.bf16 %v806_v0, %v805_v58  ;;  %5745 = vmatpush3.bf16.msra.mxu1 %v1142_v1  ;;  %5748 = vmatprep.mubr.msk.bf16.mxu1 %vm6484_vm2, %v6483_v28  ;;  %v1247_v58 = vsel %vm924_vm6, %v1245_v47, 0 }
 0x126   : > { %v837_v5 = vpack.c.bf16 %v804_v3, %v803_v61  ;;  %v5698_v6 = vpop.f32.mrb[32].mxu0  ;;  %5746 = vmatprep.subr.bf16.mxu1 %v6483_v28  ;;  %v1337_v62 = vld [vmem:[#allocation2 + $0x68] sm:$0xf0] }
 0x127   : > { %863 = vst.msk [vmem:[#allocation2 + $0x78] sm:$0xff] %vm847_vm3, %v838_v56  ;;  %v721_v7 = vadd.f32 %v5698_v6, %v6609_v29  ;;  %v712_v8 = vpop.f32.mrb[33].mxu0  ;;  %v1341_v4 = vrot.slane %v1337_v62, 4 }
 0x128   : > { %862 = vst.msk [vmem:[#allocation2 + $0x70] sm:$0xff] %vm847_vm3, %v837_v5  ;;  %v713_v10 = vadd.f32 %v6609_v29, %v712_v8  ;;  %v5699_v12 = vpop.f32.mrb[34].mxu0 }
 0x129   : > { %v809_v14 = vmax.f32 %v721_v7, 0.0  ;;  %v724_v15 = vadd.f32 %v5699_v12, %v6609_v29  ;;  %v715_v16 = vpop.f32.mrb[35].mxu0  ;;  %5747 = vmatpush3.bf16.msra.mxu1 %v1145_v13 }
 0x12a   : > { %v807_v20 = vmax.f32 %v713_v10, 0.0  ;;  %v716_v21 = vadd.f32 %v6609_v29, %v715_v16  ;;  %5752 = vmatprep.subr.bf16.mxu1 %v6483_v28 }
 0x12b   : > { %v810_v22 = vmax.f32 %v724_v15, 0.0 }
 0x12c   : > { %v808_v23 = vmax.f32 %v716_v21, 0.0  ;;  %5749 = vmatmul.mubr.msk.bf16.vlgmr.msra.gmra.mrb[16].mxu1 %vm932_vm13, %v6670_v53 }
 0x12d   : > { %v840_v26 = vpack.c.bf16 %v810_v22, %v809_v14  ;;  %5753 = vmatpush3.bf16.msra.mxu1 %v1142_v1  ;;  %5756 = vmatprep.mubr.msk.bf16.mxu1 %vm6484_vm2, %v6483_v28  ;;  %v1335_v14 = vld [vmem:[#allocation2 + $0x60] sm:$0xff] }
 0x12e   : > { %v839_v27 = vpack.c.bf16 %v808_v23, %v807_v20  ;;  %v5702_v30 = vpop.f32.mrb[36].mxu0  ;;  %5754 = vmatprep.subr.bf16.mxu1 %v6483_v28  ;;  %v1336_v20 = vld [vmem:[#allocation2 + $0x68] sm:$0xf] }
 0x12f   : > { %865 = vst.msk [vmem:[#allocation2 + $0x88] sm:$0xff] %vm847_vm3, %v840_v26  ;;  %v737_v31 = vadd.f32 %v5702_v30, %v6609_v29  ;;  %v728_v32 = vpop.f32.mrb[37].mxu0  ;;  %v1338_v63 = vld [vmem:[#allocation2 + $0x70] sm:$0xff] }
 0x130   : > { %864 = vst.msk [vmem:[#allocation2 + $0x80] sm:$0xff] %vm847_vm3, %v839_v27  ;;  %v729_v33 = vadd.f32 %v6609_v29, %v728_v32  ;;  %v5703_v34 = vpop.f32.mrb[38].mxu0  ;;  %v1342_v56 = vrot.slane %v1338_v63, 4 }
 0x131   : > { %v813_v37 = vmax.f32 %v737_v31, 0.0  ;;  %v740_v38 = vadd.f32 %v5703_v34, %v6609_v29  ;;  %v731_v39 = vpop.f32.mrb[39].mxu0  ;;  %5755 = vmatpush3.bf16.msra.mxu1 %v1145_v13 }
 0x132   : > { %v811_v41 = vmax.f32 %v729_v33, 0.0  ;;  %v732_v42 = vadd.f32 %v6609_v29, %v731_v39  ;;  %5760 = vmatprep.subr.bf16.mxu1 %v6483_v28  ;;  %v1343_v15 = vsel %vm924_vm6, %v1341_v4, %v1342_v56  ;;  %v1347_v27 = vmax.bf16 %v1342_v56, %v1336_v20 }
 0x133   : > { %v814_v44 = vmax.f32 %v740_v38, 0.0  ;;  %v1346_v24 = vmax.bf16 %v1343_v15, %v1335_v14 }
 0x134   : > { %v812_v46 = vmax.f32 %v732_v42, 0.0  ;;  %5757 = vmatmul.mubr.msk.bf16.vlgmr.msra.gmra.mrb[20].mxu1 %vm932_vm13, %v6695_v11  ;;  %v1349_v34 = vsel %vm924_vm6, %v1347_v27, 0 }
 0x135   : > { %v842_v49 = vpack.c.bf16 %v814_v44, %v813_v37  ;;  %5761 = vmatpush3.bf16.msra.mxu1 %v1244_v45  ;;  %5764 = vmatprep.mubr.msk.bf16.mxu1 %vm6484_vm2, %v6483_v28 }
 0x136   : > { %v841_v50 = vpack.c.bf16 %v812_v46, %v811_v41  ;;  %v5706_v51 = vpop.f32.mrb[40].mxu0  ;;  %5762 = vmatprep.subr.bf16.mxu1 %v6483_v28  ;;  %v1440_v39 = vld [vmem:[#allocation2 + $0x88] sm:$0xff] }
 0x137   : > { %867 = vst.msk [vmem:[#allocation2 + $0x98] sm:$0xff] %vm847_vm3, %v842_v49  ;;  %v753_v52 = vadd.f32 %v5706_v51, %v6609_v29  ;;  %v744_v54 = vpop.f32.mrb[41].mxu0  ;;  %v1439_v38 = vld [vmem:[#allocation2 + $0x80] sm:$0xf0]  ;;  %v1444_v44 = vrot.slane %v1440_v39, 4  ;;  %v1437_v51 = vld [vmem:[#allocation2 + $0x78] sm:$0xff] }
 0x138   : > { %866 = vst.msk [vmem:[#allocation2 + $0x90] sm:$0xff] %vm847_vm3, %v841_v50  ;;  %v745_v55 = vadd.f32 %v6609_v29, %v744_v54  ;;  %v5707_v57 = vpop.f32.mrb[42].mxu0  ;;  %v1443_v43 = vrot.slane %v1439_v38, 4 }
 0x139   : > { %v817_v59 = vmax.f32 %v753_v52, 0.0  ;;  %v756_v60 = vadd.f32 %v5707_v57, %v6609_v29  ;;  %v747_v61 = vpop.f32.mrb[43].mxu0  ;;  %5763 = vmatpush3.bf16.msra.mxu1 %v1247_v58  ;;  %v1438_v57 = vld [vmem:[#allocation2 + $0x80] sm:$0xf] }
 0x13a   : > { %v815_v0 = vmax.f32 %v745_v55, 0.0  ;;  %v748_v1 = vadd.f32 %v6609_v29, %v747_v61  ;;  %5768 = vmatprep.subr.bf16.mxu1 %v6483_v28  ;;  %v1445_v52 = vsel %vm924_vm6, %v1443_v43, %v1444_v44  ;;  %v1449_v62 = vmax.bf16 %v1444_v44, %v1438_v57 }
 0x13b   : > { %v818_v2 = vmax.f32 %v756_v60, 0.0  ;;  %v1448_v60 = vmax.bf16 %v1445_v52, %v1437_v51 }
 0x13c   : > { %v816_v3 = vmax.f32 %v748_v1, 0.0  ;;  %5765 = vmatmul.mubr.msk.bf16.vlgmr.msra.gmra.mrb[24].mxu1 %vm932_vm13, %v6670_v53  ;;  %v6485_v1 = vmov 0  }
 0x13d   : > { %v844_v5 = vpack.c.bf16 %v818_v2, %v817_v59  ;;  %5769 = vmatpush3.bf16.msra.mxu1 %v1244_v45  ;;  %5772 = vmatprep.mubr.msk.bf16.mxu1 %vm6484_vm2, %v6483_v28  ;;  %873 = vst.msk [vmem:[#allocation3 + $0x8] sm:$0xff] %vm847_vm3, %v6485_v1  ;;  %872 = vst.msk [vmem:[#allocation3] sm:$0xff] %vm847_vm3, %v6485_v1  ;;  %v6406_v2 = vld [vmem:[%s7517_s3 + $0x18] sm:$0xff]  }
 0x13e   : > { %v843_v6 = vpack.c.bf16 %v816_v3, %v815_v0  ;;  %v5710_v7 = vpop.f32.mrb[44].mxu0  ;;  %5770 = vmatprep.subr.bf16.mxu1 %v6483_v28  ;;  %v1541_v25 = vld [vmem:[#allocation2 + $0x98] sm:$0xf0]  ;;  %v1540_v33 = vld [vmem:[#allocation2 + $0x98] sm:$0xf]  ;;  %v1451_v0 = vsel %vm924_vm6, %v1449_v62, 0 }
 0x13f   : > { %869 = vst.msk [vmem:[#allocation2 + $0xa8] sm:$0xff] %vm847_vm3, %v844_v5  ;;  %v769_v8 = vadd.f32 %v5710_v7, %v6609_v29  ;;  %v760_v10 = vpop.f32.mrb[45].mxu0  ;;  %v1545_v32 = vrot.slane %v1541_v25, 4  ;;  %v1539_v36 = vld [vmem:[#allocation2 + $0x90] sm:$0xff]  ;;  %874 = vst.msk [vmem:[#allocation3 + $0x10] sm:$0xff] %vm847_vm3, %v6485_v1 }
 0x140   : > { %868 = vst.msk [vmem:[#allocation2 + $0xa0] sm:$0xff] %vm847_vm3, %v843_v6  ;;  %v761_v12 = vadd.f32 %v6609_v29, %v760_v10  ;;  %v5711_v13 = vpop.f32.mrb[46].mxu0  ;;  %875 = vst.msk [vmem:[#allocation3 + $0x18] sm:$0xff] %vm847_vm3, %v6485_v1 }
 0x141   : > { %v821_v16 = vmax.f32 %v769_v8, 0.0  ;;  %v772_v17 = vadd.f32 %v5711_v13, %v6609_v29  ;;  %v763_v19 = vpop.f32.mrb[47].mxu0  ;;  %5771 = vmatpush3.bf16.msra.mxu1 %v1247_v58  ;;  %876 = vst.msk [vmem:[#allocation3 + $0x20] sm:$0xff] %vm847_vm3, %v6485_v1  ;;  %877 = vst.msk [vmem:[#allocation3 + $0x28] sm:$0xff] %vm847_vm3, %v6485_v1 }
 0x142   : > { %v819_v21 = vmax.f32 %v761_v12, 0.0  ;;  %v764_v22 = vadd.f32 %v6609_v29, %v763_v19  ;;  %5776 = vmatprep.subr.bf16.mxu1 %v6483_v28  ;;  %878 = vst.msk [vmem:[#allocation3 + $0x30] sm:$0xff] %vm847_vm3, %v6485_v1  ;;  %879 = vst.msk [vmem:[#allocation3 + $0x38] sm:$0xff] %vm847_vm3, %v6485_v1 }
 0x143   : > { %v822_v23 = vmax.f32 %v772_v17, 0.0  ;;  %880 = vst.msk [vmem:[#allocation3 + $0x40] sm:$0xff] %vm847_vm3, %v6485_v1  ;;  %881 = vst.msk [vmem:[#allocation3 + $0x48] sm:$0xff] %vm847_vm3, %v6485_v1 }
 0x144   : > { %v820_v26 = vmax.f32 %v764_v22, 0.0  ;;  %5773 = vmatmul.mubr.msk.bf16.vlgmr.msra.gmra.mrb[28].mxu1 %vm932_vm13, %v6695_v11  ;;  %882 = vst.msk [vmem:[#allocation3 + $0x50] sm:$0xff] %vm847_vm3, %v6485_v1  ;;  %v6869_v14 = vld [vmem:[#allocation3] sm:$0xff]  ;;  %4788 = vst [vmem:[%s276_s27] sm:$0x3] %v6485_v1 }
 0x145   : > { %v846_v30 = vpack.c.bf16 %v822_v23, %v821_v16  ;;  %5777 = vmatpush3.bf16.msra.mxu1 %v1346_v24  ;;  %5780 = vmatprep.mubr.msk.bf16.mxu1 %vm6484_vm2, %v6483_v28  ;;  %v1765_v16 = vshll.u32 %v6869_v14, 16  ;;  %v1763_v22 = vshrl.u32 %v6869_v14, 16  ;;  %3434 = vst.msk [vmem:[#allocation5 + $0x4] sm:$0xf] %vm3432_vm10, %v6485_v1  ;;  %3433 = vst.msk [vmem:[#allocation5] sm:$0xf] %vm3432_vm10, %v6485_v1 }
 0x146   : > { %v845_v31 = vpack.c.bf16 %v820_v26, %v819_v21  ;;  %5778 = vmatprep.subr.bf16.mxu1 %v6483_v28  ;;  %v1641_v54 = vld [vmem:[#allocation2 + $0xa8] sm:$0xff]  ;;  %3435 = vst.msk [vmem:[#allocation5 + $0x8] sm:$0xf] %vm3432_vm10, %v6485_v1  ;;  %3436 = vst.msk [vmem:[#allocation5 + $0xc] sm:$0xf] %vm3432_vm10, %v6485_v1 }
 0x147   : > { %871 = vst.msk [vmem:[#allocation2 + $0xb8] sm:$0xff] %vm847_vm3, %v846_v30  ;;  %v1542_v29 = vld [vmem:[#allocation2 + $0xa0] sm:$0xff]  ;;  %v1767_v23 = vrot.slane %v1765_v16, 1 }
 0x148   : > { %870 = vst.msk [vmem:[#allocation2 + $0xb0] sm:$0xff] %vm847_vm3, %v845_v31  ;;  %v1546_v37 = vrot.slane %v1542_v29, 4 }
 0x149   : > { %5779 = vmatpush3.bf16.msra.mxu1 %v1349_v34  ;;  %v1768_v25 = vor.u32 %v1767_v23, %v1763_v22  ;;  %3437 = vst.msk [vmem:[#allocation5 + $0x10] sm:$0xf] %vm3432_vm10, %v6485_v1  ;;  %3438 = vst.msk [vmem:[#allocation5 + $0x14] sm:$0xf] %vm3432_vm10, %v6485_v1 }
 0x14a   : > { %5784 = vmatprep.subr.bf16.mxu1 %v6483_v28  ;;  %v1547_v40 = vsel %vm924_vm6, %v1545_v32, %v1546_v37  ;;  %v1551_v41 = vmax.bf16 %v1546_v37, %v1540_v33  ;;  %3439 = vst.msk [vmem:[#allocation5 + $0x18] sm:$0xf] %vm3432_vm10, %v6485_v1 }
 0x14b   : > { %v1550_v42 = vmax.bf16 %v1547_v40, %v1539_v36 }
 0x14c   : > { %5781 = vmatmul.mubr.msk.bf16.vlgmr.msra.gmra.mrb[32].mxu1 %vm932_vm13, %v6670_v53  ;;  %v1553_v45 = vsel %vm924_vm6, %v1551_v41, 0 }
 0x14d   : > { %5785 = vmatpush3.bf16.msra.mxu1 %v1346_v24  ;;  %5817 = vmatpush3.bf16.msra.mxu0 %v1550_v42 }
 0x14e   : > { %5786 = vmatprep.subr.bf16.mxu1 %v6483_v28  ;;  %5818 = vmatprep.subr.bf16.mxu0 %v6483_v28  ;;  %v1644_v46 = vld [vmem:[#allocation2 + $0xb8] sm:$0xff] }
 0x14f   : > { %5788 = vmatprep.mubr.msk.bf16.mxu1 %vm6484_vm2, %v6483_v28  ;;  %v1643_v47 = vld [vmem:[#allocation2 + $0xb0] sm:$0xf0]  ;;  %v1648_v49 = vrot.slane %v1644_v46, 4  ;;  %v1642_v50 = vld [vmem:[#allocation2 + $0xb0] sm:$0xf] }
 0x150   : > { %v1647_v55 = vrot.slane %v1643_v47, 4 }
 0x151   : > { %5787 = vmatpush3.bf16.msra.mxu1 %v1349_v34  ;;  %5819 = vmatpush3.bf16.msra.mxu0 %v1553_v45  ;;  %v1653_v59 = vmax.bf16 %v1648_v49, %v1642_v50 }
 0x152   : > { %5792 = vmatprep.subr.bf16.mxu1 %v6483_v28  ;;  %5832 = vmatprep.subr.bf16.mxu0 %v6483_v28  ;;  %v1649_v58 = vsel %vm924_vm6, %v1647_v55, %v1648_v49 }
 0x153   : > { %v1652_v61 = vmax.bf16 %v1649_v58, %v1641_v54  ;;  %v1655_v63 = vsel %vm924_vm6, %v1653_v59, 0 }
 0x154   : > { %5789 = vmatmul.mubr.msk.bf16.vlgmr.msra.gmra.mrb[36].mxu1 %vm932_vm13, %v6695_v11  ;;  %5821 = vmatmul.mubr.msk.bf16.vlgmr.msra.gmra.mrb[48].mxu0 %vm932_vm13, %v6695_v11 }
 0x155   : > { %5793 = vmatpush3.bf16.msra.mxu1 %v1448_v60  ;;  %5833 = vmatpush3.bf16.msra.mxu0 %v1652_v61 }
 0x156   : > { %5794 = vmatprep.subr.bf16.mxu1 %v6483_v28  ;;  %5796 = vmatprep.mubr.msk.bf16.mxu1 %vm6484_vm2, %v6483_v28 }
 0x157   : > { %5834 = vmatprep.subr.bf16.mxu0 %v6483_v28  ;;  %5836 = vmatprep.mubr.msk.bf16.mxu0 %vm6484_vm2, %v6483_v28 }
 0x159   : > { %5795 = vmatpush3.bf16.msra.mxu1 %v1451_v0  ;;  %5835 = vmatpush3.bf16.msra.mxu0 %v1655_v63 }
 0x15a   : > { %5800 = vmatprep.subr.bf16.mxu1 %v6483_v28 }
 0x15c   : > { %5797 = vmatmul.mubr.msk.bf16.vlgmr.msra.gmra.mrb[40].mxu1 %vm932_vm13, %v6670_v53  ;;  %5837 = vmatmul.mubr.msk.bf16.vlgmr.msra.gmra.mrb[52].mxu0 %vm932_vm13, %v6695_v11 }
 0x15d   : > { %5801 = vmatpush3.bf16.msra.mxu1 %v1448_v60  ;;  %5804 = vmatprep.mubr.msk.bf16.mxu1 %vm6484_vm2, %v6483_v28 }
 0x15e   : > { %5802 = vmatprep.subr.bf16.mxu1 %v6483_v28 }
 0x161   : > { %5803 = vmatpush3.bf16.msra.mxu1 %v1451_v0 }
 0x162   : > { %5808 = vmatprep.subr.bf16.mxu1 %v6483_v28 }
 0x164   : > { %5805 = vmatmul.mubr.msk.bf16.vlgmr.msra.gmra.mrb[44].mxu1 %vm932_vm13, %v6695_v11  ;;  %v6405_v11 = vld [vmem:[%s7517_s3 + $0x10] sm:$0xff]  }
 0x165   : > { %5809 = vmatpush3.bf16.msra.mxu1 %v1550_v42  ;;  %5812 = vmatprep.mubr.msk.bf16.mxu1 %vm6484_vm2, %v6483_v28 }
 0x166   : > { %5810 = vmatprep.subr.bf16.mxu1 %v6483_v28  ;;  %5840 = vmatprep.subr.bf16.mxu0 %v6405_v11 }
 0x167   : > { %5841 = vmatpush3.bf16.msra.mxu0 %v6405_v11 }
 0x168   : > { %5842 = vmatprep.subr.bf16.mxu0 %v6406_v2 }
 0x169   : > { %5811 = vmatpush3.bf16.msra.mxu1 %v1553_v45 }
 0x16a   : > { %5824 = vmatprep.subr.bf16.mxu1 %v6483_v28 }
 0x16b   : > { %5843 = vmatpush3.bf16.msra.mxu0 %v6406_v2 }
 0x16c   : > { %5813 = vmatmul.mubr.msk.bf16.vlgmr.msra.gmra.mrb[48].mxu1 %vm932_vm13, %v6670_v53  ;;  %6020 = vmatprep.subr.bf16.mxu0 %v6483_v28 }
 0x16d   : > { %5825 = vmatpush3.bf16.msra.mxu1 %v1652_v61  ;;  %5828 = vmatprep.mubr.msk.bf16.mxu1 %vm6484_vm2, %v6483_v28 }
 0x16e   : > { %5826 = vmatprep.subr.bf16.mxu1 %v6483_v28 }
 0x171   : > { %5827 = vmatpush3.bf16.msra.mxu1 %v1655_v63 }
 0x172   : > { %6200 = vmatprep.subr.bf16.mxu1 %v6405_v11 }
 0x174   : > { %5829 = vmatmul.mubr.msk.bf16.vlgmr.msra.gmra.mrb[52].mxu1 %vm932_vm13, %v6670_v53  ;;  %v6866_v53 = vld [vmem:[%s7517_s3] sm:$0xff]  }
 0x175   : > { %6202 = vmatpush3.bf16.msra.mxu1 %v6405_v11 }
 0x176   : > { %6201 = vmatprep.subr.bf16.mxu1 %v6406_v2 }
 0x179   : > { %6203 = vmatpush3.bf16.msra.mxu1 %v6406_v2 }
 0x17a   : > { %5860 = vmatprep.subr.bf16.mxu1 %v6866_v53 }
 0x1df   : > { %v974_v3 = vpop.f32.mrb[0].mxu1 }
 0x1e0   : > { %v5718_v4 = vpop.f32.mrb[1].mxu1 }
 0x1e1   : > { %v977_v56 = vpop.f32.mrb[2].mxu1 }
 0x1e2   : > { %v5719_v5 = vpop.f32.mrb[3].mxu1 }
 0x1e7   : > { %v1018_v6 = vpop.f32.mrb[4].mxu1 }
 0x1e8   : > { %v1025_v7 = vmax.f32 %v974_v3, %v1018_v6  ;;  %v5726_v8 = vpop.f32.mrb[5].mxu1 }
 0x1e9   : > { %v1021_v10 = vpop.f32.mrb[6].mxu1 }
 0x1ea   : > { %v1026_v12 = vmax.f32 %v977_v56, %v1021_v10  ;;  %v5727_v13 = vpop.f32.mrb[7].mxu1 }
 0x1ec   : > { %v1027_v15 = vpack.c.bf16 %v1026_v12, %v1025_v7 }
 0x1ee   : > { %1028 = vst.msk [vmem:[#allocation3 + $0x8] sm:$0xff] %vm847_vm3, %v1027_v15 }
 0x1ef   : > { %v1079_v17 = vpop.f32.mrb[8].mxu1 }
 0x1f0   : > { %v5734_v19 = vpop.f32.mrb[9].mxu1 }
 0x1f1   : > { %v1082_v20 = vpop.f32.mrb[10].mxu1 }
 0x1f2   : > { %v5735_v21 = vpop.f32.mrb[11].mxu1 }
 0x1f5   : > { %v6874_v24 = vld [vmem:[#allocation3 + $0x8] sm:$0xff] }
 0x1f6   : > { %v1770_v26 = vshll.u32 %v6874_v24, 16  ;;  %v1774_v29 = vshrl.u32 %v6874_v24, 16 }
 0x1f7   : > { %v1120_v27 = vpop.f32.mrb[12].mxu1 }
 0x1f8   : > { %v1127_v30 = vmax.f32 %v1079_v17, %v1120_v27  ;;  %v5742_v31 = vpop.f32.mrb[13].mxu1  ;;  %v1772_v32 = vrot.slane %v1770_v26, 1 }
 0x1f9   : > { %v1123_v33 = vpop.f32.mrb[14].mxu1 }
 0x1fa   : > { %v1128_v34 = vmax.f32 %v1082_v20, %v1123_v33  ;;  %v5743_v36 = vpop.f32.mrb[15].mxu1  ;;  %v1773_v37 = vsel %vm1761_vm0, %v1768_v25, %v1772_v32  ;;  %v2424_v38 = vor.u32 %v1774_v29, %v1772_v32 }
 0x1fb   : > { %5844 = vmatprep.mubr.msk.bf16.mxu0 %vm847_vm3, %v1773_v37 }
 0x1fc   : > { %v1129_v39 = vpack.c.bf16 %v1128_v34, %v1127_v30 }
 0x1fe   : > { %1130 = vst.msk [vmem:[#allocation3 + $0x10] sm:$0xff] %vm847_vm3, %v1129_v39 }
 0x1ff   : > { %v1181_v40 = vpop.f32.mrb[16].mxu1 }
 0x200   : > { %v5750_v41 = vpop.f32.mrb[17].mxu1 }
 0x201   : > { %v1184_v42 = vpop.f32.mrb[18].mxu1 }
 0x202   : > { %v5751_v43 = vpop.f32.mrb[19].mxu1 }
 0x205   : > { %v6881_v44 = vld [vmem:[#allocation3 + $0x10] sm:$0xff] }
 0x206   : > { %v1778_v45 = vshll.u32 %v6881_v44, 16  ;;  %v1782_v52 = vshrl.u32 %v6881_v44, 16 }
 0x207   : > { %v1222_v46 = vpop.f32.mrb[20].mxu1 }
 0x208   : > { %v1229_v47 = vmax.f32 %v1181_v40, %v1222_v46  ;;  %v5758_v49 = vpop.f32.mrb[21].mxu1  ;;  %v1780_v50 = vrot.slane %v1778_v45, 1 }
 0x209   : > { %v1225_v51 = vpop.f32.mrb[22].mxu1 }
 0x20a   : > { %v6886_v54 = vsel %vm1761_vm0, %v2424_v38, %v1780_v50  ;;  %v1230_v55 = vmax.f32 %v1184_v42, %v1225_v51  ;;  %v5759_v57 = vpop.f32.mrb[23].mxu1  ;;  %v2984_v58 = vor.u32 %v1782_v52, %v1780_v50 }
 0x20b   : > { %5845 = vmatmul.mubr.msk.bf16.vlgmr.msra.gmra.mrb[56].mxu0 %vm847_vm3, %v6886_v54 }
 0x20c   : > { %v1231_v59 = vpack.c.bf16 %v1230_v55, %v1229_v47 }
 0x20e   : > { %1232 = vst.msk [vmem:[#allocation3 + $0x18] sm:$0xff] %vm847_vm3, %v1231_v59 }
 0x20f   : > { %v1283_v60 = vpop.f32.mrb[24].mxu1 }
 0x210   : > { %v5766_v61 = vpop.f32.mrb[25].mxu1 }
 0x211   : > { %v1286_v62 = vpop.f32.mrb[26].mxu1 }
 0x212   : > { %v5767_v63 = vpop.f32.mrb[27].mxu1 }
 0x215   : > { %v6891_v0 = vld [vmem:[#allocation3 + $0x18] sm:$0xff] }
 0x216   : > { %v1786_v11 = vshll.u32 %v6891_v0, 16  ;;  %v1790_v19 = vshrl.u32 %v6891_v0, 16 }
 0x217   : > { %v1324_v2 = vpop.f32.mrb[28].mxu1 }
 0x218   : > { %v1331_v3 = vmax.f32 %v1283_v60, %v1324_v2  ;;  %v5774_v4 = vpop.f32.mrb[29].mxu1  ;;  %v1788_v56 = vrot.slane %v1786_v11, 1 }
 0x219   : > { %v1327_v5 = vpop.f32.mrb[30].mxu1 }
 0x21a   : > { %v1332_v6 = vmax.f32 %v1286_v62, %v1327_v5  ;;  %v6895_v7 = vsel %vm1761_vm0, %v2984_v58, %v1788_v56  ;;  %v5775_v8 = vpop.f32.mrb[31].mxu1  ;;  %v1792_v26 = vor.u32 %v1790_v19, %v1788_v56 }
 0x21b   : > { %5848 = vmatprep.mubr.msk.bf16.mxu0 %vm847_vm3, %v6895_v7 }
 0x21c   : > { %v1333_v10 = vpack.c.bf16 %v1332_v6, %v1331_v3 }
 0x21e   : > { %1334 = vst.msk [vmem:[#allocation3 + $0x20] sm:$0xff] %vm847_vm3, %v1333_v10 }
 0x21f   : > { %v1385_v12 = vpop.f32.mrb[32].mxu1 }
 0x220   : > { %v5782_v13 = vpop.f32.mrb[33].mxu1 }
 0x221   : > { %v1388_v15 = vpop.f32.mrb[34].mxu1 }
 0x222   : > { %v5783_v16 = vpop.f32.mrb[35].mxu1 }
 0x225   : > { %v6900_v17 = vld [vmem:[#allocation3 + $0x20] sm:$0xff] }
 0x226   : > { %v1794_v20 = vshll.u32 %v6900_v17, 16  ;;  %v1798_v49 = vshrl.u32 %v6900_v17, 16 }
 0x227   : > { %v1426_v21 = vpop.f32.mrb[36].mxu1  ;;  %v1630_v22 = vpop.f32.mrb[48].mxu0 }
 0x228   : > { %v1433_v23 = vmax.f32 %v1385_v12, %v1426_v21  ;;  %v5790_v25 = vpop.f32.mrb[37].mxu1  ;;  %v1796_v27 = vrot.slane %v1794_v20, 1  ;;  %v5822_v30 = vpop.f32.mrb[49].mxu0 }
 0x229   : > { %v1429_v31 = vpop.f32.mrb[38].mxu1  ;;  %v1633_v32 = vpop.f32.mrb[50].mxu0 }
 0x22a   : > { %v1434_v29 = vmax.f32 %v1388_v15, %v1429_v31  ;;  %v5791_v33 = vpop.f32.mrb[39].mxu1  ;;  %v6905_v34 = vsel %vm1761_vm0, %v1792_v26, %v1796_v27  ;;  %v5823_v36 = vpop.f32.mrb[51].mxu0  ;;  %v1800_v57 = vor.u32 %v1798_v49, %v1796_v27  ;;  %v2105_v49 = vrot.slane %v6874_v24, 1 }
 0x22b   : > { %5849 = vmatmul.mubr.msk.bf16.gmra.mrb[60].mxu0 %vm847_vm3, %v6905_v34 }
 0x22c   : > { %v1435_v37 = vpack.c.bf16 %v1434_v29, %v1433_v23 }
 0x22e   : > { %1436 = vst.msk [vmem:[#allocation3 + $0x28] sm:$0xff] %vm847_vm3, %v1435_v37 }
 0x22f   : > { %v1487_v38 = vpop.f32.mrb[40].mxu1  ;;  %v1732_v39 = vpop.f32.mrb[52].mxu0 }
 0x230   : > { %v5798_v40 = vpop.f32.mrb[41].mxu1  ;;  %v5838_v41 = vpop.f32.mrb[53].mxu0 }
 0x231   : > { %v1490_v42 = vpop.f32.mrb[42].mxu1  ;;  %v1735_v43 = vpop.f32.mrb[54].mxu0  ;;  %v6408_v41 = vld [vmem:[%s7517_s3 + $0x8] sm:$0xff]  }
 0x232   : > { %v5799_v45 = vpop.f32.mrb[43].mxu1  ;;  %v5839_v46 = vpop.f32.mrb[55].mxu0 }
 0x233   : > { %v6410_v45 = vld [vmem:[%s7517_s3 + $0x28] sm:$0xff]  }
 0x235   : > { %v6910_v47 = vld [vmem:[#allocation3 + $0x28] sm:$0xff] }
 0x236   : > { %v1802_v50 = vshll.u32 %v6910_v47, 16  ;;  %v1806_v10 = vshrl.u32 %v6910_v47, 16 }
 0x237   : > { %v1528_v51 = vpop.f32.mrb[44].mxu1 }
 0x238   : > { %v1535_v52 = vmax.f32 %v1487_v38, %v1528_v51  ;;  %v5806_v55 = vpop.f32.mrb[45].mxu1  ;;  %v1804_v58 = vrot.slane %v1802_v50, 1  ;;  %v6981_v51 = vrot.slane %v6881_v44, 1 }
 0x239   : > { %v1531_v59 = vpop.f32.mrb[46].mxu1  ;;  %v6412_v55 = vld [vmem:[%s7517_s3 + $0x38] sm:$0xff]  }
 0x23a   : > { %v1536_v60 = vmax.f32 %v1490_v42, %v1531_v59  ;;  %v5807_v61 = vpop.f32.mrb[47].mxu1  ;;  %v6915_v62 = vsel %vm1761_vm0, %v1800_v57, %v1804_v58  ;;  %v1808_v19 = vor.u32 %v1806_v10, %v1804_v58  ;;  %v2108_v57 = vsel %vm2103_vm1, %v2105_v49, %v6981_v51  ;;  %v6413_v59 = vld [vmem:[%s7517_s3 + $0x40] sm:$0xff]   ;;  %v6414_v10 = vld [vmem:[%s7517_s3 + $0x48] sm:$0xff]  }
 0x23b   : > { %5852 = vmatprep.mubr.msk.bf16.mxu0 %vm847_vm3, %v6915_v62  ;;  %v2113_v61 = vrot.slane %v6910_v47, 1 }
 0x23c   : > { %v1537_v63 = vpack.c.bf16 %v1536_v60, %v1535_v52  ;;  %v6984_v52 = vrot.slane %v6891_v0, 1  ;;  %v2111_v60 = vrot.slane %v6900_v17, 1 }
 0x23e   : > { %1538 = vst.msk [vmem:[#allocation3 + $0x30] sm:$0xff] %vm847_vm3, %v1537_v63  ;;  %v6995_v58 = vsel %vm2103_vm1, %v6981_v51, %v6984_v52  ;;  %v7006_v63 = vsel %vm2103_vm1, %v6984_v52, %v2111_v60 }
 0x23f   : > { %v1589_v11 = vpop.f32.mrb[48].mxu1 }
 0x240   : > { %v1637_v2 = vmax.f32 %v1589_v11, %v1630_v22  ;;  %v5814_v3 = vpop.f32.mrb[49].mxu1  ;;  %v7011_v11 = vsel %vm2103_vm1, %v2111_v60, %v2113_v61 }
 0x241   : > { %v1592_v4 = vpop.f32.mrb[50].mxu1 }
 0x242   : > { %v1638_v56 = vmax.f32 %v1592_v4, %v1633_v32  ;;  %v5815_v5 = vpop.f32.mrb[51].mxu1 }
 0x244   : > { %v1639_v6 = vpack.c.bf16 %v1638_v56, %v1637_v2 }
 0x245   : > { %v6920_v8 = vld [vmem:[#allocation3 + $0x30] sm:$0xff] }
 0x246   : > { %1640 = vst.msk [vmem:[#allocation3 + $0x38] sm:$0xff] %vm847_vm3, %v1639_v6  ;;  %v1810_v12 = vshll.u32 %v6920_v8, 16  ;;  %v1814_v30 = vshrl.u32 %v6920_v8, 16  ;;  %v2115_v2 = vrot.slane %v6920_v8, 1 }
 0x247   : > { %v1691_v13 = vpop.f32.mrb[52].mxu1 }
 0x248   : > { %v1739_v15 = vmax.f32 %v1691_v13, %v1732_v39  ;;  %v5830_v16 = vpop.f32.mrb[53].mxu1  ;;  %v1812_v20 = vrot.slane %v1810_v12, 1  ;;  %v7020_v4 = vsel %vm2103_vm1, %v2113_v61, %v2115_v2  ;;  %v6415_v12 = vld [vmem:[%s7517_s3 + $0x50] sm:$0xff]   ;;  %v6416_v13 = vld [vmem:[%s7517_s3 + $0x58] sm:$0xff]  }
 0x249   : > { %v1694_v21 = vpop.f32.mrb[54].mxu1 }
 0x24a   : > { %v1740_v22 = vmax.f32 %v1694_v21, %v1735_v43  ;;  %v6926_v23 = vsel %vm1761_vm0, %v1808_v19, %v1812_v20  ;;  %v5831_v25 = vpop.f32.mrb[55].mxu1  ;;  %v1816_v32 = vor.u32 %v1814_v30, %v1812_v20  ;;  %v6409_v43 = vld [vmem:[%s7517_s3 + $0x20] sm:$0xff]   ;;  %v2412_v19 = vld [vmem:[#allocation3 + $0x48] sm:$0x1]  ;;  %v2635_v30 = vld [vmem:[#allocation3 + $0x8] sm:$0xfe] }
 0x24b   : > { %5853 = vmatmul.mubr.msk.bf16.gmra.mrb[64].mxu0 %vm847_vm3, %v6926_v23  ;;  %v2482_v20 = vshll.u32 %v2412_v19, 16 }
 0x24c   : > { %v1741_v26 = vpack.c.bf16 %v1740_v22, %v1739_v15  ;;  %6022 = vmatprep.mubr.msk.bf16.mxu0 %vm6484_vm2, %v6483_v28  ;;  %v6417_v15 = vld [vmem:[%s7517_s3 + $0x60] sm:$0xff]  }
 0x24d   : > { %v6932_v27 = vld [vmem:[#allocation3 + $0x38] sm:$0xff] }
 0x24e   : > { %1742 = vst.msk [vmem:[#allocation3 + $0x40] sm:$0xff] %vm847_vm3, %v1741_v26  ;;  %v1818_v31 = vshll.u32 %v6932_v27, 16  ;;  %v1822_v37 = vshrl.u32 %v6932_v27, 16  ;;  %v7017_v3 = vrot.slane %v6932_v27, 1  ;;  %v2484_v26 = vrot.slane %v2482_v20, 1 }
 0x250   : > { %v1820_v29 = vrot.slane %v1818_v31, 1  ;;  %v7026_v56 = vsel %vm2103_vm1, %v2115_v2, %v7017_v3  ;;  %v2650_v31 = vrot.slane %v2635_v30, 1  ;;  %v3195_v2 = vld [vmem:[#allocation3 + $0x10] sm:$0xfe] }
 0x252   : > { %v6938_v33 = vsel %vm1761_vm0, %v1816_v32, %v1820_v29  ;;  %v6943_v39 = vor.u32 %v1822_v37, %v1820_v29  ;;  %v2652_v29 = vsel %vm2103_vm1, %v2650_v31, %v6981_v51  ;;  %v6420_v51 = vld [vmem:[%s7517_s3 + $0x78] sm:$0xff]  }
 0x253   : > { %5856 = vmatprep.mubr.msk.bf16.mxu1 %vm847_vm3, %v6938_v33 }
 0x255   : > { %v1755_v36 = vld [vmem:[#allocation3 + $0x40] sm:$0x1] }
 0x256   : > { %v1826_v38 = vshll.u32 %v1755_v36, 16  ;;  %v2119_v5 = vrot.slane %v1755_v36, 1 }
 0x258   : > { %v1828_v40 = vrot.slane %v1826_v38, 1  ;;  %v2120_v6 = vsel %vm2103_vm1, %v7017_v3, %v2119_v5 }
 0x25a   : > { %v1829_v42 = vsel %vm1761_vm0, %v6943_v39, %v1828_v40  ;;  %v6418_v40 = vld [vmem:[%s7517_s3 + $0x68] sm:$0xff]  }
 0x25b   : > { %5857 = vmatmul.mubr.msk.bf16.vlgmr.msra.gmra.mrb[56].mxu1 %vm847_vm3, %v1829_v42 }
 0x25c   : > { %5861 = vmatpush3.bf16.msra.mxu1 %v6866_v53  ;;  %5864 = vmatprep.mubr.msk.bf16.mxu1 %vm847_vm3, %v6869_v14  ;;  %v6411_v53 = vld [vmem:[%s7517_s3 + $0x30] sm:$0xff]   ;;  %v2088_v14 = vld [vmem:[#allocation3] sm:$0xfe] }
 0x25d   : > { %5862 = vmatprep.subr.bf16.mxu1 %v6408_v41  ;;  %v2104_v46 = vrot.slane %v2088_v14, 1 }
 0x25f   : > { %v2106_v50 = vsel %vm2103_vm1, %v2104_v46, %v2105_v49 }
 0x260   : > { %5863 = vmatpush3.bf16.msra.mxu1 %v6408_v41  ;;  %v6419_v41 = vld [vmem:[%s7517_s3 + $0x70] sm:$0xff]  }
 0x261   : > { %5880 = vmatprep.subr.bf16.mxu1 %v6409_v43 }
 0x263   : > { %5865 = vmatmul.mubr.msk.bf16.vlgmr.msra.gmra.mrb[60].mxu1 %vm847_vm3, %v6874_v24 }
 0x264   : > { %5868 = vmatprep.mubr.msk.bf16.mxu1 %vm847_vm3, %v6881_v44  ;;  %5881 = vmatpush3.bf16.msra.mxu1 %v6409_v43 }
 0x265   : > { %5882 = vmatprep.subr.bf16.mxu1 %v6410_v45 }
 0x268   : > { %5883 = vmatpush3.bf16.msra.mxu1 %v6410_v45  ;;  %v2665_v45 = vrot.slane %v2412_v19, 1 }
 0x269   : > { %5900 = vmatprep.subr.bf16.mxu1 %v6411_v53 }
 0x26b   : > { %5869 = vmatmul.mubr.msk.bf16.gmra.mrb[64].mxu1 %vm847_vm3, %v6891_v0 }
 0x26c   : > { %5872 = vmatprep.mubr.msk.bf16.mxu1 %vm847_vm3, %v6900_v17 }
 0x273   : > { %5873 = vmatmul.mubr.msk.bf16.gmra.mrb[68].mxu1 %vm847_vm3, %v6910_v47 }
 0x274   : > { %5876 = vmatprep.mubr.msk.bf16.mxu1 %vm847_vm3, %v6920_v8 }
 0x27b   : > { %5877 = vmatmul.mubr.msk.bf16.gmra.mrb[56].mxu1 %vm847_vm3, %v6932_v27 }
 0x27c   : > { %5884 = vmatprep.mubr.msk.bf16.mxu1 %vm847_vm3, %v2106_v50 }
 0x283   : > { %5885 = vmatmul.mubr.msk.bf16.vlgmr.msra.gmra.mrb[60].mxu1 %vm847_vm3, %v2108_v57 }
 0x284   : > { %5888 = vmatprep.mubr.msk.bf16.mxu1 %vm847_vm3, %v6995_v58  ;;  %5901 = vmatpush3.bf16.msra.mxu1 %v6411_v53 }
 0x285   : > { %5902 = vmatprep.subr.bf16.mxu1 %v6412_v55 }
 0x288   : > { %5903 = vmatpush3.bf16.msra.mxu1 %v6412_v55 }
 0x289   : > { %5920 = vmatprep.subr.bf16.mxu1 %v6413_v59 }
 0x28b   : > { %5889 = vmatmul.mubr.msk.bf16.gmra.mrb[64].mxu1 %vm847_vm3, %v7006_v63 }
 0x28c   : > { %5892 = vmatprep.mubr.msk.bf16.mxu1 %vm847_vm3, %v7011_v11 }
 0x293   : > { %5893 = vmatmul.mubr.msk.bf16.gmra.mrb[68].mxu1 %vm847_vm3, %v7020_v4 }
 0x294   : > { %5896 = vmatprep.mubr.msk.bf16.mxu1 %vm847_vm3, %v7026_v56 }
 0x29b   : > { %5897 = vmatmul.mubr.msk.bf16.gmra.mrb[56].mxu1 %vm847_vm3, %v2120_v6 }
 0x29c   : > { %5904 = vmatprep.mubr.msk.bf16.mxu1 %vm847_vm3, %v6874_v24  ;;  %v7053_v24 = vld [vmem:[#allocation3 + $0x40] sm:$0xff] }
 0x29d   : > { %v2478_v22 = vshrl.u32 %v7053_v24, 16  ;;  %v2663_v42 = vrot.slane %v7053_v24, 1 }
 0x29f   : > { %v2664_v43 = vsel %vm2103_vm1, %v7017_v3, %v2663_v42  ;;  %v2666_v53 = vsel %vm2103_vm1, %v2663_v42, %v2665_v45  ;;  %v3210_v3 = vrot.slane %v3195_v2, 1 }
 0x2a3   : > { %5905 = vmatmul.mubr.msk.bf16.vlgmr.msra.gmra.mrb[60].mxu1 %vm847_vm3, %v6881_v44 }
 0x2a4   : > { %5908 = vmatprep.mubr.msk.bf16.mxu1 %vm847_vm3, %v6891_v0  ;;  %5921 = vmatpush3.bf16.msra.mxu1 %v6413_v59 }
 0x2a5   : > { %5922 = vmatprep.subr.bf16.mxu1 %v6414_v10 }
 0x2a8   : > { %5923 = vmatpush3.bf16.msra.mxu1 %v6414_v10 }
 0x2a9   : > { %5940 = vmatprep.subr.bf16.mxu1 %v6415_v12 }
 0x2ab   : > { %5909 = vmatmul.mubr.msk.bf16.gmra.mrb[64].mxu1 %vm847_vm3, %v6900_v17 }
 0x2ac   : > { %5912 = vmatprep.mubr.msk.bf16.mxu1 %vm847_vm3, %v6910_v47 }
 0x2b3   : > { %5913 = vmatmul.mubr.msk.bf16.gmra.mrb[68].mxu1 %vm847_vm3, %v6920_v8 }
 0x2b4   : > { %5916 = vmatprep.mubr.msk.bf16.mxu1 %vm847_vm3, %v6932_v27 }
 0x2bb   : > { %5917 = vmatmul.mubr.msk.bf16.gmra.mrb[56].mxu1 %vm847_vm3, %v7053_v24 }
 0x2bc   : > { %5924 = vmatprep.mubr.msk.bf16.mxu1 %vm847_vm3, %v6886_v54  ;;  %v2474_v54 = vshll.u32 %v7053_v24, 16 }
 0x2be   : > { %v2476_v16 = vrot.slane %v2474_v54, 1 }
 0x2c0   : > { %v7078_v21 = vsel %vm1761_vm0, %v6943_v39, %v2476_v16  ;;  %v7083_v25 = vor.u32 %v2478_v22, %v2476_v16 }
 0x2c2   : > { %v2485_v32 = vsel %vm1761_vm0, %v7083_v25, %v2484_v26 }
 0x2c3   : > { %5925 = vmatmul.mubr.msk.bf16.vlgmr.msra.gmra.mrb[60].mxu1 %vm847_vm3, %v6895_v7 }
 0x2c4   : > { %5928 = vmatprep.mubr.msk.bf16.mxu1 %vm847_vm3, %v6905_v34  ;;  %5941 = vmatpush3.bf16.msra.mxu1 %v6415_v12 }
 0x2c5   : > { %5942 = vmatprep.subr.bf16.mxu1 %v6416_v13 }
 0x2c8   : > { %5943 = vmatpush3.bf16.msra.mxu1 %v6416_v13 }
 0x2c9   : > { %5960 = vmatprep.subr.bf16.mxu1 %v6417_v15 }
 0x2cb   : > { %5929 = vmatmul.mubr.msk.bf16.gmra.mrb[64].mxu1 %vm847_vm3, %v6915_v62 }
 0x2cc   : > { %5932 = vmatprep.mubr.msk.bf16.mxu1 %vm847_vm3, %v6926_v23 }
 0x2d3   : > { %5933 = vmatmul.mubr.msk.bf16.gmra.mrb[68].mxu1 %vm847_vm3, %v6938_v33 }
 0x2d4   : > { %5936 = vmatprep.mubr.msk.bf16.mxu1 %vm847_vm3, %v7078_v21 }
 0x2db   : > { %5937 = vmatmul.mubr.msk.bf16.gmra.mrb[56].mxu1 %vm847_vm3, %v2485_v32 }
 0x2dc   : > { %5944 = vmatprep.mubr.msk.bf16.mxu1 %vm847_vm3, %v2652_v29 }
 0x2de   : > { %v7091_v36 = vpop.f32.mrb[56].mxu0 }
 0x2df   : > { %v7093_v37 = vpop.f32.mrb[57].mxu0 }
 0x2e0   : > { %v7095_v38 = vpop.f32.mrb[58].mxu0 }
 0x2e1   : > { %v7097_v39 = vpop.f32.mrb[59].mxu0 }
 0x2e3   : > { %5945 = vmatmul.mubr.msk.bf16.vlgmr.msra.gmra.mrb[60].mxu1 %vm847_vm3, %v6995_v58 }
 0x2e4   : > { %5948 = vmatprep.mubr.msk.bf16.mxu1 %vm847_vm3, %v7006_v63  ;;  %5961 = vmatpush3.bf16.msra.mxu1 %v6417_v15 }
 0x2e5   : > { %5962 = vmatprep.subr.bf16.mxu1 %v6418_v40 }
 0x2e8   : > { %5963 = vmatpush3.bf16.msra.mxu1 %v6418_v40 }
 0x2e9   : > { %5980 = vmatprep.subr.bf16.mxu1 %v6419_v41 }
 0x2eb   : > { %5949 = vmatmul.mubr.msk.bf16.gmra.mrb[64].mxu1 %vm847_vm3, %v7011_v11 }
 0x2ec   : > { %5952 = vmatprep.mubr.msk.bf16.mxu1 %vm847_vm3, %v7020_v4 }
 0x2f3   : > { %5953 = vmatmul.mubr.msk.bf16.gmra.mrb[68].mxu1 %vm847_vm3, %v7026_v56 }
 0x2f4   : > { %5956 = vmatprep.mubr.msk.bf16.mxu1 %vm847_vm3, %v2664_v43 }
 0x2fb   : > { %5957 = vmatmul.mubr.msk.bf16.gmra.mrb[56].mxu1 %vm847_vm3, %v2666_v53  ;;  %v6426_v53 = vld [vmem:[%s7519_s5 + $0x38] sm:$0xff]  }
 0x2fc   : > { %5964 = vmatprep.mubr.msk.bf16.mxu1 %vm847_vm3, %v6881_v44  ;;  %v6421_v44 = vld [vmem:[%s7517_s3 + $0x80] sm:$0xff]  }
 0x2fe   : > { %v7123_v14 = vpop.f32.mrb[60].mxu0 }
 0x2ff   : > { %v7125_v46 = vpop.f32.mrb[61].mxu0 }
 0x300   : > { %v7127_v49 = vpop.f32.mrb[62].mxu0 }
 0x301   : > { %v7129_v50 = vpop.f32.mrb[63].mxu0 }
 0x303   : > { %5965 = vmatmul.mubr.msk.bf16.vlgmr.msra.gmra.mrb[60].mxu1 %vm847_vm3, %v6891_v0  ;;  %v2816_v0 = vld [vmem:[#allocation3 + $0x48] sm:$0xff] }
 0x304   : > { %5968 = vmatprep.mubr.msk.bf16.mxu1 %vm847_vm3, %v6900_v17  ;;  %5981 = vmatpush3.bf16.msra.mxu1 %v6419_v41  ;;  %v3038_v59 = vshrl.u32 %v2816_v0, 16  ;;  %v3223_v5 = vrot.slane %v2816_v0, 1 }
 0x305   : > { %5982 = vmatprep.subr.bf16.mxu1 %v6420_v51 }
 0x306   : > { %v3224_v6 = vsel %vm2103_vm1, %v2663_v42, %v3223_v5 }
 0x308   : > { %5983 = vmatpush3.bf16.msra.mxu1 %v6420_v51 }
 0x309   : > { %6000 = vmatprep.subr.bf16.mxu1 %v6421_v44 }
 0x30b   : > { %5969 = vmatmul.mubr.msk.bf16.gmra.mrb[64].mxu1 %vm847_vm3, %v6910_v47 }
 0x30c   : > { %5972 = vmatprep.mubr.msk.bf16.mxu1 %vm847_vm3, %v6920_v8  ;;  %v6422_v8 = vld [vmem:[%s7517_s3 + $0x88] sm:$0xff]  }
 0x313   : > { %5973 = vmatmul.mubr.msk.bf16.gmra.mrb[68].mxu1 %vm847_vm3, %v6932_v27  ;;  %v2972_v27 = vld [vmem:[#allocation3 + $0x50] sm:$0x1] }
 0x314   : > { %5976 = vmatprep.mubr.msk.bf16.mxu1 %vm847_vm3, %v7053_v24  ;;  %v3042_v60 = vshll.u32 %v2972_v27, 16 }
 0x316   : > { %v3044_v61 = vrot.slane %v3042_v60, 1 }
 0x31b   : > { %5977 = vmatmul.mubr.msk.bf16.gmra.mrb[56].mxu1 %vm847_vm3, %v2816_v0 }
 0x31c   : > { %5984 = vmatprep.mubr.msk.bf16.mxu1 %vm847_vm3, %v6895_v7  ;;  %v3034_v7 = vshll.u32 %v2816_v0, 16 }
 0x31e   : > { %v7152_v17 = vpop.f32.mrb[64].mxu0  ;;  %v3036_v58 = vrot.slane %v3034_v7, 1 }
 0x31f   : > { %v7154_v55 = vpop.f32.mrb[65].mxu0 }
 0x320   : > { %v7156_v47 = vpop.f32.mrb[66].mxu0 }
 0x321   : > { %v7158_v57 = vpop.f32.mrb[67].mxu0 }
 0x323   : > { %5985 = vmatmul.mubr.msk.bf16.vlgmr.msra.gmra.mrb[60].mxu1 %vm847_vm3, %v6905_v34  ;;  %v3037_v34 = vsel %vm1761_vm0, %v7083_v25, %v3036_v58 }
 0x324   : > { %5988 = vmatprep.mubr.msk.bf16.mxu1 %vm847_vm3, %v6915_v62  ;;  %6001 = vmatpush3.bf16.msra.mxu1 %v6421_v44  ;;  %v3040_v62 = vor.u32 %v3038_v59, %v3036_v58 }
 0x325   : > { %6002 = vmatprep.subr.bf16.mxu1 %v6422_v8 }
 0x328   : > { %6003 = vmatpush3.bf16.msra.mxu1 %v6422_v8 }
 0x32b   : > { %5989 = vmatmul.mubr.msk.bf16.gmra.mrb[64].mxu1 %vm847_vm3, %v6926_v23  ;;  %v3045_v23 = vsel %vm1761_vm0, %v3040_v62, %v3044_v61  ;;  %v5262_v62 = vsel %vm3442_vm9, 1.0, %v6483_v28 }
 0x32c   : > { %5992 = vmatprep.mubr.msk.bf16.mxu1 %vm847_vm3, %v6938_v33  ;;  %v3212_v33 = vsel %vm2103_vm1, %v3210_v3, %v6984_v52  ;;  %v3225_v52 = vrot.slane %v2972_v27, 1 }
 0x32e   : > { %v3226_v10 = vsel %vm2103_vm1, %v3223_v5, %v3225_v52  ;;  %v7238_v5 = vpack.c.bf16 %v5262_v62, %v5262_v62 }
 0x333   : > { %5993 = vmatmul.mubr.msk.bf16.gmra.mrb[68].mxu1 %vm847_vm3, %v7078_v21 }
 0x334   : > { %5996 = vmatprep.mubr.msk.bf16.mxu1 %vm847_vm3, %v3037_v34 }
 0x33b   : > { %5997 = vmatmul.mubr.msk.bf16.gmra.mrb[56].mxu1 %vm847_vm3, %v3045_v23 }
 0x33c   : > { %6004 = vmatprep.mubr.msk.bf16.mxu1 %vm847_vm3, %v3212_v33 }
 0x343   : > { %6005 = vmatmul.mubr.msk.bf16.vlgmr.msra.gmra.mrb[60].mxu1 %vm847_vm3, %v7006_v63 }
 0x344   : > { %6008 = vmatprep.mubr.msk.bf16.mxu1 %vm847_vm3, %v7011_v11  ;;  %v7197_v11 = vld [vmem:[%s7518_s4] ss:$0 sm:$0xff] }
 0x34b   : > { %6009 = vmatmul.mubr.msk.bf16.gmra.mrb[64].mxu1 %vm847_vm3, %v7020_v4 }
 0x34c   : > { %6012 = vmatprep.mubr.msk.bf16.mxu1 %vm847_vm3, %v7026_v56 }
 0x353   : > { %6013 = vmatmul.mubr.msk.bf16.gmra.mrb[68].mxu1 %vm847_vm3, %v2664_v43 }
 0x354   : > { %6016 = vmatprep.mubr.msk.bf16.mxu1 %vm847_vm3, %v3224_v6 }
 0x35b   : > { %6017 = vmatmul.mubr.msk.bf16.gmra.mrb[56].mxu1 %vm847_vm3, %v3226_v10  ;;  %vm3423_vm3 = vcmask 523264  }
 0x416   : > { %v6006_v63 = vpop.f32.mrb[60].mxu1 }
 0x417   : > { %v6204_v4 = vadd.f32 %v6006_v63, %v7091_v36  ;;  %v3297_v56 = vpop.f32.mrb[61].mxu1 }
 0x418   : > { %v6205_v12 = vadd.f32 %v3297_v56, %v7093_v37  ;;  %v6007_v24 = vpop.f32.mrb[62].mxu1 }
 0x419   : > { %v3385_v13 = vadd.f32 %v6204_v4, %v7197_v11  ;;  %v6206_v15 = vadd.f32 %v6007_v24, %v7095_v38  ;;  %v3300_v54 = vpop.f32.mrb[63].mxu1 }
 0x41a   : > { %v3383_v16 = vadd.f32 %v6205_v12, %v7197_v11  ;;  %v6207_v19 = vadd.f32 %v3300_v54, %v7097_v39 }
 0x41b   : > { %v3386_v20 = vadd.f32 %v6206_v15, %v7197_v11  ;;  %v3401_v22 = vmax.f32 %v3385_v13, 0.0 }
 0x41c   : > { %v3384_v21 = vadd.f32 %v6207_v19, %v7197_v11  ;;  %v3399_v26 = vmax.f32 %v3383_v16, 0.0 }
 0x41d   : > { %v3402_v25 = vmax.f32 %v3386_v20, 0.0 }
 0x41e   : > { %v3400_v30 = vmax.f32 %v3384_v21, 0.0  ;;  %v6010_v31 = vpop.f32.mrb[64].mxu1 }
 0x41f   : > { %v3416_v32 = vpack.c.bf16 %v3402_v25, %v3401_v22  ;;  %v6208_v29 = vadd.f32 %v6010_v31, %v7123_v14  ;;  %v3313_v36 = vpop.f32.mrb[65].mxu1  ;;  %v3449_v22 = vpack.c.bf16 %v5263_v35, %v5263_v35 }
 0x420   : > { %v3415_v37 = vpack.c.bf16 %v3400_v30, %v3399_v26  ;;  %v6209_v38 = vadd.f32 %v3313_v36, %v7125_v46  ;;  %v6011_v39 = vpop.f32.mrb[66].mxu1 }
 0x421   : > { %3425 = vst.msk [vmem:[#allocation4 + $0x8] sm:$0xff] %vm3423_vm3, %v3416_v32  ;;  %v3389_v40 = vadd.f32 %v6208_v29, %v7197_v11  ;;  %v6210_v41 = vadd.f32 %v6011_v39, %v7127_v49  ;;  %v3316_v42 = vpop.f32.mrb[67].mxu1 }
 0x422   : > { %3424 = vst.msk [vmem:[#allocation4] sm:$0xff] %vm3423_vm3, %v3415_v37  ;;  %v3387_v43 = vadd.f32 %v6209_v38, %v7197_v11  ;;  %v6211_v45 = vadd.f32 %v3316_v42, %v7129_v50  ;;  %v6423_v42 = vld [vmem:[%s7519_s5 + $0x20] sm:$0xff]  }
 0x423   : > { %v3390_v14 = vadd.f32 %v6210_v41, %v7197_v11  ;;  %v3405_v51 = vmax.f32 %v3389_v40, 0.0 }
 0x424   : > { %v3388_v46 = vadd.f32 %v6211_v45, %v7197_v11  ;;  %v3403_v49 = vmax.f32 %v3387_v43, 0.0  ;;  %v6424_v43 = vld [vmem:[%s7519_s5 + $0x28] sm:$0xff]   ;;  %v6425_v45 = vld [vmem:[%s7519_s5 + $0x30] sm:$0xff]  }
 0x425   : > { %v3406_v44 = vmax.f32 %v3390_v14, 0.0  ;;  %v7317_v14 = vld [vmem:[%s7519_s5] sm:$0xff]  }
 0x426   : > { %v3404_v0 = vmax.f32 %v3388_v46, 0.0  ;;  %v6014_v50 = vpop.f32.mrb[68].mxu1 }
 0x427   : > { %v3418_v8 = vpack.c.bf16 %v3406_v44, %v3405_v51  ;;  %v6212_v7 = vadd.f32 %v6014_v50, %v7152_v17  ;;  %v3329_v27 = vpop.f32.mrb[69].mxu1 }
 0x428   : > { %v3417_v58 = vpack.c.bf16 %v3404_v0, %v3403_v49  ;;  %v6213_v59 = vadd.f32 %v3329_v27, %v7154_v55  ;;  %v6015_v60 = vpop.f32.mrb[70].mxu1  ;;  %v3451_v34 = vld [vmem:[#allocation4 + $0x8] sm:$0xff] }
 0x429   : > { %3427 = vst.msk [vmem:[#allocation4 + $0x18] sm:$0xff] %vm3423_vm3, %v3418_v8  ;;  %v3393_v61 = vadd.f32 %v6212_v7, %v7197_v11  ;;  %v6214_v18 = vadd.f32 %v6015_v60, %v7156_v47  ;;  %v3332_v2 = vpop.f32.mrb[71].mxu1  ;;  %v3450_v23 = vld [vmem:[#allocation4] sm:$0xff] }
 0x42a   : > { %3426 = vst.msk [vmem:[#allocation4 + $0x10] sm:$0xff] %vm3423_vm3, %v3417_v58  ;;  %v3391_v17 = vadd.f32 %v6213_v59, %v7197_v11  ;;  %v6215_v3 = vadd.f32 %v3332_v2, %v7158_v57  ;;  %v3452_v33 = vmax.bf16 %v3451_v34, %v3450_v23 }
 0x42b   : > { %v3394_v55 = vadd.f32 %v6214_v18, %v7197_v11  ;;  %v3409_v52 = vmax.f32 %v3393_v61, 0.0 }
 0x42c   : > { %v3392_v6 = vadd.f32 %v6215_v3, %v7197_v11  ;;  %6021 = vmatpush3.bf16.msra.mxu0 %v3452_v33  ;;  %v3407_v47 = vmax.f32 %v3391_v17, 0.0 }
 0x42d   : > { %v3410_v10 = vmax.f32 %v3394_v55, 0.0  ;;  %6026 = vmatprep.subr.bf16.mxu0 %v6483_v28 }
 0x42e   : > { %v3408_v57 = vmax.f32 %v3392_v6, 0.0  ;;  %v6018_v63 = vpop.f32.mrb[56].mxu1 }
 0x42f   : > { %v3420_v4 = vpack.c.bf16 %v3410_v10, %v3409_v52  ;;  %v3397_v56 = vadd.f32 %v6018_v63, %v7197_v11  ;;  %v3345_v12 = vpop.f32.mrb[57].mxu1  ;;  %6023 = vmatmul.mubr.msk.bf16.vlgmr.msra.gmra.mrb[68].mxu0 %vm3453_vm4, %v7238_v5  ;;  %v3801_v63 = vld [vmem:[#allocation5] sm:$0xf] }
 0x430   : > { %v3419_v24 = vpack.c.bf16 %v3408_v57, %v3407_v47  ;;  %v3395_v13 = vadd.f32 %v7197_v11, %v3345_v12  ;;  %v6019_v15 = vpop.f32.mrb[58].mxu1  ;;  %6027 = vmatpush3.bf16.msra.mxu0 %v3452_v33  ;;  %6028 = vmatprep.mubr.msk.bf16.mxu0 %vm6484_vm2, %v6483_v28  ;;  %v3544_v26 = vld [vmem:[#allocation4 + $0x18] sm:$0xff] }
 0x431   : > { %3429 = vst.msk [vmem:[#allocation4 + $0x28] sm:$0xff] %vm3423_vm3, %v3420_v4  ;;  %v3398_v54 = vadd.f32 %v6019_v15, %v7197_v11  ;;  %v3348_v16 = vpop.f32.mrb[59].mxu1  ;;  %6032 = vmatprep.subr.bf16.mxu0 %v6483_v28  ;;  %v3413_v20 = vmax.f32 %v3397_v56, 0.0  ;;  %v3543_v25 = vld [vmem:[#allocation4 + $0x10] sm:$0xff] }
 0x432   : > { %3428 = vst.msk [vmem:[#allocation4 + $0x20] sm:$0xff] %vm3423_vm3, %v3419_v24  ;;  %v3396_v19 = vadd.f32 %v7197_v11, %v3348_v16  ;;  %v3411_v30 = vmax.f32 %v3395_v13, 0.0  ;;  %v3545_v36 = vmax.bf16 %v3544_v26, %v3543_v25 }
 0x433   : > { %v3414_v21 = vmax.f32 %v3398_v54, 0.0 }
 0x434   : > { %v3412_v31 = vmax.f32 %v3396_v19, 0.0 }
 0x435   : > { %v3422_v32 = vpack.c.bf16 %v3414_v21, %v3413_v20 }
 0x436   : > { %v3421_v29 = vpack.c.bf16 %v3412_v31, %v3411_v30 }
 0x437   : > { %3431 = vst.msk [vmem:[#allocation4 + $0x38] sm:$0xff] %vm3423_vm3, %v3422_v32  ;;  %6029 = vmatmul.mubr.msk.bf16.vlgmr.msra.gmra.mrb[72].mxu0 %vm3453_vm4, %v3449_v22 }
 0x438   : > { %3430 = vst.msk [vmem:[#allocation4 + $0x30] sm:$0xff] %vm3423_vm3, %v3421_v29  ;;  %6033 = vmatpush3.bf16.msra.mxu0 %v3545_v36  ;;  %6034 = vmatprep.mubr.msk.bf16.mxu0 %vm6484_vm2, %v6483_v28  ;;  %v3630_v37 = vld [vmem:[#allocation4 + $0x28] sm:$0xff] }
 0x439   : > { %6038 = vmatprep.subr.bf16.mxu0 %v6483_v28  ;;  %v3629_v11 = vld [vmem:[#allocation4 + $0x20] sm:$0xff] }
 0x43a   : > { %v3631_v38 = vmax.bf16 %v3630_v37, %v3629_v11 }
 0x43e   : > { %v3716_v40 = vld [vmem:[#allocation4 + $0x38] sm:$0xff] }
 0x43f   : > { %6035 = vmatmul.mubr.msk.bf16.vlgmr.msra.gmra.mrb[76].mxu0 %vm3453_vm4, %v7238_v5  ;;  %v3715_v39 = vld [vmem:[#allocation4 + $0x30] sm:$0xff] }
 0x440   : > { %6039 = vmatpush3.bf16.msra.mxu0 %v3545_v36  ;;  %6040 = vmatprep.mubr.msk.bf16.mxu0 %vm6484_vm2, %v6483_v28  ;;  %v3717_v41 = vmax.bf16 %v3716_v40, %v3715_v39 }
 0x441   : > { %6044 = vmatprep.subr.bf16.mxu0 %v6483_v28 }
 0x447   : > { %6041 = vmatmul.mubr.msk.bf16.vlgmr.msra.gmra.mrb[80].mxu0 %vm3453_vm4, %v3449_v22 }
 0x448   : > { %6045 = vmatpush3.bf16.msra.mxu0 %v3631_v38  ;;  %6046 = vmatprep.mubr.msk.bf16.mxu0 %vm6484_vm2, %v6483_v28 }
 0x449   : > { %6050 = vmatprep.subr.bf16.mxu0 %v6483_v28 }
 0x44f   : > { %6047 = vmatmul.mubr.msk.bf16.vlgmr.msra.gmra.mrb[84].mxu0 %vm3453_vm4, %v7238_v5 }
 0x450   : > { %6051 = vmatpush3.bf16.msra.mxu0 %v3631_v38  ;;  %6052 = vmatprep.mubr.msk.bf16.mxu0 %vm6484_vm2, %v6483_v28 }
 0x451   : > { %6056 = vmatprep.subr.bf16.mxu0 %v6483_v28 }
 0x457   : > { %6053 = vmatmul.mubr.msk.bf16.vlgmr.msra.gmra.mrb[88].mxu0 %vm3453_vm4, %v3449_v22 }
 0x458   : > { %6057 = vmatpush3.bf16.msra.mxu0 %v3717_v41  ;;  %6058 = vmatprep.mubr.msk.bf16.mxu0 %vm6484_vm2, %v6483_v28 }
 0x459   : > { %6062 = vmatprep.subr.bf16.mxu0 %v6483_v28 }
 0x45f   : > { %6059 = vmatmul.mubr.msk.bf16.vlgmr.msra.gmra.mrb[92].mxu0 %vm3453_vm4, %v7238_v5 }
 0x460   : > { %6063 = vmatpush3.bf16.msra.mxu0 %v3717_v41  ;;  %6064 = vmatprep.mubr.msk.bf16.mxu0 %vm6484_vm2, %v6483_v28 }
 0x461   : > { %6068 = vmatprep.subr.bf16.mxu0 %v6423_v42 }
 0x467   : > { %6065 = vmatmul.mubr.msk.bf16.vlgmr.msra.gmra.mrb[96].mxu0 %vm3453_vm4, %v3449_v22 }
 0x468   : > { %6069 = vmatpush3.bf16.msra.mxu0 %v6423_v42 }
 0x469   : > { %6070 = vmatprep.subr.bf16.mxu0 %v6424_v43 }
 0x46c   : > { %6071 = vmatpush3.bf16.msra.mxu0 %v6424_v43 }
 0x46d   : > { %6072 = vmatprep.subr.bf16.mxu0 %v6425_v45 }
 0x470   : > { %6073 = vmatpush3.bf16.msra.mxu0 %v6425_v45 }
 0x471   : > { %6074 = vmatprep.subr.bf16.mxu0 %v6426_v53 }
 0x474   : > { %6075 = vmatpush3.bf16.msra.mxu0 %v6426_v53  ;;  %v6431_v53 = vld [vmem:[%s7519_s5 + $0x8] sm:$0xff]  }
 0x475   : > { %6080 = vmatprep.subr.bf16.mxu0 %v7317_v14 }
 0x502   : > { %v3491_v46 = vpop.f32.mrb[68].mxu0 }
 0x503   : > { %v6024_v51 = vpop.f32.mrb[69].mxu0 }
 0x504   : > { %v3494_v44 = vpop.f32.mrb[70].mxu0  ;;  %v6432_v51 = vld [vmem:[%s7519_s5 + $0x10] sm:$0xff]  }
 0x505   : > { %v6025_v49 = vpop.f32.mrb[71].mxu0  ;;  %v6433_v44 = vld [vmem:[%s7519_s5 + $0x18] sm:$0xff]  }
 0x506   : > { %v4012_v49 = vld [vmem:[#allocation5] sm:$0xe] }
 0x50a   : > { %v3534_v0 = vpop.f32.mrb[72].mxu0 }
 0x50b   : > { %v3540_v50 = vmax.f32 %v3491_v46, %v3534_v0  ;;  %v6030_v8 = vpop.f32.mrb[73].mxu0 }
 0x50c   : > { %v3537_v7 = vpop.f32.mrb[74].mxu0 }
 0x50d   : > { %v3541_v27 = vpack.c.bf16 %v3540_v50, %v3540_v50  ;;  %v6031_v58 = vpop.f32.mrb[75].mxu0  ;;  %v6436_v7 = vld [vmem:[%s7519_s5 + $0x48] sm:$0xff]  }
 0x50e   : > { %v6437_v58 = vld [vmem:[%s7519_s5 + $0x50] sm:$0xff]  }
 0x50f   : > { %3542 = vst.msk [vmem:[#allocation5 + $0x4] sm:$0xf] %vm3432_vm10, %v3541_v27 }
 0x512   : > { %v3580_v59 = vpop.f32.mrb[76].mxu0 }
 0x513   : > { %v6036_v60 = vpop.f32.mrb[77].mxu0 }
 0x514   : > { %v3583_v34 = vpop.f32.mrb[78].mxu0  ;;  %v6439_v60 = vld [vmem:[%s7519_s5 + $0x60] sm:$0xff]  }
 0x515   : > { %v6037_v62 = vpop.f32.mrb[79].mxu0 }
 0x516   : > { %v7322_v4 = vld [vmem:[#allocation5 + $0x4] sm:$0xf]  ;;  %v6441_v62 = vld [vmem:[%s7519_s5 + $0x68] sm:$0xff]  }
 0x517   : > { %v5280_v24 = vcombine.low %v3801_v63, %v7322_v4  ;;  %v5303_v0 = vcombine.low %v4012_v49, %v7322_v4  ;;  %v6461_v49 = vld [vmem:[%s7519_s5 + $0xd8] sm:$0xff]  }
 0x519   : > { %v3839_v35 = vshll.u32 %v5280_v24, 16  ;;  %v3837_v25 = vshrl.u32 %v5280_v24, 16  ;;  %v4025_v8 = vrot.slane %v5303_v0, 1 }
 0x51a   : > { %v3620_v61 = vpop.f32.mrb[80].mxu0 }
 0x51b   : > { %v3626_v18 = vmax.f32 %v3580_v59, %v3620_v61  ;;  %v6042_v2 = vpop.f32.mrb[81].mxu0  ;;  %v3841_v22 = vrot.slane %v3839_v35, 1  ;;  %v6438_v59 = vld [vmem:[%s7519_s5 + $0x58] sm:$0xff]   ;;  %v6449_v35 = vld [vmem:[%s7519_s5 + $0x90] sm:$0xff]  }
 0x51c   : > { %v3623_v23 = vpop.f32.mrb[82].mxu0 }
 0x51d   : > { %v3627_v17 = vpack.c.bf16 %v3626_v18, %v3626_v18  ;;  %v6043_v3 = vpop.f32.mrb[83].mxu0  ;;  %v3842_v32 = vor.u32 %v3841_v22, %v3837_v25  ;;  %v4210_v23 = vld [vmem:[#allocation5 + $0x4] sm:$0xf]  ;;  %v6452_v22 = vld [vmem:[%s7519_s5 + $0xa0] sm:$0xff]  }
 0x51e   : > { %v6442_v3 = vld [vmem:[%s7519_s5 + $0x70] sm:$0xff]  }
 0x51f   : > { %3628 = vst.msk [vmem:[#allocation5 + $0x8] sm:$0xf] %vm3432_vm10, %v3627_v17 }
 0x522   : > { %v3666_v33 = vpop.f32.mrb[84].mxu0 }
 0x523   : > { %v6048_v55 = vpop.f32.mrb[85].mxu0 }
 0x524   : > { %v3669_v5 = vpop.f32.mrb[86].mxu0 }
 0x525   : > { %v6049_v6 = vpop.f32.mrb[87].mxu0 }
 0x526   : > { %v7326_v19 = vld [vmem:[#allocation5 + $0x8] sm:$0xf]  ;;  %v6443_v6 = vld [vmem:[%s7519_s5 + $0x78] sm:$0xff]  }
 0x527   : > { %v5318_v18 = vcombine.low %v7322_v4, %v7326_v19  ;;  %v7373_v2 = vld [vmem:[#allocation5 + $0x8] sm:$0xf] }
 0x52a   : > { %v3706_v52 = vpop.f32.mrb[88].mxu0 }
 0x52b   : > { %v3712_v10 = vmax.f32 %v3666_v33, %v3706_v52  ;;  %v6054_v47 = vpop.f32.mrb[89].mxu0  ;;  %v5334_v33 = vcombine.low %v4210_v23, %v7373_v2 }
 0x52c   : > { %v3709_v57 = vpop.f32.mrb[90].mxu0  ;;  %v6445_v47 = vld [vmem:[%s7519_s5 + $0x80] sm:$0xff]  }
 0x52d   : > { %v3713_v56 = vpack.c.bf16 %v3712_v10, %v3712_v10  ;;  %v6055_v12 = vpop.f32.mrb[91].mxu0  ;;  %v4240_v52 = vshll.u32 %v5334_v33, 16  ;;  %v4238_v4 = vshrl.u32 %v5334_v33, 16  ;;  %v6470_v33 = vld [vmem:[%s7519_s5 + $0x100] sm:$0xff]  }
 0x52f   : > { %3714 = vst.msk [vmem:[#allocation5 + $0xc] sm:$0xf] %vm3432_vm10, %v3713_v56  ;;  %v4242_v57 = vrot.slane %v4240_v52, 1 }
 0x532   : > { %v3752_v13 = vpop.f32.mrb[92].mxu0 }
 0x533   : > { %v6060_v15 = vpop.f32.mrb[93].mxu0 }
 0x534   : > { %v3755_v54 = vpop.f32.mrb[94].mxu0 }
 0x535   : > { %v6061_v16 = vpop.f32.mrb[95].mxu0  ;;  %v6451_v54 = vld [vmem:[#allocation5 + $0x14] ss:$0 sps:$4 sm:$0x11]  }
 0x536   : > { %v7328_v20 = vld [vmem:[#allocation5 + $0xc] sm:$0xf]  ;;  %v6450_v16 = vld [vmem:[%s7519_s5 + $0x98] sm:$0xff]  }
 0x537   : > { %v5281_v21 = vcombine.low %v7326_v19, %v7328_v20  ;;  %v7383_v55 = vld [vmem:[#allocation5 + $0xc] sm:$0xf]  ;;  %v4253_v19 = vshll.u32 %v6451_v54, 16 }
 0x539   : > { %v3844_v26 = vshll.u32 %v5281_v21, 16  ;;  %v3848_v41 = vshrl.u32 %v5281_v21, 16  ;;  %v4026_v50 = vrot.slane %v5281_v21, 1 }
 0x53a   : > { %v3792_v30 = vpop.f32.mrb[96].mxu0 }
 0x53b   : > { %v3798_v31 = vmax.f32 %v3752_v13, %v3792_v30  ;;  %v3846_v29 = vrot.slane %v3844_v26, 1  ;;  %v6066_v36 = vpop.f32.mrb[97].mxu0  ;;  %v4027_v27 = vsel %vm2103_vm1, %v4025_v8, %v4026_v50  ;;  %v6448_v13 = vld [vmem:[%s7519_s5 + $0x88] sm:$0xff]   ;;  %v4255_v30 = vrot.slane %v4253_v19, 1 }
 0x53c   : > { %v3795_v11 = vpop.f32.mrb[98].mxu0 }
 0x53d   : > { %v3799_v37 = vpack.c.bf16 %v3798_v31, %v3798_v31  ;;  %v3847_v38 = vsel %vm1761_vm0, %v3842_v32, %v3846_v29  ;;  %v6067_v39 = vpop.f32.mrb[99].mxu0  ;;  %v3850_v43 = vor.u32 %v3848_v41, %v3846_v29  ;;  %v6454_v29 = vld [vmem:[%s7519_s5 + $0xa8] sm:$0xff]  }
 0x53e   : > { %6076 = vmatprep.mubr.msk.bf16.mxu0 %vm3423_vm3, %v3847_v38  ;;  %v6456_v38 = vld [vmem:[%s7519_s5 + $0xb8] sm:$0xff]   ;;  %v6457_v39 = vld [vmem:[%s7519_s5 + $0xc0] sm:$0xff]   ;;  %v6459_v41 = vld [vmem:[%s7519_s5 + $0xc8] sm:$0xff]  }
 0x53f   : > { %3800 = vst.msk [vmem:[#allocation5 + $0x10] sm:$0xf] %vm3432_vm10, %v3799_v37  ;;  %v6455_v37 = vld [vmem:[%s7519_s5 + $0xb0] sm:$0xff]  }
 0x546   : > { %v6430_v40 = vld [vmem:[#allocation5 + $0x10] ss:$0 sps:$4 sm:$0x11]  }
 0x547   : > { %v3852_v42 = vshll.u32 %v6430_v40, 16  ;;  %v4028_v34 = vrot.slane %v6430_v40, 1  ;;  %v7377_v17 = vld [vmem:[#allocation5 + $0x10] sm:$0xf]  ;;  %v4356_v40 = vrot.slane %v6451_v54, 1 }
 0x548   : > { %v5335_v5 = vcombine.low %v7383_v55, %v7377_v17  ;;  %v4113_v63 = vld [vmem:[#allocation5 + $0x10] sm:$0xf] }
 0x549   : > { %v3854_v45 = vrot.slane %v3852_v42, 1  ;;  %v4029_v61 = vsel %vm2103_vm1, %v4026_v50, %v4028_v34  ;;  %v5319_v12 = vcombine.low %v7328_v20, %v4113_v63  ;;  %v6463_v50 = vld [vmem:[%s7519_s5 + $0xe0] sm:$0xff]   ;;  %v6466_v34 = vld [vmem:[%s7519_s5 + $0xe8] sm:$0xff]  }
 0x54a   : > { %v4245_v10 = vshll.u32 %v5335_v5, 16  ;;  %v4249_v20 = vshrl.u32 %v5335_v5, 16  ;;  %v4354_v31 = vrot.slane %v5335_v5, 1 }
 0x54b   : > { %v3855_v46 = vsel %vm1761_vm0, %v3850_v43, %v3854_v45  ;;  %v5366_v43 = vcombine.low %v7373_v2, %v7383_v55  ;;  %v4539_v45 = vld [vmem:[#allocation5 + $0xc] sm:$0xf] }
 0x54c   : > { %6077 = vmatmul.mubr.msk.bf16.vlgmr.msra.gmra.mrb[100].mxu0 %vm3423_vm3, %v3855_v46  ;;  %v4247_v56 = vrot.slane %v4245_v10, 1  ;;  %v4357_v42 = vsel %vm2103_vm1, %v4354_v31, %v4356_v40  ;;  %v6460_v46 = vld [vmem:[%s7519_s5 + $0xd0] sm:$0xff]  }
 0x54d   : > { %6081 = vmatpush3.bf16.msra.mxu0 %v7317_v14  ;;  %6088 = vmatprep.mubr.msk.bf16.mxu0 %vm3423_vm3, %v5280_v24  ;;  %v6434_v14 = vld [vmem:[%s7519_s5 + $0x40] sm:$0xff]   ;;  %v4243_v24 = vor.u32 %v4242_v57, %v4238_v4  ;;  %v6473_v4 = vld [vmem:[%s7519_s5 + $0x110] sm:$0xff]  }
 0x54e   : > { %6082 = vmatprep.subr.bf16.mxu0 %v6431_v53  ;;  %v4251_v26 = vor.u32 %v4249_v20, %v4247_v56 }
 0x54f   : > { %v4248_v15 = vsel %vm1761_vm0, %v4243_v24, %v4247_v56  ;;  %v6474_v56 = vld [vmem:[%s7519_s5 + $0x118] sm:$0xff]  }
 0x550   : > { %v4256_v36 = vsel %vm1761_vm0, %v4251_v26, %v4255_v30 }
 0x551   : > { %6083 = vmatpush3.bf16.msra.mxu0 %v6431_v53  ;;  %v4538_v53 = vld [vmem:[#allocation5 + $0x8] sm:$0xf] }
 0x552   : > { %6084 = vmatprep.subr.bf16.mxu0 %v6432_v51 }
 0x555   : > { %6085 = vmatpush3.bf16.msra.mxu0 %v6432_v51  ;;  %v5382_v51 = vcombine.low %v4538_v53, %v4539_v45 }
 0x556   : > { %6086 = vmatprep.subr.bf16.mxu0 %v6433_v44 }
 0x559   : > { %6087 = vmatpush3.bf16.msra.mxu0 %v6433_v44  ;;  %v6465_v44 = vld [vmem:[#allocation5 + $0x10] sm:$0xff]  }
 0x55a   : > { %6092 = vmatprep.subr.bf16.mxu0 %v6434_v14  ;;  %v4573_v0 = vshll.u32 %v6465_v44, 16  ;;  %v4682_v52 = vrot.slane %v6465_v44, 1 }
 0x55c   : > { %6089 = vmatmul.mubr.msk.bf16.vlgmr.msra.gmra.mrb[100].mxu0 %vm3423_vm3, %v5281_v21  ;;  %v4340_v21 = vld [vmem:[#allocation5 + $0x4] sm:$0xe] }
 0x55d   : > { %6093 = vmatpush3.bf16.msra.mxu0 %v6434_v14  ;;  %6100 = vmatprep.mubr.msk.bf16.mxu0 %vm3423_vm3, %v4027_v27  ;;  %v5351_v25 = vcombine.low %v4340_v21, %v7373_v2  ;;  %v4568_v14 = vshll.u32 %v5382_v51, 16  ;;  %v4566_v27 = vshrl.u32 %v5382_v51, 16  ;;  %v6468_v2 = vld [vmem:[%s7519_s5 + $0xf8] sm:$0xff]  }
 0x55e   : > { %6094 = vmatprep.subr.bf16.mxu0 %v6436_v7 }
 0x55f   : > { %v4353_v32 = vrot.slane %v5351_v25, 1  ;;  %v4570_v8 = vrot.slane %v4568_v14, 1 }
 0x561   : > { %6095 = vmatpush3.bf16.msra.mxu0 %v6436_v7  ;;  %v4355_v11 = vsel %vm2103_vm1, %v4353_v32, %v4354_v31  ;;  %v4441_v7 = vld [vmem:[#allocation5 + $0x14] sm:$0xf] }
 0x562   : > { %6096 = vmatprep.subr.bf16.mxu0 %v6437_v58 }
 0x565   : > { %6097 = vmatpush3.bf16.msra.mxu0 %v6437_v58  ;;  %v4575_v58 = vrot.slane %v4573_v0, 1 }
 0x566   : > { %6098 = vmatprep.subr.bf16.mxu0 %v6438_v59 }
 0x569   : > { %6099 = vmatpush3.bf16.msra.mxu0 %v6438_v59  ;;  %v5367_v59 = vcombine.low %v7377_v17, %v4441_v7  ;;  %v4577_v17 = vshrl.u32 %v6465_v44, 16 }
 0x56a   : > { %6104 = vmatprep.subr.bf16.mxu0 %v6439_v60 }
 0x56b   : > { %v4579_v5 = vor.u32 %v4577_v17, %v4575_v58 }
 0x56c   : > { %6101 = vmatmul.mubr.msk.bf16.vlgmr.msra.gmra.mrb[100].mxu0 %vm3423_vm3, %v4029_v61  ;;  %v6467_v61 = vld [vmem:[%s7519_s5 + $0xf0] sm:$0xff]  }
 0x56d   : > { %6105 = vmatpush3.bf16.msra.mxu0 %v6439_v60  ;;  %6112 = vmatprep.mubr.msk.bf16.mxu0 %vm3423_vm3, %v5318_v18  ;;  %v4571_v60 = vor.u32 %v4570_v8, %v4566_v27  ;;  %v6469_v18 = vld [vmem:[#allocation5 + $0x18] ss:$0 sps:$4 sm:$0x11]  }
 0x56e   : > { %6106 = vmatprep.subr.bf16.mxu0 %v6441_v62  ;;  %v4581_v23 = vshll.u32 %v6469_v18, 16 }
 0x571   : > { %6107 = vmatpush3.bf16.msra.mxu0 %v6441_v62  ;;  %v4576_v62 = vsel %vm1761_vm0, %v4571_v60, %v4575_v58 }
 0x572   : > { %6108 = vmatprep.subr.bf16.mxu0 %v6442_v3 }
 0x575   : > { %6109 = vmatpush3.bf16.msra.mxu0 %v6442_v3  ;;  %v4668_v3 = vld [vmem:[#allocation5 + $0x8] sm:$0xe] }
 0x576   : > { %6110 = vmatprep.subr.bf16.mxu0 %v6443_v6  ;;  %v5399_v55 = vcombine.low %v4668_v3, %v4539_v45 }
 0x578   : > { %v4681_v10 = vrot.slane %v5399_v55, 1 }
 0x579   : > { %6111 = vmatpush3.bf16.msra.mxu0 %v6443_v6  ;;  %v4583_v6 = vrot.slane %v4581_v23, 1 }
 0x57a   : > { %6116 = vmatprep.subr.bf16.mxu0 %v6445_v47  ;;  %v4683_v63 = vsel %vm2103_vm1, %v4681_v10, %v4682_v52 }
 0x57b   : > { %v4584_v57 = vsel %vm1761_vm0, %v4579_v5, %v4583_v6 }
 0x57c   : > { %6113 = vmatmul.mubr.msk.bf16.vlgmr.msra.gmra.mrb[100].mxu0 %vm3423_vm3, %v5319_v12  ;;  %v4684_v12 = vrot.slane %v6469_v18, 1 }
 0x57d   : > { %6117 = vmatpush3.bf16.msra.mxu0 %v6445_v47  ;;  %6124 = vmatprep.mubr.msk.bf16.mxu0 %vm3423_vm3, %v4248_v15  ;;  %v6472_v47 = vld [vmem:[%s7519_s5 + $0x108] sm:$0xff]  }
 0x57e   : > { %6118 = vmatprep.subr.bf16.mxu0 %v6448_v13  ;;  %v4685_v24 = vsel %vm2103_vm1, %v4682_v52, %v4684_v12 }
 0x581   : > { %6119 = vmatpush3.bf16.msra.mxu0 %v6448_v13  ;;  %v5406_v13 = vld [vmem:[%s7520_s6] ss:$0 sm:$0xff] }
 0x582   : > { %6120 = vmatprep.subr.bf16.mxu0 %v6449_v35 }
 0x585   : > { %6121 = vmatpush3.bf16.msra.mxu0 %v6449_v35 }
 0x586   : > { %6122 = vmatprep.subr.bf16.mxu0 %v6450_v16 }
 0x589   : > { %6123 = vmatpush3.bf16.msra.mxu0 %v6450_v16 }
 0x58a   : > { %6128 = vmatprep.subr.bf16.mxu0 %v6452_v22 }
 0x58c   : > { %6125 = vmatmul.mubr.msk.bf16.vlgmr.msra.gmra.mrb[100].mxu0 %vm3423_vm3, %v4256_v36  ;;  %v4792_v36 = vmul.u32 2, %v6617_v48 }
 0x58d   : > { %6129 = vmatpush3.bf16.msra.mxu0 %v6452_v22  ;;  %6136 = vmatprep.mubr.msk.bf16.mxu0 %vm3423_vm3, %v4355_v11 }
 0x58e   : > { %6130 = vmatprep.subr.bf16.mxu0 %v6454_v29  ;;  %vm4793_vm12 = vcmp.eq.s32.totalorder %v6634_v9, %v4792_v36 }
 0x58f   : > { %vm4794_vm13 = vmand %vm4793_vm12, %vm4790_vm11 }
 0x590   : > { %v5407_v40 = vsel %vm4794_vm13, 1.0, %v6483_v28 }
 0x591   : > { %6131 = vmatpush3.bf16.msra.mxu0 %v6454_v29 }
 0x592   : > { %6132 = vmatprep.subr.bf16.mxu0 %v6455_v37 }
 0x595   : > { %6133 = vmatpush3.bf16.msra.mxu0 %v6455_v37  ;;  %v4798_v37 = vadd.s32 1, %v4792_v36 }
 0x596   : > { %6134 = vmatprep.subr.bf16.mxu0 %v6456_v38 }
 0x597   : > { %vm4799_vm14 = vcmp.eq.s32.totalorder %v6634_v9, %v4798_v37 }
 0x598   : > { %vm4800_vm0 = vmand %vm4799_vm14, %vm4790_vm11 }
 0x599   : > { %6135 = vmatpush3.bf16.msra.mxu0 %v6456_v38  ;;  %v5408_v9 = vsel %vm4800_vm0, 1.0, %v6483_v28 }
 0x59a   : > { %6140 = vmatprep.subr.bf16.mxu0 %v6457_v39  ;;  %v4803_v51 = vpack.c.bf16 %v5408_v9, %v5408_v9 }
 0x59c   : > { %6137 = vmatmul.mubr.msk.bf16.vlgmr.msra.gmra.mrb[100].mxu0 %vm3423_vm3, %v4357_v42 }
 0x59d   : > { %6141 = vmatpush3.bf16.msra.mxu0 %v6457_v39  ;;  %6148 = vmatprep.mubr.msk.bf16.mxu0 %vm3423_vm3, %v5366_v43  ;;  %v4797_v43 = vpack.c.bf16 %v5407_v40, %v5407_v40 }
 0x59e   : > { %6142 = vmatprep.subr.bf16.mxu0 %v6459_v41 }
 0x5a1   : > { %6143 = vmatpush3.bf16.msra.mxu0 %v6459_v41 }
 0x5a2   : > { %6144 = vmatprep.subr.bf16.mxu0 %v6460_v46 }
 0x5a5   : > { %6145 = vmatpush3.bf16.msra.mxu0 %v6460_v46 }
 0x5a6   : > { %6146 = vmatprep.subr.bf16.mxu0 %v6461_v49 }
 0x5a9   : > { %6147 = vmatpush3.bf16.msra.mxu0 %v6461_v49 }
 0x5aa   : > { %6152 = vmatprep.subr.bf16.mxu0 %v6463_v50 }
 0x5ac   : > { %6149 = vmatmul.mubr.msk.bf16.vlgmr.msra.gmra.mrb[100].mxu0 %vm3423_vm3, %v5367_v59 }
 0x5ad   : > { %6153 = vmatpush3.bf16.msra.mxu0 %v6463_v50  ;;  %6160 = vmatprep.mubr.msk.bf16.mxu0 %vm3423_vm3, %v4576_v62 }
 0x5ae   : > { %6154 = vmatprep.subr.bf16.mxu0 %v6466_v34 }
 0x5b1   : > { %6155 = vmatpush3.bf16.msra.mxu0 %v6466_v34 }
 0x5b2   : > { %6156 = vmatprep.subr.bf16.mxu0 %v6467_v61 }
 0x5b5   : > { %6157 = vmatpush3.bf16.msra.mxu0 %v6467_v61  ;;  %v6486_v61 = vmov 1983009808  }
 0x5b6   : > { %6158 = vmatprep.subr.bf16.mxu0 %v6468_v2  ;;  %v4996_v18 = vunpack.c.l.s4 %v6486_v61 }
 0x5b8   : > { %v4997_v17 = vunpack.c.0.s8 %v4996_v18 }
 0x5b9   : > { %6159 = vmatpush3.bf16.msra.mxu0 %v6468_v2 }
 0x5ba   : > { %6164 = vmatprep.subr.bf16.mxu0 %v6470_v33 }
 0x5bc   : > { %6161 = vmatmul.mubr.msk.bf16.vlgmr.msra.gmra.mrb[100].mxu0 %vm3423_vm3, %v4584_v57 }
 0x5bd   : > { %6165 = vmatpush3.bf16.msra.mxu0 %v6470_v33  ;;  %6172 = vmatprep.mubr.msk.bf16.mxu0 %vm3423_vm3, %v4683_v63  ;;  %v5000_v33 = vsub.s32 %v4997_v17, %v6617_v48 }
 0x5be   : > { %6166 = vmatprep.subr.bf16.mxu0 %v6472_v47 }
 0x5c1   : > { %6167 = vmatpush3.bf16.msra.mxu0 %v6472_v47 }
 0x5c2   : > { %6168 = vmatprep.subr.bf16.mxu0 %v6473_v4 }
 0x5c5   : > { %6169 = vmatpush3.bf16.msra.mxu0 %v6473_v4 }
 0x5c6   : > { %6170 = vmatprep.subr.bf16.mxu0 %v6474_v56 }
 0x5c9   : > { %6171 = vmatpush3.bf16.msra.mxu0 %v6474_v56 }
 0x5ca   : > { %6176 = vmatprep.subr.bf16.mxu0 %v6483_v28 }
 0x5cc   : > { %6173 = vmatmul.mubr.msk.bf16.vlgmr.msra.gmra.mrb[100].mxu0 %vm3423_vm3, %v4685_v24 }
 0x5cd   : > { %6178 = vmatprep.mubr.msk.bf16.mxu0 %vm6484_vm2, %v6483_v28 }
 0x69f   : > { %v6174_v15 = vpop.f32.mrb[100].mxu0 }
 0x6a0   : > { %v4778_v35 = vadd.f32 %v6174_v15, %v5406_v13  ;;  %v4750_v54 = vpop.f32.mrb[101].mxu0 }
 0x6a1   : > { %v4776_v16 = vadd.f32 %v5406_v13, %v4750_v54  ;;  %v6175_v19 = vpop.f32.mrb[102].mxu0 }
 0x6a2   : > { %v4779_v20 = vadd.f32 %v6175_v19, %v5406_v13  ;;  %v4753_v21 = vpop.f32.mrb[103].mxu0  ;;  %v4782_v25 = vmax.f32 %v4778_v35, 0.0 }
 0x6a3   : > { %v4777_v22 = vadd.f32 %v5406_v13, %v4753_v21  ;;  %v4780_v30 = vmax.f32 %v4776_v16, 0.0 }
 0x6a4   : > { %v4783_v26 = vmax.f32 %v4779_v20, 0.0 }
 0x6a5   : > { %v4781_v31 = vmax.f32 %v4777_v22, 0.0 }
 0x6a6   : > { %v4785_v32 = vpack.c.bf16 %v4783_v26, %v4782_v25 }
 0x6a7   : > { %v4784_v29 = vpack.c.bf16 %v4781_v31, %v4780_v30 }
 0x6a8   : > { %4787 = vst [vmem:[#allocation6 + $0x8] sm:$0xff] %v4785_v32 }
 0x6a9   : > { %4786 = vst [vmem:[#allocation6] sm:$0xff] %v4784_v29 }
 0x6af   : > { %v4904_v45 = vld [vmem:[#allocation6 + $0x8] sm:$0xf0]  ;;  %v4903_v46 = vld [vmem:[#allocation6 + $0x8] sm:$0xf] }
 0x6b0   : > { %v4805_v11 = vld [vmem:[#allocation6] sm:$0xf0]  ;;  %v4804_v39 = vld [vmem:[#allocation6] sm:$0xf]  ;;  %v4906_v53 = vrot.slane %v4904_v45, 4 }
 0x6b1   : > { %v4807_v38 = vrot.slane %v4805_v11, 4 }
 0x6b2   : > { %v4908_v44 = vmax.bf16 %v4906_v53, %v4903_v46 }
 0x6b3   : > { %v4809_v41 = vmax.bf16 %v4807_v38, %v4804_v39 }
 0x6b4   : > { %v4910_v49 = vsel %vm924_vm6, %v4908_v44, 0 }
 0x6b5   : > { %v4815_v42 = vsel %vm924_vm6, %v4809_v41, 0 }
 0x6b6   : > { %6177 = vmatpush3.bf16.msra.mxu0 %v4815_v42 }
 0x6b7   : > { %6182 = vmatprep.subr.bf16.mxu0 %v6483_v28 }
 0x6b9   : > { %6179 = vmatmul.mubr.msk.bf16.vlgmr.msra.gmra.mrb[104].mxu0 %vm4810_vm15, %v4797_v43 }
 0x6ba   : > { %6183 = vmatpush3.bf16.msra.mxu0 %v4815_v42  ;;  %6184 = vmatprep.mubr.msk.bf16.mxu0 %vm6484_vm2, %v6483_v28 }
 0x6bb   : > { %6188 = vmatprep.subr.bf16.mxu0 %v6483_v28 }
 0x6c1   : > { %6185 = vmatmul.mubr.msk.bf16.vlgmr.msra.gmra.mrb[108].mxu0 %vm4810_vm15, %v4803_v51 }
 0x6c2   : > { %6189 = vmatpush3.bf16.msra.mxu0 %v4910_v49  ;;  %6190 = vmatprep.mubr.msk.bf16.mxu0 %vm6484_vm2, %v6483_v28 }
 0x6c3   : > { %6194 = vmatprep.subr.bf16.mxu0 %v6483_v28 }
 0x6c9   : > { %6191 = vmatmul.mubr.msk.bf16.vlgmr.msra.gmra.mrb[112].mxu0 %vm4810_vm15, %v4797_v43 }
 0x6ca   : > { %6195 = vmatpush3.bf16.msra.mxu0 %v4910_v49  ;;  %6196 = vmatprep.mubr.msk.bf16.mxu0 %vm6484_vm2, %v6483_v28 }
 0x6d1   : > { %6197 = vmatmul.mubr.msk.bf16.vlgmr.msra.gmra.mrb[116].mxu0 %vm4810_vm15, %v4803_v51 }
 0x78c   : > { %v4851_v14 = vpop.f32.mrb[104].mxu0 }
 0x78d   : > { %v6180_v0 = vpop.f32.mrb[105].mxu0 }
 0x78e   : > { %v4854_v50 = vpop.f32.mrb[106].mxu0 }
 0x78f   : > { %v6181_v8 = vpop.f32.mrb[107].mxu0 }
 0x794   : > { %v4894_v7 = vpop.f32.mrb[108].mxu0 }
 0x795   : > { %v4900_v27 = vmax.f32 %v4851_v14, %v4894_v7  ;;  %v6186_v58 = vpop.f32.mrb[109].mxu0 }
 0x796   : > { %v4897_v59 = vpop.f32.mrb[110].mxu0 }
 0x797   : > { %v4901_v60 = vpack.c.bf16 %v4900_v27, %v4900_v27  ;;  %v6187_v34 = vpop.f32.mrb[111].mxu0 }
 0x799   : > { %4902 = vst [vmem:[%s276_s27] sm:$0x1] %v4901_v60 }
 0x79c   : > { %v4946_v28 = vpop.f32.mrb[112].mxu0 }
 0x79d   : > { %v6192_v62 = vpop.f32.mrb[113].mxu0 }
 0x79e   : > { %v4949_v2 = vpop.f32.mrb[114].mxu0 }
 0x79f   : > { %v6193_v23 = vpop.f32.mrb[115].mxu0 }
 0x7a4   : > { %v4986_v3 = vpop.f32.mrb[116].mxu0 }
 0x7a5   : > { %v4992_v1 = vmax.f32 %v4946_v28, %v4986_v3  ;;  %v6198_v55 = vpop.f32.mrb[117].mxu0 }
 0x7a6   : > { %v4989_v5 = vpop.f32.mrb[118].mxu0 }
 0x7a7   : > { %v4993_v6 = vpack.c.bf16 %v4992_v1, %v4992_v1  ;;  %v6199_v52 = vpop.f32.mrb[119].mxu0 }
 0x7a9   : > { %v5001_v10 = vrot.slane %v4993_v6, %v5000_v33 }
 0x7ab   : > { %v5002_v47 = vrot.slane %v5001_v10, 7 }
 0x7ad   : > { %5004 = vst [vmem:[%s276_s27] sm:$0x2] %v5002_v47 }
 0x7ae PF: > { %s17_s24 = sadd.s32 1, %s6481_s24  }
 0x7af   : > { %p14_p4 = scmp.ge.s32.totalorder %s17_s24, 4  }
 0x7b1   :  { %16 = sbr.rel (!%p14_p4) target bundleno = 1 (0x1), region = 94 }

// kernel: classifier_forward.3
= control target key start
LH: loop header
LB: loop body
LE: loop exit
PB: predicated region body
PF: predicated region fallthrough
CT: control target
= control target key end

     0   :  { %v5895_v35 = vmov 1966171168   ;;  %v315_v37 = vlaneseq  ;;  %s7893_s0 = inlined_call_operand.<no memory space> [shape: f32[1,1], index: 0, kind: input, shape index: {}]   ;;  %s7894_s1 = inlined_call_operand.vmem [shape: bf16[2,512], index: 1, kind: input, shape index: {}]   ;;  %s7895_s2 = inlined_call_operand.vmem [shape: bf16[512,1024], index: 2, kind: input, shape index: {}]   ;;  %s7896_s3 = inlined_call_operand.vmem [shape: bf16[1024,512], index: 3, kind: input, shape index: {}]   ;;  %s7897_s4 = inlined_call_operand.vmem [shape: bf16[512,256], index: 4, kind: input, shape index: {}]   ;;  %s7898_s5 = inlined_call_operand.vmem [shape: bf16[256,10], index: 5, kind: input, shape index: {}]   ;;  %s7899_s6 = inlined_call_operand.vmem [shape: f32[1,1024], index: 6, kind: input, shape index: {}]   ;;  %s7900_s7 = inlined_call_operand.vmem [shape: f32[1,512], index: 7, kind: input, shape index: {}]   ;;  %s7901_s8 = inlined_call_operand.vmem [shape: f32[1,256], index: 8, kind: input, shape index: {}]   ;;  %s7902_s9 = inlined_call_operand.vmem [shape: f32[1,10], index: 9, kind: input, shape index: {}]   ;;  %s7903_s10 = inlined_call_operand.hbm [shape: f32[2,10], index: 10, kind: output, shape index: {}]  }
   0x1   :  { %v47_v0 = vld [vmem:[%s7895_s2] sm:$0xff]  ;;  %v313_v36 = vunpack.c.l.s4 %v5895_v35 }
   0x2   :  { %v51_v1 = vld [vmem:[%s7895_s2 + $0x20] sm:$0xff]  ;;  %v6026_v47 = vshrl.u32 %v315_v37, 7 }
   0x3   :  { %v175_v2 = vld [vmem:[%s7895_s2 + $0x400] sm:$0xff]  ;;  %v4704_v3 = vcombine.high %v47_v0, %v51_v1  ;;  %v4703_v5 = vcombine.low %v47_v0, %v51_v1  ;;  %v314_v46 = vunpack.c.0.s8 %v313_v36 }
   0x4   :  { %v179_v4 = vld [vmem:[%s7895_s2 + $0x420] sm:$0xff] }
   0x5   :  { %v55_v6 = vld [vmem:[%s7895_s2 + $0x40] sm:$0xff]  ;;  %v4832_v8 = vcombine.high %v175_v2, %v179_v4  ;;  %v4831_v9 = vcombine.low %v175_v2, %v179_v4  ;;  %1612 = vmatprep.subr.bf16.mxu1 %v4704_v3  ;;  %v6041_v56 = vsub.s32 %v314_v46, %v6026_v47 }
   0x6   :  { %v59_v7 = vld [vmem:[%s7895_s2 + $0x60] sm:$0xff]  ;;  %1613 = vmatpush1.bf16.msra.mxu1 %v4703_v5 }
   0x7   :  { %v4712_v10 = vcombine.high %v55_v6, %v59_v7  ;;  %v183_v11 = vld [vmem:[%s7895_s2 + $0x440] sm:$0xff]  ;;  %1653 = vmatprep.subr.bf16.mxu0 %v4832_v8  ;;  %v4711_v18 = vcombine.low %v55_v6, %v59_v7 }
   0x8   :  { %v187_v12 = vld [vmem:[%s7895_s2 + $0x460] sm:$0xff]  ;;  %1654 = vmatpush1.bf16.msra.mxu0 %v4831_v9 }
   0x9   :  { %v63_v13 = vld [vmem:[%s7895_s2 + $0x80] sm:$0xff]  ;;  %v4840_v14 = vcombine.high %v183_v11, %v187_v12  ;;  %1614 = vmatprep.subr.bf16.mxu1 %v4712_v10  ;;  %v4839_v19 = vcombine.low %v183_v11, %v187_v12 }
   0xa   :  { %v67_v15 = vld [vmem:[%s7895_s2 + $0xa0] sm:$0xff]  ;;  %1615 = vmatpush1.bf16.msra.mxu1 %v4711_v18 }
   0xb   :  { %v191_v16 = vld [vmem:[%s7895_s2 + $0x480] sm:$0xff]  ;;  %v4720_v20 = vcombine.high %v63_v13, %v67_v15  ;;  %1655 = vmatprep.subr.bf16.mxu0 %v4840_v14  ;;  %v4719_v26 = vcombine.low %v63_v13, %v67_v15 }
   0xc   :  { %v195_v17 = vld [vmem:[%s7895_s2 + $0x4a0] sm:$0xff]  ;;  %1656 = vmatpush1.bf16.msra.mxu0 %v4839_v19 }
   0xd   :  { %v4848_v21 = vcombine.high %v191_v16, %v195_v17  ;;  %v71_v22 = vld [vmem:[%s7895_s2 + $0xc0] sm:$0xff]  ;;  %1616 = vmatprep.subr.bf16.mxu1 %v4720_v20  ;;  %v4847_v27 = vcombine.low %v191_v16, %v195_v17 }
   0xe   :  { %v75_v23 = vld [vmem:[%s7895_s2 + $0xe0] sm:$0xff]  ;;  %1617 = vmatpush1.bf16.msra.mxu1 %v4719_v26 }
   0xf   :  { %v199_v24 = vld [vmem:[%s7895_s2 + $0x4c0] sm:$0xff]  ;;  %v4728_v28 = vcombine.high %v71_v22, %v75_v23  ;;  %1657 = vmatprep.subr.bf16.mxu0 %v4848_v21  ;;  %v4727_v34 = vcombine.low %v71_v22, %v75_v23 }
  0x10   :  { %v203_v25 = vld [vmem:[%s7895_s2 + $0x4e0] sm:$0xff]  ;;  %1658 = vmatpush1.bf16.msra.mxu0 %v4847_v27 }
  0x11   :  { %v4856_v29 = vcombine.high %v199_v24, %v203_v25  ;;  %v79_v30 = vld [vmem:[%s7895_s2 + $0x100] sm:$0xff]  ;;  %1618 = vmatprep.subr.bf16.mxu1 %v4728_v28  ;;  %v4855_v38 = vcombine.low %v199_v24, %v203_v25 }
  0x12   :  { %v83_v31 = vld [vmem:[%s7895_s2 + $0x120] sm:$0xff]  ;;  %1619 = vmatpush1.bf16.msra.mxu1 %v4727_v34 }
  0x13   :  { %v207_v32 = vld [vmem:[%s7895_s2 + $0x500] sm:$0xff]  ;;  %v4736_v39 = vcombine.high %v79_v30, %v83_v31  ;;  %1659 = vmatprep.subr.bf16.mxu0 %v4856_v29  ;;  %v4735_v45 = vcombine.low %v79_v30, %v83_v31 }
  0x14   :  { %v211_v33 = vld [vmem:[%s7895_s2 + $0x520] sm:$0xff]  ;;  %1660 = vmatpush1.bf16.msra.mxu0 %v4855_v38 }
  0x15   :  { %v4864_v40 = vcombine.high %v207_v32, %v211_v33  ;;  %v87_v41 = vld [vmem:[%s7895_s2 + $0x140] sm:$0xff]  ;;  %1620 = vmatprep.subr.bf16.mxu1 %v4736_v39  ;;  %v4863_v48 = vcombine.low %v207_v32, %v211_v33 }
  0x16   :  { %v91_v42 = vld [vmem:[%s7895_s2 + $0x160] sm:$0xff]  ;;  %1621 = vmatpush1.bf16.msra.mxu1 %v4735_v45 }
  0x17   :  { %v215_v43 = vld [vmem:[%s7895_s2 + $0x540] sm:$0xff]  ;;  %v4744_v49 = vcombine.high %v87_v41, %v91_v42  ;;  %1661 = vmatprep.subr.bf16.mxu0 %v4864_v40  ;;  %v4743_v55 = vcombine.low %v87_v41, %v91_v42 }
  0x18   :  { %v219_v44 = vld [vmem:[%s7895_s2 + $0x560] sm:$0xff]  ;;  %1662 = vmatpush1.bf16.msra.mxu0 %v4863_v48 }
  0x19   :  { %v4872_v50 = vcombine.high %v215_v43, %v219_v44  ;;  %v95_v51 = vld [vmem:[%s7895_s2 + $0x180] sm:$0xff]  ;;  %1622 = vmatprep.subr.bf16.mxu1 %v4744_v49  ;;  %v4871_v57 = vcombine.low %v215_v43, %v219_v44 }
  0x1a   :  { %v99_v52 = vld [vmem:[%s7895_s2 + $0x1a0] sm:$0xff]  ;;  %1623 = vmatpush1.bf16.msra.mxu1 %v4743_v55 }
  0x1b   :  { %v223_v53 = vld [vmem:[%s7895_s2 + $0x580] sm:$0xff]  ;;  %v4752_v58 = vcombine.high %v95_v51, %v99_v52  ;;  %1663 = vmatprep.subr.bf16.mxu0 %v4872_v50  ;;  %v4751_v2 = vcombine.low %v95_v51, %v99_v52 }
  0x1c   :  { %v227_v54 = vld [vmem:[%s7895_s2 + $0x5a0] sm:$0xff]  ;;  %1664 = vmatpush1.bf16.msra.mxu0 %v4871_v57 }
  0x1d   :  { %v6046_v59 = vld.sshfl [vmem:[%s7894_s1] sm:$0x33 pattern:$0x75316420]  ;;  %v4880_v60 = vcombine.high %v223_v53, %v227_v54  ;;  %1624 = vmatprep.subr.bf16.mxu1 %v4752_v58  ;;  %v4879_v4 = vcombine.low %v223_v53, %v227_v54 }
  0x1e   :  { %v103_v61 = vld [vmem:[%s7895_s2 + $0x1c0] sm:$0xff]  ;;  %v311_v63 = vcombine.high %v6046_v59, %v6046_v59  ;;  %1625 = vmatpush1.bf16.msra.mxu1 %v4751_v2 }
  0x1f   :  { %v107_v62 = vld [vmem:[%s7895_s2 + $0x1e0] sm:$0xff]  ;;  %1665 = vmatprep.subr.bf16.mxu0 %v4880_v60 }
  0x20   :  { %v231_v0 = vld [vmem:[%s7895_s2 + $0x5c0] sm:$0xff]  ;;  %v6063_v3 = vrot.slane %v311_v63, %v6041_v56  ;;  %v4760_v5 = vcombine.high %v103_v61, %v107_v62  ;;  %v4759_v12 = vcombine.low %v103_v61, %v107_v62  ;;  %1666 = vmatpush1.bf16.msra.mxu0 %v4879_v4 }
  0x21   :  { %v235_v1 = vld [vmem:[%s7895_s2 + $0x5e0] sm:$0xff] }
  0x22   :  { %v4888_v6 = vcombine.high %v231_v0, %v235_v1  ;;  %v111_v7 = vld [vmem:[%s7895_s2 + $0x200] sm:$0xff]  ;;  %1644 = vmatprep.mubr.bf16.mxu1 %v6063_v3  ;;  %v6074_v9 = vcombine.high %v6063_v3, %v6063_v3  ;;  %1626 = vmatprep.subr.bf16.mxu1 %v4760_v5  ;;  %v4887_v13 = vcombine.low %v231_v0, %v235_v1 }
  0x23   :  { %v115_v8 = vld [vmem:[%s7895_s2 + $0x220] sm:$0xff]  ;;  %1627 = vmatpush1.bf16.msra.mxu1 %v4759_v12 }
  0x24   :  { %v239_v10 = vld [vmem:[%s7895_s2 + $0x600] sm:$0xff]  ;;  %1685 = vmatprep.mubr.bf16.mxu0 %v6074_v9  ;;  %v4768_v14 = vcombine.high %v111_v7, %v115_v8  ;;  %1667 = vmatprep.subr.bf16.mxu0 %v4888_v6  ;;  %v4767_v20 = vcombine.low %v111_v7, %v115_v8 }
  0x25   :  { %v243_v11 = vld [vmem:[%s7895_s2 + $0x620] sm:$0xff]  ;;  %1668 = vmatpush1.bf16.msra.mxu0 %v4887_v13 }
  0x26   :  { %v4896_v15 = vcombine.high %v239_v10, %v243_v11  ;;  %v119_v16 = vld [vmem:[%s7895_s2 + $0x240] sm:$0xff]  ;;  %1628 = vmatprep.subr.bf16.mxu1 %v4768_v14  ;;  %v4895_v21 = vcombine.low %v239_v10, %v243_v11  ;;  %v48_v10 = vld [vmem:[%s7895_s2 + $0x8] sm:$0xff] }
  0x27   :  { %v123_v17 = vld [vmem:[%s7895_s2 + $0x260] sm:$0xff]  ;;  %1629 = vmatpush1.bf16.msra.mxu1 %v4767_v20  ;;  %v52_v11 = vld [vmem:[%s7895_s2 + $0x28] sm:$0xff] }
  0x28   :  { %v247_v18 = vld [vmem:[%s7895_s2 + $0x640] sm:$0xff]  ;;  %v4776_v22 = vcombine.high %v119_v16, %v123_v17  ;;  %1669 = vmatprep.subr.bf16.mxu0 %v4896_v15  ;;  %v4775_v28 = vcombine.low %v119_v16, %v123_v17  ;;  %v49_v15 = vld [vmem:[%s7895_s2 + $0x10] sm:$0xff]  ;;  %v60_v20 = vld [vmem:[%s7895_s2 + $0x68] sm:$0xff] }
  0x29   :  { %v251_v19 = vld [vmem:[%s7895_s2 + $0x660] sm:$0xff]  ;;  %1670 = vmatpush1.bf16.msra.mxu0 %v4895_v21  ;;  %v53_v16 = vld [vmem:[%s7895_s2 + $0x30] sm:$0xff] }
  0x2a   :  { %v4904_v23 = vcombine.high %v247_v18, %v251_v19  ;;  %v127_v24 = vld [vmem:[%s7895_s2 + $0x280] sm:$0xff]  ;;  %1630 = vmatprep.subr.bf16.mxu1 %v4776_v22  ;;  %v4903_v29 = vcombine.low %v247_v18, %v251_v19  ;;  %v6181_v18 = vrot.slane %v6046_v59, %v6041_v56  ;;  %v56_v19 = vld [vmem:[%s7895_s2 + $0x48] sm:$0xff]  ;;  %v4706_v22 = vcombine.high %v48_v10, %v52_v11  ;;  %v61_v56 = vld [vmem:[%s7895_s2 + $0x70] sm:$0xff] }
  0x2b   :  { %v131_v25 = vld [vmem:[%s7895_s2 + $0x2a0] sm:$0xff]  ;;  %1631 = vmatpush1.bf16.msra.mxu1 %v4775_v28  ;;  %v68_v28 = vld [vmem:[%s7895_s2 + $0xa8] sm:$0xff] }
  0x2c   :  { %v255_v26 = vld [vmem:[%s7895_s2 + $0x680] sm:$0xff]  ;;  %v4784_v30 = vcombine.high %v127_v24, %v131_v25  ;;  %1671 = vmatprep.subr.bf16.mxu0 %v4904_v23  ;;  %v4783_v36 = vcombine.low %v127_v24, %v131_v25  ;;  %v4708_v23 = vcombine.high %v49_v15, %v53_v16  ;;  %v57_v24 = vld [vmem:[%s7895_s2 + $0x50] sm:$0xff]  ;;  %v6197_v59 = vcombine.high %v6181_v18, %v6181_v18 }
  0x2d   :  { %v259_v27 = vld [vmem:[%s7895_s2 + $0x6a0] sm:$0xff]  ;;  %1672 = vmatpush1.bf16.msra.mxu0 %v4903_v29  ;;  %v4705_v25 = vcombine.low %v48_v10, %v52_v11  ;;  %v4707_v29 = vcombine.low %v49_v15, %v53_v16  ;;  %v112_v15 = vld [vmem:[%s7895_s2 + $0x208] sm:$0xff] }
  0x2e   :  { %v4912_v31 = vcombine.high %v255_v26, %v259_v27  ;;  %v135_v32 = vld [vmem:[%s7895_s2 + $0x2c0] sm:$0xff]  ;;  %1632 = vmatprep.subr.bf16.mxu1 %v4784_v30  ;;  %v4911_v37 = vcombine.low %v255_v26, %v259_v27  ;;  %v4714_v26 = vcombine.high %v56_v19, %v60_v20  ;;  %v64_v27 = vld [vmem:[%s7895_s2 + $0x88] sm:$0xff]  ;;  %v4716_v30 = vcombine.high %v57_v24, %v61_v56 }
  0x2f   :  { %v139_v33 = vld [vmem:[%s7895_s2 + $0x2e0] sm:$0xff]  ;;  %1633 = vmatpush1.bf16.msra.mxu1 %v4783_v36  ;;  %v4722_v36 = vcombine.high %v64_v27, %v68_v28  ;;  %v116_v16 = vld [vmem:[%s7895_s2 + $0x228] sm:$0xff] }
  0x30   :  { %v263_v34 = vld [vmem:[%s7895_s2 + $0x6c0] sm:$0xff]  ;;  %v4792_v38 = vcombine.high %v135_v32, %v139_v33  ;;  %1673 = vmatprep.subr.bf16.mxu0 %v4912_v31  ;;  %v4791_v44 = vcombine.low %v135_v32, %v139_v33  ;;  %v65_v31 = vld [vmem:[%s7895_s2 + $0x90] sm:$0xff]  ;;  %v4713_v33 = vcombine.low %v56_v19, %v60_v20 }
  0x31   :  { %v267_v35 = vld [vmem:[%s7895_s2 + $0x6e0] sm:$0xff]  ;;  %1674 = vmatpush1.bf16.msra.mxu0 %v4911_v37  ;;  %v69_v32 = vld [vmem:[%s7895_s2 + $0xb0] sm:$0xff]  ;;  %v4715_v37 = vcombine.low %v57_v24, %v61_v56  ;;  %v120_v24 = vld [vmem:[%s7895_s2 + $0x248] sm:$0xff] }
  0x32   :  { %v4920_v39 = vcombine.high %v263_v34, %v267_v35  ;;  %v143_v40 = vld [vmem:[%s7895_s2 + $0x300] sm:$0xff]  ;;  %1634 = vmatprep.subr.bf16.mxu1 %v4792_v38  ;;  %v4919_v45 = vcombine.low %v263_v34, %v267_v35  ;;  %v72_v34 = vld [vmem:[%s7895_s2 + $0xc8] sm:$0xff]  ;;  %v4724_v38 = vcombine.high %v65_v31, %v69_v32 }
  0x33   :  { %v147_v41 = vld [vmem:[%s7895_s2 + $0x320] sm:$0xff]  ;;  %1635 = vmatpush1.bf16.msra.mxu1 %v4791_v44  ;;  %v76_v35 = vld [vmem:[%s7895_s2 + $0xe8] sm:$0xff] }
  0x34   :  { %v271_v42 = vld [vmem:[%s7895_s2 + $0x700] sm:$0xff]  ;;  %v4800_v46 = vcombine.high %v143_v40, %v147_v41  ;;  %1675 = vmatprep.subr.bf16.mxu0 %v4920_v39  ;;  %v4799_v53 = vcombine.low %v143_v40, %v147_v41  ;;  %v73_v39 = vld [vmem:[%s7895_s2 + $0xd0] sm:$0xff]  ;;  %v4721_v41 = vcombine.low %v64_v27, %v68_v28  ;;  %v4730_v44 = vcombine.high %v72_v34, %v76_v35  ;;  %v124_v56 = vld [vmem:[%s7895_s2 + $0x268] sm:$0xff] }
  0x35   :  { %v275_v43 = vld [vmem:[%s7895_s2 + $0x720] sm:$0xff]  ;;  %1676 = vmatpush1.bf16.msra.mxu0 %v4919_v45  ;;  %v77_v40 = vld [vmem:[%s7895_s2 + $0xf0] sm:$0xff]  ;;  %v4723_v45 = vcombine.low %v65_v31, %v69_v32  ;;  %v128_v31 = vld [vmem:[%s7895_s2 + $0x288] sm:$0xff] }
  0x36   :  { %v4928_v48 = vcombine.high %v271_v42, %v275_v43  ;;  %v151_v49 = vld [vmem:[%s7895_s2 + $0x340] sm:$0xff]  ;;  %1636 = vmatprep.subr.bf16.mxu1 %v4800_v46  ;;  %v4927_v54 = vcombine.low %v271_v42, %v275_v43  ;;  %v80_v42 = vld [vmem:[%s7895_s2 + $0x108] sm:$0xff]  ;;  %v4732_v46 = vcombine.high %v73_v39, %v77_v40  ;;  %v121_v28 = vld [vmem:[%s7895_s2 + $0x250] sm:$0xff] }
  0x37   :  { %v155_v50 = vld [vmem:[%s7895_s2 + $0x360] sm:$0xff]  ;;  %1637 = vmatpush1.bf16.msra.mxu1 %v4799_v53  ;;  %v84_v43 = vld [vmem:[%s7895_s2 + $0x128] sm:$0xff] }
  0x38   :  { %v279_v51 = vld [vmem:[%s7895_s2 + $0x740] sm:$0xff]  ;;  %v4808_v55 = vcombine.high %v151_v49, %v155_v50  ;;  %1677 = vmatprep.subr.bf16.mxu0 %v4928_v48  ;;  %v4807_v63 = vcombine.low %v151_v49, %v155_v50  ;;  %v81_v48 = vld [vmem:[%s7895_s2 + $0x110] sm:$0xff]  ;;  %v4729_v50 = vcombine.low %v72_v34, %v76_v35  ;;  %v4738_v53 = vcombine.high %v80_v42, %v84_v43  ;;  %v132_v32 = vld [vmem:[%s7895_s2 + $0x2a8] sm:$0xff] }
  0x39   :  { %v283_v52 = vld [vmem:[%s7895_s2 + $0x760] sm:$0xff]  ;;  %1678 = vmatpush1.bf16.msra.mxu0 %v4927_v54  ;;  %v85_v49 = vld [vmem:[%s7895_s2 + $0x130] sm:$0xff]  ;;  %v4731_v54 = vcombine.low %v73_v39, %v77_v40  ;;  %v136_v39 = vld [vmem:[%s7895_s2 + $0x2c8] sm:$0xff] }
  0x3a   :  { %v159_v57 = vld [vmem:[%s7895_s2 + $0x380] sm:$0xff]  ;;  %v4936_v60 = vcombine.high %v279_v51, %v283_v52  ;;  %1638 = vmatprep.subr.bf16.mxu1 %v4808_v55  ;;  %v4935_v2 = vcombine.low %v279_v51, %v283_v52  ;;  %v88_v51 = vld [vmem:[%s7895_s2 + $0x148] sm:$0xff]  ;;  %v4740_v55 = vcombine.high %v81_v48, %v85_v49 }
  0x3b   :  { %v163_v58 = vld [vmem:[%s7895_s2 + $0x3a0] sm:$0xff]  ;;  %1639 = vmatpush1.bf16.msra.mxu1 %v4807_v63  ;;  %v92_v52 = vld [vmem:[%s7895_s2 + $0x168] sm:$0xff] }
  0x3c   :  { %v287_v61 = vld [vmem:[%s7895_s2 + $0x780] sm:$0xff]  ;;  %v4816_v4 = vcombine.high %v159_v57, %v163_v58  ;;  %1679 = vmatprep.subr.bf16.mxu0 %v4936_v60  ;;  %v4815_v8 = vcombine.low %v159_v57, %v163_v58  ;;  %v89_v57 = vld [vmem:[%s7895_s2 + $0x150] sm:$0xff]  ;;  %v4737_v60 = vcombine.low %v80_v42, %v84_v43  ;;  %v4746_v63 = vcombine.high %v88_v51, %v92_v52  ;;  %v140_v40 = vld [vmem:[%s7895_s2 + $0x2e8] sm:$0xff] }
  0x3d   :  { %v291_v62 = vld [vmem:[%s7895_s2 + $0x7a0] sm:$0xff]  ;;  %1680 = vmatpush1.bf16.msra.mxu0 %v4935_v2  ;;  %v93_v58 = vld [vmem:[%s7895_s2 + $0x170] sm:$0xff] }
  0x3e   :  { %v167_v0 = vld [vmem:[%s7895_s2 + $0x3c0] sm:$0xff]  ;;  %v4944_v5 = vcombine.high %v287_v61, %v291_v62  ;;  %1640 = vmatprep.subr.bf16.mxu1 %v4816_v4  ;;  %v4943_v12 = vcombine.low %v287_v61, %v291_v62  ;;  %v96_v61 = vld [vmem:[%s7895_s2 + $0x188] sm:$0xff]  ;;  %v97_v2 = vld [vmem:[%s7895_s2 + $0x190] sm:$0xff]  ;;  %v4747_v10 = vcombine.low %v89_v57, %v93_v58 }
  0x3f   :  { %v171_v1 = vld [vmem:[%s7895_s2 + $0x3e0] sm:$0xff]  ;;  %1641 = vmatpush1.bf16.msra.mxu1 %v4815_v8  ;;  %v100_v62 = vld [vmem:[%s7895_s2 + $0x1a8] sm:$0xff]  ;;  %v101_v4 = vld [vmem:[%s7895_s2 + $0x1b0] sm:$0xff] }
  0x40   :  { %v295_v6 = vld [vmem:[%s7895_s2 + $0x7c0] sm:$0xff]  ;;  %v4824_v13 = vcombine.high %v167_v0, %v171_v1  ;;  %1681 = vmatprep.subr.bf16.mxu0 %v4944_v5  ;;  %v4823_v17 = vcombine.low %v167_v0, %v171_v1  ;;  %v4739_v0 = vcombine.low %v81_v48, %v85_v49  ;;  %v4748_v1 = vcombine.high %v89_v57, %v93_v58  ;;  %v144_v48 = vld [vmem:[%s7895_s2 + $0x308] sm:$0xff] }
  0x41   :  { %v299_v7 = vld [vmem:[%s7895_s2 + $0x7e0] sm:$0xff]  ;;  %1682 = vmatpush1.bf16.msra.mxu0 %v4943_v12  ;;  %v4745_v5 = vcombine.low %v88_v51, %v92_v52  ;;  %v4754_v8 = vcombine.high %v96_v61, %v100_v62  ;;  %v4756_v11 = vcombine.high %v97_v2, %v101_v4  ;;  %v105_v12 = vld [vmem:[%s7895_s2 + $0x1d0] sm:$0xff]  ;;  %v4755_v19 = vcombine.low %v97_v2, %v101_v4  ;;  %v148_v49 = vld [vmem:[%s7895_s2 + $0x328] sm:$0xff] }
  0x42   :  { %v4952_v14 = vcombine.high %v295_v6, %v299_v7  ;;  %1642 = vmatprep.subr.bf16.mxu1 %v4824_v13  ;;  %v4951_v21 = vcombine.low %v295_v6, %v299_v7  ;;  %v104_v6 = vld [vmem:[%s7895_s2 + $0x1c8] sm:$0xff]  ;;  %v109_v13 = vld [vmem:[%s7895_s2 + $0x1f0] sm:$0xff] }
  0x43   :  { %1643 = vmatpush1.bf16.msra.mxu1 %v4823_v17  ;;  %v108_v7 = vld [vmem:[%s7895_s2 + $0x1e8] sm:$0xff]  ;;  %v4764_v20 = vcombine.high %v105_v12, %v109_v13 }
  0x44   :  { %1683 = vmatprep.subr.bf16.mxu0 %v4952_v14  ;;  %1694 = vmatprep.subr.bf16.mxu1 %v4706_v22  ;;  %v4753_v14 = vcombine.low %v96_v61, %v100_v62  ;;  %v4762_v17 = vcombine.high %v104_v6, %v108_v7  ;;  %v117_v22 = vld [vmem:[%s7895_s2 + $0x230] sm:$0xff]  ;;  %v152_v57 = vld [vmem:[%s7895_s2 + $0x348] sm:$0xff] }
  0x45   :  { %1684 = vmatpush1.bf16.msra.mxu0 %v4951_v21  ;;  %v113_v21 = vld [vmem:[%s7895_s2 + $0x210] sm:$0xff]  ;;  %v156_v58 = vld [vmem:[%s7895_s2 + $0x368] sm:$0xff] }
  0x46   :  { %1776 = vmatprep.subr.bf16.mxu0 %v4708_v23  ;;  %1645 = vmatmul.mubr.bf16.vlgmr.msra.gmra.mrb[0].mxu1 %v6181_v18  ;;  %v4761_v23 = vcombine.low %v104_v6, %v108_v7  ;;  %v4772_v27 = vcombine.high %v113_v21, %v117_v22  ;;  %v4771_v34 = vcombine.low %v113_v21, %v117_v22  ;;  %v160_v2 = vld [vmem:[%s7895_s2 + $0x388] sm:$0xff] }
  0x47   :  { %1695 = vmatpush1.bf16.msra.mxu1 %v4705_v25  ;;  %1726 = vmatprep.mubr.bf16.mxu1 %v6063_v3  ;;  %v4770_v25 = vcombine.high %v112_v15, %v116_v16  ;;  %v164_v4 = vld [vmem:[%s7895_s2 + $0x3a8] sm:$0xff] }
  0x48   :  { %1686 = vmatmul.mubr.bf16.vlgmr.msra.gmra.mrb[0].mxu0 %v6197_v59  ;;  %1696 = vmatprep.subr.bf16.mxu1 %v4714_v26  ;;  %v4763_v26 = vcombine.low %v105_v12, %v109_v13  ;;  %v168_v12 = vld [vmem:[%s7895_s2 + $0x3c8] sm:$0xff] }
  0x49   :  { %1777 = vmatpush1.bf16.msra.mxu0 %v4707_v29  ;;  %1808 = vmatprep.mubr.bf16.mxu0 %v6063_v3  ;;  %v125_v29 = vld [vmem:[%s7895_s2 + $0x270] sm:$0xff]  ;;  %v172_v13 = vld [vmem:[%s7895_s2 + $0x3e8] sm:$0xff] }
  0x4a   :  { %1778 = vmatprep.subr.bf16.mxu0 %v4716_v30  ;;  %v4769_v30 = vcombine.low %v112_v15, %v116_v16  ;;  %v4780_v35 = vcombine.high %v121_v28, %v125_v29  ;;  %v4779_v42 = vcombine.low %v121_v28, %v125_v29  ;;  %v176_v21 = vld [vmem:[%s7895_s2 + $0x408] sm:$0xff] }
  0x4b   :  { %1697 = vmatpush1.bf16.msra.mxu1 %v4713_v33  ;;  %v4778_v33 = vcombine.high %v120_v24, %v124_v56  ;;  %v180_v22 = vld [vmem:[%s7895_s2 + $0x428] sm:$0xff] }
  0x4c   :  { %1698 = vmatprep.subr.bf16.mxu1 %v4722_v36  ;;  %v129_v36 = vld [vmem:[%s7895_s2 + $0x290] sm:$0xff]  ;;  %v184_v28 = vld [vmem:[%s7895_s2 + $0x448] sm:$0xff] }
  0x4d   :  { %1779 = vmatpush1.bf16.msra.mxu0 %v4715_v37  ;;  %v133_v37 = vld [vmem:[%s7895_s2 + $0x2b0] sm:$0xff]  ;;  %v188_v29 = vld [vmem:[%s7895_s2 + $0x468] sm:$0xff] }
  0x4e   :  { %1780 = vmatprep.subr.bf16.mxu0 %v4724_v38  ;;  %v4777_v38 = vcombine.low %v120_v24, %v124_v56  ;;  %v4788_v43 = vcombine.high %v129_v36, %v133_v37  ;;  %v4787_v51 = vcombine.low %v129_v36, %v133_v37  ;;  %v185_v36 = vld [vmem:[%s7895_s2 + $0x450] sm:$0xff] }
  0x4f   :  { %1699 = vmatpush1.bf16.msra.mxu1 %v4721_v41  ;;  %v4786_v41 = vcombine.high %v128_v31, %v132_v32  ;;  %v189_v37 = vld [vmem:[%s7895_s2 + $0x470] sm:$0xff] }
  0x50   :  { %1700 = vmatprep.subr.bf16.mxu1 %v4730_v44  ;;  %v137_v44 = vld [vmem:[%s7895_s2 + $0x2d0] sm:$0xff] }
  0x51   :  { %1781 = vmatpush1.bf16.msra.mxu0 %v4723_v45  ;;  %v141_v45 = vld [vmem:[%s7895_s2 + $0x2f0] sm:$0xff] }
  0x52   :  { %1782 = vmatprep.subr.bf16.mxu0 %v4732_v46  ;;  %v4785_v46 = vcombine.low %v128_v31, %v132_v32  ;;  %v4796_v52 = vcombine.high %v137_v44, %v141_v45  ;;  %v4795_v61 = vcombine.low %v137_v44, %v141_v45  ;;  %v193_v44 = vld [vmem:[%s7895_s2 + $0x490] sm:$0xff] }
  0x53   :  { %1701 = vmatpush1.bf16.msra.mxu1 %v4729_v50  ;;  %v4794_v50 = vcombine.high %v136_v39, %v140_v40  ;;  %v197_v45 = vld [vmem:[%s7895_s2 + $0x4b0] sm:$0xff] }
  0x54   :  { %1702 = vmatprep.subr.bf16.mxu1 %v4738_v53  ;;  %v145_v53 = vld [vmem:[%s7895_s2 + $0x310] sm:$0xff] }
  0x55   :  { %1783 = vmatpush1.bf16.msra.mxu0 %v4731_v54  ;;  %v149_v54 = vld [vmem:[%s7895_s2 + $0x330] sm:$0xff] }
  0x56   :  { %1784 = vmatprep.subr.bf16.mxu0 %v4740_v55  ;;  %v4793_v55 = vcombine.low %v136_v39, %v140_v40  ;;  %v4804_v62 = vcombine.high %v145_v53, %v149_v54  ;;  %v4803_v6 = vcombine.low %v145_v53, %v149_v54  ;;  %v4844_v40 = vcombine.high %v185_v36, %v189_v37  ;;  %v201_v53 = vld [vmem:[%s7895_s2 + $0x4d0] sm:$0xff] }
  0x57   :  { %1703 = vmatpush1.bf16.msra.mxu1 %v4737_v60  ;;  %v4802_v60 = vcombine.high %v144_v48, %v148_v49  ;;  %v205_v54 = vld [vmem:[%s7895_s2 + $0x4f0] sm:$0xff] }
  0x58   :  { %1704 = vmatprep.subr.bf16.mxu1 %v4746_v63  ;;  %v153_v63 = vld [vmem:[%s7895_s2 + $0x350] sm:$0xff] }
  0x59   :  { %1785 = vmatpush1.bf16.msra.mxu0 %v4739_v0  ;;  %v157_v0 = vld [vmem:[%s7895_s2 + $0x370] sm:$0xff] }
  0x5a   :  { %1786 = vmatprep.subr.bf16.mxu0 %v4748_v1  ;;  %v4801_v1 = vcombine.low %v144_v48, %v148_v49  ;;  %v4812_v7 = vcombine.high %v153_v63, %v157_v0  ;;  %v4811_v15 = vcombine.low %v153_v63, %v157_v0  ;;  %v4843_v48 = vcombine.low %v185_v36, %v189_v37  ;;  %v209_v63 = vld [vmem:[%s7895_s2 + $0x510] sm:$0xff] }
  0x5b   :  { %1705 = vmatpush1.bf16.msra.mxu1 %v4745_v5  ;;  %v4810_v5 = vcombine.high %v152_v57, %v156_v58  ;;  %v4852_v49 = vcombine.high %v193_v44, %v197_v45  ;;  %v213_v0 = vld [vmem:[%s7895_s2 + $0x530] sm:$0xff] }
  0x5c   :  { %1706 = vmatprep.subr.bf16.mxu1 %v4754_v8  ;;  %v161_v8 = vld [vmem:[%s7895_s2 + $0x390] sm:$0xff] }
  0x5d   :  { %1787 = vmatpush1.bf16.msra.mxu0 %v4747_v10  ;;  %v165_v10 = vld [vmem:[%s7895_s2 + $0x3b0] sm:$0xff] }
  0x5e   :  { %1788 = vmatprep.subr.bf16.mxu0 %v4756_v11  ;;  %v4809_v11 = vcombine.low %v152_v57, %v156_v58  ;;  %v4820_v16 = vcombine.high %v161_v8, %v165_v10  ;;  %v4819_v24 = vcombine.low %v161_v8, %v165_v10  ;;  %v4851_v57 = vcombine.low %v193_v44, %v197_v45  ;;  %v217_v8 = vld [vmem:[%s7895_s2 + $0x550] sm:$0xff] }
  0x5f   :  { %1707 = vmatpush1.bf16.msra.mxu1 %v4753_v14  ;;  %v4818_v14 = vcombine.high %v160_v2, %v164_v4  ;;  %v4860_v58 = vcombine.high %v201_v53, %v205_v54  ;;  %v221_v10 = vld [vmem:[%s7895_s2 + $0x570] sm:$0xff] }
  0x60   :  { %1708 = vmatprep.subr.bf16.mxu1 %v4762_v17  ;;  %v169_v17 = vld [vmem:[%s7895_s2 + $0x3d0] sm:$0xff] }
  0x61   :  { %1789 = vmatpush1.bf16.msra.mxu0 %v4755_v19  ;;  %v173_v19 = vld [vmem:[%s7895_s2 + $0x3f0] sm:$0xff] }
  0x62   :  { %1790 = vmatprep.subr.bf16.mxu0 %v4764_v20  ;;  %v4817_v20 = vcombine.low %v160_v2, %v164_v4  ;;  %v4828_v56 = vcombine.high %v169_v17, %v173_v19  ;;  %v4827_v31 = vcombine.low %v169_v17, %v173_v19  ;;  %v4859_v2 = vcombine.low %v201_v53, %v205_v54  ;;  %v232_v19 = vld [vmem:[%s7895_s2 + $0x5c8] sm:$0xff] }
  0x63   :  { %1709 = vmatpush1.bf16.msra.mxu1 %v4761_v23  ;;  %v4826_v23 = vcombine.high %v168_v12, %v172_v13  ;;  %v4868_v4 = vcombine.high %v209_v63, %v213_v0 }
  0x64   :  { %1710 = vmatprep.subr.bf16.mxu1 %v4770_v25  ;;  %v177_v25 = vld [vmem:[%s7895_s2 + $0x410] sm:$0xff] }
  0x65   :  { %1791 = vmatpush1.bf16.msra.mxu0 %v4763_v26  ;;  %v181_v26 = vld [vmem:[%s7895_s2 + $0x430] sm:$0xff] }
  0x66   :  { %1792 = vmatprep.subr.bf16.mxu0 %v4772_v27  ;;  %v4825_v27 = vcombine.low %v168_v12, %v172_v13  ;;  %v4836_v32 = vcombine.high %v177_v25, %v181_v26  ;;  %v4835_v39 = vcombine.low %v177_v25, %v181_v26  ;;  %v4867_v12 = vcombine.low %v209_v63, %v213_v0  ;;  %v225_v13 = vld [vmem:[%s7895_s2 + $0x590] sm:$0xff]  ;;  %v240_v26 = vld [vmem:[%s7895_s2 + $0x608] sm:$0xff] }
  0x67   :  { %1711 = vmatpush1.bf16.msra.mxu1 %v4769_v30  ;;  %v4834_v30 = vcombine.high %v176_v21, %v180_v22 }
  0x68   :  { %1712 = vmatprep.subr.bf16.mxu1 %v4778_v33  ;;  %v4833_v33 = vcombine.low %v176_v21, %v180_v22  ;;  %v4875_v21 = vcombine.low %v217_v8, %v221_v10  ;;  %v233_v22 = vld [vmem:[%s7895_s2 + $0x5d0] sm:$0xff] }
  0x69   :  { %1793 = vmatpush1.bf16.msra.mxu0 %v4771_v34  ;;  %v192_v34 = vld [vmem:[%s7895_s2 + $0x488] sm:$0xff] }
  0x6a   :  { %1794 = vmatprep.subr.bf16.mxu0 %v4780_v35  ;;  %v196_v35 = vld [vmem:[%s7895_s2 + $0x4a8] sm:$0xff] }
  0x6b   :  { %1713 = vmatpush1.bf16.msra.mxu1 %v4777_v38  ;;  %v4842_v38 = vcombine.high %v184_v28, %v188_v29 }
  0x6c   :  { %1714 = vmatprep.subr.bf16.mxu1 %v4786_v41  ;;  %v4841_v41 = vcombine.low %v184_v28, %v188_v29  ;;  %v241_v29 = vld [vmem:[%s7895_s2 + $0x610] sm:$0xff] }
  0x6d   :  { %1795 = vmatpush1.bf16.msra.mxu0 %v4779_v42  ;;  %v200_v42 = vld [vmem:[%s7895_s2 + $0x4c8] sm:$0xff] }
  0x6e   :  { %1796 = vmatprep.subr.bf16.mxu0 %v4788_v43  ;;  %v204_v43 = vld [vmem:[%s7895_s2 + $0x4e8] sm:$0xff] }
  0x6f   :  { %1715 = vmatpush1.bf16.msra.mxu1 %v4785_v46  ;;  %v4850_v46 = vcombine.high %v192_v34, %v196_v35 }
  0x70   :  { %1716 = vmatprep.subr.bf16.mxu1 %v4794_v50  ;;  %v4849_v50 = vcombine.low %v192_v34, %v196_v35  ;;  %v248_v34 = vld [vmem:[%s7895_s2 + $0x648] sm:$0xff] }
  0x71   :  { %1797 = vmatpush1.bf16.msra.mxu0 %v4787_v51  ;;  %v208_v51 = vld [vmem:[%s7895_s2 + $0x508] sm:$0xff] }
  0x72   :  { %1798 = vmatprep.subr.bf16.mxu0 %v4796_v52  ;;  %v212_v52 = vld [vmem:[%s7895_s2 + $0x528] sm:$0xff] }
  0x73   :  { %1717 = vmatpush1.bf16.msra.mxu1 %v4793_v55  ;;  %v4858_v55 = vcombine.high %v200_v42, %v204_v43  ;;  %v252_v35 = vld [vmem:[%s7895_s2 + $0x668] sm:$0xff] }
  0x74   :  { %1718 = vmatprep.subr.bf16.mxu1 %v4802_v60  ;;  %v4857_v60 = vcombine.low %v200_v42, %v204_v43  ;;  %v253_v42 = vld [vmem:[%s7895_s2 + $0x670] sm:$0xff]  ;;  %v4906_v43 = vcombine.high %v248_v34, %v252_v35 }
  0x75   :  { %1799 = vmatpush1.bf16.msra.mxu0 %v4795_v61  ;;  %v216_v61 = vld [vmem:[%s7895_s2 + $0x548] sm:$0xff] }
  0x76   :  { %1800 = vmatprep.subr.bf16.mxu0 %v4804_v62  ;;  %v220_v62 = vld [vmem:[%s7895_s2 + $0x568] sm:$0xff] }
  0x77   :  { %1719 = vmatpush1.bf16.msra.mxu1 %v4801_v1  ;;  %v4866_v1 = vcombine.high %v208_v51, %v212_v52 }
  0x78   :  { %1720 = vmatprep.subr.bf16.mxu1 %v4810_v5  ;;  %v4865_v5 = vcombine.low %v208_v51, %v212_v52  ;;  %v261_v51 = vld [vmem:[%s7895_s2 + $0x6b0] sm:$0xff] }
  0x79   :  { %1801 = vmatpush1.bf16.msra.mxu0 %v4803_v6  ;;  %v224_v6 = vld [vmem:[%s7895_s2 + $0x588] sm:$0xff] }
  0x7a   :  { %1802 = vmatprep.subr.bf16.mxu0 %v4812_v7  ;;  %v228_v7 = vld [vmem:[%s7895_s2 + $0x5a8] sm:$0xff] }
  0x7b   :  { %1721 = vmatpush1.bf16.msra.mxu1 %v4809_v11  ;;  %v4874_v11 = vcombine.high %v216_v61, %v220_v62  ;;  %v4882_v17 = vcombine.high %v224_v6, %v228_v7 }
  0x7c   :  { %1722 = vmatprep.subr.bf16.mxu1 %v4818_v14  ;;  %v229_v14 = vld [vmem:[%s7895_s2 + $0x5b0] sm:$0xff] }
  0x7d   :  { %1803 = vmatpush1.bf16.msra.mxu0 %v4811_v15  ;;  %v4876_v15 = vcombine.high %v217_v8, %v221_v10  ;;  %v4883_v28 = vcombine.low %v225_v13, %v229_v14 }
  0x7e   :  { %1804 = vmatprep.subr.bf16.mxu0 %v4820_v16  ;;  %v4873_v16 = vcombine.low %v216_v61, %v220_v62  ;;  %v269_v61 = vld [vmem:[%s7895_s2 + $0x6f0] sm:$0xff] }
  0x7f   :  { %1723 = vmatpush1.bf16.msra.mxu1 %v4817_v20  ;;  %v236_v20 = vld [vmem:[%s7895_s2 + $0x5e8] sm:$0xff] }
  0x80   :  { %1724 = vmatprep.subr.bf16.mxu1 %v4826_v23  ;;  %v237_v23 = vld [vmem:[%s7895_s2 + $0x5f0] sm:$0xff]  ;;  %v4890_v25 = vcombine.high %v232_v19, %v236_v20 }
  0x81   :  { %1805 = vmatpush1.bf16.msra.mxu0 %v4819_v24  ;;  %v4884_v24 = vcombine.high %v225_v13, %v229_v14  ;;  %v4891_v36 = vcombine.low %v233_v22, %v237_v23  ;;  %v292_v13 = vld [vmem:[%s7895_s2 + $0x7a8] sm:$0xff]  ;;  %v281_v14 = vld [vmem:[%s7895_s2 + $0x750] sm:$0xff] }
  0x82   :  { %1806 = vmatprep.subr.bf16.mxu0 %v4828_v56  ;;  %v4881_v56 = vcombine.low %v224_v6, %v228_v7  ;;  %v277_v6 = vld [vmem:[%s7895_s2 + $0x730] sm:$0xff] }
  0x83   :  { %1725 = vmatpush1.bf16.msra.mxu1 %v4825_v27  ;;  %v244_v27 = vld [vmem:[%s7895_s2 + $0x628] sm:$0xff] }
  0x84   :  { %1735 = vmatprep.subr.bf16.mxu1 %v4834_v30  ;;  %v245_v30 = vld [vmem:[%s7895_s2 + $0x630] sm:$0xff] }
  0x85   :  { %1807 = vmatpush1.bf16.msra.mxu0 %v4827_v31  ;;  %v4892_v31 = vcombine.high %v233_v22, %v237_v23  ;;  %v4900_v37 = vcombine.high %v241_v29, %v245_v30  ;;  %v4899_v44 = vcombine.low %v241_v29, %v245_v30  ;;  %v300_v22 = vld [vmem:[%s7895_s2 + $0x7e8] sm:$0xff]  ;;  %v289_v23 = vld [vmem:[%s7895_s2 + $0x790] sm:$0xff]  ;;  %v54_v29 = vld [vmem:[%s7895_s2 + $0x38] sm:$0xff] }
  0x86   :  { %1817 = vmatprep.subr.bf16.mxu0 %v4836_v32  ;;  %1727 = vmatmul.mubr.bf16.vlgmr.msra.gmra.mrb[4].mxu1 %v6181_v18  ;;  %v4889_v32 = vcombine.low %v232_v19, %v236_v20  ;;  %v297_v30 = vld [vmem:[%s7895_s2 + $0x7d0] sm:$0xff] }
  0x87   :  { %1736 = vmatpush1.bf16.msra.mxu1 %v4833_v33  ;;  %1767 = vmatprep.mubr.bf16.mxu1 %v6074_v9  ;;  %v4898_v33 = vcombine.high %v240_v26, %v244_v27 }
  0x88   :  { %1737 = vmatprep.subr.bf16.mxu1 %v4842_v38  ;;  %1809 = vmatmul.mubr.bf16.vlgmr.msra.gmra.mrb[4].mxu0 %v6181_v18  ;;  %v4897_v38 = vcombine.low %v240_v26, %v244_v27 }
  0x89   :  { %1818 = vmatpush1.bf16.msra.mxu0 %v4835_v39  ;;  %1849 = vmatprep.mubr.bf16.mxu0 %v6074_v9  ;;  %v256_v39 = vld [vmem:[%s7895_s2 + $0x688] sm:$0xff] }
  0x8a   :  { %1819 = vmatprep.subr.bf16.mxu0 %v4844_v40  ;;  %v260_v40 = vld [vmem:[%s7895_s2 + $0x6a8] sm:$0xff] }
  0x8b   :  { %1738 = vmatpush1.bf16.msra.mxu1 %v4841_v41  ;;  %v249_v41 = vld [vmem:[%s7895_s2 + $0x650] sm:$0xff]  ;;  %v4914_v52 = vcombine.high %v256_v39, %v260_v40 }
  0x8c   :  { %1739 = vmatprep.subr.bf16.mxu1 %v4850_v46  ;;  %v4908_v45 = vcombine.high %v249_v41, %v253_v42  ;;  %v4905_v46 = vcombine.low %v248_v34, %v252_v35  ;;  %v4907_v53 = vcombine.low %v249_v41, %v253_v42  ;;  %v66_v41 = vld [vmem:[%s7895_s2 + $0x98] sm:$0xff] }
  0x8d   :  { %1820 = vmatpush1.bf16.msra.mxu0 %v4843_v48  ;;  %v264_v48 = vld [vmem:[%s7895_s2 + $0x6c8] sm:$0xff]  ;;  %v70_v42 = vld [vmem:[%s7895_s2 + $0xb8] sm:$0xff] }
  0x8e   :  { %1821 = vmatprep.subr.bf16.mxu0 %v4852_v49  ;;  %v268_v49 = vld [vmem:[%s7895_s2 + $0x6e8] sm:$0xff] }
  0x8f   :  { %1740 = vmatpush1.bf16.msra.mxu1 %v4849_v50  ;;  %v257_v50 = vld [vmem:[%s7895_s2 + $0x690] sm:$0xff]  ;;  %v4922_v62 = vcombine.high %v264_v48, %v268_v49 }
  0x90   :  { %1741 = vmatprep.subr.bf16.mxu1 %v4858_v55  ;;  %v4916_v54 = vcombine.high %v257_v50, %v261_v51  ;;  %v4913_v55 = vcombine.low %v256_v39, %v260_v40  ;;  %v4915_v63 = vcombine.low %v257_v50, %v261_v51  ;;  %v4726_v50 = vcombine.high %v66_v41, %v70_v42  ;;  %v78_v51 = vld [vmem:[%s7895_s2 + $0xf8] sm:$0xff] }
  0x91   :  { %1822 = vmatpush1.bf16.msra.mxu0 %v4851_v57  ;;  %v272_v57 = vld [vmem:[%s7895_s2 + $0x708] sm:$0xff] }
  0x92   :  { %1823 = vmatprep.subr.bf16.mxu0 %v4860_v58  ;;  %v276_v58 = vld [vmem:[%s7895_s2 + $0x728] sm:$0xff] }
  0x93   :  { %1742 = vmatpush1.bf16.msra.mxu1 %v4857_v60  ;;  %v265_v60 = vld [vmem:[%s7895_s2 + $0x6d0] sm:$0xff]  ;;  %v4930_v7 = vcombine.high %v272_v57, %v276_v58 }
  0x94   :  { %1743 = vmatprep.subr.bf16.mxu1 %v4866_v1  ;;  %v4924_v0 = vcombine.high %v265_v60, %v269_v61  ;;  %v4921_v1 = vcombine.low %v264_v48, %v268_v49  ;;  %v4923_v8 = vcombine.low %v265_v60, %v269_v61  ;;  %v74_v48 = vld [vmem:[%s7895_s2 + $0xd8] sm:$0xff]  ;;  %v5379_v49 = vld [vmem:[%s7896_s3 + $0x24] ss:$16 sps:$4 sm:$0xff]  }
  0x95   :  { %1824 = vmatpush1.bf16.msra.mxu0 %v4859_v2  ;;  %v280_v2 = vld [vmem:[%s7895_s2 + $0x748] sm:$0xff]  ;;  %v4733_v60 = vcombine.low %v74_v48, %v78_v51  ;;  %v90_v61 = vld [vmem:[%s7895_s2 + $0x158] sm:$0xff] }
  0x96   :  { %1825 = vmatprep.subr.bf16.mxu0 %v4868_v4  ;;  %v284_v4 = vld [vmem:[%s7895_s2 + $0x768] sm:$0xff] }
  0x97   :  { %1744 = vmatpush1.bf16.msra.mxu1 %v4865_v5  ;;  %v273_v5 = vld [vmem:[%s7895_s2 + $0x710] sm:$0xff]  ;;  %v4937_v20 = vcombine.low %v280_v2, %v284_v4 }
  0x98   :  { %1745 = vmatprep.subr.bf16.mxu1 %v4874_v11  ;;  %v4932_v10 = vcombine.high %v273_v5, %v277_v6  ;;  %v4929_v11 = vcombine.low %v272_v57, %v276_v58  ;;  %v4734_v57 = vcombine.high %v74_v48, %v78_v51  ;;  %v5383_v58 = vld [vmem:[%s7896_s3 + $0x40] ss:$16 sps:$4 sm:$0xff]  }
  0x99   :  { %1826 = vmatpush1.bf16.msra.mxu0 %v4867_v12  ;;  %v288_v12 = vld [vmem:[%s7895_s2 + $0x788] sm:$0xff] }
  0x9a   :  { %1827 = vmatprep.subr.bf16.mxu0 %v4876_v15  ;;  %v285_v15 = vld [vmem:[%s7895_s2 + $0x770] sm:$0xff]  ;;  %v4945_v27 = vcombine.low %v288_v12, %v292_v13 }
  0x9b   :  { %1746 = vmatpush1.bf16.msra.mxu1 %v4873_v16  ;;  %v4938_v16 = vcombine.high %v280_v2, %v284_v4  ;;  %v4940_v19 = vcombine.high %v281_v14, %v285_v15  ;;  %v5397_v4 = vld [vmem:[%s7896_s3 + $0x84] ss:$16 sps:$4 sm:$0xff]  }
  0x9c   :  { %1747 = vmatprep.subr.bf16.mxu1 %v4882_v17  ;;  %v4931_v17 = vcombine.low %v273_v5, %v277_v6 }
  0x9d   :  { %1828 = vmatpush1.bf16.msra.mxu0 %v4875_v21  ;;  %v296_v21 = vld [vmem:[%s7895_s2 + $0x7c8] sm:$0xff] }
  0x9e   :  { %1829 = vmatprep.subr.bf16.mxu0 %v4884_v24  ;;  %v293_v24 = vld [vmem:[%s7895_s2 + $0x7b0] sm:$0xff]  ;;  %v4953_v35 = vcombine.low %v296_v21, %v300_v22 }
  0x9f   :  { %1748 = vmatpush1.bf16.msra.mxu1 %v4881_v56  ;;  %v4946_v56 = vcombine.high %v288_v12, %v292_v13  ;;  %v4948_v26 = vcombine.high %v289_v23, %v293_v24 }
  0xa0   :  { %1749 = vmatprep.subr.bf16.mxu1 %v4890_v25  ;;  %v4939_v25 = vcombine.low %v281_v14, %v285_v15 }
  0xa1   :  { %1830 = vmatpush1.bf16.msra.mxu0 %v4883_v28  ;;  %v50_v28 = vld [vmem:[%s7895_s2 + $0x18] sm:$0xff] }
  0xa2   :  { %1831 = vmatprep.subr.bf16.mxu0 %v4892_v31  ;;  %v301_v31 = vld [vmem:[%s7895_s2 + $0x7f0] sm:$0xff]  ;;  %v4709_v40 = vcombine.low %v50_v28, %v54_v29 }
  0xa3   :  { %1750 = vmatpush1.bf16.msra.mxu1 %v4889_v32  ;;  %v4954_v32 = vcombine.high %v296_v21, %v300_v22  ;;  %v4956_v34 = vcombine.high %v297_v30, %v301_v31  ;;  %v4955_v39 = vcombine.low %v297_v30, %v301_v31 }
  0xa4   :  { %1751 = vmatprep.subr.bf16.mxu1 %v4898_v33  ;;  %v4947_v33 = vcombine.low %v289_v23, %v293_v24 }
  0xa5   :  { %1832 = vmatpush1.bf16.msra.mxu0 %v4891_v36  ;;  %v58_v36 = vld [vmem:[%s7895_s2 + $0x58] sm:$0xff] }
  0xa6   :  { %1833 = vmatprep.subr.bf16.mxu0 %v4900_v37  ;;  %v62_v37 = vld [vmem:[%s7895_s2 + $0x78] sm:$0xff] }
  0xa7   :  { %1752 = vmatpush1.bf16.msra.mxu1 %v4897_v38  ;;  %v4710_v38 = vcombine.high %v50_v28, %v54_v29 }
  0xa8   :  { %1753 = vmatprep.subr.bf16.mxu1 %v4906_v43  ;;  %v4718_v43 = vcombine.high %v58_v36, %v62_v37 }
  0xa9   :  { %1834 = vmatpush1.bf16.msra.mxu0 %v4899_v44  ;;  %v5371_v44 = vld [vmem:[%s7896_s3] ss:$16 sps:$4 sm:$0xff]  }
  0xaa   :  { %1835 = vmatprep.subr.bf16.mxu0 %v4908_v45  ;;  %v5373_v45 = vld [vmem:[%s7896_s3 + $0x4] ss:$16 sps:$4 sm:$0xff]  }
  0xab   :  { %1754 = vmatpush1.bf16.msra.mxu1 %v4905_v46  ;;  %v4717_v46 = vcombine.low %v58_v36, %v62_v37 }
  0xac   :  { %1755 = vmatprep.subr.bf16.mxu1 %v4914_v52  ;;  %v5377_v52 = vld [vmem:[%s7896_s3 + $0x20] ss:$16 sps:$4 sm:$0xff]  }
  0xad   :  { %1836 = vmatpush1.bf16.msra.mxu0 %v4907_v53  ;;  %v82_v53 = vld [vmem:[%s7895_s2 + $0x118] sm:$0xff] }
  0xae   :  { %1837 = vmatprep.subr.bf16.mxu0 %v4916_v54  ;;  %v86_v54 = vld [vmem:[%s7895_s2 + $0x138] sm:$0xff] }
  0xaf   :  { %1756 = vmatpush1.bf16.msra.mxu1 %v4913_v55  ;;  %v5385_v55 = vld [vmem:[%s7896_s3 + $0x44] ss:$16 sps:$4 sm:$0xff]   ;;  %v4741_v2 = vcombine.low %v82_v53, %v86_v54 }
  0xb0   :  { %1757 = vmatprep.subr.bf16.mxu1 %v4922_v62  ;;  %v94_v62 = vld [vmem:[%s7895_s2 + $0x178] sm:$0xff] }
  0xb1   :  { %1838 = vmatpush1.bf16.msra.mxu0 %v4915_v63  ;;  %v5391_v63 = vld [vmem:[%s7896_s3 + $0x64] ss:$16 sps:$4 sm:$0xff]   ;;  %v4750_v5 = vcombine.high %v90_v61, %v94_v62 }
  0xb2   :  { %1839 = vmatprep.subr.bf16.mxu0 %v4924_v0  ;;  %v4742_v0 = vcombine.high %v82_v53, %v86_v54 }
  0xb3   :  { %1758 = vmatpush1.bf16.msra.mxu1 %v4921_v1  ;;  %v5389_v1 = vld [vmem:[%s7896_s3 + $0x60] ss:$16 sps:$4 sm:$0xff]  }
  0xb4   :  { %1759 = vmatprep.subr.bf16.mxu1 %v4930_v7 }
  0xb5   :  { %1840 = vmatpush1.bf16.msra.mxu0 %v4923_v8 }
  0xb6   :  { %1841 = vmatprep.subr.bf16.mxu0 %v4932_v10 }
  0xb7   :  { %1760 = vmatpush1.bf16.msra.mxu1 %v4929_v11 }
  0xb8   :  { %1761 = vmatprep.subr.bf16.mxu1 %v4938_v16 }
  0xb9   :  { %1842 = vmatpush1.bf16.msra.mxu0 %v4931_v17 }
  0xba   :  { %1843 = vmatprep.subr.bf16.mxu0 %v4940_v19 }
  0xbb   :  { %1762 = vmatpush1.bf16.msra.mxu1 %v4937_v20 }
  0xbc   :  { %1763 = vmatprep.subr.bf16.mxu1 %v4946_v56 }
  0xbd   :  { %1844 = vmatpush1.bf16.msra.mxu0 %v4939_v25 }
  0xbe   :  { %1845 = vmatprep.subr.bf16.mxu0 %v4948_v26 }
  0xbf   :  { %1764 = vmatpush1.bf16.msra.mxu1 %v4945_v27 }
  0xc0   :  { %1765 = vmatprep.subr.bf16.mxu1 %v4954_v32 }
  0xc1   :  { %1846 = vmatpush1.bf16.msra.mxu0 %v4947_v33 }
  0xc2   :  { %1847 = vmatprep.subr.bf16.mxu0 %v4956_v34 }
  0xc3   :  { %1766 = vmatpush1.bf16.msra.mxu1 %v4953_v35 }
  0xc4   :  { %1858 = vmatprep.subr.bf16.mxu1 %v4710_v38 }
  0xc5   :  { %1848 = vmatpush1.bf16.msra.mxu0 %v4955_v39 }
  0xc6   :  { %1768 = vmatmul.mubr.bf16.vlgmr.msra.gmra.mrb[4].mxu1 %v6197_v59  ;;  %3677 = vmatprep.subr.bf16.mxu0 %v5373_v45 }
  0xc7   :  { %1859 = vmatpush1.bf16.msra.mxu1 %v4709_v40  ;;  %1890 = vmatprep.mubr.bf16.mxu1 %v6063_v3  ;;  %v4725_v3 = vcombine.low %v66_v41, %v70_v42 }
  0xc8   :  { %1860 = vmatprep.subr.bf16.mxu1 %v4718_v43  ;;  %1850 = vmatmul.mubr.bf16.vlgmr.msra.gmra.mrb[4].mxu0 %v6197_v59 }
  0xc9   :  { %3678 = vmatpush1.bf16.msra.mxu0 %v5371_v44 }
  0xca   :  { %3679 = vmatprep.subr.bf16.mxu0 %v5379_v49 }
  0xcb   :  { %1861 = vmatpush1.bf16.msra.mxu1 %v4717_v46 }
  0xcc   :  { %1862 = vmatprep.subr.bf16.mxu1 %v4726_v50 }
  0xcd   :  { %3680 = vmatpush1.bf16.msra.mxu0 %v5377_v52 }
  0xce   :  { %3681 = vmatprep.subr.bf16.mxu0 %v5385_v55 }
  0xcf   :  { %1863 = vmatpush1.bf16.msra.mxu1 %v4725_v3 }
  0xd0   :  { %1864 = vmatprep.subr.bf16.mxu1 %v4734_v57 }
  0xd1   :  { %3682 = vmatpush1.bf16.msra.mxu0 %v5383_v58 }
  0xd2   :  { %3683 = vmatprep.subr.bf16.mxu0 %v5391_v63 }
  0xd3   :  { %1865 = vmatpush1.bf16.msra.mxu1 %v4733_v60 }
  0xd4   :  { %1866 = vmatprep.subr.bf16.mxu1 %v4742_v0 }
  0xd5   :  { %16 = vsyncpa [#allocation5], 0  ;;  %v98_v6 = vld [vmem:[%s7895_s2 + $0x198] sm:$0xff]  ;;  %3684 = vmatpush1.bf16.msra.mxu0 %v5389_v1  ;;  %v5395_v8 = vld [vmem:[%s7896_s3 + $0x80] ss:$16 sps:$4 sm:$0xff]   ;;  %v4749_v10 = vcombine.low %v90_v61, %v94_v62  ;;  %vm4670_vm0 = vcmask 74752  }
  0xd6   :  { %v102_v7 = vld [vmem:[%s7895_s2 + $0x1b8] sm:$0xff]  ;;  %3685 = vmatprep.subr.bf16.mxu0 %v5397_v4  ;;  %v5403_v11 = vld [vmem:[%s7896_s3 + $0xa4] ss:$16 sps:$4 sm:$0xff]   ;;  %v5401_v15 = vld [vmem:[%s7896_s3 + $0xa0] ss:$16 sps:$4 sm:$0xff]  }
  0xd7   :  { %1867 = vmatpush1.bf16.msra.mxu1 %v4741_v2  ;;  %v4758_v12 = vcombine.high %v98_v6, %v102_v7  ;;  %v106_v13 = vld [vmem:[%s7895_s2 + $0x1d8] sm:$0xff]  ;;  %v4757_v16 = vcombine.low %v98_v6, %v102_v7  ;;  %v5409_v17 = vld [vmem:[%s7896_s3 + $0xc4] ss:$16 sps:$4 sm:$0xff]   ;;  %v5407_v22 = vld [vmem:[%s7896_s3 + $0xc0] ss:$16 sps:$4 sm:$0xff]  }
  0xd8   :  { %1868 = vmatprep.subr.bf16.mxu1 %v4750_v5  ;;  %v110_v14 = vld [vmem:[%s7895_s2 + $0x1f8] sm:$0xff]  ;;  %v5415_v24 = vld [vmem:[%s7896_s3 + $0xe4] ss:$16 sps:$4 sm:$0xff]   ;;  %v5413_v27 = vld [vmem:[%s7896_s3 + $0xe0] ss:$16 sps:$4 sm:$0xff]  }
  0xd9   :  { %3686 = vmatpush1.bf16.msra.mxu0 %v5395_v8  ;;  %v4766_v19 = vcombine.high %v106_v13, %v110_v14  ;;  %v114_v20 = vld [vmem:[%s7895_s2 + $0x218] sm:$0xff]  ;;  %v4765_v23 = vcombine.low %v106_v13, %v110_v14  ;;  %v5421_v29 = vld [vmem:[%s7896_s3 + $0x104] ss:$16 sps:$4 sm:$0xff]   ;;  %v5419_v33 = vld [vmem:[%s7896_s3 + $0x100] ss:$16 sps:$4 sm:$0xff]  }
  0xda   :  { %3687 = vmatprep.subr.bf16.mxu0 %v5403_v11  ;;  %v118_v21 = vld [vmem:[%s7895_s2 + $0x238] sm:$0xff]  ;;  %v5427_v35 = vld [vmem:[%s7896_s3 + $0x124] ss:$16 sps:$4 sm:$0xff]   ;;  %v5425_v39 = vld [vmem:[%s7896_s3 + $0x120] ss:$16 sps:$4 sm:$0xff]  }
  0xdb   :  { %1869 = vmatpush1.bf16.msra.mxu1 %v4749_v10  ;;  %v4774_v56 = vcombine.high %v114_v20, %v118_v21  ;;  %v122_v25 = vld [vmem:[%s7895_s2 + $0x258] sm:$0xff]  ;;  %v4773_v28 = vcombine.low %v114_v20, %v118_v21  ;;  %v5433_v41 = vld [vmem:[%s7896_s3 + $0x144] ss:$16 sps:$4 sm:$0xff]   ;;  %v5431_v45 = vld [vmem:[%s7896_s3 + $0x140] ss:$16 sps:$4 sm:$0xff]  }
  0xdc   :  { %1870 = vmatprep.subr.bf16.mxu1 %v4758_v12  ;;  %v126_v26 = vld [vmem:[%s7895_s2 + $0x278] sm:$0xff]  ;;  %v5439_v48 = vld [vmem:[%s7896_s3 + $0x164] ss:$16 sps:$4 sm:$0xff]   ;;  %v5437_v52 = vld [vmem:[%s7896_s3 + $0x160] ss:$16 sps:$4 sm:$0xff]  }
  0xdd   :  { %3688 = vmatpush1.bf16.msra.mxu0 %v5401_v15  ;;  %v4782_v30 = vcombine.high %v122_v25, %v126_v26  ;;  %v130_v31 = vld [vmem:[%s7895_s2 + $0x298] sm:$0xff]  ;;  %v4781_v34 = vcombine.low %v122_v25, %v126_v26 }
  0xde   :  { %3689 = vmatprep.subr.bf16.mxu0 %v5409_v17  ;;  %v134_v32 = vld [vmem:[%s7895_s2 + $0x2b8] sm:$0xff] }
  0xdf   :  { %1871 = vmatpush1.bf16.msra.mxu1 %v4757_v16  ;;  %v4790_v36 = vcombine.high %v130_v31, %v134_v32  ;;  %v138_v37 = vld [vmem:[%s7895_s2 + $0x2d8] sm:$0xff]  ;;  %v4789_v40 = vcombine.low %v130_v31, %v134_v32 }
  0xe0   :  { %1872 = vmatprep.subr.bf16.mxu1 %v4766_v19  ;;  %v142_v38 = vld [vmem:[%s7895_s2 + $0x2f8] sm:$0xff] }
  0xe1   :  { %3690 = vmatpush1.bf16.msra.mxu0 %v5407_v22  ;;  %v4798_v42 = vcombine.high %v138_v37, %v142_v38  ;;  %v146_v43 = vld [vmem:[%s7895_s2 + $0x318] sm:$0xff]  ;;  %v4797_v46 = vcombine.low %v138_v37, %v142_v38  ;;  %v5443_v38 = vld [vmem:[%s7896_s3 + $0x180] ss:$16 sps:$4 sm:$0xff]  }
  0xe2   :  { %3691 = vmatprep.subr.bf16.mxu0 %v5415_v24  ;;  %v150_v44 = vld [vmem:[%s7895_s2 + $0x338] sm:$0xff] }
  0xe3   :  { %1873 = vmatpush1.bf16.msra.mxu1 %v4765_v23  ;;  %v4806_v49 = vcombine.high %v146_v43, %v150_v44  ;;  %v154_v50 = vld [vmem:[%s7895_s2 + $0x358] sm:$0xff]  ;;  %v4805_v3 = vcombine.low %v146_v43, %v150_v44 }
  0xe4   :  { %1874 = vmatprep.subr.bf16.mxu1 %v4774_v56  ;;  %v158_v51 = vld [vmem:[%s7895_s2 + $0x378] sm:$0xff] }
  0xe5   :  { %3692 = vmatpush1.bf16.msra.mxu0 %v5413_v27  ;;  %v4814_v53 = vcombine.high %v154_v50, %v158_v51  ;;  %v162_v54 = vld [vmem:[%s7895_s2 + $0x398] sm:$0xff]  ;;  %v4813_v57 = vcombine.low %v154_v50, %v158_v51  ;;  %v5449_v50 = vld [vmem:[%s7896_s3 + $0x1a0] ss:$16 sps:$4 sm:$0xff]  }
  0xe6   :  { %3693 = vmatprep.subr.bf16.mxu0 %v5421_v29  ;;  %v166_v55 = vld [vmem:[%s7895_s2 + $0x3b8] sm:$0xff] }
  0xe7   :  { %1875 = vmatpush1.bf16.msra.mxu1 %v4773_v28  ;;  %v4822_v58 = vcombine.high %v162_v54, %v166_v55  ;;  %v170_v60 = vld [vmem:[%s7895_s2 + $0x3d8] sm:$0xff]  ;;  %v4821_v62 = vcombine.low %v162_v54, %v166_v55  ;;  %v5455_v55 = vld [vmem:[%s7896_s3 + $0x1c0] ss:$16 sps:$4 sm:$0xff]  }
  0xe8   :  { %1876 = vmatprep.subr.bf16.mxu1 %v4782_v30  ;;  %v174_v61 = vld [vmem:[%s7895_s2 + $0x3f8] sm:$0xff] }
  0xe9   :  { %3694 = vmatpush1.bf16.msra.mxu0 %v5419_v33  ;;  %v4830_v63 = vcombine.high %v170_v60, %v174_v61  ;;  %v178_v0 = vld [vmem:[%s7895_s2 + $0x418] sm:$0xff]  ;;  %v4829_v2 = vcombine.low %v170_v60, %v174_v61  ;;  %v5445_v33 = vld [vmem:[%s7896_s3 + $0x184] ss:$16 sps:$4 sm:$0xff]  }
  0xea   :  { %3695 = vmatprep.subr.bf16.mxu0 %v5427_v35  ;;  %v182_v1 = vld [vmem:[%s7895_s2 + $0x438] sm:$0xff] }
  0xeb   :  { %1877 = vmatpush1.bf16.msra.mxu1 %v4781_v34  ;;  %v4838_v4 = vcombine.high %v178_v0, %v182_v1  ;;  %v186_v5 = vld [vmem:[%s7895_s2 + $0x458] sm:$0xff]  ;;  %v4837_v7 = vcombine.low %v178_v0, %v182_v1 }
  0xec   :  { %1878 = vmatprep.subr.bf16.mxu1 %v4790_v36  ;;  %v190_v6 = vld [vmem:[%s7895_s2 + $0x478] sm:$0xff] }
  0xed   :  { %3696 = vmatpush1.bf16.msra.mxu0 %v5425_v39  ;;  %v4846_v8 = vcombine.high %v186_v5, %v190_v6  ;;  %v194_v10 = vld [vmem:[%s7895_s2 + $0x498] sm:$0xff]  ;;  %v4845_v12 = vcombine.low %v186_v5, %v190_v6 }
  0xee   :  { %3697 = vmatprep.subr.bf16.mxu0 %v5433_v41  ;;  %v198_v11 = vld [vmem:[%s7895_s2 + $0x4b8] sm:$0xff] }
  0xef   :  { %1879 = vmatpush1.bf16.msra.mxu1 %v4789_v40  ;;  %v4854_v13 = vcombine.high %v194_v10, %v198_v11  ;;  %v202_v14 = vld [vmem:[%s7895_s2 + $0x4d8] sm:$0xff]  ;;  %v4853_v16 = vcombine.low %v194_v10, %v198_v11 }
  0xf0   :  { %1880 = vmatprep.subr.bf16.mxu1 %v4798_v42  ;;  %v206_v15 = vld [vmem:[%s7895_s2 + $0x4f8] sm:$0xff] }
  0xf1   :  { %3698 = vmatpush1.bf16.msra.mxu0 %v5431_v45  ;;  %v4862_v17 = vcombine.high %v202_v14, %v206_v15  ;;  %v4861_v19 = vcombine.low %v202_v14, %v206_v15  ;;  %v218_v21 = vld [vmem:[%s7895_s2 + $0x558] sm:$0xff] }
  0xf2   :  { %3699 = vmatprep.subr.bf16.mxu0 %v5439_v48  ;;  %v222_v22 = vld [vmem:[%s7895_s2 + $0x578] sm:$0xff]  ;;  %v5451_v48 = vld [vmem:[%s7896_s3 + $0x1a4] ss:$16 sps:$4 sm:$0xff]  }
  0xf3   :  { %1881 = vmatpush1.bf16.msra.mxu1 %v4797_v46  ;;  %v4878_v24 = vcombine.high %v218_v21, %v222_v22  ;;  %v226_v56 = vld [vmem:[%s7895_s2 + $0x598] sm:$0xff]  ;;  %v4877_v26 = vcombine.low %v218_v21, %v222_v22 }
  0xf4   :  { %1882 = vmatprep.subr.bf16.mxu1 %v4806_v49  ;;  %v230_v25 = vld [vmem:[%s7895_s2 + $0x5b8] sm:$0xff] }
  0xf5   :  { %3700 = vmatpush1.bf16.msra.mxu0 %v5437_v52  ;;  %v4886_v27 = vcombine.high %v226_v56, %v230_v25  ;;  %v234_v29 = vld [vmem:[%s7895_s2 + $0x5d8] sm:$0xff]  ;;  %v4885_v37 = vcombine.low %v226_v56, %v230_v25 }
  0xf6   :  { %v238_v30 = vld [vmem:[%s7895_s2 + $0x5f8] sm:$0xff]  ;;  %3701 = vmatprep.subr.bf16.mxu0 %v5445_v33 }
  0xf7   :  { %1883 = vmatpush1.bf16.msra.mxu1 %v4805_v3  ;;  %v4894_v41 = vcombine.high %v234_v29, %v238_v30  ;;  %v242_v43 = vld [vmem:[%s7895_s2 + $0x618] sm:$0xff]  ;;  %v4893_v49 = vcombine.low %v234_v29, %v238_v30 }
  0xf8   :  { %1884 = vmatprep.subr.bf16.mxu1 %v4814_v53  ;;  %v246_v44 = vld [vmem:[%s7895_s2 + $0x638] sm:$0xff]  ;;  %v5457_v53 = vld [vmem:[%s7896_s3 + $0x1c4] ss:$16 sps:$4 sm:$0xff]  }
  0xf9   :  { %3702 = vmatpush1.bf16.msra.mxu0 %v5443_v38  ;;  %v4902_v51 = vcombine.high %v242_v43, %v246_v44  ;;  %v250_v52 = vld [vmem:[%s7895_s2 + $0x658] sm:$0xff]  ;;  %v4901_v54 = vcombine.low %v242_v43, %v246_v44 }
  0xfa   :  { %3703 = vmatprep.subr.bf16.mxu0 %v5451_v48  ;;  %v254_v3 = vld [vmem:[%s7895_s2 + $0x678] sm:$0xff] }
  0xfb   :  { %1885 = vmatpush1.bf16.msra.mxu1 %v4813_v57  ;;  %v4910_v57 = vcombine.high %v250_v52, %v254_v3  ;;  %v258_v60 = vld [vmem:[%s7895_s2 + $0x698] sm:$0xff] }
  0xfc   :  { %1886 = vmatprep.subr.bf16.mxu1 %v4822_v58  ;;  %v5463_v58 = vld [vmem:[%s7896_s3 + $0x1e4] ss:$16 sps:$4 sm:$0xff]   ;;  %v262_v61 = vld [vmem:[%s7895_s2 + $0x6b8] sm:$0xff] }
  0xfd   :  { %3704 = vmatpush1.bf16.msra.mxu0 %v5449_v50  ;;  %v4918_v0 = vcombine.high %v258_v60, %v262_v61  ;;  %v266_v1 = vld [vmem:[%s7895_s2 + $0x6d8] sm:$0xff]  ;;  %v4917_v5 = vcombine.low %v258_v60, %v262_v61  ;;  %v6970_v60 = vsub.s32 0, %v6026_v47  ;;  %v6973_v61 = vsub.s32 1, %v6026_v47 }
  0xfe   :  { %3705 = vmatprep.subr.bf16.mxu0 %v5457_v53  ;;  %v5374_v56 = vld [vmem:[%s7896_s3 + $0x8] ss:$16 sps:$4 sm:$0xff]   ;;  %v5382_v25 = vld [vmem:[%s7896_s3 + $0x2c] ss:$16 sps:$4 sm:$0xff]  }
  0xff   :  { %1887 = vmatpush1.bf16.msra.mxu1 %v4821_v62  ;;  %v5461_v62 = vld [vmem:[%s7896_s3 + $0x1e0] ss:$16 sps:$4 sm:$0xff]   ;;  %v5392_v29 = vld [vmem:[%s7896_s3 + $0x68] ss:$16 sps:$4 sm:$0xff]   ;;  %v5400_v30 = vld [vmem:[%s7896_s3 + $0x8c] ss:$16 sps:$4 sm:$0xff]  }
 0x100   :  { %1888 = vmatprep.subr.bf16.mxu1 %v4830_v63  ;;  %v4909_v63 = vcombine.low %v250_v52, %v254_v3  ;;  %v5404_v33 = vld [vmem:[%s7896_s3 + $0xa8] ss:$16 sps:$4 sm:$0xff]   ;;  %v5436_v44 = vld [vmem:[%s7896_s3 + $0x14c] ss:$16 sps:$4 sm:$0xff]  }
 0x101   :  { %3706 = vmatpush1.bf16.msra.mxu0 %v5455_v55  ;;  %v5416_v38 = vld [vmem:[%s7896_s3 + $0xe8] ss:$16 sps:$4 sm:$0xff]   ;;  %v5442_v48 = vld [vmem:[%s7896_s3 + $0x16c] ss:$16 sps:$4 sm:$0xff]  }
 0x102   :  { %3707 = vmatprep.subr.bf16.mxu0 %v5463_v58  ;;  %v5428_v43 = vld [vmem:[%s7896_s3 + $0x128] ss:$16 sps:$4 sm:$0xff]   ;;  %v5448_v50 = vld [vmem:[%s7896_s3 + $0x18c] ss:$16 sps:$4 sm:$0xff]  }
 0x103   :  { %1889 = vmatpush1.bf16.msra.mxu1 %v4829_v2  ;;  %v270_v2 = vld [vmem:[%s7895_s2 + $0x6f8] sm:$0xff] }
 0x104   :  { %1899 = vmatprep.subr.bf16.mxu1 %v4838_v4  ;;  %v5469_v4 = vld [vmem:[%s7896_s3 + $0x204] ss:$16 sps:$4 sm:$0xff]   ;;  %v4926_v6 = vcombine.high %v266_v1, %v270_v2  ;;  %v4925_v10 = vcombine.low %v266_v1, %v270_v2  ;;  %v5454_v52 = vld [vmem:[%s7896_s3 + $0x1ac] ss:$16 sps:$4 sm:$0xff]   ;;  %v5452_v3 = vld [vmem:[%s7896_s3 + $0x1a8] ss:$16 sps:$4 sm:$0xff]  }
 0x105   :  { %3708 = vmatpush1.bf16.msra.mxu0 %v5461_v62  ;;  %v5460_v53 = vld [vmem:[%s7896_s3 + $0x1cc] ss:$16 sps:$4 sm:$0xff]   ;;  %v2005_v62 = vsub.s32 2, %v6026_v47  ;;  %v5896_v1 = vmov 1983009808  }
 0x106   :  { %1891 = vmatmul.mubr.bf16.vlgmr.msra.gmra.mrb[8].mxu1 %v6181_v18  ;;  %v210_v18 = vld [vmem:[%s7895_s2 + $0x518] sm:$0xff]  ;;  %3718 = vmatprep.subr.bf16.mxu0 %v5469_v4  ;;  %v1951_v2 = vunpack.c.l.s4 %v5896_v1  ;;  %v5505_v1 = vld [vmem:[%s7896_s3 + $0x2c4] ss:$16 sps:$4 sm:$0xff]  }
 0x107   :  { %1900 = vmatpush1.bf16.msra.mxu1 %v4837_v7  ;;  %1931 = vmatprep.mubr.bf16.mxu1 %v6074_v9  ;;  %v214_v9 = vld [vmem:[%s7895_s2 + $0x538] sm:$0xff] }
 0x108   :  { %1901 = vmatprep.subr.bf16.mxu1 %v4846_v8  ;;  %v4870_v20 = vcombine.high %v210_v18, %v214_v9  ;;  %v4869_v23 = vcombine.low %v210_v18, %v214_v9  ;;  %v274_v7 = vld [vmem:[%s7895_s2 + $0x718] sm:$0xff] }
 0x109   :  { %v278_v8 = vld [vmem:[%s7895_s2 + $0x738] sm:$0xff] }
 0x10a   :  { %v4934_v11 = vcombine.high %v274_v7, %v278_v8  ;;  %v4933_v14 = vcombine.low %v274_v7, %v278_v8  ;;  %v5466_v55 = vld [vmem:[%s7896_s3 + $0x1ec] ss:$16 sps:$4 sm:$0xff]   ;;  %v1952_v8 = vunpack.c.0.s8 %v1951_v2 }
 0x10b   :  { %1902 = vmatpush1.bf16.msra.mxu1 %v4845_v12  ;;  %v282_v12 = vld [vmem:[%s7895_s2 + $0x758] sm:$0xff] }
 0x10c   :  { %1903 = vmatprep.subr.bf16.mxu1 %v4854_v13  ;;  %v286_v13 = vld [vmem:[%s7895_s2 + $0x778] sm:$0xff] }
 0x10d   :  { %v4942_v15 = vcombine.high %v282_v12, %v286_v13  ;;  %v4941_v18 = vcombine.low %v282_v12, %v286_v13  ;;  %v5472_v58 = vld [vmem:[%s7896_s3 + $0x20c] ss:$16 sps:$4 sm:$0xff]   ;;  %v6993_v12 = vsub.s32 %v1952_v8, %v6026_v47  ;;  %v5509_v8 = vld [vmem:[%s7896_s3 + $0x2e0] ss:$16 sps:$4 sm:$0xff]  }
 0x10e   :  { %v5508_v2 = vld [vmem:[%s7896_s3 + $0x2cc] ss:$16 sps:$4 sm:$0xff]  }
 0x10f   :  { %1904 = vmatpush1.bf16.msra.mxu1 %v4853_v16  ;;  %v290_v16 = vld [vmem:[%s7895_s2 + $0x798] sm:$0xff] }
 0x110   :  { %1905 = vmatprep.subr.bf16.mxu1 %v4862_v17  ;;  %v294_v17 = vld [vmem:[%s7895_s2 + $0x7b8] sm:$0xff] }
 0x111   :  { %v4950_v9 = vcombine.high %v290_v16, %v294_v17  ;;  %v4949_v21 = vcombine.low %v290_v16, %v294_v17 }
 0x113   :  { %1906 = vmatpush1.bf16.msra.mxu1 %v4861_v19  ;;  %v298_v19 = vld [vmem:[%s7895_s2 + $0x7d8] sm:$0xff] }
 0x114   :  { %1907 = vmatprep.subr.bf16.mxu1 %v4870_v20  ;;  %v302_v20 = vld [vmem:[%s7895_s2 + $0x7f8] sm:$0xff]  ;;  %s5897_s2 = smov [#allocation4]  }
 0x115   :  { %v4958_v22 = vcombine.high %v298_v19, %v302_v20  ;;  %s4694_s14 = sshll.u32 %s5897_s2, 4  ;;  %s4695_s14 = int_to_ptr.vmem [resolvable:$true] %s4694_s14 }
 0x116   :  { %s5871_s15 = scalar_lea.vmem %s4695_s14, 32  ;;  %p5876_p1 = scmp.lt.s32.totalorder %s4695_s14, %s4695_s14 }
 0x117   :  { %1908 = vmatpush1.bf16.msra.mxu1 %v4869_v23  ;;  %v4957_v23 = vcombine.low %v298_v19, %v302_v20  ;;  %p5872_p0 = scmp.ne.s32.totalorder %s4695_s14, %s5871_s15  ;;  %p5877_p2 = scmp.lt.s32.totalorder %s5871_s15, %s5871_s15 }
 0x118   :  { %1909 = vmatprep.subr.bf16.mxu1 %v4878_v24  ;;  %v5376_v24 = vld [vmem:[%s7896_s3 + $0xc] ss:$16 sps:$4 sm:$0xff]  }
 0x119   :  { %v1646_v28 = vpop.f32.mrb[0].mxu1  ;;  %p5878_p3 = por %p5877_p2, %p5876_p1 }
 0x11a   :  { %v1648_v32 = vpop.f32.mrb[1].mxu1 }
 0x11b   :  { %v1687_v31 = vpop.f32.mrb[0].mxu0  ;;  %v1650_v36 = vpop.f32.mrb[2].mxu1  ;;  %1910 = vmatpush1.bf16.msra.mxu1 %v4877_v26  ;;  %v5380_v26 = vld [vmem:[%s7896_s3 + $0x28] ss:$16 sps:$4 sm:$0xff]   ;;  %p5879_p4 = pnand %p5878_p3, %p5872_p0 }
 0x11c   :  { %v6791_v34 = vadd.f32 %v1687_v31, %v1646_v28  ;;  %v1689_v35 = vpop.f32.mrb[1].mxu0  ;;  %v1651_v40 = vpop.f32.mrb[3].mxu1  ;;  %1911 = vmatprep.subr.bf16.mxu1 %v4886_v27  ;;  %v5388_v27 = vld [vmem:[%s7896_s3 + $0x4c] ss:$16 sps:$4 sm:$0xff]   ;;  %v5386_v28 = vld [vmem:[%s7896_s3 + $0x48] ss:$16 sps:$4 sm:$0xff]  }
 0x11d   :  { %v6796_v39 = vadd.f32 %v1689_v35, %v1648_v32  ;;  %v1691_v42 = vpop.f32.mrb[2].mxu0  ;;  %v5398_v31 = vld [vmem:[%s7896_s3 + $0x88] ss:$16 sps:$4 sm:$0xff]   ;;  %v5406_v32 = vld [vmem:[%s7896_s3 + $0xac] ss:$16 sps:$4 sm:$0xff]  }
 0x11e   :  { %v1692_v45 = vpop.f32.mrb[3].mxu0  ;;  %v5412_v35 = vld [vmem:[%s7896_s3 + $0xcc] ss:$16 sps:$4 sm:$0xff]   ;;  %v5410_v36 = vld [vmem:[%s7896_s3 + $0xc8] ss:$16 sps:$4 sm:$0xff]  }
 0x11f   :  { %v1948_v46 = vcombine.low %v6791_v34, %v6796_v39  ;;  %1912 = vmatpush1.bf16.msra.mxu1 %v4885_v37  ;;  %v5418_v37 = vld [vmem:[%s7896_s3 + $0xec] ss:$16 sps:$4 sm:$0xff]   ;;  %v5434_v45 = vld [vmem:[%s7896_s3 + $0x148] ss:$16 sps:$4 sm:$0xff]   ;;  %v5467_v39 = vld [vmem:[%s7896_s3 + $0x200] ss:$16 sps:$4 sm:$0xff]  }
 0x120   :  { %1913 = vmatprep.subr.bf16.mxu1 %v4894_v41  ;;  %v5424_v40 = vld [vmem:[%s7896_s3 + $0x10c] ss:$16 sps:$4 sm:$0xff]   ;;  %v5422_v41 = vld [vmem:[%s7896_s3 + $0x108] ss:$16 sps:$4 sm:$0xff]  }
 0x121   :  { %v5430_v42 = vld [vmem:[%s7896_s3 + $0x12c] ss:$16 sps:$4 sm:$0xff]  }
 0x123   :  { %1914 = vmatpush1.bf16.msra.mxu1 %v4893_v49  ;;  %v5440_v49 = vld [vmem:[%s7896_s3 + $0x168] ss:$16 sps:$4 sm:$0xff]  }
 0x124   :  { %1915 = vmatprep.subr.bf16.mxu1 %v4902_v51  ;;  %v5446_v51 = vld [vmem:[%s7896_s3 + $0x188] ss:$16 sps:$4 sm:$0xff]  }
 0x127   :  { %1916 = vmatpush1.bf16.msra.mxu1 %v4901_v54  ;;  %v5458_v54 = vld [vmem:[%s7896_s3 + $0x1c8] ss:$16 sps:$4 sm:$0xff]  }
 0x128   :  { %1917 = vmatprep.subr.bf16.mxu1 %v4910_v57  ;;  %v5464_v57 = vld [vmem:[%s7896_s3 + $0x1e8] ss:$16 sps:$4 sm:$0xff]  }
 0x12b   :  { %1918 = vmatpush1.bf16.msra.mxu1 %v4909_v63  ;;  %v2009_v63 = vsub.s32 3, %v6026_v47 }
 0x12c   :  { %1919 = vmatprep.subr.bf16.mxu1 %v4918_v0  ;;  %v6980_v0 = vld [vmem:[%s7899_s6] sm:$0xff] }
 0x12d   :  { %v1998_v4 = vrot.slane %v6980_v0, %v6970_v60  ;;  %v2010_v7 = vrot.slane %v6980_v0, %v2009_v63 }
 0x12f   :  { %1920 = vmatpush1.bf16.msra.mxu1 %v4917_v5  ;;  %v2002_v5 = vrot.slane %v6980_v0, %v6973_v61 }
 0x130   :  { %1921 = vmatprep.subr.bf16.mxu1 %v4926_v6  ;;  %v2006_v6 = vrot.slane %v6980_v0, %v2005_v62 }
 0x133   :  { %1922 = vmatpush1.bf16.msra.mxu1 %v4925_v10  ;;  %v2027_v10 = vcombine.low %v1998_v4, %v2002_v5  ;;  %v5503_v4 = vld [vmem:[%s7896_s3 + $0x2c0] ss:$16 sps:$4 sm:$0xff]   ;;  %v5506_v5 = vld [vmem:[%s7896_s3 + $0x2c8] ss:$16 sps:$4 sm:$0xff]  }
 0x134   :  { %1923 = vmatprep.subr.bf16.mxu1 %v4934_v11  ;;  %v2028_v11 = vcombine.low %v2006_v6, %v2010_v7  ;;  %v5511_v6 = vld [vmem:[%s7896_s3 + $0x2e4] ss:$16 sps:$4 sm:$0xff]   ;;  %v5514_v7 = vld [vmem:[%s7896_s3 + $0x2ec] ss:$16 sps:$4 sm:$0xff]  }
 0x137   :  { %1924 = vmatpush1.bf16.msra.mxu1 %v4933_v14  ;;  %v2035_v14 = vrot.slane %v2027_v10, %v6993_v12  ;;  %v5512_v10 = vld [vmem:[%s7896_s3 + $0x2e8] ss:$16 sps:$4 sm:$0xff]  }
 0x138   :  { %1925 = vmatprep.subr.bf16.mxu1 %v4942_v15  ;;  %v2042_v15 = vrot.slane %v2028_v11, %v6993_v12  ;;  %v5517_v11 = vld [vmem:[%s7896_s3 + $0x304] ss:$16 sps:$4 sm:$0xff]  }
 0x13b   :  { %1926 = vmatpush1.bf16.msra.mxu1 %v4941_v18 }
 0x13c   :  { %1927 = vmatprep.subr.bf16.mxu1 %v4950_v9 }
 0x13f   :  { %1928 = vmatpush1.bf16.msra.mxu1 %v4949_v21  ;;  %v1956_v21 = vrot.slane %v1948_v46, %v6993_v12  ;;  %v5470_v46 = vld [vmem:[%s7896_s3 + $0x208] ss:$16 sps:$4 sm:$0xff]  }
 0x140   :  { %1929 = vmatprep.subr.bf16.mxu1 %v4958_v22 }
 0x143   :  { %1930 = vmatpush1.bf16.msra.mxu1 %v4957_v23  ;;  %v2043_v23 = vcombine.low %v2035_v14, %v2042_v15  ;;  %v5515_v14 = vld [vmem:[%s7896_s3 + $0x300] ss:$16 sps:$4 sm:$0xff]   ;;  %v5518_v15 = vld [vmem:[%s7896_s3 + $0x308] ss:$16 sps:$4 sm:$0xff]  }
 0x144   :  { %3841 = vmatprep.subr.bf16.mxu1 %v5376_v24 }
 0x146   :  { %1932 = vmatmul.mubr.bf16.vlgmr.msra.gmra.mrb[8].mxu1 %v6197_v59  ;;  %v5394_v59 = vld [vmem:[%s7896_s3 + $0x6c] ss:$16 sps:$4 sm:$0xff]  }
 0x147   :  { %3842 = vmatpush1.bf16.msra.mxu1 %v5374_v56 }
 0x148   :  { %3843 = vmatprep.subr.bf16.mxu1 %v5382_v25 }
 0x14b   :  { %3844 = vmatpush1.bf16.msra.mxu1 %v5380_v26 }
 0x14c   :  { %3845 = vmatprep.subr.bf16.mxu1 %v5388_v27 }
 0x14f   :  { %3846 = vmatpush1.bf16.msra.mxu1 %v5386_v28 }
 0x150   :  { %3847 = vmatprep.subr.bf16.mxu1 %v5394_v59 }
 0x153   :  { %3848 = vmatpush1.bf16.msra.mxu1 %v5392_v29 }
 0x154   :  { %3849 = vmatprep.subr.bf16.mxu1 %v5400_v30 }
 0x157   :  { %3850 = vmatpush1.bf16.msra.mxu1 %v5398_v31 }
 0x158   :  { %3851 = vmatprep.subr.bf16.mxu1 %v5406_v32 }
 0x15b   :  { %3852 = vmatpush1.bf16.msra.mxu1 %v5404_v33 }
 0x15c   :  { %3853 = vmatprep.subr.bf16.mxu1 %v5412_v35 }
 0x15f   :  { %3854 = vmatpush1.bf16.msra.mxu1 %v5410_v36  ;;  %v5475_v36 = vld [vmem:[%s7896_s3 + $0x224] ss:$16 sps:$4 sm:$0xff]  }
 0x160   :  { %3855 = vmatprep.subr.bf16.mxu1 %v5418_v37  ;;  %v5478_v37 = vld [vmem:[%s7896_s3 + $0x22c] ss:$16 sps:$4 sm:$0xff]  }
 0x163   :  { %3856 = vmatpush1.bf16.msra.mxu1 %v5416_v38  ;;  %v5473_v38 = vld [vmem:[%s7896_s3 + $0x220] ss:$16 sps:$4 sm:$0xff]  }
 0x164   :  { %3857 = vmatprep.subr.bf16.mxu1 %v5424_v40  ;;  %v5476_v40 = vld [vmem:[%s7896_s3 + $0x228] ss:$16 sps:$4 sm:$0xff]  }
 0x167   :  { %3858 = vmatpush1.bf16.msra.mxu1 %v5422_v41  ;;  %v5481_v41 = vld [vmem:[%s7896_s3 + $0x244] ss:$16 sps:$4 sm:$0xff]  }
 0x168   :  { %3859 = vmatprep.subr.bf16.mxu1 %v5430_v42  ;;  %v5484_v42 = vld [vmem:[%s7896_s3 + $0x24c] ss:$16 sps:$4 sm:$0xff]  }
 0x16b   :  { %3860 = vmatpush1.bf16.msra.mxu1 %v5428_v43  ;;  %v5479_v43 = vld [vmem:[%s7896_s3 + $0x240] ss:$16 sps:$4 sm:$0xff]  }
 0x16c   :  { %3861 = vmatprep.subr.bf16.mxu1 %v5436_v44  ;;  %v5482_v44 = vld [vmem:[%s7896_s3 + $0x248] ss:$16 sps:$4 sm:$0xff]  }
 0x16f   :  { %3862 = vmatpush1.bf16.msra.mxu1 %v5434_v45  ;;  %v5487_v45 = vld [vmem:[%s7896_s3 + $0x264] ss:$16 sps:$4 sm:$0xff]  }
 0x170   :  { %3863 = vmatprep.subr.bf16.mxu1 %v5442_v48  ;;  %v5490_v48 = vld [vmem:[%s7896_s3 + $0x26c] ss:$16 sps:$4 sm:$0xff]  }
 0x173   :  { %3864 = vmatpush1.bf16.msra.mxu1 %v5440_v49  ;;  %v5485_v49 = vld [vmem:[%s7896_s3 + $0x260] ss:$16 sps:$4 sm:$0xff]  }
 0x174   :  { %3865 = vmatprep.subr.bf16.mxu1 %v5448_v50  ;;  %v5488_v50 = vld [vmem:[%s7896_s3 + $0x268] ss:$16 sps:$4 sm:$0xff]  }
 0x177   :  { %3866 = vmatpush1.bf16.msra.mxu1 %v5446_v51  ;;  %v5493_v51 = vld [vmem:[%s7896_s3 + $0x284] ss:$16 sps:$4 sm:$0xff]  }
 0x178   :  { %3867 = vmatprep.subr.bf16.mxu1 %v5454_v52  ;;  %v5496_v52 = vld [vmem:[%s7896_s3 + $0x28c] ss:$16 sps:$4 sm:$0xff]  }
 0x17b   :  { %3868 = vmatpush1.bf16.msra.mxu1 %v5452_v3  ;;  %v5491_v3 = vld [vmem:[%s7896_s3 + $0x280] ss:$16 sps:$4 sm:$0xff]  }
 0x17c   :  { %3869 = vmatprep.subr.bf16.mxu1 %v5460_v53  ;;  %v5494_v53 = vld [vmem:[%s7896_s3 + $0x288] ss:$16 sps:$4 sm:$0xff]  }
 0x17f   :  { %3870 = vmatpush1.bf16.msra.mxu1 %v5458_v54  ;;  %v5499_v54 = vld [vmem:[%s7896_s3 + $0x2a4] ss:$16 sps:$4 sm:$0xff]  }
 0x180   :  { %3871 = vmatprep.subr.bf16.mxu1 %v5466_v55  ;;  %v5502_v55 = vld [vmem:[%s7896_s3 + $0x2ac] ss:$16 sps:$4 sm:$0xff]  }
 0x183   :  { %3872 = vmatpush1.bf16.msra.mxu1 %v5464_v57  ;;  %v5497_v57 = vld [vmem:[%s7896_s3 + $0x2a0] ss:$16 sps:$4 sm:$0xff]  }
 0x184   :  { %3882 = vmatprep.subr.bf16.mxu1 %v5472_v58  ;;  %v5500_v58 = vld [vmem:[%s7896_s3 + $0x2a8] ss:$16 sps:$4 sm:$0xff]  }
 0x199   :  { %v1769_v13 = vpop.f32.mrb[4].mxu1 }
 0x19a   :  { %v1771_v16 = vpop.f32.mrb[5].mxu1 }
 0x19b   :  { %v1949_v17 = vcombine.low %v1769_v13, %v1771_v16  ;;  %v1773_v18 = vpop.f32.mrb[6].mxu1  ;;  %v6997_v9 = vpop.f32.mrb[4].mxu0  ;;  %v5520_v13 = vld [vmem:[%s7896_s3 + $0x30c] ss:$16 sps:$4 sm:$0xff]   ;;  %v5523_v16 = vld [vmem:[%s7896_s3 + $0x324] ss:$16 sps:$4 sm:$0xff]  }
 0x19c   :  { %v1774_v19 = vpop.f32.mrb[7].mxu1  ;;  %v6999_v20 = vpop.f32.mrb[5].mxu0  ;;  %v5521_v18 = vld [vmem:[%s7896_s3 + $0x320] ss:$16 sps:$4 sm:$0xff]  }
 0x19d   :  { %v1963_v22 = vrot.slane %v1949_v17, %v6993_v12  ;;  %v1965_v24 = vcombine.low %v6997_v9, %v6999_v20  ;;  %v1855_v56 = vpop.f32.mrb[6].mxu0  ;;  %v5526_v17 = vld [vmem:[%s7896_s3 + $0x32c] ss:$16 sps:$4 sm:$0xff]   ;;  %v5524_v19 = vld [vmem:[%s7896_s3 + $0x328] ss:$16 sps:$4 sm:$0xff]  }
 0x19e   :  { %v1856_v25 = vpop.f32.mrb[7].mxu0  ;;  %v5530_v56 = vld [vmem:[%s7896_s3 + $0x348] ss:$16 sps:$4 sm:$0xff]   ;;  %v5649_v9 = vld [vmem:[%s7896_s3 + $0x5c4] ss:$16 sps:$4 sm:$0xff]  }
 0x19f   :  { %v1964_v26 = vcombine.low %v1956_v21, %v1963_v22  ;;  %v5529_v21 = vld [vmem:[%s7896_s3 + $0x344] ss:$16 sps:$4 sm:$0xff]   ;;  %v5532_v22 = vld [vmem:[%s7896_s3 + $0x34c] ss:$16 sps:$4 sm:$0xff]  }
 0x1a0   :  { %v5535_v25 = vld [vmem:[%s7896_s3 + $0x364] ss:$16 sps:$4 sm:$0xff]   ;;  %v5652_v20 = vld [vmem:[%s7896_s3 + $0x5cc] ss:$16 sps:$4 sm:$0xff]  }
 0x1a1   :  { %v2063_v27 = vadd.f32 %v2043_v23, %v1964_v26  ;;  %v5527_v23 = vld [vmem:[%s7896_s3 + $0x340] ss:$16 sps:$4 sm:$0xff]   ;;  %v5538_v26 = vld [vmem:[%s7896_s3 + $0x36c] ss:$16 sps:$4 sm:$0xff]  }
 0x1a3   :  { %v2065_v28 = vmax.f32 %v2063_v27, 0.0  ;;  %v5533_v27 = vld [vmem:[%s7896_s3 + $0x360] ss:$16 sps:$4 sm:$0xff]  }
 0x1a5   :  { %v2076_v59 = vrot.slane %v2065_v28, %v6993_v12  ;;  %v2069_v29 = vcombine.high %v2065_v28, %v2065_v28  ;;  %v5536_v28 = vld [vmem:[%s7896_s3 + $0x368] ss:$16 sps:$4 sm:$0xff]  }
 0x1a7   :  { %v2084_v30 = vcombine.high %v2076_v59, %v2076_v59  ;;  %v7010_v31 = vrot.slane %v2069_v29, %v6993_v12  ;;  %v2111_v33 = vpack.c.bf16 %v2076_v59, %v2076_v59  ;;  %v5541_v59 = vld [vmem:[%s7896_s3 + $0x384] ss:$16 sps:$4 sm:$0xff]   ;;  %v5544_v29 = vld [vmem:[%s7896_s3 + $0x38c] ss:$16 sps:$4 sm:$0xff]  }
 0x1a9   :  { %v2112_v34 = vpack.c.bf16 %v2084_v30, %v2084_v30  ;;  %v2085_v32 = vcombine.high %v7010_v31, %v7010_v31  ;;  %v5539_v30 = vld [vmem:[%s7896_s3 + $0x380] ss:$16 sps:$4 sm:$0xff]  }
 0x1ab   :  { %3709 = vmatprep.mubr.bf16.mxu0 %v2112_v34  ;;  %3873 = vmatprep.mubr.bf16.mxu1 %v2112_v34  ;;  %v2114_v35 = vpack.c.bf16 %v2085_v32, %v2085_v32  ;;  %v5542_v34 = vld [vmem:[%s7896_s3 + $0x388] ss:$16 sps:$4 sm:$0xff]   ;;  %v5545_v32 = vld [vmem:[%s7896_s3 + $0x3a0] ss:$16 sps:$4 sm:$0xff]  }
 0x1ac   :  { %3710 = vmatmul.mubr.bf16.vlgmr.msra.gmra.mrb[8].mxu0 %v2111_v33  ;;  %3874 = vmatmul.mubr.bf16.vlgmr.msra.gmra.mrb[12].mxu1 %v2111_v33  ;;  %v5548_v33 = vld [vmem:[%s7896_s3 + $0x3a8] ss:$16 sps:$4 sm:$0xff]  }
 0x1ad   :  { %3719 = vmatpush1.bf16.msra.mxu0 %v5467_v39  ;;  %3883 = vmatpush1.bf16.msra.mxu1 %v5470_v46  ;;  %v5547_v39 = vld [vmem:[%s7896_s3 + $0x3a4] ss:$16 sps:$4 sm:$0xff]   ;;  %v5550_v46 = vld [vmem:[%s7896_s3 + $0x3ac] ss:$16 sps:$4 sm:$0xff]  }
 0x1ae   :  { %3750 = vmatprep.mubr.bf16.mxu0 %v2114_v35  ;;  %3914 = vmatprep.mubr.bf16.mxu1 %v2114_v35  ;;  %v5553_v35 = vld [vmem:[%s7896_s3 + $0x3c4] ss:$16 sps:$4 sm:$0xff]  }
 0x1af   :  { %3720 = vmatprep.subr.bf16.mxu0 %v5475_v36  ;;  %3884 = vmatprep.subr.bf16.mxu1 %v5478_v37  ;;  %v5556_v36 = vld [vmem:[%s7896_s3 + $0x3cc] ss:$16 sps:$4 sm:$0xff]   ;;  %v5551_v37 = vld [vmem:[%s7896_s3 + $0x3c0] ss:$16 sps:$4 sm:$0xff]  }
 0x1b1   :  { %3721 = vmatpush1.bf16.msra.mxu0 %v5473_v38  ;;  %3885 = vmatpush1.bf16.msra.mxu1 %v5476_v40  ;;  %v5554_v38 = vld [vmem:[%s7896_s3 + $0x3c8] ss:$16 sps:$4 sm:$0xff]   ;;  %v5559_v40 = vld [vmem:[%s7896_s3 + $0x3e4] ss:$16 sps:$4 sm:$0xff]  }
 0x1b2   :  { %3722 = vmatprep.subr.bf16.mxu0 %v5481_v41  ;;  %3886 = vmatprep.subr.bf16.mxu1 %v5484_v42  ;;  %v5562_v41 = vld [vmem:[%s7896_s3 + $0x3ec] ss:$16 sps:$4 sm:$0xff]   ;;  %v5557_v42 = vld [vmem:[%s7896_s3 + $0x3e0] ss:$16 sps:$4 sm:$0xff]  }
 0x1b5   :  { %3723 = vmatpush1.bf16.msra.mxu0 %v5479_v43  ;;  %3887 = vmatpush1.bf16.msra.mxu1 %v5482_v44  ;;  %v5560_v43 = vld [vmem:[%s7896_s3 + $0x3e8] ss:$16 sps:$4 sm:$0xff]   ;;  %v5565_v44 = vld [vmem:[%s7896_s3 + $0x404] ss:$16 sps:$4 sm:$0xff]  }
 0x1b6   :  { %3724 = vmatprep.subr.bf16.mxu0 %v5487_v45  ;;  %3888 = vmatprep.subr.bf16.mxu1 %v5490_v48  ;;  %v5568_v45 = vld [vmem:[%s7896_s3 + $0x40c] ss:$16 sps:$4 sm:$0xff]   ;;  %v5563_v48 = vld [vmem:[%s7896_s3 + $0x400] ss:$16 sps:$4 sm:$0xff]  }
 0x1b9   :  { %3725 = vmatpush1.bf16.msra.mxu0 %v5485_v49  ;;  %3889 = vmatpush1.bf16.msra.mxu1 %v5488_v50  ;;  %v5566_v49 = vld [vmem:[%s7896_s3 + $0x408] ss:$16 sps:$4 sm:$0xff]   ;;  %v2113_v50 = vpack.c.bf16 %v7010_v31, %v7010_v31 }
 0x1ba   :  { %3726 = vmatprep.subr.bf16.mxu0 %v5493_v51  ;;  %3890 = vmatprep.subr.bf16.mxu1 %v5496_v52  ;;  %v5571_v51 = vld [vmem:[%s7896_s3 + $0x424] ss:$16 sps:$4 sm:$0xff]   ;;  %v5574_v52 = vld [vmem:[%s7896_s3 + $0x42c] ss:$16 sps:$4 sm:$0xff]   ;;  %v5572_v31 = vld [vmem:[%s7896_s3 + $0x428] ss:$16 sps:$4 sm:$0xff]  }
 0x1bd   :  { %3727 = vmatpush1.bf16.msra.mxu0 %v5491_v3  ;;  %3891 = vmatpush1.bf16.msra.mxu1 %v5494_v53  ;;  %v5569_v3 = vld [vmem:[%s7896_s3 + $0x420] ss:$16 sps:$4 sm:$0xff]   ;;  %v5577_v53 = vld [vmem:[%s7896_s3 + $0x444] ss:$16 sps:$4 sm:$0xff]  }
 0x1be   :  { %3728 = vmatprep.subr.bf16.mxu0 %v5499_v54  ;;  %3892 = vmatprep.subr.bf16.mxu1 %v5502_v55  ;;  %v5580_v54 = vld [vmem:[%s7896_s3 + $0x44c] ss:$16 sps:$4 sm:$0xff]   ;;  %v5575_v55 = vld [vmem:[%s7896_s3 + $0x440] ss:$16 sps:$4 sm:$0xff]  }
 0x1c1   :  { %3729 = vmatpush1.bf16.msra.mxu0 %v5497_v57  ;;  %3893 = vmatpush1.bf16.msra.mxu1 %v5500_v58  ;;  %v5578_v57 = vld [vmem:[%s7896_s3 + $0x448] ss:$16 sps:$4 sm:$0xff]   ;;  %v5583_v58 = vld [vmem:[%s7896_s3 + $0x464] ss:$16 sps:$4 sm:$0xff]  }
 0x1c2   :  { %3730 = vmatprep.subr.bf16.mxu0 %v5505_v1  ;;  %3894 = vmatprep.subr.bf16.mxu1 %v5508_v2  ;;  %v5586_v1 = vld [vmem:[%s7896_s3 + $0x46c] ss:$16 sps:$4 sm:$0xff]   ;;  %v5581_v2 = vld [vmem:[%s7896_s3 + $0x460] ss:$16 sps:$4 sm:$0xff]  }
 0x1c5   :  { %3731 = vmatpush1.bf16.msra.mxu0 %v5503_v4  ;;  %3895 = vmatpush1.bf16.msra.mxu1 %v5506_v5  ;;  %v5584_v4 = vld [vmem:[%s7896_s3 + $0x468] ss:$16 sps:$4 sm:$0xff]   ;;  %v5589_v5 = vld [vmem:[%s7896_s3 + $0x484] ss:$16 sps:$4 sm:$0xff]  }
 0x1c6   :  { %3732 = vmatprep.subr.bf16.mxu0 %v5511_v6  ;;  %3896 = vmatprep.subr.bf16.mxu1 %v5514_v7  ;;  %v5592_v6 = vld [vmem:[%s7896_s3 + $0x48c] ss:$16 sps:$4 sm:$0xff]   ;;  %v5587_v7 = vld [vmem:[%s7896_s3 + $0x480] ss:$16 sps:$4 sm:$0xff]  }
 0x1c9   :  { %3733 = vmatpush1.bf16.msra.mxu0 %v5509_v8  ;;  %3897 = vmatpush1.bf16.msra.mxu1 %v5512_v10  ;;  %v5590_v8 = vld [vmem:[%s7896_s3 + $0x488] ss:$16 sps:$4 sm:$0xff]   ;;  %v5595_v10 = vld [vmem:[%s7896_s3 + $0x4a4] ss:$16 sps:$4 sm:$0xff]  }
 0x1ca   :  { %3734 = vmatprep.subr.bf16.mxu0 %v5517_v11  ;;  %3898 = vmatprep.subr.bf16.mxu1 %v5520_v13  ;;  %v5598_v11 = vld [vmem:[%s7896_s3 + $0x4ac] ss:$16 sps:$4 sm:$0xff]   ;;  %v5593_v13 = vld [vmem:[%s7896_s3 + $0x4a0] ss:$16 sps:$4 sm:$0xff]  }
 0x1cd   :  { %3735 = vmatpush1.bf16.msra.mxu0 %v5515_v14  ;;  %3899 = vmatpush1.bf16.msra.mxu1 %v5518_v15  ;;  %v5596_v14 = vld [vmem:[%s7896_s3 + $0x4a8] ss:$16 sps:$4 sm:$0xff]   ;;  %v5601_v15 = vld [vmem:[%s7896_s3 + $0x4c4] ss:$16 sps:$4 sm:$0xff]  }
 0x1ce   :  { %3736 = vmatprep.subr.bf16.mxu0 %v5523_v16  ;;  %3900 = vmatprep.subr.bf16.mxu1 %v5526_v17  ;;  %v5604_v16 = vld [vmem:[%s7896_s3 + $0x4cc] ss:$16 sps:$4 sm:$0xff]   ;;  %v5599_v17 = vld [vmem:[%s7896_s3 + $0x4c0] ss:$16 sps:$4 sm:$0xff]  }
 0x1d1   :  { %3737 = vmatpush1.bf16.msra.mxu0 %v5521_v18  ;;  %3901 = vmatpush1.bf16.msra.mxu1 %v5524_v19  ;;  %v5602_v18 = vld [vmem:[%s7896_s3 + $0x4c8] ss:$16 sps:$4 sm:$0xff]   ;;  %v5607_v19 = vld [vmem:[%s7896_s3 + $0x4e4] ss:$16 sps:$4 sm:$0xff]  }
 0x1d2   :  { %3738 = vmatprep.subr.bf16.mxu0 %v5529_v21  ;;  %3902 = vmatprep.subr.bf16.mxu1 %v5532_v22  ;;  %v5610_v21 = vld [vmem:[%s7896_s3 + $0x4ec] ss:$16 sps:$4 sm:$0xff]   ;;  %v5605_v22 = vld [vmem:[%s7896_s3 + $0x4e0] ss:$16 sps:$4 sm:$0xff]  }
 0x1d5   :  { %3739 = vmatpush1.bf16.msra.mxu0 %v5527_v23  ;;  %3903 = vmatpush1.bf16.msra.mxu1 %v5530_v56  ;;  %v5608_v23 = vld [vmem:[%s7896_s3 + $0x4e8] ss:$16 sps:$4 sm:$0xff]   ;;  %v5613_v56 = vld [vmem:[%s7896_s3 + $0x504] ss:$16 sps:$4 sm:$0xff]  }
 0x1d6   :  { %3740 = vmatprep.subr.bf16.mxu0 %v5535_v25  ;;  %3904 = vmatprep.subr.bf16.mxu1 %v5538_v26  ;;  %v5616_v25 = vld [vmem:[%s7896_s3 + $0x50c] ss:$16 sps:$4 sm:$0xff]   ;;  %v5611_v26 = vld [vmem:[%s7896_s3 + $0x500] ss:$16 sps:$4 sm:$0xff]  }
 0x1d9   :  { %3741 = vmatpush1.bf16.msra.mxu0 %v5533_v27  ;;  %3905 = vmatpush1.bf16.msra.mxu1 %v5536_v28  ;;  %v5614_v27 = vld [vmem:[%s7896_s3 + $0x508] ss:$16 sps:$4 sm:$0xff]   ;;  %v5619_v28 = vld [vmem:[%s7896_s3 + $0x524] ss:$16 sps:$4 sm:$0xff]  }
 0x1da   :  { %3742 = vmatprep.subr.bf16.mxu0 %v5541_v59  ;;  %3906 = vmatprep.subr.bf16.mxu1 %v5544_v29  ;;  %v5622_v59 = vld [vmem:[%s7896_s3 + $0x52c] ss:$16 sps:$4 sm:$0xff]   ;;  %v5617_v29 = vld [vmem:[%s7896_s3 + $0x520] ss:$16 sps:$4 sm:$0xff]  }
 0x1dd   :  { %3743 = vmatpush1.bf16.msra.mxu0 %v5539_v30  ;;  %3907 = vmatpush1.bf16.msra.mxu1 %v5542_v34  ;;  %v2013_v30 = vsub.s32 4, %v6026_v47  ;;  %v5620_v34 = vld [vmem:[%s7896_s3 + $0x528] ss:$16 sps:$4 sm:$0xff]  }
 0x1de   :  { %3744 = vmatprep.subr.bf16.mxu0 %v5547_v39  ;;  %3908 = vmatprep.subr.bf16.mxu1 %v5550_v46  ;;  %v2017_v39 = vsub.s32 5, %v6026_v47  ;;  %v2021_v46 = vsub.s32 6, %v6026_v47 }
 0x1e1   :  { %3745 = vmatpush1.bf16.msra.mxu0 %v5545_v32  ;;  %3909 = vmatpush1.bf16.msra.mxu1 %v5548_v33  ;;  %v2025_v32 = vsub.s32 7, %v6026_v47  ;;  %v5625_v33 = vld [vmem:[%s7896_s3 + $0x544] ss:$16 sps:$4 sm:$0xff]   ;;  %v5848_v47 = vld [vmem:[%s7897_s4 + $0x1f0] ss:$8 sps:$4 sm:$0xff]  }
 0x1e2   :  { %3746 = vmatprep.subr.bf16.mxu0 %v5553_v35  ;;  %3910 = vmatprep.subr.bf16.mxu1 %v5556_v36  ;;  %v5628_v35 = vld [vmem:[%s7896_s3 + $0x54c] ss:$16 sps:$4 sm:$0xff]   ;;  %v2014_v36 = vrot.slane %v6980_v0, %v2013_v30 }
 0x1e5   :  { %3747 = vmatpush1.bf16.msra.mxu0 %v5551_v37  ;;  %3911 = vmatpush1.bf16.msra.mxu1 %v5554_v38  ;;  %v5623_v37 = vld [vmem:[%s7896_s3 + $0x540] ss:$16 sps:$4 sm:$0xff]   ;;  %v5626_v38 = vld [vmem:[%s7896_s3 + $0x548] ss:$16 sps:$4 sm:$0xff]  }
 0x1e6   :  { %3748 = vmatprep.subr.bf16.mxu0 %v5559_v40  ;;  %3912 = vmatprep.subr.bf16.mxu1 %v5562_v41  ;;  %v2018_v40 = vrot.slane %v6980_v0, %v2017_v39  ;;  %v2022_v41 = vrot.slane %v6980_v0, %v2021_v46  ;;  %v5670_v39 = vld [vmem:[%s7896_s3 + $0x62c] ss:$16 sps:$4 sm:$0xff]   ;;  %v5665_v46 = vld [vmem:[%s7896_s3 + $0x620] ss:$16 sps:$4 sm:$0xff]  }
 0x1e9   :  { %3749 = vmatpush1.bf16.msra.mxu0 %v5557_v42  ;;  %3913 = vmatpush1.bf16.msra.mxu1 %v5560_v43  ;;  %v2026_v42 = vrot.slane %v6980_v0, %v2025_v32  ;;  %v5631_v43 = vld [vmem:[%s7896_s3 + $0x564] ss:$16 sps:$4 sm:$0xff]   ;;  %v5632_v0 = vld [vmem:[%s7896_s3 + $0x568] ss:$16 sps:$4 sm:$0xff]  }
 0x1ea   :  { %3759 = vmatprep.subr.bf16.mxu0 %v5565_v44  ;;  %3923 = vmatprep.subr.bf16.mxu1 %v5568_v45  ;;  %v5634_v44 = vld [vmem:[%s7896_s3 + $0x56c] ss:$16 sps:$4 sm:$0xff]   ;;  %v5629_v45 = vld [vmem:[%s7896_s3 + $0x560] ss:$16 sps:$4 sm:$0xff]   ;;  %v5668_v32 = vld [vmem:[%s7896_s3 + $0x628] ss:$16 sps:$4 sm:$0xff]  }
 0x1ec   :  { %3751 = vmatmul.mubr.bf16.vlgmr.msra.gmra.mrb[8].mxu0 %v2113_v50  ;;  %3915 = vmatmul.mubr.bf16.vlgmr.msra.gmra.mrb[12].mxu1 %v2113_v50  ;;  %v5637_v50 = vld [vmem:[%s7896_s3 + $0x584] ss:$16 sps:$4 sm:$0xff]  }
 0x1ed   :  { %3760 = vmatpush1.bf16.msra.mxu0 %v5563_v48  ;;  %3924 = vmatpush1.bf16.msra.mxu1 %v5566_v49  ;;  %v2044_v48 = vcombine.low %v2014_v36, %v2018_v40  ;;  %v2045_v49 = vcombine.low %v2022_v41, %v2026_v42  ;;  %v5671_v36 = vld [vmem:[%s7896_s3 + $0x640] ss:$16 sps:$4 sm:$0xff]   ;;  %v5682_v40 = vld [vmem:[%s7896_s3 + $0x66c] ss:$16 sps:$4 sm:$0xff]   ;;  %v5680_v42 = vld [vmem:[%s7896_s3 + $0x668] ss:$16 sps:$4 sm:$0xff]  }
 0x1ee   :  { %3761 = vmatprep.subr.bf16.mxu0 %v5571_v51  ;;  %3925 = vmatprep.subr.bf16.mxu1 %v5574_v52  ;;  %v5640_v51 = vld [vmem:[%s7896_s3 + $0x58c] ss:$16 sps:$4 sm:$0xff]   ;;  %v5677_v41 = vld [vmem:[%s7896_s3 + $0x660] ss:$16 sps:$4 sm:$0xff]  }
 0x1f1   :  { %3762 = vmatpush1.bf16.msra.mxu0 %v5569_v3  ;;  %3926 = vmatpush1.bf16.msra.mxu1 %v5572_v31  ;;  %v2052_v3 = vrot.slane %v2044_v48, %v6993_v12  ;;  %v2059_v31 = vrot.slane %v2045_v49, %v6993_v12  ;;  %v5691_v48 = vld [vmem:[%s7896_s3 + $0x6a4] ss:$16 sps:$4 sm:$0xff]   ;;  %v5694_v49 = vld [vmem:[%s7896_s3 + $0x6ac] ss:$16 sps:$4 sm:$0xff]  }
 0x1f2   :  { %3763 = vmatprep.subr.bf16.mxu0 %v5577_v53  ;;  %3927 = vmatprep.subr.bf16.mxu1 %v5580_v54  ;;  %v5635_v53 = vld [vmem:[%s7896_s3 + $0x580] ss:$16 sps:$4 sm:$0xff]   ;;  %v5638_v54 = vld [vmem:[%s7896_s3 + $0x588] ss:$16 sps:$4 sm:$0xff]  }
 0x1f5   :  { %3764 = vmatpush1.bf16.msra.mxu0 %v5575_v55  ;;  %3928 = vmatpush1.bf16.msra.mxu1 %v5578_v57  ;;  %v5643_v57 = vld [vmem:[%s7896_s3 + $0x5a4] ss:$16 sps:$4 sm:$0xff]  }
 0x1f6   :  { %3765 = vmatprep.subr.bf16.mxu0 %v5583_v58  ;;  %3929 = vmatprep.subr.bf16.mxu1 %v5586_v1  ;;  %v5646_v58 = vld [vmem:[%s7896_s3 + $0x5ac] ss:$16 sps:$4 sm:$0xff]  }
 0x1f9   :  { %3766 = vmatpush1.bf16.msra.mxu0 %v5581_v2  ;;  %3930 = vmatpush1.bf16.msra.mxu1 %v5584_v4 }
 0x1fa   :  { %3767 = vmatprep.subr.bf16.mxu0 %v5589_v5  ;;  %3931 = vmatprep.subr.bf16.mxu1 %v5592_v6  ;;  %v1973_v5 = vrot.slane %v1965_v24, %v6993_v12 }
 0x1fd   :  { %3768 = vmatpush1.bf16.msra.mxu0 %v5587_v7  ;;  %3932 = vmatpush1.bf16.msra.mxu1 %v5590_v8  ;;  %v2060_v7 = vcombine.low %v2052_v3, %v2059_v31  ;;  %v5641_v8 = vld [vmem:[%s7896_s3 + $0x5a0] ss:$16 sps:$4 sm:$0xff]   ;;  %v5700_v3 = vld [vmem:[%s7896_s3 + $0x6cc] ss:$16 sps:$4 sm:$0xff]  }
 0x1fe   :  { %3769 = vmatprep.subr.bf16.mxu0 %v5595_v10  ;;  %3933 = vmatprep.subr.bf16.mxu1 %v5598_v11  ;;  %v5644_v10 = vld [vmem:[%s7896_s3 + $0x5a8] ss:$16 sps:$4 sm:$0xff]   ;;  %v5695_v31 = vld [vmem:[%s7896_s3 + $0x6c0] ss:$16 sps:$4 sm:$0xff]  }
 0x201   :  { %3770 = vmatpush1.bf16.msra.mxu0 %v5593_v13  ;;  %3934 = vmatpush1.bf16.msra.mxu1 %v5596_v14  ;;  %v5647_v13 = vld [vmem:[%s7896_s3 + $0x5c0] ss:$16 sps:$4 sm:$0xff]   ;;  %v5650_v14 = vld [vmem:[%s7896_s3 + $0x5c8] ss:$16 sps:$4 sm:$0xff]  }
 0x202   :  { %3771 = vmatprep.subr.bf16.mxu0 %v5601_v15  ;;  %3935 = vmatprep.subr.bf16.mxu1 %v5604_v16  ;;  %v5655_v15 = vld [vmem:[%s7896_s3 + $0x5e4] ss:$16 sps:$4 sm:$0xff]   ;;  %v5658_v16 = vld [vmem:[%s7896_s3 + $0x5ec] ss:$16 sps:$4 sm:$0xff]  }
 0x205   :  { %3772 = vmatpush1.bf16.msra.mxu0 %v5599_v17  ;;  %3936 = vmatpush1.bf16.msra.mxu1 %v5602_v18  ;;  %v5653_v18 = vld [vmem:[%s7896_s3 + $0x5e0] ss:$16 sps:$4 sm:$0xff]  }
 0x206   :  { %3773 = vmatprep.subr.bf16.mxu0 %v5607_v19  ;;  %3937 = vmatprep.subr.bf16.mxu1 %v5610_v21  ;;  %v5656_v19 = vld [vmem:[%s7896_s3 + $0x5e8] ss:$16 sps:$4 sm:$0xff]  }
 0x209   :  { %3774 = vmatpush1.bf16.msra.mxu0 %v5605_v22  ;;  %3938 = vmatpush1.bf16.msra.mxu1 %v5608_v23  ;;  %v5661_v23 = vld [vmem:[%s7896_s3 + $0x604] ss:$16 sps:$4 sm:$0xff]  }
 0x20a   :  { %3775 = vmatprep.subr.bf16.mxu0 %v5613_v56  ;;  %3939 = vmatprep.subr.bf16.mxu1 %v5616_v25  ;;  %v5664_v56 = vld [vmem:[%s7896_s3 + $0x60c] ss:$16 sps:$4 sm:$0xff]  }
 0x20d   :  { %3776 = vmatpush1.bf16.msra.mxu0 %v5611_v26  ;;  %3940 = vmatpush1.bf16.msra.mxu1 %v5614_v27 }
 0x20e   :  { %3777 = vmatprep.subr.bf16.mxu0 %v5619_v28  ;;  %3941 = vmatprep.subr.bf16.mxu1 %v5622_v59  ;;  %v5659_v28 = vld [vmem:[%s7896_s3 + $0x600] ss:$16 sps:$4 sm:$0xff]   ;;  %v5662_v59 = vld [vmem:[%s7896_s3 + $0x608] ss:$16 sps:$4 sm:$0xff]  }
 0x211   :  { %3778 = vmatpush1.bf16.msra.mxu0 %v5617_v29  ;;  %3942 = vmatpush1.bf16.msra.mxu1 %v5620_v34  ;;  %v5667_v34 = vld [vmem:[%s7896_s3 + $0x624] ss:$16 sps:$4 sm:$0xff]  }
 0x212   :  { %3779 = vmatprep.subr.bf16.mxu0 %v5625_v33  ;;  %3943 = vmatprep.subr.bf16.mxu1 %v5628_v35  ;;  %v5673_v33 = vld [vmem:[%s7896_s3 + $0x644] ss:$16 sps:$4 sm:$0xff]   ;;  %v5676_v35 = vld [vmem:[%s7896_s3 + $0x64c] ss:$16 sps:$4 sm:$0xff]  }
 0x215   :  { %3780 = vmatpush1.bf16.msra.mxu0 %v5623_v37  ;;  %3944 = vmatpush1.bf16.msra.mxu1 %v5626_v38  ;;  %v5674_v37 = vld [vmem:[%s7896_s3 + $0x648] ss:$16 sps:$4 sm:$0xff]   ;;  %v5679_v38 = vld [vmem:[%s7896_s3 + $0x664] ss:$16 sps:$4 sm:$0xff]  }
 0x216   :  { %3781 = vmatprep.subr.bf16.mxu0 %v5631_v43  ;;  %3945 = vmatprep.subr.bf16.mxu1 %v5634_v44  ;;  %v5685_v43 = vld [vmem:[%s7896_s3 + $0x684] ss:$16 sps:$4 sm:$0xff]   ;;  %v5688_v44 = vld [vmem:[%s7896_s3 + $0x68c] ss:$16 sps:$4 sm:$0xff]  }
 0x219   :  { %3782 = vmatpush1.bf16.msra.mxu0 %v5629_v45  ;;  %3946 = vmatpush1.bf16.msra.mxu1 %v5632_v0  ;;  %v1933_v52 = vpop.f32.mrb[8].mxu1  ;;  %v5683_v45 = vld [vmem:[%s7896_s3 + $0x680] ss:$16 sps:$4 sm:$0xff]   ;;  %v5686_v0 = vld [vmem:[%s7896_s3 + $0x688] ss:$16 sps:$4 sm:$0xff]  }
 0x21a   :  { %v1935_v55 = vpop.f32.mrb[9].mxu1  ;;  %3783 = vmatprep.subr.bf16.mxu0 %v5637_v50  ;;  %3947 = vmatprep.subr.bf16.mxu1 %v5640_v51  ;;  %v5689_v50 = vld [vmem:[%s7896_s3 + $0x6a0] ss:$16 sps:$4 sm:$0xff]   ;;  %v5692_v51 = vld [vmem:[%s7896_s3 + $0x6a8] ss:$16 sps:$4 sm:$0xff]  }
 0x21b   :  { %v1966_v1 = vcombine.low %v1933_v52, %v1935_v55  ;;  %v1937_v2 = vpop.f32.mrb[10].mxu1  ;;  %v5697_v52 = vld [vmem:[%s7896_s3 + $0x6c4] ss:$16 sps:$4 sm:$0xff]   ;;  %v5706_v55 = vld [vmem:[%s7896_s3 + $0x6ec] ss:$16 sps:$4 sm:$0xff]  }
 0x21c   :  { %v1938_v4 = vpop.f32.mrb[11].mxu1  ;;  %v5712_v2 = vld [vmem:[%s7896_s3 + $0x70c] ss:$16 sps:$4 sm:$0xff]  }
 0x21d   :  { %v1980_v6 = vrot.slane %v1966_v1, %v6993_v12  ;;  %3784 = vmatpush1.bf16.msra.mxu0 %v5635_v53  ;;  %3948 = vmatpush1.bf16.msra.mxu1 %v5638_v54  ;;  %v5698_v53 = vld [vmem:[%s7896_s3 + $0x6c8] ss:$16 sps:$4 sm:$0xff]   ;;  %v5703_v54 = vld [vmem:[%s7896_s3 + $0x6e4] ss:$16 sps:$4 sm:$0xff]   ;;  %v5707_v4 = vld [vmem:[%s7896_s3 + $0x700] ss:$16 sps:$4 sm:$0xff]  }
 0x21e   :  { %3785 = vmatprep.subr.bf16.mxu0 %v5643_v57  ;;  %3949 = vmatprep.subr.bf16.mxu1 %v5646_v58  ;;  %v5701_v57 = vld [vmem:[%s7896_s3 + $0x6e0] ss:$16 sps:$4 sm:$0xff]   ;;  %v5704_v58 = vld [vmem:[%s7896_s3 + $0x6e8] ss:$16 sps:$4 sm:$0xff]   ;;  %v5709_v1 = vld [vmem:[%s7896_s3 + $0x704] ss:$16 sps:$4 sm:$0xff]  }
 0x21f   :  { %v1981_v24 = vcombine.low %v1973_v5, %v1980_v6  ;;  %v5710_v5 = vld [vmem:[%s7896_s3 + $0x708] ss:$16 sps:$4 sm:$0xff]   ;;  %v5715_v6 = vld [vmem:[%s7896_s3 + $0x724] ss:$16 sps:$4 sm:$0xff]  }
 0x221   :  { %v2064_v11 = vadd.f32 %v2060_v7, %v1981_v24  ;;  %3786 = vmatpush1.bf16.msra.mxu0 %v5641_v8  ;;  %3950 = vmatpush1.bf16.msra.mxu1 %v5644_v10  ;;  %v5718_v7 = vld [vmem:[%s7896_s3 + $0x72c] ss:$16 sps:$4 sm:$0xff]   ;;  %v5713_v8 = vld [vmem:[%s7896_s3 + $0x720] ss:$16 sps:$4 sm:$0xff]   ;;  %v5716_v10 = vld [vmem:[%s7896_s3 + $0x728] ss:$16 sps:$4 sm:$0xff]  }
 0x222   :  { %3787 = vmatprep.subr.bf16.mxu0 %v5649_v9  ;;  %3951 = vmatprep.subr.bf16.mxu1 %v5652_v20  ;;  %v5721_v9 = vld [vmem:[%s7896_s3 + $0x744] ss:$16 sps:$4 sm:$0xff]   ;;  %v5724_v20 = vld [vmem:[%s7896_s3 + $0x74c] ss:$16 sps:$4 sm:$0xff]   ;;  %v5719_v24 = vld [vmem:[%s7896_s3 + $0x740] ss:$16 sps:$4 sm:$0xff]  }
 0x223   :  { %v2066_v17 = vmax.f32 %v2064_v11, 0.0  ;;  %v5722_v11 = vld [vmem:[%s7896_s3 + $0x748] ss:$16 sps:$4 sm:$0xff]  }
 0x225   :  { %3788 = vmatpush1.bf16.msra.mxu0 %v5647_v13  ;;  %3952 = vmatpush1.bf16.msra.mxu1 %v5650_v14  ;;  %v2093_v21 = vrot.slane %v2066_v17, %v6993_v12  ;;  %v2086_v22 = vcombine.high %v2066_v17, %v2066_v17  ;;  %v5727_v13 = vld [vmem:[%s7896_s3 + $0x764] ss:$16 sps:$4 sm:$0xff]   ;;  %v5730_v14 = vld [vmem:[%s7896_s3 + $0x76c] ss:$16 sps:$4 sm:$0xff]  }
 0x226   :  { %3789 = vmatprep.subr.bf16.mxu0 %v5655_v15  ;;  %3953 = vmatprep.subr.bf16.mxu1 %v5658_v16  ;;  %v5725_v15 = vld [vmem:[%s7896_s3 + $0x760] ss:$16 sps:$4 sm:$0xff]   ;;  %v5728_v16 = vld [vmem:[%s7896_s3 + $0x768] ss:$16 sps:$4 sm:$0xff]   ;;  %v5733_v17 = vld [vmem:[%s7896_s3 + $0x784] ss:$16 sps:$4 sm:$0xff]  }
 0x227   :  { %v2101_v25 = vcombine.high %v2093_v21, %v2093_v21  ;;  %v7417_v26 = vrot.slane %v2086_v22, %v6993_v12  ;;  %v2115_v30 = vpack.c.bf16 %v2093_v21, %v2093_v21  ;;  %v5734_v21 = vld [vmem:[%s7896_s3 + $0x788] ss:$16 sps:$4 sm:$0xff]   ;;  %v5739_v22 = vld [vmem:[%s7896_s3 + $0x7a4] ss:$16 sps:$4 sm:$0xff]  }
 0x229   :  { %3790 = vmatpush1.bf16.msra.mxu0 %v5653_v18  ;;  %3954 = vmatpush1.bf16.msra.mxu1 %v5656_v19  ;;  %v2116_v27 = vpack.c.bf16 %v2101_v25, %v2101_v25  ;;  %v2102_v29 = vcombine.high %v7417_v26, %v7417_v26  ;;  %v5736_v18 = vld [vmem:[%s7896_s3 + $0x78c] ss:$16 sps:$4 sm:$0xff]   ;;  %v5731_v19 = vld [vmem:[%s7896_s3 + $0x780] ss:$16 sps:$4 sm:$0xff]   ;;  %v5740_v25 = vld [vmem:[%s7896_s3 + $0x7a8] ss:$16 sps:$4 sm:$0xff]  }
 0x22a   :  { %3800 = vmatprep.subr.bf16.mxu0 %v5661_v23  ;;  %3964 = vmatprep.subr.bf16.mxu1 %v5664_v56  ;;  %v5742_v23 = vld [vmem:[%s7896_s3 + $0x7ac] ss:$16 sps:$4 sm:$0xff]   ;;  %v5737_v56 = vld [vmem:[%s7896_s3 + $0x7a0] ss:$16 sps:$4 sm:$0xff]  }
 0x22b   :  { %3791 = vmatprep.mubr.bf16.mxu0 %v2116_v27  ;;  %3955 = vmatprep.mubr.bf16.mxu1 %v2116_v27  ;;  %v2118_v12 = vpack.c.bf16 %v2102_v29, %v2102_v29  ;;  %v5745_v27 = vld [vmem:[%s7896_s3 + $0x7c4] ss:$16 sps:$4 sm:$0xff]   ;;  %v5746_v29 = vld [vmem:[%s7896_s3 + $0x7c8] ss:$16 sps:$4 sm:$0xff]  }
 0x22c   :  { %3792 = vmatmul.mubr.bf16.vlgmr.msra.gmra.mrb[8].mxu0 %v2115_v30  ;;  %3956 = vmatmul.mubr.bf16.vlgmr.msra.gmra.mrb[12].mxu1 %v2115_v30  ;;  %v5751_v30 = vld [vmem:[%s7896_s3 + $0x7e4] ss:$16 sps:$4 sm:$0xff]  }
 0x22d   :  { %3801 = vmatpush1.bf16.msra.mxu0 %v5659_v28  ;;  %3965 = vmatpush1.bf16.msra.mxu1 %v5662_v59  ;;  %v5748_v28 = vld [vmem:[%s7896_s3 + $0x7cc] ss:$16 sps:$4 sm:$0xff]   ;;  %v5743_v59 = vld [vmem:[%s7896_s3 + $0x7c0] ss:$16 sps:$4 sm:$0xff]  }
 0x22e   :  { %3832 = vmatprep.mubr.bf16.mxu0 %v2118_v12  ;;  %3996 = vmatprep.mubr.bf16.mxu1 %v2118_v12  ;;  %v5754_v12 = vld [vmem:[%s7896_s3 + $0x7ec] ss:$16 sps:$4 sm:$0xff]  }
 0x22f   :  { %3802 = vmatprep.subr.bf16.mxu0 %v5667_v34  ;;  %3966 = vmatprep.subr.bf16.mxu1 %v5670_v39  ;;  %v5749_v34 = vld [vmem:[%s7896_s3 + $0x7e0] ss:$16 sps:$4 sm:$0xff]   ;;  %v5752_v39 = vld [vmem:[%s7896_s3 + $0x7e8] ss:$16 sps:$4 sm:$0xff]  }
 0x231   :  { %3803 = vmatpush1.bf16.msra.mxu0 %v5665_v46  ;;  %3967 = vmatpush1.bf16.msra.mxu1 %v5668_v32  ;;  %v5757_v46 = vld [vmem:[%s7897_s4 + $0x4] ss:$8 sps:$4 sm:$0xff]   ;;  %v5755_v32 = vld [vmem:[%s7897_s4] ss:$8 sps:$4 sm:$0xff]  }
 0x232   :  { %3804 = vmatprep.subr.bf16.mxu0 %v5673_v33  ;;  %3968 = vmatprep.subr.bf16.mxu1 %v5676_v35  ;;  %v2117_v33 = vpack.c.bf16 %v7417_v26, %v7417_v26  ;;  %v5760_v35 = vld [vmem:[%s7897_s4 + $0x14] ss:$8 sps:$4 sm:$0xff]   ;;  %v5761_v26 = vld [vmem:[%s7897_s4 + $0x20] ss:$8 sps:$4 sm:$0xff]  }
 0x235   :  { %3805 = vmatpush1.bf16.msra.mxu0 %v5671_v36  ;;  %3969 = vmatpush1.bf16.msra.mxu1 %v5674_v37  ;;  %v5758_v36 = vld [vmem:[%s7897_s4 + $0x10] ss:$8 sps:$4 sm:$0xff]   ;;  %v5763_v37 = vld [vmem:[%s7897_s4 + $0x24] ss:$8 sps:$4 sm:$0xff]  }
 0x236   :  { %3806 = vmatprep.subr.bf16.mxu0 %v5679_v38  ;;  %3970 = vmatprep.subr.bf16.mxu1 %v5682_v40  ;;  %v5766_v38 = vld [vmem:[%s7897_s4 + $0x34] ss:$8 sps:$4 sm:$0xff]   ;;  %v5764_v40 = vld [vmem:[%s7897_s4 + $0x30] ss:$8 sps:$4 sm:$0xff]  }
 0x239   :  { %3807 = vmatpush1.bf16.msra.mxu0 %v5677_v41  ;;  %3971 = vmatpush1.bf16.msra.mxu1 %v5680_v42  ;;  %v5769_v41 = vld [vmem:[%s7897_s4 + $0x44] ss:$8 sps:$4 sm:$0xff]   ;;  %v5767_v42 = vld [vmem:[%s7897_s4 + $0x40] ss:$8 sps:$4 sm:$0xff]  }
 0x23a   :  { %3808 = vmatprep.subr.bf16.mxu0 %v5685_v43  ;;  %3972 = vmatprep.subr.bf16.mxu1 %v5688_v44  ;;  %v5772_v43 = vld [vmem:[%s7897_s4 + $0x54] ss:$8 sps:$4 sm:$0xff]   ;;  %v5770_v44 = vld [vmem:[%s7897_s4 + $0x50] ss:$8 sps:$4 sm:$0xff]  }
 0x23d   :  { %3809 = vmatpush1.bf16.msra.mxu0 %v5683_v45  ;;  %3973 = vmatpush1.bf16.msra.mxu1 %v5686_v0  ;;  %v5775_v45 = vld [vmem:[%s7897_s4 + $0x64] ss:$8 sps:$4 sm:$0xff]   ;;  %v5773_v0 = vld [vmem:[%s7897_s4 + $0x60] ss:$8 sps:$4 sm:$0xff]  }
 0x23e   :  { %3810 = vmatprep.subr.bf16.mxu0 %v5691_v48  ;;  %3974 = vmatprep.subr.bf16.mxu1 %v5694_v49  ;;  %v5778_v48 = vld [vmem:[%s7897_s4 + $0x74] ss:$8 sps:$4 sm:$0xff]   ;;  %v5776_v49 = vld [vmem:[%s7897_s4 + $0x70] ss:$8 sps:$4 sm:$0xff]  }
 0x241   :  { %3811 = vmatpush1.bf16.msra.mxu0 %v5689_v50  ;;  %3975 = vmatpush1.bf16.msra.mxu1 %v5692_v51  ;;  %v5781_v50 = vld [vmem:[%s7897_s4 + $0x84] ss:$8 sps:$4 sm:$0xff]   ;;  %v5779_v51 = vld [vmem:[%s7897_s4 + $0x80] ss:$8 sps:$4 sm:$0xff]  }
 0x242   :  { %3812 = vmatprep.subr.bf16.mxu0 %v5697_v52  ;;  %3976 = vmatprep.subr.bf16.mxu1 %v5700_v3  ;;  %v5784_v52 = vld [vmem:[%s7897_s4 + $0x94] ss:$8 sps:$4 sm:$0xff]   ;;  %v5782_v3 = vld [vmem:[%s7897_s4 + $0x90] ss:$8 sps:$4 sm:$0xff]  }
 0x245   :  { %3813 = vmatpush1.bf16.msra.mxu0 %v5695_v31  ;;  %3977 = vmatpush1.bf16.msra.mxu1 %v5698_v53  ;;  %v5787_v31 = vld [vmem:[%s7897_s4 + $0xa4] ss:$8 sps:$4 sm:$0xff]   ;;  %v5785_v53 = vld [vmem:[%s7897_s4 + $0xa0] ss:$8 sps:$4 sm:$0xff]  }
 0x246   :  { %3814 = vmatprep.subr.bf16.mxu0 %v5703_v54  ;;  %3978 = vmatprep.subr.bf16.mxu1 %v5706_v55  ;;  %v5790_v54 = vld [vmem:[%s7897_s4 + $0xb4] ss:$8 sps:$4 sm:$0xff]   ;;  %v5788_v55 = vld [vmem:[%s7897_s4 + $0xb0] ss:$8 sps:$4 sm:$0xff]  }
 0x249   :  { %3815 = vmatpush1.bf16.msra.mxu0 %v5701_v57  ;;  %3979 = vmatpush1.bf16.msra.mxu1 %v5704_v58  ;;  %v5793_v57 = vld [vmem:[%s7897_s4 + $0xc4] ss:$8 sps:$4 sm:$0xff]   ;;  %v5791_v58 = vld [vmem:[%s7897_s4 + $0xc0] ss:$8 sps:$4 sm:$0xff]  }
 0x24a   :  { %3816 = vmatprep.subr.bf16.mxu0 %v5709_v1  ;;  %3980 = vmatprep.subr.bf16.mxu1 %v5712_v2  ;;  %v5796_v1 = vld [vmem:[%s7897_s4 + $0xd4] ss:$8 sps:$4 sm:$0xff]   ;;  %v5794_v2 = vld [vmem:[%s7897_s4 + $0xd0] ss:$8 sps:$4 sm:$0xff]  }
 0x24d   :  { %3817 = vmatpush1.bf16.msra.mxu0 %v5707_v4  ;;  %3981 = vmatpush1.bf16.msra.mxu1 %v5710_v5  ;;  %v5799_v4 = vld [vmem:[%s7897_s4 + $0xe4] ss:$8 sps:$4 sm:$0xff]   ;;  %v5797_v5 = vld [vmem:[%s7897_s4 + $0xe0] ss:$8 sps:$4 sm:$0xff]  }
 0x24e   :  { %3818 = vmatprep.subr.bf16.mxu0 %v5715_v6  ;;  %3982 = vmatprep.subr.bf16.mxu1 %v5718_v7  ;;  %v5802_v6 = vld [vmem:[%s7897_s4 + $0xf4] ss:$8 sps:$4 sm:$0xff]   ;;  %v5800_v7 = vld [vmem:[%s7897_s4 + $0xf0] ss:$8 sps:$4 sm:$0xff]  }
 0x251   :  { %3819 = vmatpush1.bf16.msra.mxu0 %v5713_v8  ;;  %3983 = vmatpush1.bf16.msra.mxu1 %v5716_v10  ;;  %v5805_v8 = vld [vmem:[%s7897_s4 + $0x104] ss:$8 sps:$4 sm:$0xff]  }
 0x252   :  { %3820 = vmatprep.subr.bf16.mxu0 %v5721_v9  ;;  %3984 = vmatprep.subr.bf16.mxu1 %v5724_v20  ;;  %v5851_v10 = vld [vmem:[%s7898_s5 + $0x40] sm:$0xff]   ;;  %v5853_v20 = vld [vmem:[%s7898_s5 + $0x48] sm:$0xff]  }
 0x253   :  { %v5852_v9 = vld [vmem:[%s7898_s5] sm:$0xff]  }
 0x255   :  { %3821 = vmatpush1.bf16.msra.mxu0 %v5719_v24  ;;  %3985 = vmatpush1.bf16.msra.mxu1 %v5722_v11  ;;  %v5854_v24 = vld [vmem:[%s7898_s5 + $0x8] sm:$0xff]   ;;  %v5855_v11 = vld [vmem:[%s7898_s5 + $0x50] sm:$0xff]  }
 0x256   :  { %3822 = vmatprep.subr.bf16.mxu0 %v5727_v13  ;;  %3986 = vmatprep.subr.bf16.mxu1 %v5730_v14  ;;  %v5856_v13 = vld [vmem:[%s7898_s5 + $0x10] sm:$0xff]   ;;  %v5857_v14 = vld [vmem:[%s7898_s5 + $0x58] sm:$0xff]  }
 0x259   :  { %3823 = vmatpush1.bf16.msra.mxu0 %v5725_v15  ;;  %3987 = vmatpush1.bf16.msra.mxu1 %v5728_v16  ;;  %v5858_v15 = vld [vmem:[%s7898_s5 + $0x18] sm:$0xff]   ;;  %v5859_v16 = vld [vmem:[%s7898_s5 + $0x60] sm:$0xff]  }
 0x25a   :  { %3824 = vmatprep.subr.bf16.mxu0 %v5733_v17  ;;  %3988 = vmatprep.subr.bf16.mxu1 %v5736_v18  ;;  %v5860_v17 = vld [vmem:[%s7898_s5 + $0x20] sm:$0xff]   ;;  %v5861_v18 = vld [vmem:[%s7898_s5 + $0x68] sm:$0xff]  }
 0x25d   :  { %3825 = vmatpush1.bf16.msra.mxu0 %v5731_v19  ;;  %3989 = vmatpush1.bf16.msra.mxu1 %v5734_v21  ;;  %v5862_v19 = vld [vmem:[%s7898_s5 + $0x28] sm:$0xff]   ;;  %v7747_v21 = vld [vmem:[%s7900_s7] sm:$0xf] }
 0x25e   :  { %3826 = vmatprep.subr.bf16.mxu0 %v5739_v22  ;;  %3990 = vmatprep.subr.bf16.mxu1 %v5742_v23  ;;  %v2380_v22 = vrot.slane %v7747_v21, %v6970_v60  ;;  %v2384_v23 = vrot.slane %v7747_v21, %v6973_v61 }
 0x261   :  { %3827 = vmatpush1.bf16.msra.mxu0 %v5737_v56  ;;  %3991 = vmatpush1.bf16.msra.mxu1 %v5740_v25  ;;  %v2392_v56 = vrot.slane %v7747_v21, %v2009_v63  ;;  %v5803_v63 = vld [vmem:[%s7897_s4 + $0x100] ss:$8 sps:$4 sm:$0xff]  }
 0x262   :  { %3828 = vmatprep.subr.bf16.mxu0 %v5745_v27  ;;  %3992 = vmatprep.subr.bf16.mxu1 %v5748_v28 }
 0x265   :  { %3829 = vmatpush1.bf16.msra.mxu0 %v5743_v59  ;;  %3993 = vmatpush1.bf16.msra.mxu1 %v5746_v29 }
 0x266   :  { %3830 = vmatprep.subr.bf16.mxu0 %v5751_v30  ;;  %3994 = vmatprep.subr.bf16.mxu1 %v5754_v12 }
 0x269   :  { %3831 = vmatpush1.bf16.msra.mxu0 %v5749_v34  ;;  %3995 = vmatpush1.bf16.msra.mxu1 %v5752_v39 }
 0x26a   :  { %4409 = vmatprep.subr.bf16.mxu0 %v5757_v46  ;;  %5297 = vmatprep.subr.bf16.mxu1 %v5851_v10  ;;  %v2388_v10 = vrot.slane %v7747_v21, %v2005_v62 }
 0x26c   :  { %3833 = vmatmul.mubr.bf16.vlgmr.msra.gmra.mrb[8].mxu0 %v2117_v33  ;;  %3997 = vmatmul.mubr.bf16.vlgmr.msra.gmra.mrb[12].mxu1 %v2117_v33 }
 0x26d   :  { %4410 = vmatpush1.bf16.msra.mxu0 %v5755_v32  ;;  %5298 = vmatpush3.bf16.msra.mxu1 %v5852_v9  ;;  %v5847_v9 = vld [vmem:[%s7897_s4 + $0x1e4] ss:$8 sps:$4 sm:$0xff]  }
 0x26e   :  { %4411 = vmatprep.subr.bf16.mxu0 %v5760_v35  ;;  %5299 = vmatprep.subr.bf16.mxu1 %v5853_v20  ;;  %v5845_v20 = vld [vmem:[%s7897_s4 + $0x1e0] ss:$8 sps:$4 sm:$0xff]  }
 0x271   :  { %4412 = vmatpush1.bf16.msra.mxu0 %v5758_v36  ;;  %5300 = vmatpush3.bf16.msra.mxu1 %v5854_v24 }
 0x272   :  { %4413 = vmatprep.subr.bf16.mxu0 %v5763_v37  ;;  %5301 = vmatprep.subr.bf16.mxu1 %v5855_v11  ;;  %v5850_v11 = vld [vmem:[%s7897_s4 + $0x1f4] ss:$8 sps:$4 sm:$0xff]  }
 0x275   :  { %4414 = vmatpush1.bf16.msra.mxu0 %v5761_v26  ;;  %5302 = vmatpush3.bf16.msra.mxu1 %v5856_v13 }
 0x276   :  { %4415 = vmatprep.subr.bf16.mxu0 %v5766_v38  ;;  %5303 = vmatprep.subr.bf16.mxu1 %v5857_v14  ;;  %v5808_v38 = vld [vmem:[%s7897_s4 + $0x114] ss:$8 sps:$4 sm:$0xff]  }
 0x277   :  { %v5863_v14 = vld [vmem:[%s7898_s5 + $0x70] sm:$0xff]  }
 0x279   :  { %4416 = vmatpush1.bf16.msra.mxu0 %v5764_v40  ;;  %5304 = vmatpush3.bf16.msra.mxu1 %v5858_v15  ;;  %v5864_v15 = vld [vmem:[%s7898_s5 + $0x30] sm:$0xff]  }
 0x27a   :  { %4417 = vmatprep.subr.bf16.mxu0 %v5769_v41  ;;  %5305 = vmatprep.subr.bf16.mxu1 %v5859_v16  ;;  %v5806_v41 = vld [vmem:[%s7897_s4 + $0x110] ss:$8 sps:$4 sm:$0xff]  }
 0x27b   :  { %v5865_v16 = vld [vmem:[%s7898_s5 + $0x78] sm:$0xff]  }
 0x27d   :  { %4418 = vmatpush1.bf16.msra.mxu0 %v5767_v42  ;;  %5306 = vmatpush3.bf16.msra.mxu1 %v5860_v17  ;;  %v5811_v42 = vld [vmem:[%s7897_s4 + $0x124] ss:$8 sps:$4 sm:$0xff]   ;;  %v5866_v17 = vld [vmem:[%s7898_s5 + $0x38] sm:$0xff]  }
 0x27e   :  { %4419 = vmatprep.subr.bf16.mxu0 %v5772_v43  ;;  %5307 = vmatprep.subr.bf16.mxu1 %v5861_v18  ;;  %v5809_v43 = vld [vmem:[%s7897_s4 + $0x120] ss:$8 sps:$4 sm:$0xff]  }
 0x27f   :  { %v4077_v18 = vld [vmem:[%s7901_s8] sm:$0x3] }
 0x280   :  { %v4086_v21 = vrot.slane %v4077_v18, %v6973_v61 }
 0x281   :  { %4420 = vmatpush1.bf16.msra.mxu0 %v5770_v44  ;;  %5308 = vmatpush3.bf16.msra.mxu1 %v5862_v19  ;;  %v5814_v44 = vld [vmem:[%s7897_s4 + $0x134] ss:$8 sps:$4 sm:$0xff]   ;;  %v4082_v19 = vrot.slane %v4077_v18, %v6970_v60  ;;  %v5279_v60 = vld [vmem:[%s7902_s9] ss:$0 sm:$0xff] }
 0x282   :  { %4421 = vmatprep.subr.bf16.mxu0 %v5775_v45  ;;  %v5812_v45 = vld [vmem:[%s7897_s4 + $0x130] ss:$8 sps:$4 sm:$0xff]   ;;  %5309 = vmatprep.subr.bf16.mxu1 %v5863_v14 }
 0x285   :  { %4422 = vmatpush1.bf16.msra.mxu0 %v5773_v0  ;;  %v5817_v0 = vld [vmem:[%s7897_s4 + $0x144] ss:$8 sps:$4 sm:$0xff]   ;;  %5310 = vmatpush3.bf16.msra.mxu1 %v5864_v15 }
 0x286   :  { %4423 = vmatprep.subr.bf16.mxu0 %v5778_v48  ;;  %v5815_v48 = vld [vmem:[%s7897_s4 + $0x140] ss:$8 sps:$4 sm:$0xff]   ;;  %5311 = vmatprep.subr.bf16.mxu1 %v5865_v16 }
 0x289   :  { %4424 = vmatpush1.bf16.msra.mxu0 %v5776_v49  ;;  %v5820_v49 = vld [vmem:[%s7897_s4 + $0x154] ss:$8 sps:$4 sm:$0xff]   ;;  %5312 = vmatpush3.bf16.msra.mxu1 %v5866_v17 }
 0x28a   :  { %4425 = vmatprep.subr.bf16.mxu0 %v5781_v50  ;;  %v5818_v50 = vld [vmem:[%s7897_s4 + $0x150] ss:$8 sps:$4 sm:$0xff]  }
 0x28d   :  { %4426 = vmatpush1.bf16.msra.mxu0 %v5779_v51  ;;  %v5823_v51 = vld [vmem:[%s7897_s4 + $0x164] ss:$8 sps:$4 sm:$0xff]  }
 0x28e   :  { %4427 = vmatprep.subr.bf16.mxu0 %v5784_v52  ;;  %v5821_v52 = vld [vmem:[%s7897_s4 + $0x160] ss:$8 sps:$4 sm:$0xff]  }
 0x291   :  { %4428 = vmatpush1.bf16.msra.mxu0 %v5782_v3  ;;  %v5826_v3 = vld [vmem:[%s7897_s4 + $0x174] ss:$8 sps:$4 sm:$0xff]  }
 0x292   :  { %4429 = vmatprep.subr.bf16.mxu0 %v5787_v31  ;;  %v5824_v31 = vld [vmem:[%s7897_s4 + $0x170] ss:$8 sps:$4 sm:$0xff]  }
 0x295   :  { %4430 = vmatpush1.bf16.msra.mxu0 %v5785_v53  ;;  %v5829_v53 = vld [vmem:[%s7897_s4 + $0x184] ss:$8 sps:$4 sm:$0xff]  }
 0x296   :  { %4431 = vmatprep.subr.bf16.mxu0 %v5790_v54  ;;  %v5827_v54 = vld [vmem:[%s7897_s4 + $0x180] ss:$8 sps:$4 sm:$0xff]  }
 0x299   :  { %4432 = vmatpush1.bf16.msra.mxu0 %v5788_v55  ;;  %v5832_v55 = vld [vmem:[%s7897_s4 + $0x194] ss:$8 sps:$4 sm:$0xff]  }
 0x29a   :  { %4433 = vmatprep.subr.bf16.mxu0 %v5793_v57  ;;  %v5830_v57 = vld [vmem:[%s7897_s4 + $0x190] ss:$8 sps:$4 sm:$0xff]  }
 0x29d   :  { %4434 = vmatpush1.bf16.msra.mxu0 %v5791_v58  ;;  %v5835_v58 = vld [vmem:[%s7897_s4 + $0x1a4] ss:$8 sps:$4 sm:$0xff]  }
 0x29e   :  { %4435 = vmatprep.subr.bf16.mxu0 %v5796_v1  ;;  %v5833_v1 = vld [vmem:[%s7897_s4 + $0x1a0] ss:$8 sps:$4 sm:$0xff]  }
 0x2a1   :  { %4436 = vmatpush1.bf16.msra.mxu0 %v5794_v2  ;;  %v5838_v2 = vld [vmem:[%s7897_s4 + $0x1b4] ss:$8 sps:$4 sm:$0xff]  }
 0x2a2   :  { %4437 = vmatprep.subr.bf16.mxu0 %v5799_v4  ;;  %v5836_v4 = vld [vmem:[%s7897_s4 + $0x1b0] ss:$8 sps:$4 sm:$0xff]  }
 0x2a5   :  { %4438 = vmatpush1.bf16.msra.mxu0 %v5797_v5  ;;  %v5841_v5 = vld [vmem:[%s7897_s4 + $0x1c4] ss:$8 sps:$4 sm:$0xff]  }
 0x2a6   :  { %4439 = vmatprep.subr.bf16.mxu0 %v5802_v6  ;;  %v5839_v6 = vld [vmem:[%s7897_s4 + $0x1c0] ss:$8 sps:$4 sm:$0xff]  }
 0x2a9   :  { %4440 = vmatpush1.bf16.msra.mxu0 %v5800_v7  ;;  %v5844_v7 = vld [vmem:[%s7897_s4 + $0x1d4] ss:$8 sps:$4 sm:$0xff]  }
 0x2aa   :  { %4450 = vmatprep.subr.bf16.mxu0 %v5805_v8  ;;  %v5842_v8 = vld [vmem:[%s7897_s4 + $0x1d0] ss:$8 sps:$4 sm:$0xff]  }
 0x33f   :  { %v3834_v25 = vpop.f32.mrb[8].mxu0  ;;  %v7756_v27 = vpop.f32.mrb[12].mxu1 }
 0x340   :  { %v5321_v28 = vadd.f32 %v3834_v25, %v2380_v22  ;;  %v3836_v59 = vpop.f32.mrb[9].mxu0  ;;  %v4000_v29 = vpop.f32.mrb[13].mxu1  ;;  %v5323_v24 = vadd.f32 %v7756_v27, %v2388_v10 }
 0x341   :  { %v5322_v30 = vadd.f32 %v3836_v59, %v2384_v23  ;;  %v5324_v12 = vadd.f32 %v4000_v29, %v2392_v56  ;;  %v3838_v34 = vpop.f32.mrb[10].mxu0  ;;  %v4002_v39 = vpop.f32.mrb[14].mxu1 }
 0x342   :  { %v4005_v46 = vmax.f32 %v5321_v28, 0.0  ;;  %v3839_v32 = vpop.f32.mrb[11].mxu0  ;;  %v4003_v33 = vpop.f32.mrb[15].mxu1  ;;  %v4007_v62 = vmax.f32 %v5323_v24, 0.0 }
 0x343   :  { %v4006_v35 = vmax.f32 %v5322_v30, 0.0  ;;  %v4008_v36 = vmax.f32 %v5324_v12, 0.0 }
 0x344   :  { %v4009_v26 = vpack.c.bf16 %v4005_v46, %v4005_v46  ;;  %v4011_v13 = vpack.c.bf16 %v4007_v62, %v4007_v62 }
 0x345   :  { %v4010_v37 = vpack.c.bf16 %v4006_v35, %v4006_v35  ;;  %v4012_v40 = vpack.c.bf16 %v4008_v36, %v4008_v36 }
 0x347   :  { %4441 = vmatprep.mubr.bf16.mxu0 %v4010_v37 }
 0x348   :  { %4442 = vmatmul.mubr.bf16.vlgmr.msra.gmra.mrb[12].mxu0 %v4009_v26 }
 0x349   :  { %4451 = vmatpush1.bf16.msra.mxu0 %v5803_v63  ;;  %4482 = vmatprep.mubr.bf16.mxu0 %v4012_v40 }
 0x34a   :  { %4452 = vmatprep.subr.bf16.mxu0 %v5808_v38 }
 0x34d   :  { %4453 = vmatpush1.bf16.msra.mxu0 %v5806_v41 }
 0x34e   :  { %4454 = vmatprep.subr.bf16.mxu0 %v5811_v42  ;;  %v4683_v42 = vstv %s7893_s0 }
 0x351   :  { %4455 = vmatpush1.bf16.msra.mxu0 %v5809_v43 }
 0x352   :  { %4456 = vmatprep.subr.bf16.mxu0 %v5814_v44  ;;  %v5898_v44 = vmov 0.0  }
 0x355   :  { %4457 = vmatpush1.bf16.msra.mxu0 %v5812_v45 }
 0x356   :  { %4458 = vmatprep.subr.bf16.mxu0 %v5817_v0 }
 0x359   :  { %4459 = vmatpush1.bf16.msra.mxu0 %v5815_v48 }
 0x35a   :  { %4460 = vmatprep.subr.bf16.mxu0 %v5820_v49 }
 0x35d   :  { %4461 = vmatpush1.bf16.msra.mxu0 %v5818_v50 }
 0x35e   :  { %4462 = vmatprep.subr.bf16.mxu0 %v5823_v51 }
 0x361   :  { %4463 = vmatpush1.bf16.msra.mxu0 %v5821_v52 }
 0x362   :  { %4464 = vmatprep.subr.bf16.mxu0 %v5826_v3 }
 0x365   :  { %4465 = vmatpush1.bf16.msra.mxu0 %v5824_v31 }
 0x366   :  { %4466 = vmatprep.subr.bf16.mxu0 %v5829_v53 }
 0x369   :  { %4467 = vmatpush1.bf16.msra.mxu0 %v5827_v54 }
 0x36a   :  { %4468 = vmatprep.subr.bf16.mxu0 %v5832_v55 }
 0x36d   :  { %4469 = vmatpush1.bf16.msra.mxu0 %v5830_v57 }
 0x36e   :  { %4470 = vmatprep.subr.bf16.mxu0 %v5835_v58 }
 0x371   :  { %4471 = vmatpush1.bf16.msra.mxu0 %v5833_v1 }
 0x372   :  { %4472 = vmatprep.subr.bf16.mxu0 %v5838_v2 }
 0x375   :  { %4473 = vmatpush1.bf16.msra.mxu0 %v5836_v4 }
 0x376   :  { %4474 = vmatprep.subr.bf16.mxu0 %v5841_v5 }
 0x379   :  { %4475 = vmatpush1.bf16.msra.mxu0 %v5839_v6 }
 0x37a   :  { %4476 = vmatprep.subr.bf16.mxu0 %v5844_v7 }
 0x37d   :  { %4477 = vmatpush1.bf16.msra.mxu0 %v5842_v8 }
 0x37e   :  { %4478 = vmatprep.subr.bf16.mxu0 %v5847_v9 }
 0x381   :  { %4479 = vmatpush1.bf16.msra.mxu0 %v5845_v20 }
 0x382   :  { %4480 = vmatprep.subr.bf16.mxu0 %v5850_v11 }
 0x385   :  { %4481 = vmatpush1.bf16.msra.mxu0 %v5848_v47 }
 0x388   :  { %4483 = vmatmul.mubr.bf16.vlgmr.msra.gmra.mrb[12].mxu0 %v4011_v13 }
 0x45b   :  { %v4484_v22 = vpop.f32.mrb[12].mxu0 }
 0x45c   :  { %v5325_v23 = vadd.f32 %v4484_v22, %v4082_v19  ;;  %v4486_v56 = vpop.f32.mrb[13].mxu0 }
 0x45d   :  { %v5326_v25 = vadd.f32 %v4486_v56, %v4086_v21  ;;  %v4488_v27 = vpop.f32.mrb[14].mxu0 }
 0x45e   :  { %v4491_v28 = vmax.f32 %v5325_v23, 0.0  ;;  %v4489_v59 = vpop.f32.mrb[15].mxu0 }
 0x45f   :  { %v4492_v29 = vmax.f32 %v5326_v25, 0.0 }
 0x460   :  { %v4493_v12 = vpack.c.bf16 %v4491_v28, %v4491_v28 }
 0x461   :  { %v4494_v30 = vpack.c.bf16 %v4492_v29, %v4492_v29 }
 0x463   :  { %4662 = vmatprep.mubr.bf16.mxu1 %v4494_v30 }
 0x464   :  { %4663 = vmatmul.mubr.bf16.vlgmr.msra.gmra.mrb[16].mxu1 %v4493_v12 }
 0x537   :  { %v5313_v34 = vpop.f32.mrb[16].mxu1 }
 0x538   :  { %v5314_v39 = vpop.f32.mrb[17].mxu1 }
 0x539   :  { %v5315_v46 = vadd.f32 %v5314_v39, %v5313_v34  ;;  %v5316_v61 = vpop.f32.mrb[18].mxu1 }
 0x53a   :  { %v5317_v32 = vpop.f32.mrb[19].mxu1 }
 0x53b   :  { %v4665_v33 = vadd.f32 %v5315_v46, %v5279_v60 }
 0x53d   :  { %v4671_v35 = vsel %vm4670_vm0, %v4665_v33, -inf }
 0x53e   :  { %4672 = vmax.xlane.f32.xlu0 %v4671_v35 }
 0x5cb   :  { %v4673_v36 = vpop.xlane.xlu0 %4672 }
 0x5cc   :  { %v4674_v37 = vsub.f32 %v4665_v33, %v4673_v36 }
 0x5ce   :  { %v4675_v63 = vmul.f32 1.442695, %v4674_v37 }
 0x5d0   :  { %5867 = vpow2.f32 %v4675_v63 }
 0x5da   :  { %v5868_v26 = vpop.eup %5867 }
 0x5db   :  { %v4677_v38 = vsel %vm4670_vm0, %v5868_v26, 0.0 }
 0x5dc   :  { %4678 = vadd.xlane.f32.xlu0 %v4677_v38 }
 0x669   :  { %v4679_v40 = vpop.xlane.xlu0 %4678 }
 0x66a   :  { %5869 = vrcp.f32 %v4679_v40 }
 0x674   :  { %v5870_v41 = vpop.eup %5869 }
 0x675   :  { %v4681_v43 = vmul.f32 %v5870_v41, %v5868_v26 }
 0x677   :  { %vm4684_vm1 = vcmp.ge.f32.partialorder %v4681_v43, %v4683_v42 }
 0x678   :  { %v5296_v45 = vsel %vm4684_vm1, 1.0, %v5898_v44 }
 0x679   :  { %4687 = vst.msk [vmem:[#allocation4] sm:$0x3] %vm4670_vm0, %v5296_v45 }
 0x67a   :  { %5882 = shalt.err (!%p5879_p4)
}
 0x67b   :  { %s5883_s0 = scalar_lea.hbm %s7903_s10, 32 }
 0x67c   :  { %p5884_p5 = scmp.ne.s32.totalorder %s7903_s10, %s5883_s0  ;;  %p5887_p6 = scmp.lt.u32.totalorder %s5883_s0, %s7903_s10 }
 0x67e   :  { %p5889_p7 = pnand %p5887_p6, %p5884_p5 }
 0x680   :  { %5892 = shalt.err (!%p5889_p7)
}
 0x681   :  { %4697 = dma.vmem_to_hbm [thread:$0]  %s4695_s14, 32, %s7903_s10, [#allocation5]  }
 0x682   :  { %5893 = dma.done.wait [#allocation5], 32  }
 0x683   :  { %5894 = vsyncadd [#allocation5], 4294967264 }
 0x684   :  { %4701 = vsyncpa [#allocation5], 1 }

</bundles_post_ra>
